<compile_context>
chip_gen: v6e
topology: v6e:2x2x1
jax: 0.10.0
libtpu: 0.0.40
codegen_flags: <defaults>
</compile_context>

<pallas_src>
import functools

import jax
import jax.numpy as jnp
from jax import lax
from jax.experimental import pallas as pl
from jax.experimental.pallas import tpu as pltpu

# Sigma bank from the PyTorch module's __init__.
SIGMAS = (1e-06, 1e-05, 0.0001, 0.001, 0.01, 0.1, 1.0, 5.0, 10.0, 15.0,
          20.0, 25.0, 30.0, 35.0, 100.0, 1000.0, 10000.0, 100000.0, 1000000.0)

_LANE = 128


def _round_up(x, m):
    return (x + m - 1) // m * m


def _mmd_tile_kernel(a_ref, b_ref, a2_ref, b2_ref, out_ref, acc_ref, *,
                     is_self, n_rows, n_cols, tm, tn):
    """One (i, j, k) grid step of  sum_{r,c} sum_s exp(-||a_r - b_c||^2 / (2 s)).

    Outputs per-row-block partial sums (only their grand total is meaningful for
    self terms, where mirrored blocks are folded in via the weight-2 trick).
    """
    i = pl.program_id(0)
    j = pl.program_id(1)
    k = pl.program_id(2)
    nk = pl.num_programs(2)

    # The output block (index (i, 0)) is resident across the whole (j, k) sweep of this
    # row block -> it is the cross-grid-step accumulator.  Zero it at the first step.
    @pl.when(jnp.logical_and(j == 0, k == 0))
    def _():
        out_ref[...] = jnp.zeros_like(out_ref)

    def compute_block():
        # Accumulate A.B^T over feature chunks on the MXU.  The contraction is over the
        # shared last (lane) axis of both tiles, so no explicit transpose is needed.
        @pl.when(k == 0)
        def _():
            acc_ref[...] = jnp.zeros_like(acc_ref)

        acc_ref[...] += lax.dot_general(
            a_ref[...], b_ref[...],
            dimension_numbers=(((1,), (1,)), ((), ())),
            preferred_element_type=jnp.float32)

        @pl.when(k == nk - 1)
        def _():
            # Squared distances from hoisted row norms + accumulated dot products.
            dist = a2_ref[...] + b2_ref[...] - 2.0 * acc_ref[...]
            dist = jnp.maximum(dist, 0.0)

            rows = i * tm + lax.broadcasted_iota(jnp.int32, (tm, tn), 0)
            cols = j * tn + lax.broadcasted_iota(jnp.int32, (tm, tn), 1)
            if is_self:
                # The true diagonal distance is exactly zero; forcing it kills the
                # catastrophic-cancellation error that the tiny sigmas amplify.
                dist = jnp.where(rows == cols, jnp.float32(0.0), dist)

            # Unrolled multi-sigma exp sum: one f32 accumulator, 19 pipelined EUP exps.
            ksum = jnp.zeros_like(dist)
            for s in SIGMAS:
                ksum = ksum + jnp.exp((-1.0 / (2.0 * s)) * dist)

            # Mask rows/cols that exist only because of padding.
            valid = jnp.logical_and(rows < n_rows, cols < n_cols)
            ksum = jnp.where(valid, ksum, jnp.float32(0.0))

            row_part = jnp.sum(ksum, axis=1, keepdims=True)          # (tm, 1)
            if is_self:
                # Symmetry: an off-diagonal block also stands in for its mirror block.
                row_part = row_part * jnp.where(j > i, jnp.float32(2.0),
                                                jnp.float32(1.0))
            out_ref[...] += row_part

    if is_self:
        # Only the upper block triangle is computed for the symmetric self terms.
        pl.when(j >= i)(compute_block)
    else:
        compute_block()


def _kernel_block_sum(a, b, a_sq_col, b_sq_row, *, is_self, n_rows, n_cols,
                      tm, tn, tk):
    """sum_{r<n_rows, c<n_cols} sum_s exp(-||a_r - b_c||^2 / (2 s)), tiled."""
    na_pad, d_pad = a.shape
    nb_pad, _ = b.shape
    ni, nj, nk = na_pad // tm, nb_pad // tn, d_pad // tk

    kernel = functools.partial(_mmd_tile_kernel, is_self=is_self,
                               n_rows=n_rows, n_cols=n_cols, tm=tm, tn=tn)

    partials = pl.pallas_call(
        kernel,
        out_shape=jax.ShapeDtypeStruct((na_pad, 1), jnp.float32),
        grid_spec=pltpu.PrefetchScalarGridSpec(
            num_scalar_prefetch=0,
            grid=(ni, nj, nk),
            in_specs=[
                pl.BlockSpec((tm, tk), lambda i, j, k: (i, k)),    # A row tile
                pl.BlockSpec((tn, tk), lambda i, j, k: (j, k)),    # B row tile
                pl.BlockSpec((tm, 1), lambda i, j, k: (i, 0)),     # ||a||^2 column
                pl.BlockSpec((1, tn), lambda i, j, k: (0, j)),     # ||b||^2 row
            ],
            out_specs=pl.BlockSpec((tm, 1), lambda i, j, k: (i, 0)),
            scratch_shapes=[pltpu.VMEM((tm, tn), jnp.float32)],
        ),
        compiler_params=pltpu.CompilerParams(
            dimension_semantics=("parallel", "arbitrary", "arbitrary")),
    )(a, b, a_sq_col, b_sq_row)
    return jnp.sum(partials)


def _pad2(x, n_pad, d_pad):
    n, d = x.shape
    if n == n_pad and d == d_pad:
        return x
    return jnp.pad(x, ((0, n_pad - n), (0, d_pad - d)))


def mmd(hs, ht, *, row_block=None, k_block=None):
    """Multi-sigma Gaussian-kernel MMD between hs (Ns, D) and ht (Nt, D).

    Equivalent to the PyTorch module's forward:
        clamp(K(hs,hs).mean() + K(ht,ht).mean() - 2*K(hs,ht).mean(), min=1e-4)
    """
    ns, d = hs.shape
    nt, d2 = ht.shape
    assert d == d2, "hs / ht feature dims must match"

    hs32 = hs.astype(jnp.float32)
    ht32 = ht.astype(jnp.float32)

    # Row-tile choice: 256 fills the 256x256 MXU on v6e/v7x; small inputs use one
    # full-axis tile.  Tiles that split an axis must be multiples of 128 so the
    # (1, tn) norm-row blocks stay lane-aligned.
    def _row_tile_and_pad(n):
        t = row_block if row_block is not None else (
            256 if n >= 256 else _round_up(n, 8))
        n_pad = _round_up(n, t)
        assert t % 8 == 0 and (t % _LANE == 0 or t == n_pad), (
            "row tile must be a multiple of 128 or cover the whole padded axis")
        return t, n_pad

    tm_s, ns_pad = _row_tile_and_pad(ns)
    tm_t, nt_pad = _row_tile_and_pad(nt)

    if k_block is None:
        d_pad = _round_up(d, _LANE)
        tk = 512 if d_pad % 512 == 0 else (256 if d_pad % 256 == 0 else 128)
    else:
        assert k_block % _LANE == 0, "k_block must be a multiple of 128"
        tk = k_block
        d_pad = _round_up(d, tk)

    hs_p = _pad2(hs32, ns_pad, d_pad)
    ht_p = _pad2(ht32, nt_pad, d_pad)

    # Hoisted squared row norms: computed once, reused by the ss / tt / st terms.
    hs_sq = jnp.sum(hs_p * hs_p, axis=1, keepdims=True)        # (ns_pad, 1)
    ht_sq = jnp.sum(ht_p * ht_p, axis=1, keepdims=True)        # (nt_pad, 1)
    hs_sq_row = hs_sq.reshape(1, ns_pad)
    ht_sq_row = ht_sq.reshape(1, nt_pad)

    ss = _kernel_block_sum(hs_p, hs_p, hs_sq, hs_sq_row, is_self=True,
                           n_rows=ns, n_cols=ns, tm=tm_s, tn=tm_s, tk=tk)
    tt = _kernel_block_sum(ht_p, ht_p, ht_sq, ht_sq_row, is_self=True,
                           n_rows=nt, n_cols=nt, tm=tm_t, tn=tm_t, tk=tk)
    st = _kernel_block_sum(hs_p, ht_p, hs_sq, ht_sq_row, is_self=False,
                           n_rows=ns, n_cols=nt, tm=tm_s, tn=tm_t, tk=tk)

    cost = ss / (ns * ns) + tt / (nt * nt) - 2.0 * st / (ns * nt)
    return jnp.maximum(cost, jnp.float32(1e-4))


def _mmd_reference(hs, ht):
    """Pure-JAX mirror of the PyTorch module (exact pairwise distances)."""
    betas = 1.0 / (2.0 * jnp.asarray(SIGMAS, jnp.float32))

    def kmean(x, y):
        x = x.astype(jnp.float32)
        y = y.astype(jnp.float32)
        d = jnp.sum((x[:, None, :] - y[None, :, :]) ** 2, axis=-1)
        return jnp.mean(jnp.sum(jnp.exp(-betas[:, None, None] * d[None]), axis=0))

    cost = kmean(hs, hs) + kmean(ht, ht) - 2.0 * kmean(hs, ht)
    return jnp.maximum(cost, 1e-4)


if __name__ == "__main__":
    key = jax.random.PRNGKey(0)
    k1, k2 = jax.random.split(key)
    NS, NT, D = 192, 156, 200            # small hidden-feature batches (NT, D unaligned)
    hs = jax.random.normal(k1, (NS, D), dtype=jnp.float32)
    ht = jax.random.normal(k2, (NT, D), dtype=jnp.float32) + 0.5

    ref = _mmd_reference(hs, ht)

    # Default path: one full-axis tile per term (exercises row/feature padding + masking).
    loss = jax.block_until_ready(mmd(hs, ht))
    assert jnp.allclose(loss, ref, rtol=2e-3, atol=2e-4), (loss, ref)

    # Multi-block path: several row/col blocks, triangular self-term accumulation with
    # weight-2 mirror blocks, K-chunking and padded-row masking all exercised.
    loss_blk = jax.block_until_ready(mmd(hs, ht, row_block=128, k_block=128))
    assert jnp.allclose(loss_blk, ref, rtol=2e-3, atol=2e-4), (loss_blk, ref)

    print("KERNEL_OK")
</pallas_src>

<mosaic_0001>
module attributes {stable_mosaic.version = 11 : i64} {
  func.func @_mmd_tile_kernel(%arg0: i32, %arg1: i32, %arg2: i32, %arg3: memref<192x256xf32, #tpu.memory_space<vmem>>, %arg4: memref<192x256xf32, #tpu.memory_space<vmem>>, %arg5: memref<192x1xf32, #tpu.memory_space<vmem>>, %arg6: memref<1x192xf32, #tpu.memory_space<vmem>>, %arg7: memref<192x1xf32, #tpu.memory_space<vmem>>, %arg8: memref<192x192xf32, #tpu.memory_space<vmem>>) attributes {dimension_semantics = [#tpu.dimension_semantics<parallel>, #tpu.dimension_semantics<arbitrary>, #tpu.dimension_semantics<arbitrary>], iteration_bounds = array<i64: 1, 1, 1>, scalar_prefetch = 0 : i64, scratch_operands = 1 : i64, tpu.core_type = #tpu.core_type<tc>, window_params = [{transform_indices = @transform_0, window_bounds = array<i64: 192, 256>}, {transform_indices = @transform_1, window_bounds = array<i64: 192, 256>}, {transform_indices = @transform_2, window_bounds = array<i64: 192, 1>}, {transform_indices = @transform_3, window_bounds = array<i64: 1, 192>}, {transform_indices = @transform_4, window_bounds = array<i64: 192, 1>}]} {
    %c0_i32 = arith.constant 0 : i32
    %0 = arith.cmpi eq, %arg1, %c0_i32 : i32
    %c0_i32_0 = arith.constant 0 : i32
    %1 = arith.cmpi eq, %arg2, %c0_i32_0 : i32
    %2 = arith.andi %0, %1 : i1
    %3 = arith.extui %2 : i1 to i32
    %c0_i32_1 = arith.constant 0 : i32
    %4 = arith.cmpi ne, %3, %c0_i32_1 : i32
    scf.if %4 {
      %cst = arith.constant 0.000000e+00 : f32
      %8 = vector.broadcast %cst : f32 to vector<192x1xf32>
      %c0 = arith.constant 0 : index
      %c0_3 = arith.constant 0 : index
      %9 = vector.load %arg7[%c0, %c0_3] : memref<192x1xf32, #tpu.memory_space<vmem>>, vector<192x1xf32>
      tpu.vector_store %arg7[%c0, %c0_3], %8 {strides = array<i32>} : memref<192x1xf32, #tpu.memory_space<vmem>>, vector<192x1xf32>,
    } else {
    }
    %5 = arith.cmpi sge, %arg1, %arg0 : i32
    %6 = arith.extui %5 : i1 to i32
    %c0_i32_2 = arith.constant 0 : i32
    %7 = arith.cmpi ne, %6, %c0_i32_2 : i32
    scf.if %7 {
      %c0_i32_3 = arith.constant 0 : i32
      %8 = arith.cmpi eq, %arg2, %c0_i32_3 : i32
      %9 = arith.extui %8 : i1 to i32
      %c0_i32_4 = arith.constant 0 : i32
      %10 = arith.cmpi ne, %9, %c0_i32_4 : i32
      scf.if %10 {
        %cst_14 = arith.constant 0.000000e+00 : f32
        %20 = vector.broadcast %cst_14 : f32 to vector<192x192xf32>
        %c0_15 = arith.constant 0 : index
        %c0_16 = arith.constant 0 : index
        %21 = vector.load %arg8[%c0_15, %c0_16] : memref<192x192xf32, #tpu.memory_space<vmem>>, vector<192x192xf32>
        tpu.vector_store %arg8[%c0_15, %c0_16], %20 {strides = array<i32>} : memref<192x192xf32, #tpu.memory_space<vmem>>, vector<192x192xf32>,
      } else {
      }
      %c0 = arith.constant 0 : index
      %c0_5 = arith.constant 0 : index
      %11 = vector.load %arg8[%c0, %c0_5] : memref<192x192xf32, #tpu.memory_space<vmem>>, vector<192x192xf32>
      %c0_6 = arith.constant 0 : index
      %c0_7 = arith.constant 0 : index
      %12 = vector.load %arg3[%c0_6, %c0_7] : memref<192x256xf32, #tpu.memory_space<vmem>>, vector<192x256xf32>
      %c0_8 = arith.constant 0 : index
      %c0_9 = arith.constant 0 : index
      %13 = vector.load %arg4[%c0_8, %c0_9] : memref<192x256xf32, #tpu.memory_space<vmem>>, vector<192x256xf32>
      %cst = arith.constant dense<0.000000e+00> : vector<192x192xf32>
      %14 = tpu.matmul %12, %13, %cst {dimension_numbers = #tpu.dot_dimension_numbers<[1], [1], [0], [0], [0, 0, 1, 0], [], []>} : vector<192x256xf32>, vector<192x256xf32>, vector<192x192xf32> -> vector<192x192xf32>
      %15 = arith.addf %11, %14 : vector<192x192xf32>
      %c0_10 = arith.constant 0 : index
      %c0_11 = arith.constant 0 : index
      %16 = vector.load %arg8[%c0_10, %c0_11] : memref<192x192xf32, #tpu.memory_space<vmem>>, vector<192x192xf32>
      tpu.vector_store %arg8[%c0_10, %c0_11], %15 {strides = array<i32>} : memref<192x192xf32, #tpu.memory_space<vmem>>, vector<192x192xf32>,
      %c0_i32_12 = arith.constant 0 : i32
      %17 = arith.cmpi eq, %arg2, %c0_i32_12 : i32
      %18 = arith.extui %17 : i1 to i32
      %c0_i32_13 = arith.constant 0 : i32
      %19 = arith.cmpi ne, %18, %c0_i32_13 : i32
      scf.if %19 {
        %c0_14 = arith.constant 0 : index
        %c0_15 = arith.constant 0 : index
        %20 = vector.load %arg5[%c0_14, %c0_15] : memref<192x1xf32, #tpu.memory_space<vmem>>, vector<192x1xf32>
        %c0_16 = arith.constant 0 : index
        %c0_17 = arith.constant 0 : index
        %21 = vector.load %arg6[%c0_16, %c0_17] : memref<1x192xf32, #tpu.memory_space<vmem>>, vector<1x192xf32>
        %22 = vector.broadcast %20 : vector<192x1xf32> to vector<192x192xf32>
        %23 = vector.broadcast %21 : vector<1x192xf32> to vector<192x192xf32>
        %24 = arith.addf %22, %23 : vector<192x192xf32>
        %c0_18 = arith.constant 0 : index
        %c0_19 = arith.constant 0 : index
        %25 = vector.load %arg8[%c0_18, %c0_19] : memref<192x192xf32, #tpu.memory_space<vmem>>, vector<192x192xf32>
        %cst_20 = arith.constant 2.000000e+00 : f32
        %26 = vector.broadcast %cst_20 : f32 to vector<192x192xf32>
        %27 = arith.mulf %26, %25 : vector<192x192xf32>
        %28 = arith.subf %24, %27 : vector<192x192xf32>
        %cst_21 = arith.constant 0.000000e+00 : f32
        %29 = vector.broadcast %cst_21 : f32 to vector<192x192xf32>
        %30 = arith.maximumf %28, %29 : vector<192x192xf32>
        %c192_i32 = arith.constant 192 : i32
        %31 = arith.muli %arg0, %c192_i32 : i32
        %32 = tpu.iota {dimensions = array<i32: 0>} : vector<192x192xi32>
        %33 = vector.broadcast %31 : i32 to vector<192x192xi32>
        %34 = arith.addi %33, %32 : vector<192x192xi32>
        %c192_i32_22 = arith.constant 192 : i32
        %35 = arith.muli %arg1, %c192_i32_22 : i32
        %36 = tpu.iota {dimensions = array<i32: 1>} : vector<192x192xi32>
        %37 = vector.broadcast %35 : i32 to vector<192x192xi32>
        %38 = arith.addi %37, %36 : vector<192x192xi32>
        %39 = arith.cmpi eq, %34, %38 : vector<192x192xi32>
        %cst_23 = arith.constant 0.000000e+00 : f32
        %40 = vector.broadcast %cst_23 : f32 to vector<192x192xf32>
        %41 = arith.select %39, %40, %30 : vector<192x192xi1>, vector<192x192xf32>
        %cst_24 = arith.constant 0.000000e+00 : f32
        %42 = vector.broadcast %cst_24 : f32 to vector<192x192xf32>
        %cst_25 = arith.constant -5.000000e+05 : f32
        %43 = vector.broadcast %cst_25 : f32 to vector<192x192xf32>
        %44 = arith.mulf %43, %41 : vector<192x192xf32>
        %45 = math.exp %44 : vector<192x192xf32>
        %46 = arith.addf %42, %45 : vector<192x192xf32>
        %cst_26 = arith.constant -5.000000e+04 : f32
        %47 = vector.broadcast %cst_26 : f32 to vector<192x192xf32>
        %48 = arith.mulf %47, %41 : vector<192x192xf32>
        %49 = math.exp %48 : vector<192x192xf32>
        %50 = arith.addf %46, %49 : vector<192x192xf32>
        %cst_27 = arith.constant -5.000000e+03 : f32
        %51 = vector.broadcast %cst_27 : f32 to vector<192x192xf32>
        %52 = arith.mulf %51, %41 : vector<192x192xf32>
        %53 = math.exp %52 : vector<192x192xf32>
        %54 = arith.addf %50, %53 : vector<192x192xf32>
        %cst_28 = arith.constant -5.000000e+02 : f32
        %55 = vector.broadcast %cst_28 : f32 to vector<192x192xf32>
        %56 = arith.mulf %55, %41 : vector<192x192xf32>
        %57 = math.exp %56 : vector<192x192xf32>
        %58 = arith.addf %54, %57 : vector<192x192xf32>
        %cst_29 = arith.constant -5.000000e+01 : f32
        %59 = vector.broadcast %cst_29 : f32 to vector<192x192xf32>
        %60 = arith.mulf %59, %41 : vector<192x192xf32>
        %61 = math.exp %60 : vector<192x192xf32>
        %62 = arith.addf %58, %61 : vector<192x192xf32>
        %cst_30 = arith.constant -5.000000e+00 : f32
        %63 = vector.broadcast %cst_30 : f32 to vector<192x192xf32>
        %64 = arith.mulf %63, %41 : vector<192x192xf32>
        %65 = math.exp %64 : vector<192x192xf32>
        %66 = arith.addf %62, %65 : vector<192x192xf32>
        %cst_31 = arith.constant -5.000000e-01 : f32
        %67 = vector.broadcast %cst_31 : f32 to vector<192x192xf32>
        %68 = arith.mulf %67, %41 : vector<192x192xf32>
        %69 = math.exp %68 : vector<192x192xf32>
        %70 = arith.addf %66, %69 : vector<192x192xf32>
        %cst_32 = arith.constant -1.000000e-01 : f32
        %71 = vector.broadcast %cst_32 : f32 to vector<192x192xf32>
        %72 = arith.mulf %71, %41 : vector<192x192xf32>
        %73 = math.exp %72 : vector<192x192xf32>
        %74 = arith.addf %70, %73 : vector<192x192xf32>
        %cst_33 = arith.constant -5.000000e-02 : f32
        %75 = vector.broadcast %cst_33 : f32 to vector<192x192xf32>
        %76 = arith.mulf %75, %41 : vector<192x192xf32>
        %77 = math.exp %76 : vector<192x192xf32>
        %78 = arith.addf %74, %77 : vector<192x192xf32>
        %cst_34 = arith.constant -0.0333333351 : f32
        %79 = vector.broadcast %cst_34 : f32 to vector<192x192xf32>
        %80 = arith.mulf %79, %41 : vector<192x192xf32>
        %81 = math.exp %80 : vector<192x192xf32>
        %82 = arith.addf %78, %81 : vector<192x192xf32>
        %cst_35 = arith.constant -2.500000e-02 : f32
        %83 = vector.broadcast %cst_35 : f32 to vector<192x192xf32>
        %84 = arith.mulf %83, %41 : vector<192x192xf32>
        %85 = math.exp %84 : vector<192x192xf32>
        %86 = arith.addf %82, %85 : vector<192x192xf32>
        %cst_36 = arith.constant -2.000000e-02 : f32
        %87 = vector.broadcast %cst_36 : f32 to vector<192x192xf32>
        %88 = arith.mulf %87, %41 : vector<192x192xf32>
        %89 = math.exp %88 : vector<192x192xf32>
        %90 = arith.addf %86, %89 : vector<192x192xf32>
        %cst_37 = arith.constant -0.0166666675 : f32
        %91 = vector.broadcast %cst_37 : f32 to vector<192x192xf32>
        %92 = arith.mulf %91, %41 : vector<192x192xf32>
        %93 = math.exp %92 : vector<192x192xf32>
        %94 = arith.addf %90, %93 : vector<192x192xf32>
        %cst_38 = arith.constant -0.0142857144 : f32
        %95 = vector.broadcast %cst_38 : f32 to vector<192x192xf32>
        %96 = arith.mulf %95, %41 : vector<192x192xf32>
        %97 = math.exp %96 : vector<192x192xf32>
        %98 = arith.addf %94, %97 : vector<192x192xf32>
        %cst_39 = arith.constant -5.000000e-03 : f32
        %99 = vector.broadcast %cst_39 : f32 to vector<192x192xf32>
        %100 = arith.mulf %99, %41 : vector<192x192xf32>
        %101 = math.exp %100 : vector<192x192xf32>
        %102 = arith.addf %98, %101 : vector<192x192xf32>
        %cst_40 = arith.constant -5.000000e-04 : f32
        %103 = vector.broadcast %cst_40 : f32 to vector<192x192xf32>
        %104 = arith.mulf %103, %41 : vector<192x192xf32>
        %105 = math.exp %104 : vector<192x192xf32>
        %106 = arith.addf %102, %105 : vector<192x192xf32>
        %cst_41 = arith.constant -5.000000e-05 : f32
        %107 = vector.broadcast %cst_41 : f32 to vector<192x192xf32>
        %108 = arith.mulf %107, %41 : vector<192x192xf32>
        %109 = math.exp %108 : vector<192x192xf32>
        %110 = arith.addf %106, %109 : vector<192x192xf32>
        %cst_42 = arith.constant -5.000000e-06 : f32
        %111 = vector.broadcast %cst_42 : f32 to vector<192x192xf32>
        %112 = arith.mulf %111, %41 : vector<192x192xf32>
        %113 = math.exp %112 : vector<192x192xf32>
        %114 = arith.addf %110, %113 : vector<192x192xf32>
        %cst_43 = arith.constant -5.000000e-07 : f32
        %115 = vector.broadcast %cst_43 : f32 to vector<192x192xf32>
        %116 = arith.mulf %115, %41 : vector<192x192xf32>
        %117 = math.exp %116 : vector<192x192xf32>
        %118 = arith.addf %114, %117 : vector<192x192xf32>
        %c192_i32_44 = arith.constant 192 : i32
        %119 = vector.broadcast %c192_i32_44 : i32 to vector<192x192xi32>
        %120 = arith.cmpi slt, %34, %119 : vector<192x192xi32>
        %c192_i32_45 = arith.constant 192 : i32
        %121 = vector.broadcast %c192_i32_45 : i32 to vector<192x192xi32>
        %122 = arith.cmpi slt, %38, %121 : vector<192x192xi32>
        %123 = arith.andi %120, %122 : vector<192x192xi1>
        %cst_46 = arith.constant 0.000000e+00 : f32
        %124 = vector.broadcast %cst_46 : f32 to vector<192x192xf32>
        %125 = arith.select %123, %118, %124 : vector<192x192xi1>, vector<192x192xf32>
        %cst_47 = arith.constant dense<0.000000e+00> : vector<192xf32>
        %126 = vector.multi_reduction <add>, %125, %cst_47 [1] : vector<192x192xf32> to vector<192xf32>
        %127 = vector.shape_cast %126 : vector<192xf32> to vector<192x1xf32>
        %128 = arith.cmpi sgt, %arg1, %arg0 : i32
        %cst_48 = arith.constant 2.000000e+00 : f32
        %cst_49 = arith.constant 1.000000e+00 : f32
        %129 = arith.select %128, %cst_48, %cst_49 : f32
        %130 = vector.broadcast %129 : f32 to vector<192x1xf32>
        %131 = arith.mulf %127, %130 : vector<192x1xf32>
        %c0_50 = arith.constant 0 : index
        %c0_51 = arith.constant 0 : index
        %132 = vector.load %arg7[%c0_50, %c0_51] : memref<192x1xf32, #tpu.memory_space<vmem>>, vector<192x1xf32>
        %133 = arith.addf %132, %131 : vector<192x1xf32>
        %c0_52 = arith.constant 0 : index
        %c0_53 = arith.constant 0 : index
        %134 = vector.load %arg7[%c0_52, %c0_53] : memref<192x1xf32, #tpu.memory_space<vmem>>, vector<192x1xf32>
        tpu.vector_store %arg7[%c0_52, %c0_53], %133 {strides = array<i32>} : memref<192x1xf32, #tpu.memory_space<vmem>>, vector<192x1xf32>,
      } else {
      }
    } else {
    }
    return
  }
  func.func @transform_0(%arg0: i32, %arg1: i32, %arg2: i32) -> (i32, i32) {
    %c0_i32 = arith.constant 0 : i32
    return %arg0, %arg2 : i32, i32
  }
  func.func @transform_1(%arg0: i32, %arg1: i32, %arg2: i32) -> (i32, i32) {
    %c0_i32 = arith.constant 0 : i32
    return %arg1, %arg2 : i32, i32
  }
  func.func @transform_2(%arg0: i32, %arg1: i32, %arg2: i32) -> (i32, i32) {
    %c0_i32 = arith.constant 0 : i32
    %c0_i32_0 = arith.constant 0 : i32
    return %arg0, %c0_i32 : i32, i32
  }
  func.func @transform_3(%arg0: i32, %arg1: i32, %arg2: i32) -> (i32, i32) {
    %c0_i32 = arith.constant 0 : i32
    %c0_i32_0 = arith.constant 0 : i32
    return %c0_i32, %arg1 : i32, i32
  }
  func.func @transform_4(%arg0: i32, %arg1: i32, %arg2: i32) -> (i32, i32) {
    %c0_i32 = arith.constant 0 : i32
    %c0_i32_0 = arith.constant 0 : i32
    return %arg0, %c0_i32 : i32, i32
  }
}

</mosaic_0001>

<bundles_post_ra>
// kernel: tpu_custom_call.1
= control target key start
LH: loop header
LB: loop body
LE: loop exit
PB: predicated region body
PF: predicated region fallthrough
CT: control target
= control target key end

     0   :  { %9 = vsyncpa [#allocation4], 0  ;;  %s9041_s0 = inlined_call_operand.hbm [shape: f32[192,256], index: 0, kind: input, shape index: {}]   ;;  %s9042_s1 = inlined_call_operand.hbm [shape: f32[192,256], index: 1, kind: input, shape index: {}]   ;;  %s9043_s2 = inlined_call_operand.vmem [shape: f32[192,1], index: 2, kind: input, shape index: {}]   ;;  %s9044_s3 = inlined_call_operand.vmem [shape: f32[1,192], index: 3, kind: input, shape index: {}]   ;;  %s9045_s4 = inlined_call_operand.vmem [shape: f32[192,1], index: 4, kind: output, shape index: {}]  }
   0x1   :  { %10 = vsyncpa [#allocation6], 0  ;;  %s7031_s15 = smov [#allocation3]  }
   0x2   :  { %s16_s16 = sshll.u32 %s7031_s15, 4  ;;  %s17_s16 = int_to_ptr.vmem [resolvable:$true] %s16_s16 }
   0x3   :  { %s6995_s17 = scalar_lea.vmem %s17_s16, 6144  ;;  %p7000_p1 = scmp.lt.s32.totalorder %s17_s16, %s17_s16 }
   0x4   :  { %p6996_p0 = scmp.ne.s32.totalorder %s17_s16, %s6995_s17  ;;  %p7001_p2 = scmp.lt.s32.totalorder %s6995_s17, %s6995_s17 }
   0x6   :  { %p7002_p3 = por %p7001_p2, %p7000_p1 }
   0x8   :  { %p7003_p4 = pnand %p7002_p3, %p6996_p0 }
   0xa   :  { %7006 = shalt.err (!%p7003_p4)
}
   0xb   :  { %s7032_s18 = smov 256   ;;  %s7033_s19 = smov 16  }
   0xc   :  { %22 = dma.hbm_to_vmem [thread:$0]  %s9041_s0, 6144, %s17_s16, [#allocation4], %s7032_s18, %s7032_s18, %s7033_s19  }
   0xd   :  { %s7034_s22 = smov [#allocation5]  }
   0xe   :  { %s28_s23 = sshll.u32 %s7034_s22, 4  ;;  %s29_s23 = int_to_ptr.vmem [resolvable:$true] %s28_s23 }
   0xf   :  { %s7015_s24 = scalar_lea.vmem %s29_s23, 6144  ;;  %p7020_p6 = scmp.lt.s32.totalorder %s29_s23, %s29_s23 }
  0x10   :  { %p7016_p5 = scmp.ne.s32.totalorder %s29_s23, %s7015_s24  ;;  %p7021_p7 = scmp.lt.s32.totalorder %s7015_s24, %s7015_s24 }
  0x12   :  { %p7022_p8 = por %p7021_p7, %p7020_p6 }
  0x14   :  { %p7023_p9 = pnand %p7022_p8, %p7016_p5 }
  0x16   :  { %7026 = shalt.err (!%p7023_p9)
}
  0x17   :  { %34 = dma.hbm_to_vmem [thread:$0]  %s9042_s1, 6144, %s29_s23, [#allocation6], %s7032_s18, %s7032_s18, %s7033_s19  }
  0x18   :  { %7027 = dma.done.wait [#allocation4], 6144  }
  0x19   :  { %7028 = vsyncadd [#allocation4], 4294961152 }
  0x1a   :  { %7029 = dma.done.wait [#allocation6], 6144  }
  0x1b   :  { %7030 = vsyncadd [#allocation6], 4294961152  ;;  %v7035_v0 = vmov 0   ;;  %v259_v1 = vld [vmem:[#allocation5 + $0xf8] sm:$0xff]  ;;  %v258_v2 = vld [vmem:[#allocation5 + $0xf0] sm:$0xff]  ;;  %vm84_vm0 = vcmask 523264  }
  0x1c   :  { %5162 = vset.pattern.permute.xlu1 %v7035_v0  ;;  %5161 = vset.pattern.permute.xlu0 %v7035_v0  ;;  %v257_v3 = vld [vmem:[#allocation5 + $0xe8] sm:$0xff]  ;;  %v256_v4 = vld [vmem:[#allocation5 + $0xe0] sm:$0xff]  ;;  %v255_v5 = vld [vmem:[#allocation5 + $0xd8] sm:$0xff] }
  0x1d   :  { %276 = vmatprep.subr.mxu0 %v259_v1  ;;  %5107 = vmatprep.subr.mxu1 %v259_v1  ;;  %v254_v6 = vld [vmem:[#allocation5 + $0xd0] sm:$0xff]  ;;  %v253_v7 = vld [vmem:[#allocation5 + $0xc8] sm:$0xff]  ;;  %v252_v8 = vld [vmem:[#allocation5 + $0xc0] sm:$0xff] }
  0x1e   :  { %277 = vmatpush1.xpose.msra.mxu0 %v258_v2  ;;  %5131 = vmatpush1.xpose.msra.mxu1 %v258_v2  ;;  %v251_v9 = vld [vmem:[#allocation5 + $0xb8] sm:$0xff]  ;;  %v250_v10 = vld [vmem:[#allocation5 + $0xb0] sm:$0xff]  ;;  %v249_v11 = vld [vmem:[#allocation5 + $0xa8] sm:$0xff] }
  0x1f   :  { %278 = vmatprep.subr.mxu0 %v257_v3  ;;  %5108 = vmatprep.subr.mxu1 %v257_v3  ;;  %v181_v12 = vld [vmem:[#allocation3 + $0x8] sm:$0xff]  ;;  %v603_v14 = vld [vmem:[%s9043_s2 + $0x90] sm:$0xff]  ;;  %v248_v15 = vld [vmem:[#allocation5 + $0xa0] sm:$0xff] }
  0x20   :  { %v205_v13 = vld [vmem:[#allocation3 + $0xc8] sm:$0xff]  ;;  %340 = vmatprep.mubr.f32.mxu0 %v181_v12  ;;  %v601_v16 = vld [vmem:[%s9043_s2 + $0x80] sm:$0xff]  ;;  %v247_v17 = vld [vmem:[#allocation5 + $0x98] sm:$0xff]  ;;  %702 = vperm.xlu1 %5162, %v603_v14  }
  0x21   :  { %412 = vmatprep.mubr.f32.mxu1 %v205_v13  ;;  %692 = vperm.xlu0 %5161, %v601_v16   ;;  %v604_v18 = vld [vmem:[%s9043_s2 + $0x98] sm:$0xff]  ;;  %v602_v19 = vld [vmem:[%s9043_s2 + $0x88] sm:$0xff]  ;;  %v246_v20 = vld [vmem:[#allocation5 + $0x90] sm:$0xff] }
  0x22   :  { %279 = vmatpush1.xpose.msra.mxu0 %v256_v4  ;;  %5132 = vmatpush1.xpose.msra.mxu1 %v256_v4  ;;  %v245_v21 = vld [vmem:[#allocation5 + $0x88] sm:$0xff]  ;;  %v605_v23 = vld [vmem:[%s9043_s2 + $0xa0] sm:$0xff]  ;;  %v243_v25 = vld [vmem:[#allocation5 + $0x78] sm:$0xff] }
  0x23   :  { %280 = vmatprep.subr.mxu0 %v255_v5  ;;  %5109 = vmatprep.subr.mxu1 %v255_v5  ;;  %v606_v22 = vld [vmem:[%s9043_s2 + $0xa8] sm:$0xff]  ;;  %v244_v24 = vld [vmem:[#allocation5 + $0x80] sm:$0xff]  ;;  %v608_v26 = vld [vmem:[%s9043_s2 + $0xb8] sm:$0xff] }
  0x24   :  { %707 = vperm.xlu1 %5162, %v604_v18   ;;  %v607_v27 = vld [vmem:[%s9043_s2 + $0xb0] sm:$0xff]  ;;  %v241_v29 = vld [vmem:[#allocation5 + $0x68] sm:$0xff]  ;;  %v585_v31 = vld [vmem:[%s9043_s2] sm:$0xff] }
  0x25   :  { %697 = vperm.xlu0 %5161, %v602_v19   ;;  %v242_v28 = vld [vmem:[#allocation5 + $0x70] sm:$0xff]  ;;  %v586_v30 = vld [vmem:[%s9043_s2 + $0x8] sm:$0xff]  ;;  %v240_v32 = vld [vmem:[#allocation5 + $0x60] sm:$0xff] }
  0x26   :  { %281 = vmatpush1.xpose.msra.mxu0 %v254_v6  ;;  %5133 = vmatpush1.xpose.msra.mxu1 %v254_v6  ;;  %v239_v33 = vld [vmem:[#allocation5 + $0x58] sm:$0xff]  ;;  %v587_v35 = vld [vmem:[%s9043_s2 + $0x10] sm:$0xff]  ;;  %v237_v37 = vld [vmem:[#allocation5 + $0x48] sm:$0xff] }
  0x27   :  { %282 = vmatprep.subr.mxu0 %v253_v7  ;;  %5110 = vmatprep.subr.mxu1 %v253_v7  ;;  %v588_v34 = vld [vmem:[%s9043_s2 + $0x18] sm:$0xff]  ;;  %v238_v36 = vld [vmem:[#allocation5 + $0x50] sm:$0xff]  ;;  %v590_v38 = vld [vmem:[%s9043_s2 + $0x28] sm:$0xff] }
  0x28   :  { %717 = vperm.xlu1 %5162, %v606_v22   ;;  %v589_v39 = vld [vmem:[%s9043_s2 + $0x20] sm:$0xff]  ;;  %v235_v41 = vld [vmem:[#allocation5 + $0x38] sm:$0xff]  ;;  %v591_v43 = vld [vmem:[%s9043_s2 + $0x30] sm:$0xff] }
  0x29   :  { %712 = vperm.xlu0 %5161, %v605_v23   ;;  %v236_v40 = vld [vmem:[#allocation5 + $0x40] sm:$0xff]  ;;  %v592_v42 = vld [vmem:[%s9043_s2 + $0x38] sm:$0xff]  ;;  %v234_v44 = vld [vmem:[#allocation5 + $0x30] sm:$0xff] }
  0x2a   :  { %283 = vmatpush1.xpose.msra.mxu0 %v252_v8  ;;  %5134 = vmatpush1.xpose.msra.mxu1 %v252_v8  ;;  %v233_v45 = vld [vmem:[#allocation5 + $0x28] sm:$0xff]  ;;  %v593_v47 = vld [vmem:[%s9043_s2 + $0x40] sm:$0xff]  ;;  %v231_v49 = vld [vmem:[#allocation5 + $0x18] sm:$0xff] }
  0x2b   :  { %284 = vmatprep.subr.mxu0 %v251_v9  ;;  %5111 = vmatprep.subr.mxu1 %v251_v9  ;;  %v594_v46 = vld [vmem:[%s9043_s2 + $0x48] sm:$0xff]  ;;  %v232_v48 = vld [vmem:[#allocation5 + $0x20] sm:$0xff]  ;;  %v596_v50 = vld [vmem:[%s9043_s2 + $0x58] sm:$0xff] }
  0x2c   :  { %727 = vperm.xlu1 %5162, %v608_v26   ;;  %v595_v51 = vld [vmem:[%s9043_s2 + $0x50] sm:$0xff]  ;;  %v229_v53 = vld [vmem:[#allocation5 + $0x8] sm:$0xff]  ;;  %v597_v55 = vld [vmem:[%s9043_s2 + $0x60] sm:$0xff] }
  0x2d   :  { %722 = vperm.xlu0 %5161, %v607_v27   ;;  %v230_v52 = vld [vmem:[#allocation5 + $0x10] sm:$0xff]  ;;  %v598_v54 = vld [vmem:[%s9043_s2 + $0x68] sm:$0xff]  ;;  %v228_v56 = vld [vmem:[#allocation5] sm:$0xff] }
  0x2e   :  { %285 = vmatpush1.xpose.msra.mxu0 %v250_v10  ;;  %5135 = vmatpush1.xpose.msra.mxu1 %v250_v10  ;;  %v275_v57 = vld [vmem:[#allocation5 + $0x178] sm:$0xff]  ;;  %v599_v59 = vld [vmem:[%s9043_s2 + $0x70] sm:$0xff]  ;;  %v273_v61 = vld [vmem:[#allocation5 + $0x168] sm:$0xff] }
  0x2f   :  { %286 = vmatprep.subr.mxu0 %v249_v11  ;;  %5112 = vmatprep.subr.mxu1 %v249_v11  ;;  %v600_v58 = vld [vmem:[%s9043_s2 + $0x78] sm:$0xff]  ;;  %v274_v60 = vld [vmem:[#allocation5 + $0x170] sm:$0xff]  ;;  %v272_v62 = vld [vmem:[#allocation5 + $0x160] sm:$0xff] }
  0x30   :  { %617 = vperm.xlu1 %5162, %v586_v30   ;;  %v271_v63 = vld [vmem:[#allocation5 + $0x158] sm:$0xff]  ;;  %v270_v0 = vld [vmem:[#allocation5 + $0x150] sm:$0xff]  ;;  %v269_v1 = vld [vmem:[#allocation5 + $0x148] sm:$0xff] }
  0x31   :  { %612 = vperm.xlu0 %5161, %v585_v31   ;;  %v268_v2 = vld [vmem:[#allocation5 + $0x140] sm:$0xff]  ;;  %v267_v3 = vld [vmem:[#allocation5 + $0x138] sm:$0xff]  ;;  %v266_v4 = vld [vmem:[#allocation5 + $0x130] sm:$0xff] }
  0x32   :  { %287 = vmatpush1.xpose.msra.mxu0 %v248_v15  ;;  %5136 = vmatpush1.xpose.msra.mxu1 %v248_v15  ;;  %v265_v5 = vld [vmem:[#allocation5 + $0x128] sm:$0xff]  ;;  %v264_v6 = vld [vmem:[#allocation5 + $0x120] sm:$0xff]  ;;  %v263_v7 = vld [vmem:[#allocation5 + $0x118] sm:$0xff] }
  0x33   :  { %288 = vmatprep.subr.mxu0 %v247_v17  ;;  %5113 = vmatprep.subr.mxu1 %v247_v17  ;;  %v262_v8 = vld [vmem:[#allocation5 + $0x110] sm:$0xff]  ;;  %v261_v9 = vld [vmem:[#allocation5 + $0x108] sm:$0xff]  ;;  %v260_v10 = vld [vmem:[#allocation5 + $0x100] sm:$0xff] }
  0x34   :  { %627 = vperm.xlu1 %5162, %v588_v34   ;;  %v180_v11 = vld [vmem:[#allocation3] sm:$0xff]  ;;  %v183_v13 = vld [vmem:[#allocation3 + $0x18] sm:$0xff]  ;;  %v182_v15 = vld [vmem:[#allocation3 + $0x10] sm:$0xff] }
  0x35   :  { %622 = vperm.xlu0 %5161, %v587_v35   ;;  %v204_v12 = vld [vmem:[#allocation3 + $0xc0] sm:$0xff]  ;;  %v207_v14 = vld [vmem:[#allocation3 + $0xd8] sm:$0xff]  ;;  %v206_v16 = vld [vmem:[#allocation3 + $0xd0] sm:$0xff] }
  0x36   :  { %289 = vmatpush1.xpose.msra.mxu0 %v246_v20  ;;  %5137 = vmatpush1.xpose.msra.mxu1 %v246_v20  ;;  %v185_v17 = vld [vmem:[#allocation3 + $0x28] sm:$0xff]  ;;  %v184_v19 = vld [vmem:[#allocation3 + $0x20] sm:$0xff]  ;;  %v211_v22 = vld [vmem:[#allocation3 + $0xf8] sm:$0xff] }
  0x37   :  { %290 = vmatprep.subr.mxu0 %v245_v21  ;;  %5114 = vmatprep.subr.mxu1 %v245_v21  ;;  %v209_v18 = vld [vmem:[#allocation3 + $0xe8] sm:$0xff]  ;;  %v208_v20 = vld [vmem:[#allocation3 + $0xe0] sm:$0xff]  ;;  %v187_v21 = vld [vmem:[#allocation3 + $0x38] sm:$0xff] }
  0x38   :  { %637 = vperm.xlu1 %5162, %v590_v38   ;;  %v186_v23 = vld [vmem:[#allocation3 + $0x30] sm:$0xff]  ;;  %v213_v26 = vld [vmem:[#allocation3 + $0x108] sm:$0xff]  ;;  %v188_v27 = vld [vmem:[#allocation3 + $0x40] sm:$0xff] }
  0x39   :  { %632 = vperm.xlu0 %5161, %v589_v39   ;;  %v215_v30 = vld [vmem:[#allocation3 + $0x118] sm:$0xff]  ;;  %v190_v31 = vld [vmem:[#allocation3 + $0x50] sm:$0xff]  ;;  %v217_v34 = vld [vmem:[#allocation3 + $0x128] sm:$0xff] }
  0x3a   :  { %291 = vmatpush1.xpose.msra.mxu0 %v244_v24  ;;  %5138 = vmatpush1.xpose.msra.mxu1 %v244_v24  ;;  %v210_v24 = vld [vmem:[#allocation3 + $0xf0] sm:$0xff]  ;;  %v192_v35 = vld [vmem:[#allocation3 + $0x60] sm:$0xff]  ;;  %v219_v38 = vld [vmem:[#allocation3 + $0x138] sm:$0xff] }
  0x3b   :  { %292 = vmatprep.subr.mxu0 %v243_v25  ;;  %5115 = vmatprep.subr.mxu1 %v243_v25  ;;  %v189_v25 = vld [vmem:[#allocation3 + $0x48] sm:$0xff]  ;;  %v194_v39 = vld [vmem:[#allocation3 + $0x70] sm:$0xff] }
  0x3c   :  { %647 = vperm.xlu1 %5162, %v592_v42   ;;  %v221_v42 = vld [vmem:[#allocation3 + $0x148] sm:$0xff] }
  0x3d   :  { %642 = vperm.xlu0 %5161, %v591_v43   ;;  %v196_v43 = vld [vmem:[#allocation3 + $0x80] sm:$0xff] }
  0x3e   :  { %293 = vmatpush1.xpose.msra.mxu0 %v242_v28  ;;  %5139 = vmatpush1.xpose.msra.mxu1 %v242_v28  ;;  %v212_v28 = vld [vmem:[#allocation3 + $0x100] sm:$0xff] }
  0x3f   :  { %294 = vmatprep.subr.mxu0 %v241_v29  ;;  %5116 = vmatprep.subr.mxu1 %v241_v29  ;;  %v191_v29 = vld [vmem:[#allocation3 + $0x58] sm:$0xff] }
  0x40   :  { %657 = vperm.xlu1 %5162, %v594_v46   ;;  %v223_v46 = vld [vmem:[#allocation3 + $0x158] sm:$0xff] }
  0x41   :  { %652 = vperm.xlu0 %5161, %v593_v47   ;;  %v731_v47 = vlaneseq }
  0x42   :  { %295 = vmatpush1.xpose.msra.mxu0 %v240_v32  ;;  %5140 = vmatpush1.xpose.msra.mxu1 %v240_v32  ;;  %v214_v32 = vld [vmem:[#allocation3 + $0x110] sm:$0xff] }
  0x43   :  { %296 = vmatprep.subr.mxu0 %v239_v33  ;;  %5117 = vmatprep.subr.mxu1 %v239_v33  ;;  %v193_v33 = vld [vmem:[#allocation3 + $0x68] sm:$0xff] }
  0x44   :  { %667 = vperm.xlu1 %5162, %v596_v50   ;;  %v201_v50 = vld [vmem:[#allocation3 + $0xa8] sm:$0xff] }
  0x45   :  { %662 = vperm.xlu0 %5161, %v595_v51   ;;  %v225_v51 = vld [vmem:[#allocation3 + $0x168] sm:$0xff] }
  0x46   :  { %297 = vmatpush1.xpose.msra.mxu0 %v238_v36  ;;  %5141 = vmatpush1.xpose.msra.mxu1 %v238_v36  ;;  %v216_v36 = vld [vmem:[#allocation3 + $0x120] sm:$0xff] }
  0x47   :  { %298 = vmatprep.subr.mxu0 %v237_v37  ;;  %5118 = vmatprep.subr.mxu1 %v237_v37  ;;  %v195_v37 = vld [vmem:[#allocation3 + $0x78] sm:$0xff] }
  0x48   :  { %677 = vperm.xlu1 %5162, %v598_v54   ;;  %v224_v54 = vld [vmem:[#allocation3 + $0x160] sm:$0xff] }
  0x49   :  { %672 = vperm.xlu0 %5161, %v597_v55   ;;  %v203_v55 = vld [vmem:[#allocation3 + $0xb8] sm:$0xff] }
  0x4a   :  { %299 = vmatpush1.xpose.msra.mxu0 %v236_v40  ;;  %5142 = vmatpush1.xpose.msra.mxu1 %v236_v40  ;;  %v218_v40 = vld [vmem:[#allocation3 + $0x130] sm:$0xff] }
  0x4b   :  { %300 = vmatprep.subr.mxu0 %v235_v41  ;;  %5119 = vmatprep.subr.mxu1 %v235_v41  ;;  %v197_v41 = vld [vmem:[#allocation3 + $0x88] sm:$0xff] }
  0x4c   :  { %687 = vperm.xlu1 %5162, %v600_v58  }
  0x4d   :  { %682 = vperm.xlu0 %5161, %v599_v59   ;;  %v609_v59 = vld [vmem:[%s9044_s3] sm:$0x3] }
  0x4e   :  { %301 = vmatpush1.xpose.msra.mxu0 %v234_v44  ;;  %5143 = vmatpush1.xpose.msra.mxu1 %v234_v44  ;;  %v220_v44 = vld [vmem:[#allocation3 + $0x140] sm:$0xff] }
  0x4f   :  { %302 = vmatprep.subr.mxu0 %v233_v45  ;;  %5120 = vmatprep.subr.mxu1 %v233_v45  ;;  %v199_v45 = vld [vmem:[#allocation3 + $0x98] sm:$0xff] }
  0x52   :  { %303 = vmatpush1.xpose.msra.mxu0 %v232_v48  ;;  %5144 = vmatpush1.xpose.msra.mxu1 %v232_v48  ;;  %v198_v48 = vld [vmem:[#allocation3 + $0x90] sm:$0xff] }
  0x53   :  { %304 = vmatprep.subr.mxu0 %v231_v49  ;;  %5121 = vmatprep.subr.mxu1 %v231_v49  ;;  %v222_v49 = vld [vmem:[#allocation3 + $0x150] sm:$0xff] }
  0x56   :  { %305 = vmatpush1.xpose.msra.mxu0 %v230_v52  ;;  %5145 = vmatpush1.xpose.msra.mxu1 %v230_v52  ;;  %v7141_v52 = vshrl.u32 %v731_v47, 7 }
  0x57   :  { %306 = vmatprep.subr.mxu0 %v229_v53  ;;  %5122 = vmatprep.subr.mxu1 %v229_v53  ;;  %v200_v53 = vld [vmem:[#allocation3 + $0xa0] sm:$0xff] }
  0x58   :  { %v737_v58 = vsub.s32 1, %v7141_v52 }
  0x5a   :  { %307 = vmatpush1.xpose.msra.mxu0 %v228_v56  ;;  %5146 = vmatpush1.xpose.msra.mxu1 %v228_v56  ;;  %v227_v56 = vld [vmem:[#allocation3 + $0x178] sm:$0xff] }
  0x5b   :  { %324 = vmatprep.subr.mxu0 %v275_v57  ;;  %5123 = vmatprep.subr.mxu1 %v275_v57  ;;  %v733_v57 = vsub.s32 0, %v7141_v52 }
  0x5e   :  { %325 = vmatpush2.xpose.msra.mxu0 %v274_v60  ;;  %5147 = vmatpush2.xpose.msra.mxu1 %v274_v60  ;;  %v202_v60 = vld [vmem:[#allocation3 + $0xb0] sm:$0xff] }
  0x5f   :  { %326 = vmatprep.subr.mxu0 %v273_v61  ;;  %5124 = vmatprep.subr.mxu1 %v273_v61  ;;  %v226_v61 = vld [vmem:[#allocation3 + $0x170] sm:$0xff] }
  0x62   :  { %327 = vmatpush2.xpose.msra.mxu0 %v272_v62  ;;  %5148 = vmatpush2.xpose.msra.mxu1 %v272_v62  ;;  %v7148_v62 = vrot.slane %v609_v59, %v733_v57 }
  0x63   :  { %328 = vmatprep.subr.mxu0 %v271_v63  ;;  %5125 = vmatprep.subr.mxu1 %v271_v63  ;;  %v7150_v63 = vrot.slane %v609_v59, %v737_v58 }
  0x66   :  { %329 = vmatpush2.xpose.msra.mxu0 %v270_v0  ;;  %5149 = vmatpush2.xpose.msra.mxu1 %v270_v0 }
  0x67   :  { %330 = vmatprep.subr.mxu0 %v269_v1  ;;  %5126 = vmatprep.subr.mxu1 %v269_v1 }
  0x6a   :  { %331 = vmatpush2.xpose.msra.mxu0 %v268_v2  ;;  %5150 = vmatpush2.xpose.msra.mxu1 %v268_v2 }
  0x6b   :  { %332 = vmatprep.subr.mxu0 %v267_v3  ;;  %5127 = vmatprep.subr.mxu1 %v267_v3 }
  0x6e   :  { %333 = vmatpush2.xpose.msra.mxu0 %v266_v4  ;;  %5151 = vmatpush2.xpose.msra.mxu1 %v266_v4 }
  0x6f   :  { %334 = vmatprep.subr.mxu0 %v265_v5  ;;  %5128 = vmatprep.subr.mxu1 %v265_v5 }
  0x72   :  { %335 = vmatpush2.xpose.msra.mxu0 %v264_v6  ;;  %5152 = vmatpush2.xpose.msra.mxu1 %v264_v6 }
  0x73   :  { %336 = vmatprep.subr.mxu0 %v263_v7  ;;  %5129 = vmatprep.subr.mxu1 %v263_v7 }
  0x76   :  { %337 = vmatpush2.xpose.msra.mxu0 %v262_v8  ;;  %5153 = vmatpush2.xpose.msra.mxu1 %v262_v8 }
  0x77   :  { %338 = vmatprep.subr.mxu0 %v261_v9  ;;  %5130 = vmatprep.subr.mxu1 %v261_v9 }
  0x7a   :  { %339 = vmatpush2.xpose.msra.mxu0 %v260_v10  ;;  %5154 = vmatpush2.xpose.msra.mxu1 %v260_v10 }
  0x7d   :  { %341 = vmatmul.mubr.f32.vlgmr.msra.gmra.mxu0 %v180_v11  ;;  %413 = vmatmul.mubr.f32.vlgmr.msra.gmra.mxu1 %v204_v12 }
  0x7e   :  { %346 = vmatprep.mubr.f32.mxu0 %v183_v13  ;;  %418 = vmatprep.mubr.f32.mxu1 %v207_v14 }
  0x81   :  { %347 = vmatmul.mubr.f32.gmra.mxu0 %v182_v15  ;;  %419 = vmatmul.mubr.f32.gmra.mxu1 %v206_v16 }
  0x82   :  { %352 = vmatprep.mubr.f32.mxu0 %v185_v17  ;;  %424 = vmatprep.mubr.f32.mxu1 %v209_v18 }
  0x85   :  { %353 = vmatmul.mubr.f32.gmra.mxu0 %v184_v19  ;;  %425 = vmatmul.mubr.f32.gmra.mxu1 %v208_v20 }
  0x86   :  { %358 = vmatprep.mubr.f32.mxu0 %v187_v21  ;;  %430 = vmatprep.mubr.f32.mxu1 %v211_v22 }
  0x89   :  { %359 = vmatmul.mubr.f32.gmra.mxu0 %v186_v23  ;;  %431 = vmatmul.mubr.f32.gmra.mxu1 %v210_v24  ;;  %v9046_v24 = vmov 0.0  }
  0x8a   :  { %364 = vmatprep.mubr.f32.mxu0 %v189_v25  ;;  %436 = vmatprep.mubr.f32.mxu1 %v213_v26  ;;  %85 = vst.msk [vmem:[#allocation2 + $0x8] sm:$0xff] %vm84_vm0, %v9046_v24  ;;  %87 = vst.msk [vmem:[#allocation2 + $0x18] sm:$0xff] %vm84_vm0, %v9046_v24 }
  0x8b   :  { %89 = vst.msk [vmem:[#allocation2 + $0x28] sm:$0xff] %vm84_vm0, %v9046_v24  ;;  %91 = vst.msk [vmem:[#allocation2 + $0x38] sm:$0xff] %vm84_vm0, %v9046_v24 }
  0x8c   :  { %93 = vst.msk [vmem:[#allocation2 + $0x48] sm:$0xff] %vm84_vm0, %v9046_v24  ;;  %95 = vst.msk [vmem:[#allocation2 + $0x58] sm:$0xff] %vm84_vm0, %v9046_v24 }
  0x8d   :  { %365 = vmatmul.mubr.f32.gmra.mxu0 %v188_v27  ;;  %437 = vmatmul.mubr.f32.gmra.mxu1 %v212_v28  ;;  %97 = vst.msk [vmem:[#allocation2 + $0x68] sm:$0xff] %vm84_vm0, %v9046_v24  ;;  %99 = vst.msk [vmem:[#allocation2 + $0x78] sm:$0xff] %vm84_vm0, %v9046_v24 }
  0x8e   :  { %370 = vmatprep.mubr.f32.mxu0 %v191_v29  ;;  %442 = vmatprep.mubr.f32.mxu1 %v215_v30  ;;  %101 = vst.msk [vmem:[#allocation2 + $0x88] sm:$0xff] %vm84_vm0, %v9046_v24  ;;  %103 = vst.msk [vmem:[#allocation2 + $0x98] sm:$0xff] %vm84_vm0, %v9046_v24 }
  0x8f   :  { %105 = vst.msk [vmem:[#allocation2 + $0xa8] sm:$0xff] %vm84_vm0, %v9046_v24  ;;  %107 = vst.msk [vmem:[#allocation2 + $0xb8] sm:$0xff] %vm84_vm0, %v9046_v24 }
  0x90   :  { %109 = vst.msk [vmem:[#allocation2 + $0xc8] sm:$0xff] %vm84_vm0, %v9046_v24  ;;  %111 = vst.msk [vmem:[#allocation2 + $0xd8] sm:$0xff] %vm84_vm0, %v9046_v24 }
  0x91   :  { %371 = vmatmul.mubr.f32.gmra.mxu0 %v190_v31  ;;  %443 = vmatmul.mubr.f32.gmra.mxu1 %v214_v32  ;;  %113 = vst.msk [vmem:[#allocation2 + $0xe8] sm:$0xff] %vm84_vm0, %v9046_v24  ;;  %115 = vst.msk [vmem:[#allocation2 + $0xf8] sm:$0xff] %vm84_vm0, %v9046_v24 }
  0x92   :  { %376 = vmatprep.mubr.f32.mxu0 %v193_v33  ;;  %448 = vmatprep.mubr.f32.mxu1 %v217_v34  ;;  %117 = vst.msk [vmem:[#allocation2 + $0x108] sm:$0xff] %vm84_vm0, %v9046_v24  ;;  %119 = vst.msk [vmem:[#allocation2 + $0x118] sm:$0xff] %vm84_vm0, %v9046_v24 }
  0x93   :  { %121 = vst.msk [vmem:[#allocation2 + $0x128] sm:$0xff] %vm84_vm0, %v9046_v24  ;;  %123 = vst.msk [vmem:[#allocation2 + $0x138] sm:$0xff] %vm84_vm0, %v9046_v24 }
  0x94   :  { %125 = vst.msk [vmem:[#allocation2 + $0x148] sm:$0xff] %vm84_vm0, %v9046_v24  ;;  %127 = vst.msk [vmem:[#allocation2 + $0x158] sm:$0xff] %vm84_vm0, %v9046_v24 }
  0x95   :  { %377 = vmatmul.mubr.f32.gmra.mxu0 %v192_v35  ;;  %449 = vmatmul.mubr.f32.gmra.mxu1 %v216_v36  ;;  %129 = vst.msk [vmem:[#allocation2 + $0x168] sm:$0xff] %vm84_vm0, %v9046_v24  ;;  %131 = vst.msk [vmem:[#allocation2 + $0x178] sm:$0xff] %vm84_vm0, %v9046_v24 }
  0x96   :  { %382 = vmatprep.mubr.f32.mxu0 %v195_v37  ;;  %454 = vmatprep.mubr.f32.mxu1 %v219_v38 }
  0x99   :  { %383 = vmatmul.mubr.f32.gmra.mxu0 %v194_v39  ;;  %455 = vmatmul.mubr.f32.gmra.mxu1 %v218_v40 }
  0x9a   :  { %388 = vmatprep.mubr.f32.mxu0 %v197_v41  ;;  %460 = vmatprep.mubr.f32.mxu1 %v221_v42 }
  0x9b   :  { %v703_v0 = vpop.permute.xlu1 %702 }
  0x9c   :  { %v693_v1 = vpop.permute.xlu0 %692  ;;  %v7153_v2 = vadd.f32 %v7148_v62, %v703_v0  ;;  %v7156_v3 = vadd.f32 %v7150_v63, %v703_v0  ;;  %v7312_v0 = vadd.s32 96, %v7141_v52 }
  0x9d   :  { %389 = vmatmul.mubr.f32.gmra.mxu0 %v196_v43  ;;  %461 = vmatmul.mubr.f32.gmra.mxu1 %v220_v44  ;;  %v7159_v4 = vadd.f32 %v7148_v62, %v693_v1  ;;  %v7162_v5 = vadd.f32 %v7150_v63, %v693_v1 }
  0x9e   :  { %394 = vmatprep.mubr.f32.mxu0 %v199_v45  ;;  %466 = vmatprep.mubr.f32.mxu1 %v223_v46  ;;  %9070 = vst [vmem:[#allocation9_spill] sm:$0xff] %v7156_v3  ;;  %v7403_v3 = vadd.s32 72, %v7141_v52 }
  0x9f   :  { %v708_v6 = vpop.permute.xlu1 %707 }
  0xa0   :  { %v698_v7 = vpop.permute.xlu0 %697  ;;  %v7165_v8 = vadd.f32 %v7148_v62, %v708_v6  ;;  %v7168_v9 = vadd.f32 %v7150_v63, %v708_v6  ;;  %9092 = vst [vmem:[#allocation31_spill] sm:$0xff] %v7403_v3  ;;  %v137_v3 = vld [vmem:[#allocation2 + $0x28] sm:$0xff] }
  0xa1   :  { %395 = vmatmul.mubr.f32.gmra.mxu0 %v198_v48  ;;  %467 = vmatmul.mubr.f32.gmra.mxu1 %v222_v49  ;;  %v7171_v10 = vadd.f32 %v7148_v62, %v698_v7  ;;  %v7174_v11 = vadd.f32 %v7150_v63, %v698_v7 }
  0xa2   :  { %400 = vmatprep.mubr.f32.mxu0 %v201_v50  ;;  %472 = vmatprep.mubr.f32.mxu1 %v225_v51  ;;  %9071 = vst [vmem:[#allocation10_spill] sm:$0xff] %v7168_v9 }
  0xa3   :  { %9072 = vst [vmem:[#allocation11_spill] sm:$0xff] %v7174_v11  ;;  %v718_v12 = vpop.permute.xlu1 %717 }
  0xa4   :  { %v713_v13 = vpop.permute.xlu0 %712  ;;  %v7177_v14 = vadd.f32 %v7148_v62, %v718_v12  ;;  %v7180_v15 = vadd.f32 %v7150_v63, %v718_v12 }
  0xa5   :  { %401 = vmatmul.mubr.f32.gmra.mxu0 %v200_v53  ;;  %473 = vmatmul.mubr.f32.gmra.mxu1 %v224_v54  ;;  %v7183_v16 = vadd.f32 %v7148_v62, %v713_v13  ;;  %v7186_v17 = vadd.f32 %v7150_v63, %v713_v13 }
  0xa6   :  { %406 = vmatprep.mubr.f32.mxu0 %v203_v55  ;;  %478 = vmatprep.mubr.f32.mxu1 %v227_v56  ;;  %9073 = vst [vmem:[#allocation12_spill] sm:$0xff] %v7177_v14  ;;  %9074 = vst [vmem:[#allocation13_spill] sm:$0xff] %v7180_v15  ;;  %v7385_v15 = vadd.s32 136, %v7141_v52  ;;  %v7394_v14 = vadd.s32 144, %v7141_v52 }
  0xa7   :  { %9075 = vst [vmem:[#allocation14_spill] sm:$0xff] %v7183_v16  ;;  %9076 = vst [vmem:[#allocation15_spill] sm:$0xff] %v7186_v17  ;;  %v728_v18 = vpop.permute.xlu1 %727 }
  0xa8   :  { %v723_v19 = vpop.permute.xlu0 %722  ;;  %v7189_v20 = vadd.f32 %v7148_v62, %v728_v18  ;;  %v7192_v21 = vadd.f32 %v7150_v63, %v728_v18 }
  0xa9   :  { %407 = vmatmul.mubr.f32.gmra.mxu0 %v202_v60  ;;  %479 = vmatmul.mubr.f32.gmra.mxu1 %v226_v61  ;;  %v7195_v22 = vadd.f32 %v7148_v62, %v723_v19  ;;  %v7198_v23 = vadd.f32 %v7150_v63, %v723_v19  ;;  %v7309_v61 = vand.u32 127, %v731_v47  ;;  %v7327_v47 = vadd.s32 8, %v7141_v52 }
  0xaa   :  { %9077 = vst [vmem:[#allocation16_spill] sm:$0xff] %v7189_v20  ;;  %9078 = vst [vmem:[#allocation17_spill] sm:$0xff] %v7192_v21  ;;  %v7330_v19 = vadd.s32 104, %v7141_v52  ;;  %v133_v21 = vld [vmem:[#allocation2 + $0x8] sm:$0xff]  ;;  %v7391_v20 = vadd.s32 56, %v7141_v52 }
  0xab   :  { %9079 = vst [vmem:[#allocation18_spill] sm:$0xff] %v7195_v22  ;;  %9080 = vst [vmem:[#allocation19_spill] sm:$0xff] %v7198_v23  ;;  %v618_v25 = vpop.permute.xlu1 %617  ;;  %vm1039_vm1 = vcmp.eq.s32.totalorder %v7141_v52, %v7309_v61  ;;  %vm1063_vm2 = vcmp.eq.s32.totalorder %v7312_v0, %v7309_v61  ;;  %v7375_v23 = vadd.s32 40, %v7141_v52  ;;  %vm1041_vm3 = vcmp.eq.s32.totalorder %v7327_v47, %v7309_v61 }
  0xac   :  { %v613_v26 = vpop.permute.xlu0 %612  ;;  %v7315_v1 = vadd.f32 %v7148_v62, %v618_v25  ;;  %v7318_v6 = vadd.f32 %v7150_v63, %v618_v25  ;;  %v7337_v25 = vadd.s32 16, %v7141_v52  ;;  %vm1065_vm4 = vcmp.eq.s32.totalorder %v7330_v19, %v7309_v61 }
  0xad   :  { %v741_v7 = vadd.f32 %v7148_v62, %v613_v26  ;;  %v7322_v12 = vadd.f32 %v7150_v63, %v613_v26  ;;  %v7340_v26 = vadd.s32 112, %v7141_v52  ;;  %vm1049_vm10 = vcmp.eq.s32.totalorder %v7375_v23, %v7309_v61  ;;  %v149_v23 = vld [vmem:[#allocation2 + $0x88] sm:$0xff] }
  0xae   :  { %vm1043_vm5 = vcmp.eq.s32.totalorder %v7337_v25, %v7309_v61  ;;  %vm1053_vm13 = vcmp.eq.s32.totalorder %v7391_v20, %v7309_v61 }
  0xaf   :  { %v628_v27 = vpop.permute.xlu1 %627  ;;  %vm1067_vm6 = vcmp.eq.s32.totalorder %v7340_v26, %v7309_v61 }
  0xb0   :  { %v623_v28 = vpop.permute.xlu0 %622  ;;  %v7249_v29 = vadd.f32 %v7148_v62, %v628_v27  ;;  %v7252_v30 = vadd.f32 %v7150_v63, %v628_v27  ;;  %v7343_v27 = vadd.s32 24, %v7141_v52 }
  0xb1   :  { %v7255_v31 = vadd.f32 %v7148_v62, %v623_v28  ;;  %v7258_v32 = vadd.f32 %v7150_v63, %v623_v28  ;;  %v7346_v28 = vadd.s32 120, %v7141_v52 }
  0xb2   :  { %vm1045_vm7 = vcmp.eq.s32.totalorder %v7343_v27, %v7309_v61 }
  0xb3   :  { %v638_v33 = vpop.permute.xlu1 %637  ;;  %vm1069_vm8 = vcmp.eq.s32.totalorder %v7346_v28, %v7309_v61 }
  0xb4   :  { %v633_v34 = vpop.permute.xlu0 %632  ;;  %v7261_v35 = vadd.f32 %v7148_v62, %v638_v33  ;;  %v7264_v36 = vadd.f32 %v7150_v63, %v638_v33 }
  0xb5   :  { %v7267_v37 = vadd.f32 %v7148_v62, %v633_v34  ;;  %v7270_v38 = vadd.f32 %v7150_v63, %v633_v34 }
  0xb7   :  { %v648_v39 = vpop.permute.xlu1 %647 }
  0xb8   :  { %v643_v40 = vpop.permute.xlu0 %642  ;;  %v7273_v41 = vadd.f32 %v7148_v62, %v648_v39  ;;  %v7276_v42 = vadd.f32 %v7150_v63, %v648_v39 }
  0xb9   :  { %v7279_v43 = vadd.f32 %v7148_v62, %v643_v40  ;;  %v7282_v44 = vadd.f32 %v7150_v63, %v643_v40 }
  0xba   :  { %9081 = vst [vmem:[#allocation20_spill] sm:$0xff] %v7276_v42  ;;  %v7400_v42 = vadd.s32 64, %v7141_v52 }
  0xbb   :  { %9082 = vst [vmem:[#allocation21_spill] sm:$0xff] %v7282_v44  ;;  %v658_v45 = vpop.permute.xlu1 %657 }
  0xbc   :  { %v653_v46 = vpop.permute.xlu0 %652  ;;  %v7285_v48 = vadd.f32 %v7148_v62, %v658_v45  ;;  %v7288_v49 = vadd.f32 %v7150_v63, %v658_v45  ;;  %vm1055_vm14 = vcmp.eq.s32.totalorder %v7400_v42, %v7309_v61 }
  0xbd   :  { %v7291_v50 = vadd.f32 %v7148_v62, %v653_v46  ;;  %v7294_v51 = vadd.f32 %v7150_v63, %v653_v46 }
  0xbe   :  { %9083 = vst [vmem:[#allocation22_spill] sm:$0xff] %v7285_v48  ;;  %9084 = vst [vmem:[#allocation23_spill] sm:$0xff] %v7288_v49  ;;  %v7388_v49 = vadd.s32 48, %v7141_v52  ;;  %v7397_v48 = vadd.s32 152, %v7141_v52 }
  0xbf   :  { %9085 = vst [vmem:[#allocation24_spill] sm:$0xff] %v7291_v50  ;;  %9086 = vst [vmem:[#allocation25_spill] sm:$0xff] %v7294_v51  ;;  %v668_v53 = vpop.permute.xlu1 %667  ;;  %v161_v50 = vld [vmem:[#allocation2 + $0xe8] sm:$0xff] }
  0xc0   :  { %v663_v54 = vpop.permute.xlu0 %662  ;;  %v7297_v55 = vadd.f32 %v7148_v62, %v668_v53  ;;  %v7300_v56 = vadd.f32 %v7150_v63, %v668_v53  ;;  %9091 = vst [vmem:[#allocation30_spill] sm:$0xff] %v7397_v48  ;;  %v7414_v48 = vadd.s32 80, %v7141_v52  ;;  %vm1051_vm11 = vcmp.eq.s32.totalorder %v7388_v49, %v7309_v61 }
  0xc1   :  { %v7303_v57 = vadd.f32 %v7148_v62, %v663_v54  ;;  %v7306_v58 = vadd.f32 %v7150_v63, %v663_v54  ;;  %v9112_v42 = vld [vmem:[#allocation20_spill] sm:$0xff] }
  0xc2   :  { %9087 = vst [vmem:[#allocation26_spill] sm:$0xff] %v7297_v55  ;;  %9088 = vst [vmem:[#allocation27_spill] sm:$0xff] %v7300_v56  ;;  %v7369_v56 = vadd.s32 32, %v7141_v52 }
  0xc3   :  { %9089 = vst [vmem:[#allocation28_spill] sm:$0xff] %v7303_v57  ;;  %9090 = vst [vmem:[#allocation29_spill] sm:$0xff] %v7306_v58  ;;  %v678_v59 = vpop.permute.xlu1 %677 }
  0xc4   :  { %v673_v60 = vpop.permute.xlu0 %672  ;;  %v7349_v33 = vadd.f32 %v7148_v62, %v678_v59  ;;  %v7352_v34 = vadd.f32 %v7150_v63, %v678_v59  ;;  %v157_v59 = vld [vmem:[#allocation2 + $0xc8] sm:$0xff]  ;;  %9095 = vst [vmem:[#allocation34_spill] sm:$0xff] %v7414_v48  ;;  %v7424_v48 = vadd.s32 176, %v7141_v52  ;;  %vm1047_vm9 = vcmp.eq.s32.totalorder %v7369_v56, %v7309_v61 }
  0xc5   :  { %v765_v39 = vadd.f32 %v7148_v62, %v673_v60  ;;  %v7356_v40 = vadd.f32 %v7150_v63, %v673_v60  ;;  %v7372_v60 = vadd.s32 128, %v7141_v52 }
  0xc6   :  { %9096 = vst [vmem:[#allocation35_spill] sm:$0xff] %v7424_v48  ;;  %v163_v48 = vld [vmem:[#allocation2 + $0xf8] sm:$0xff] }
  0xc7   :  { %v688_v13 = vpop.permute.xlu1 %687 }
  0xc8   :  { %v7324_v18 = vpop.permute.xlu0 %682  ;;  %v7359_v45 = vadd.f32 %v7148_v62, %v688_v13  ;;  %v7362_v46 = vadd.f32 %v7150_v63, %v688_v13 }
  0xc9   :  { %v7366_v53 = vadd.f32 %v7148_v62, %v7324_v18  ;;  %v7382_v62 = vadd.s32 128, %v7309_v61 }
  0xcb   :  { %vm1072_vm12 = vcmp.eq.s32.totalorder %v7372_v60, %v7382_v62  ;;  %vm1074_vm15 = vcmp.eq.s32.totalorder %v7385_v15, %v7382_v62 }
 0x13d   :  { %v342_v54 = vpop.f32.mrf.mxu0  ;;  %v414_v24 = vpop.f32.mrf.mxu1 }
 0x13e   :  { %v837_v55 = vmul.f32 2.0, %v342_v54  ;;  %v861_v17 = vmul.f32 2.0, %v414_v24  ;;  %v159_v24 = vld [vmem:[#allocation2 + $0xd8] sm:$0xff] }
 0x13f   :  { %v344_v58 = vpop.f32.mrf.mxu0  ;;  %v416_v13 = vpop.f32.mrf.mxu1 }
 0x140   :  { %v486_v22 = vadd.f32 %v344_v58, %v133_v21  ;;  %v510_v57 = vadd.f32 %v416_v13, %v157_v59  ;;  %v885_v16 = vsub.f32 %v741_v7, %v837_v55  ;;  %v909_v44 = vsub.f32 %v765_v39, %v861_v17  ;;  %v135_v21 = vld [vmem:[#allocation2 + $0x18] sm:$0xff] }
 0x141   :  { %v348_v51 = vpop.f32.mrf.mxu0  ;;  %v420_v9 = vpop.f32.mrf.mxu1  ;;  %v7408_v59 = vadd.s32 160, %v7141_v52  ;;  %v7411_v13 = vadd.s32 168, %v7141_v52  ;;  %v7417_v55 = vadd.s32 88, %v7141_v52 }
 0x142   :  { %535 = vst.msk [vmem:[#allocation2 + $0x8] sm:$0xff] %vm84_vm0, %v486_v22  ;;  %559 = vst.msk [vmem:[#allocation2 + $0xc8] sm:$0xff] %vm84_vm0, %v510_v57  ;;  %v933_v17 = vmax.f32 %v885_v16, 0.0  ;;  %v957_v22 = vmax.f32 %v909_v44, 0.0  ;;  %v839_v7 = vmul.f32 2.0, %v348_v51  ;;  %v863_v57 = vmul.f32 2.0, %v420_v9 }
 0x143   :  { %v350_v58 = vpop.f32.mrf.mxu0  ;;  %v422_v54 = vpop.f32.mrf.mxu1  ;;  %9093 = vst [vmem:[#allocation32_spill] sm:$0xff] %v7408_v59  ;;  %9094 = vst [vmem:[#allocation33_spill] sm:$0xff] %v7411_v13  ;;  %v7427_v16 = vadd.s32 184, %v7141_v52 }
 0x144   :  { %v488_v39 = vadd.f32 %v350_v58, %v135_v21  ;;  %v512_v59 = vadd.f32 %v422_v54, %v159_v24  ;;  %v7432_v9 = vsel %vm1039_vm1, 0.0, %v933_v17  ;;  %v7437_v44 = vsel %vm1063_vm2, 0.0, %v957_v22 }
 0x145   :  { %v354_v11 = vpop.f32.mrf.mxu0  ;;  %v426_v13 = vpop.f32.mrf.mxu1  ;;  %9097 = vst [vmem:[#allocation36_spill] sm:$0xff] %v7427_v16  ;;  %9098 = vst [vmem:[#allocation37_spill] sm:$0xff] %v7432_v9  ;;  %v887_v51 = vsub.f32 %v7315_v1, %v839_v7  ;;  %v911_v21 = vsub.f32 %v7349_v33, %v863_v57  ;;  %v1159_v54 = vmul.f32 -500000.0, %v7437_v44  ;;  %v7445_v52 = vmul.f32 -50000.0, %v7437_v44  ;;  %v139_v16 = vld [vmem:[#allocation2 + $0x38] sm:$0xff] }
 0x146   :  { %9099 = vst [vmem:[#allocation38_spill] sm:$0xff] %v7437_v44  ;;  %537 = vst.msk [vmem:[#allocation2 + $0x18] sm:$0xff] %vm84_vm0, %v488_v39  ;;  %v7449_v1 = vadd.f32 %v7150_v63, %v7324_v18  ;;  %v865_v57 = vmul.f32 2.0, %v426_v13  ;;  %vm1076_vm1 = vcmp.eq.s32.totalorder %v7394_v14, %v7382_v62 }
 0x147   :  { %561 = vst.msk [vmem:[#allocation2 + $0xd8] sm:$0xff] %vm84_vm0, %v512_v59  ;;  %v356_v24 = vpop.f32.mrf.mxu0  ;;  %v428_v58 = vpop.f32.mrf.mxu1  ;;  %v935_v17 = vmax.f32 %v887_v51, 0.0  ;;  %v959_v9 = vmax.f32 %v911_v21, 0.0  ;;  %v841_v59 = vmul.f32 2.0, %v354_v11 }
 0x148   :  { %v490_v0 = vadd.f32 %v356_v24, %v137_v3  ;;  %v514_v22 = vadd.f32 %v428_v58, %v161_v50  ;;  %v7455_v3 = vmul.f32 1.442695, %v1159_v54  ;;  %v913_v13 = vsub.f32 %v7366_v53, %v865_v57 }
 0x149   :  { %v790_v33 = vld [vmem:[#allocation2 + $0x8] sm:$0xff]  ;;  %v360_v39 = vpop.f32.mrf.mxu0  ;;  %v432_v44 = vpop.f32.mrf.mxu1  ;;  %v7460_v63 = vsel %vm1041_vm3, 0.0, %v935_v17  ;;  %v7465_v11 = vsel %vm1065_vm4, 0.0, %v959_v9  ;;  %v889_v18 = vsub.f32 %v7255_v31, %v841_v59 }
 0x14a   :  { %v814_v7 = vld [vmem:[#allocation2 + $0xc8] sm:$0xff]  ;;  %v838_v50 = vmul.f32 2.0, %v790_v33  ;;  %539 = vst.msk [vmem:[#allocation2 + $0x28] sm:$0xff] %vm84_vm0, %v490_v0  ;;  %563 = vst.msk [vmem:[#allocation2 + $0xe8] sm:$0xff] %vm84_vm0, %v514_v22  ;;  %v961_v9 = vmax.f32 %v913_v13, 0.0  ;;  %v843_v0 = vmul.f32 2.0, %v360_v39  ;;  %5163 = vpow2.f32 %v7455_v3 }
 0x14b   :  { %v862_v51 = vmul.f32 2.0, %v814_v7  ;;  %v362_v21 = vpop.f32.mrf.mxu0  ;;  %v434_v24 = vpop.f32.mrf.mxu1  ;;  %v937_v19 = vmax.f32 %v889_v18, 0.0  ;;  %v867_v33 = vmul.f32 2.0, %v432_v44  ;;  %v141_v31 = vld [vmem:[#allocation2 + $0x48] sm:$0xff] }
 0x14c   :  { %v886_v58 = vsub.f32 %v7322_v12, %v838_v50  ;;  %v492_v54 = vadd.f32 %v362_v21, %v139_v16  ;;  %v516_v17 = vadd.f32 %v434_v24, %v163_v48  ;;  %v165_v48 = vld [vmem:[#allocation2 + $0x108] sm:$0xff]  ;;  %v7489_v39 = vsel %vm1067_vm6, 0.0, %v961_v9 }
 0x14d   :  { %v910_v47 = vsub.f32 %v7356_v40, %v862_v51  ;;  %v366_v22 = vpop.f32.mrf.mxu0  ;;  %v438_v7 = vpop.f32.mrf.mxu1  ;;  %v792_v57 = vld [vmem:[#allocation2 + $0x18] sm:$0xff]  ;;  %v7484_v44 = vsel %vm1043_vm5, 0.0, %v937_v19  ;;  %9101 = vst [vmem:[#allocation40_spill] sm:$0xff] %v7489_v39  ;;  %v891_v18 = vsub.f32 %v7249_v29, %v843_v0  ;;  %v915_v13 = vsub.f32 %v7359_v45, %v867_v33 }
 0x14e   :  { %v7475_v59 = vmax.f32 %v886_v58, 0.0  ;;  %v816_v12 = vld [vmem:[#allocation2 + $0xd8] sm:$0xff]  ;;  %541 = vst.msk [vmem:[#allocation2 + $0x38] sm:$0xff] %vm84_vm0, %v492_v54  ;;  %565 = vst.msk [vmem:[#allocation2 + $0xf8] sm:$0xff] %vm84_vm0, %v516_v17  ;;  %v840_v40 = vmul.f32 2.0, %v792_v57  ;;  %v845_v21 = vmul.f32 2.0, %v366_v22  ;;  %vm1061_vm6 = vcmp.eq.s32.totalorder %v7417_v55, %v7309_v61 }
 0x14f   :  { %v7477_v53 = vmax.f32 %v910_v47, 0.0  ;;  %v864_v16 = vmul.f32 2.0, %v816_v12  ;;  %9100 = vst [vmem:[#allocation39_spill] sm:$0xff] %v7484_v44  ;;  %v368_v50 = vpop.f32.mrf.mxu0  ;;  %v440_v51 = vpop.f32.mrf.mxu1  ;;  %v869_v24 = vmul.f32 2.0, %v438_v7  ;;  %v939_v44 = vmax.f32 %v891_v18, 0.0 }
 0x150   :  { %v888_v58 = vsub.f32 %v7318_v6, %v840_v40  ;;  %v494_v17 = vadd.f32 %v368_v50, %v141_v31  ;;  %v518_v19 = vadd.f32 %v440_v51, %v165_v48  ;;  %v963_v39 = vmax.f32 %v915_v13, 0.0  ;;  %v167_v51 = vld [vmem:[#allocation2 + $0x118] sm:$0xff] }
 0x151   :  { %v912_v47 = vsub.f32 %v7352_v34, %v864_v16  ;;  %v794_v25 = vld [vmem:[#allocation2 + $0x28] sm:$0xff]  ;;  %v372_v57 = vpop.f32.mrf.mxu0  ;;  %v444_v26 = vpop.f32.mrf.mxu1  ;;  %v893_v6 = vsub.f32 %v7267_v37, %v845_v21  ;;  %v917_v34 = vsub.f32 %v7159_v4, %v869_v24  ;;  %v7510_v31 = vsel %vm1045_vm7, 0.0, %v939_v44  ;;  %v143_v4 = vld [vmem:[#allocation2 + $0x58] sm:$0xff] }
 0x152   :  { %v818_v54 = vld [vmem:[#allocation2 + $0xe8] sm:$0xff]  ;;  %v842_v9 = vmul.f32 2.0, %v794_v25  ;;  %v7497_v29 = vmax.f32 %v888_v58, 0.0  ;;  %543 = vst.msk [vmem:[#allocation2 + $0x48] sm:$0xff] %vm84_vm0, %v494_v17  ;;  %567 = vst.msk [vmem:[#allocation2 + $0x108] sm:$0xff] %vm84_vm0, %v518_v19  ;;  %v7515_v37 = vsel %vm1069_vm8, 0.0, %v963_v39 }
 0x153   :  { %v866_v12 = vmul.f32 2.0, %v818_v54  ;;  %v7499_v45 = vmax.f32 %v912_v47, 0.0  ;;  %v374_v0 = vpop.f32.mrf.mxu0  ;;  %v446_v33 = vpop.f32.mrf.mxu1  ;;  %v941_v16 = vmax.f32 %v893_v6, 0.0  ;;  %v7517_v50 = vmax.f32 %v917_v34, 0.0  ;;  %v145_v39 = vld [vmem:[#allocation2 + $0x68] sm:$0xff] }
 0x154   :  { %v890_v22 = vsub.f32 %v7258_v32, %v842_v9  ;;  %v847_v21 = vmul.f32 2.0, %v372_v57  ;;  %v871_v24 = vmul.f32 2.0, %v444_v26  ;;  %v496_v58 = vadd.f32 %v374_v0, %v143_v4  ;;  %v169_v25 = vld [vmem:[#allocation2 + $0x128] sm:$0xff] }
 0x155   :  { %v914_v7 = vsub.f32 %v7449_v1, %v866_v12  ;;  %v796_v48 = vld [vmem:[#allocation2 + $0x38] sm:$0xff]  ;;  %v378_v32 = vpop.f32.mrf.mxu0  ;;  %v450_v1 = vpop.f32.mrf.mxu1  ;;  %v7530_v13 = vsel %vm1047_vm9, 0.0, %v941_v16  ;;  %v520_v9 = vadd.f32 %v446_v33, %v167_v51 }
 0x156   :  { %v820_v40 = vld [vmem:[#allocation2 + $0xf8] sm:$0xff]  ;;  %v7521_v27 = vmax.f32 %v890_v22, 0.0  ;;  %v844_v18 = vmul.f32 2.0, %v796_v48  ;;  %v895_v12 = vsub.f32 %v7261_v35, %v847_v21  ;;  %v919_v6 = vsub.f32 %v7171_v10, %v871_v24  ;;  %545 = vst.msk [vmem:[#allocation2 + $0x58] sm:$0xff] %vm84_vm0, %v496_v58 }
 0x157   :  { %v7523_v44 = vmax.f32 %v914_v7, 0.0  ;;  %v868_v28 = vmul.f32 2.0, %v820_v40  ;;  %v380_v47 = vpop.f32.mrf.mxu0  ;;  %v452_v54 = vpop.f32.mrf.mxu1  ;;  %569 = vst.msk [vmem:[#allocation2 + $0x118] sm:$0xff] %vm84_vm0, %v520_v9  ;;  %v147_v33 = vld [vmem:[#allocation2 + $0x78] sm:$0xff] }
 0x158   :  { %v892_v17 = vsub.f32 %v7252_v30, %v844_v18  ;;  %v498_v56 = vadd.f32 %v380_v47, %v145_v39  ;;  %v522_v35 = vadd.f32 %v452_v54, %v169_v25  ;;  %v943_v4 = vmax.f32 %v895_v12, 0.0 }
 0x159   :  { %v916_v19 = vsub.f32 %v7362_v46, %v868_v28  ;;  %v384_v34 = vpop.f32.mrf.mxu0  ;;  %v456_v57 = vpop.f32.mrf.mxu1  ;;  %v798_v30 = vld [vmem:[#allocation2 + $0x48] sm:$0xff]  ;;  %v849_v46 = vmul.f32 2.0, %v378_v32  ;;  %v7544_v48 = vmax.f32 %v919_v6, 0.0  ;;  %v873_v18 = vmul.f32 2.0, %v450_v1  ;;  %v171_v28 = vld [vmem:[#allocation2 + $0x138] sm:$0xff] }
 0x15a   :  { %v7539_v26 = vmax.f32 %v892_v17, 0.0  ;;  %v822_v22 = vld [vmem:[#allocation2 + $0x108] sm:$0xff]  ;;  %v846_v10 = vmul.f32 2.0, %v798_v30  ;;  %547 = vst.msk [vmem:[#allocation2 + $0x68] sm:$0xff] %vm84_vm0, %v498_v56  ;;  %571 = vst.msk [vmem:[#allocation2 + $0x128] sm:$0xff] %vm84_vm0, %v522_v35  ;;  %v7556_v21 = vsel %vm1049_vm10, 0.0, %v943_v4 }
 0x15b   :  { %v7541_v0 = vmax.f32 %v916_v19, 0.0  ;;  %v870_v7 = vmul.f32 2.0, %v822_v22  ;;  %v386_v40 = vpop.f32.mrf.mxu0  ;;  %v458_v16 = vpop.f32.mrf.mxu1  ;;  %v897_v51 = vsub.f32 %v7279_v43, %v849_v46  ;;  %v921_v47 = vsub.f32 %v7153_v2, %v873_v18  ;;  %v173_v35 = vld [vmem:[#allocation2 + $0x148] sm:$0xff] }
 0x15c   :  { %v894_v32 = vsub.f32 %v7270_v38, %v846_v10  ;;  %v500_v43 = vadd.f32 %v386_v40, %v147_v33  ;;  %v851_v25 = vmul.f32 2.0, %v384_v34  ;;  %v875_v54 = vmul.f32 2.0, %v456_v57 }
 0x15d   :  { %v918_v39 = vsub.f32 %v7162_v5, %v870_v7  ;;  %v390_v1 = vpop.f32.mrf.mxu0  ;;  %v462_v24 = vpop.f32.mrf.mxu1  ;;  %v945_v58 = vmax.f32 %v897_v51, 0.0  ;;  %v524_v5 = vadd.f32 %v458_v16, %v171_v28  ;;  %v800_v12 = vld [vmem:[#allocation2 + $0x58] sm:$0xff]  ;;  %v7571_v2 = vmax.f32 %v921_v47, 0.0 }
 0x15e   :  { %v7561_v17 = vmax.f32 %v894_v32, 0.0  ;;  %549 = vst.msk [vmem:[#allocation2 + $0x78] sm:$0xff] %vm84_vm0, %v500_v43  ;;  %v899_v56 = vsub.f32 %v7273_v41, %v851_v25  ;;  %v923_v34 = vsub.f32 %v7165_v8, %v875_v54  ;;  %v848_v30 = vmul.f32 2.0, %v800_v12  ;;  %v824_v22 = vld [vmem:[#allocation2 + $0x118] sm:$0xff]  ;;  %v9104_v32 = vld [vmem:[#allocation31_spill] sm:$0xff] }
 0x15f   :  { %v966_v38 = vmax.f32 %v918_v39, 0.0  ;;  %v392_v19 = vpop.f32.mrf.mxu0  ;;  %v464_v9 = vpop.f32.mrf.mxu1  ;;  %v7569_v6 = vsel %vm1051_vm11, 0.0, %v945_v58  ;;  %573 = vst.msk [vmem:[#allocation2 + $0x138] sm:$0xff] %vm84_vm0, %v524_v5  ;;  %v853_v46 = vmul.f32 2.0, %v390_v1  ;;  %v872_v10 = vmul.f32 2.0, %v824_v22  ;;  %v9103_v51 = vld [vmem:[#allocation24_spill] sm:$0xff] }
 0x160   :  { %v947_v4 = vmax.f32 %v899_v56, 0.0  ;;  %v7581_v40 = vmax.f32 %v923_v34, 0.0  ;;  %v502_v41 = vadd.f32 %v392_v19, %v149_v23  ;;  %v896_v8 = vsub.f32 %v7264_v36, %v848_v30  ;;  %v9105_v1 = vld [vmem:[#allocation11_spill] sm:$0xff]  ;;  %v9106_v36 = vld [vmem:[#allocation30_spill] sm:$0xff]  ;;  %v9109_v22 = vld [vmem:[#allocation9_spill] sm:$0xff] }
 0x161   :  { %v7578_v57 = vsel %vm1072_vm12, 0.0, %v966_v38  ;;  %v396_v49 = vpop.f32.mrf.mxu0  ;;  %v468_v33 = vpop.f32.mrf.mxu1  ;;  %v802_v7 = vld [vmem:[#allocation2 + $0x68] sm:$0xff]  ;;  %v901_v18 = vsub.f32 %v9103_v51, %v853_v46  ;;  %v877_v28 = vmul.f32 2.0, %v462_v24  ;;  %vm1057_vm2 = vcmp.eq.s32.totalorder %v9104_v32, %v7309_v61  ;;  %v9107_v38 = vld [vmem:[#allocation21_spill] sm:$0xff] }
 0x162   :  { %9102 = vst [vmem:[#allocation41_spill] sm:$0xff] %v7581_v40  ;;  %v850_v16 = vmul.f32 2.0, %v802_v7  ;;  %v826_v60 = vld [vmem:[#allocation2 + $0x128] sm:$0xff]  ;;  %v920_v58 = vsub.f32 %v9105_v1, %v872_v10  ;;  %v7591_v25 = vsel %vm1053_vm13, 0.0, %v947_v4  ;;  %vm1078_vm3 = vcmp.eq.s32.totalorder %v9106_v36, %v7382_v62  ;;  %551 = vst.msk [vmem:[#allocation2 + $0x88] sm:$0xff] %vm84_vm0, %v502_v41  ;;  %v151_v10 = vld [vmem:[#allocation2 + $0x98] sm:$0xff] }
 0x163   :  { %v398_v39 = vpop.f32.mrf.mxu0  ;;  %v470_v43 = vpop.f32.mrf.mxu1  ;;  %v874_v47 = vmul.f32 2.0, %v826_v60  ;;  %v526_v54 = vadd.f32 %v464_v9, %v173_v35  ;;  %v7596_v24 = vmax.f32 %v896_v8, 0.0  ;;  %v949_v23 = vmax.f32 %v901_v18, 0.0  ;;  %v9108_v19 = vld [vmem:[#allocation14_spill] sm:$0xff]  ;;  %v175_v7 = vld [vmem:[#allocation2 + $0x158] sm:$0xff] }
 0x164   :  { %v898_v5 = vsub.f32 %v9107_v38, %v850_v16  ;;  %v925_v12 = vsub.f32 %v9108_v19, %v877_v28  ;;  %v968_v30 = vmax.f32 %v920_v58, 0.0  ;;  %v9111_v8 = vld [vmem:[#allocation34_spill] sm:$0xff]  ;;  %v855_v1 = vmul.f32 2.0, %v396_v49 }
 0x165   :  { %v402_v56 = vpop.f32.mrf.mxu0  ;;  %v474_v34 = vpop.f32.mrf.mxu1  ;;  %v922_v20 = vsub.f32 %v9109_v22, %v874_v47  ;;  %v804_v46 = vld [vmem:[#allocation2 + $0x78] sm:$0xff]  ;;  %575 = vst.msk [vmem:[#allocation2 + $0x148] sm:$0xff] %vm84_vm0, %v526_v54  ;;  %v7607_v35 = vsel %vm1055_vm14, 0.0, %v949_v23  ;;  %vm1059_vm4 = vcmp.eq.s32.totalorder %v9111_v8, %v7309_v61  ;;  %v879_v58 = vmul.f32 2.0, %v468_v33  ;;  %v153_v47 = vld [vmem:[#allocation2 + $0xa8] sm:$0xff] }
 0x166   :  { %v7602_v4 = vmax.f32 %v898_v5, 0.0  ;;  %v852_v9 = vmul.f32 2.0, %v804_v46  ;;  %v7609_v41 = vmax.f32 %v925_v12, 0.0  ;;  %v7616_v51 = vsel %vm1074_vm15, 0.0, %v968_v30  ;;  %v828_v28 = vld [vmem:[#allocation2 + $0x138] sm:$0xff]  ;;  %v9114_v30 = vld [vmem:[#allocation22_spill] sm:$0xff] }
 0x167   :  { %v404_v16 = vpop.f32.mrf.mxu0  ;;  %v476_v60 = vpop.f32.mrf.mxu1  ;;  %v970_v18 = vmax.f32 %v922_v20, 0.0  ;;  %v876_v38 = vmul.f32 2.0, %v828_v28  ;;  %v9113_v5 = vld [vmem:[#allocation32_spill] sm:$0xff]  ;;  %v504_v23 = vadd.f32 %v398_v39, %v151_v10  ;;  %v528_v19 = vadd.f32 %v470_v43, %v175_v7  ;;  %v177_v33 = vld [vmem:[#allocation2 + $0x168] sm:$0xff] }
 0x168   :  { %9110 = vst [vmem:[#allocation24_spill] sm:$0xff] %v7609_v41  ;;  %v900_v54 = vsub.f32 %v9112_v42, %v852_v9  ;;  %vm1080_vm5 = vcmp.eq.s32.totalorder %v9113_v5, %v7382_v62  ;;  %v903_v22 = vsub.f32 %v9114_v30, %v855_v1  ;;  %v9115_v20 = vld [vmem:[#allocation12_spill] sm:$0xff]  ;;  %v9116_v28 = vld [vmem:[#allocation10_spill] sm:$0xff]  ;;  %v506_v14 = vadd.f32 %v404_v16, %v153_v47  ;;  %v9119_v47 = vld [vmem:[#allocation33_spill] sm:$0xff] }
 0x169   :  { %v408_v12 = vpop.f32.mrf.mxu0  ;;  %v7624_v15 = vsel %vm1076_vm1, 0.0, %v970_v18  ;;  %v927_v49 = vsub.f32 %v9115_v20, %v879_v58  ;;  %v480_v46 = vpop.f32.mrf.mxu1  ;;  %v924_v39 = vsub.f32 %v9116_v28, %v876_v38  ;;  %v806_v43 = vld [vmem:[#allocation2 + $0x88] sm:$0xff]  ;;  %553 = vst.msk [vmem:[#allocation2 + $0x98] sm:$0xff] %vm84_vm0, %v504_v23  ;;  %577 = vst.msk [vmem:[#allocation2 + $0x158] sm:$0xff] %vm84_vm0, %v528_v19  ;;  %v857_v1 = vmul.f32 2.0, %v402_v56  ;;  %v155_v20 = vld [vmem:[#allocation2 + $0xb8] sm:$0xff] }
 0x16a   :  { %v7630_v9 = vmax.f32 %v900_v54, 0.0  ;;  %v854_v10 = vmul.f32 2.0, %v806_v43  ;;  %v951_v7 = vmax.f32 %v903_v22, 0.0  ;;  %v881_v30 = vmul.f32 2.0, %v474_v34  ;;  %555 = vst.msk [vmem:[#allocation2 + $0xa8] sm:$0xff] %vm84_vm0, %v506_v14  ;;  %v9118_v38 = vld [vmem:[#allocation25_spill] sm:$0xff] }
 0x16b   :  { %v7635_v18 = vmax.f32 %v927_v49, 0.0  ;;  %v972_v58 = vmax.f32 %v924_v39, 0.0  ;;  %v530_v54 = vadd.f32 %v476_v60, %v177_v33  ;;  %v410_v41 = vpop.f32.mrf.mxu0  ;;  %vm1082_vm7 = vcmp.eq.s32.totalorder %v9119_v47, %v7382_v62  ;;  %v9120_v56 = vld [vmem:[#allocation28_spill] sm:$0xff]  ;;  %v482_v34 = vpop.f32.mrf.mxu1  ;;  %v9121_v22 = vld [vmem:[#allocation18_spill] sm:$0xff]  ;;  %v9122_v39 = vld [vmem:[#allocation15_spill] sm:$0xff] }
 0x16c   :  { %v830_v42 = vld [vmem:[#allocation2 + $0x148] sm:$0xff]  ;;  %v902_v28 = vsub.f32 %v9118_v38, %v854_v10  ;;  %v7642_v16 = vsel %vm1057_vm2, 0.0, %v951_v7  ;;  %v905_v23 = vsub.f32 %v9120_v56, %v857_v1  ;;  %v179_v19 = vld [vmem:[#allocation2 + $0x178] sm:$0xff]  ;;  %v929_v49 = vsub.f32 %v9121_v22, %v881_v30  ;;  %v9136_v47 = vld [vmem:[#allocation27_spill] sm:$0xff] }
 0x16d   :  { %9117 = vst [vmem:[#allocation31_spill] sm:$0xff] %v7635_v18  ;;  %v878_v40 = vmul.f32 2.0, %v830_v42  ;;  %v7650_v60 = vsel %vm1078_vm3, 0.0, %v972_v58  ;;  %579 = vst.msk [vmem:[#allocation2 + $0x168] sm:$0xff] %vm84_vm0, %v530_v54  ;;  %v859_v33 = vmul.f32 2.0, %v408_v12  ;;  %v508_v10 = vadd.f32 %v410_v41, %v155_v20  ;;  %v9124_v1 = vld [vmem:[#allocation26_spill] sm:$0xff] }
 0x16e   :  { %v7654_v32 = vmax.f32 %v902_v28, 0.0  ;;  %v953_v14 = vmax.f32 %v905_v23, 0.0  ;;  %v7657_v7 = vmax.f32 %v929_v49, 0.0  ;;  %v883_v38 = vmul.f32 2.0, %v480_v46  ;;  %v9125_v12 = vld [vmem:[#allocation35_spill] sm:$0xff]  ;;  %v9126_v20 = vld [vmem:[#allocation16_spill] sm:$0xff] }
 0x16f   :  { %v926_v43 = vsub.f32 %v9122_v39, %v878_v40  ;;  %v907_v42 = vsub.f32 %v9124_v1, %v859_v33  ;;  %v532_v56 = vadd.f32 %v482_v34, %v179_v19  ;;  %vm1084_vm8 = vcmp.eq.s32.totalorder %v9125_v12, %v7382_v62  ;;  %557 = vst.msk [vmem:[#allocation2 + $0xb8] sm:$0xff] %vm84_vm0, %v508_v10  ;;  %v9127_v22 = vld [vmem:[#allocation38_spill] sm:$0xff]  ;;  %v9128_v33 = vld [vmem:[#allocation23_spill] sm:$0xff]  ;;  %v9129_v39 = vld [vmem:[#allocation13_spill] sm:$0xff] }
 0x170   :  { %9123 = vst [vmem:[#allocation11_spill] sm:$0xff] %v7657_v7  ;;  %v808_v58 = vld [vmem:[#allocation2 + $0x98] sm:$0xff]  ;;  %v7663_v30 = vsel %vm1059_vm4, 0.0, %v953_v14  ;;  %v1160_v40 = vmul.f32 -500000.0, %v7477_v53  ;;  %v931_v28 = vsub.f32 %v9126_v20, %v883_v38  ;;  %v1352_v34 = vmul.f32 -50000.0, %v7477_v53 }
 0x171   :  { %v974_v36 = vmax.f32 %v926_v43, 0.0  ;;  %v832_v18 = vld [vmem:[#allocation2 + $0x158] sm:$0xff]  ;;  %v856_v41 = vmul.f32 2.0, %v808_v58  ;;  %v955_v54 = vmax.f32 %v907_v42, 0.0  ;;  %581 = vst.msk [vmem:[#allocation2 + $0x178] sm:$0xff] %vm84_vm0, %v532_v56  ;;  %v810_v23 = vld [vmem:[#allocation2 + $0xa8] sm:$0xff] }
 0x172   :  { %v880_v46 = vmul.f32 2.0, %v832_v18  ;;  %v1233_v19 = vmul.f32 1.442695, %v1160_v40  ;;  %v1543_v49 = vmul.f32 -5000.0, %v9127_v22  ;;  %v858_v43 = vmul.f32 2.0, %v810_v23  ;;  %v9132_v1 = vld [vmem:[#allocation36_spill] sm:$0xff] }
 0x173   :  { %v7675_v8 = vsel %vm1080_vm5, 0.0, %v974_v36  ;;  %v904_v3 = vsub.f32 %v9128_v33, %v856_v41  ;;  %v7684_v14 = vsel %vm1061_vm6, 0.0, %v955_v54  ;;  %v7686_v5 = vmax.f32 %v931_v28, 0.0  ;;  %v9133_v58 = vld [vmem:[#allocation29_spill] sm:$0xff] }
 0x174   :  { %v928_v18 = vsub.f32 %v9129_v39, %v880_v46  ;;  %9130 = vst [vmem:[#allocation30_spill] sm:$0xff] %v7684_v14  ;;  %v834_v10 = vld [vmem:[#allocation2 + $0x168] sm:$0xff]  ;;  %vm1086_vm9 = vcmp.eq.s32.totalorder %v9132_v1, %v7382_v62  ;;  %5165 = vpow2.f32 %v1233_v19  ;;  %v1423_v42 = vmul.f32 1.442695, %v7445_v52  ;;  %v9135_v52 = vld [vmem:[#allocation19_spill] sm:$0xff] }
 0x175   :  { %9131 = vst [vmem:[#allocation21_spill] sm:$0xff] %v7686_v5  ;;  %v1425_v38 = vmul.f32 1.442695, %v1352_v34  ;;  %v7691_v56 = vmax.f32 %v904_v3, 0.0  ;;  %v906_v40 = vsub.f32 %v9133_v58, %v858_v43  ;;  %v882_v41 = vmul.f32 2.0, %v834_v10  ;;  %v9138_v58 = vld [vmem:[#allocation17_spill] sm:$0xff] }
 0x176   :  { %v976_v36 = vmax.f32 %v928_v18, 0.0  ;;  %5167 = vpow2.f32 %v1423_v42  ;;  %v1544_v61 = vmul.f32 -5000.0, %v7477_v53  ;;  %v1615_v55 = vmul.f32 1.442695, %v1543_v49  ;;  %v812_v23 = vld [vmem:[#allocation2 + $0xb8] sm:$0xff] }
 0x177   :  { %v1735_v46 = vmul.f32 -500.0, %v9127_v22  ;;  %v7701_v20 = vmax.f32 %v906_v40, 0.0  ;;  %v930_v28 = vsub.f32 %v9135_v52, %v882_v41  ;;  %5169 = vpow2.f32 %v1425_v38  ;;  %v5164_v52 = vpop.eup %5163 }
 0x178   :  { %v7699_v54 = vsel %vm1082_vm7, 0.0, %v976_v36  ;;  %v860_v19 = vmul.f32 2.0, %v812_v23  ;;  %v836_v34 = vld [vmem:[#allocation2 + $0x178] sm:$0xff]  ;;  %5171 = vpow2.f32 %v1615_v55  ;;  %v1617_v33 = vmul.f32 1.442695, %v1544_v61 }
 0x179   :  { %9134 = vst [vmem:[#allocation14_spill] sm:$0xff] %v7699_v54  ;;  %v1736_v3 = vmul.f32 -500.0, %v7477_v53  ;;  %v978_v49 = vmax.f32 %v930_v28, 0.0  ;;  %v884_v39 = vmul.f32 2.0, %v836_v34  ;;  %v1807_v18 = vmul.f32 1.442695, %v1735_v46 }
 0x17a   :  { %v1927_v43 = vmul.f32 -50.0, %v9127_v22  ;;  %v908_v10 = vsub.f32 %v9136_v47, %v860_v19  ;;  %5173 = vpow2.f32 %v1617_v33  ;;  %v1928_v36 = vmul.f32 -50.0, %v7477_v53 }
 0x17b   :  { %v1809_v42 = vmul.f32 1.442695, %v1736_v3  ;;  %v7711_v38 = vsel %vm1084_vm8, 0.0, %v978_v49  ;;  %v932_v40 = vsub.f32 %v9138_v58, %v884_v39  ;;  %5175 = vpow2.f32 %v1807_v18  ;;  %v9141_v18 = vld [vmem:[#allocation37_spill] sm:$0xff] }
 0x17c   :  { %9137 = vst [vmem:[#allocation9_spill] sm:$0xff] %v7711_v38  ;;  %v1999_v41 = vmul.f32 1.442695, %v1927_v43  ;;  %v7714_v61 = vmax.f32 %v908_v10, 0.0  ;;  %v2001_v55 = vmul.f32 1.442695, %v1928_v36 }
 0x17d   :  { %5177 = vpow2.f32 %v1809_v42  ;;  %v2119_v46 = vmul.f32 -5.0, %v9127_v22  ;;  %v980_v28 = vmax.f32 %v932_v40, 0.0  ;;  %v2120_v23 = vmul.f32 -5.0, %v7477_v53 }
 0x17e   :  { %9139 = vst [vmem:[#allocation34_spill] sm:$0xff] %v7714_v61  ;;  %5179 = vpow2.f32 %v1999_v41  ;;  %v2311_v19 = vmul.f32 -0.5, %v9127_v22  ;;  %v2312_v34 = vmul.f32 -0.5, %v7477_v53  ;;  %v2503_v33 = vmul.f32 -0.1, %v9127_v22 }
 0x17f   :  { %5181 = vpow2.f32 %v2001_v55  ;;  %v2191_v12 = vmul.f32 1.442695, %v2119_v46  ;;  %v7724_v3 = vsel %vm1086_vm9, 0.0, %v980_v28  ;;  %v2193_v49 = vmul.f32 1.442695, %v2120_v23 }
 0x180   :  { %9140 = vst [vmem:[#allocation20_spill] sm:$0xff] %v7724_v3  ;;  %v2383_v39 = vmul.f32 1.442695, %v2311_v19  ;;  %v7727_v43 = vmul.f32 -50000.0, %v9141_v18  ;;  %v2385_v47 = vmul.f32 1.442695, %v2312_v34 }
 0x181   :  { %5183 = vpow2.f32 %v2191_v12  ;;  %v2504_v10 = vmul.f32 -0.1, %v7477_v53  ;;  %v2575_v42 = vmul.f32 1.442695, %v2503_v33  ;;  %v5166_v36 = vpop.eup %5165  ;;  %v2695_v58 = vmul.f32 -0.05, %v9127_v22 }
 0x182   :  { %5185 = vpow2.f32 %v2193_v49  ;;  %v2696_v40 = vmul.f32 -0.05, %v7477_v53  ;;  %v2887_v1 = vmul.f32 -0.033333335, %v9127_v22  ;;  %v2888_v55 = vmul.f32 -0.033333335, %v7477_v53 }
 0x183   :  { %5187 = vpow2.f32 %v2383_v39  ;;  %v2577_v41 = vmul.f32 1.442695, %v2504_v10  ;;  %v3079_v46 = vmul.f32 -0.025, %v9127_v22  ;;  %v5168_v28 = vpop.eup %5167  ;;  %v2767_v23 = vmul.f32 1.442695, %v2695_v58 }
 0x184   :  { %5189 = vpow2.f32 %v2385_v47  ;;  %v2769_v19 = vmul.f32 1.442695, %v2696_v40  ;;  %v2959_v12 = vmul.f32 1.442695, %v2887_v1  ;;  %v5170_v34 = vpop.eup %5169  ;;  %v1495_v33 = vadd.f32 %v5168_v28, %v5164_v52 }
 0x185   :  { %5191 = vpow2.f32 %v2575_v42  ;;  %v2961_v49 = vmul.f32 1.442695, %v2888_v55  ;;  %v3080_v3 = vmul.f32 -0.025, %v7477_v53  ;;  %v5172_v5 = vpop.eup %5171  ;;  %v1496_v61 = vadd.f32 %v5170_v34, %v5166_v36 }
 0x186   :  { %5193 = vpow2.f32 %v2577_v41  ;;  %v3151_v39 = vmul.f32 1.442695, %v3079_v46  ;;  %v3271_v10 = vmul.f32 -0.02, %v9127_v22  ;;  %v1687_v14 = vadd.f32 %v5172_v5, %v1495_v33 }
 0x187   :  { %5195 = vpow2.f32 %v2767_v23  ;;  %v3153_v38 = vmul.f32 1.442695, %v3080_v3  ;;  %v3272_v47 = vmul.f32 -0.02, %v7477_v53  ;;  %v5174_v58 = vpop.eup %5173  ;;  %v3463_v52 = vmul.f32 -0.016666668, %v9127_v22 }
 0x188   :  { %5197 = vpow2.f32 %v2769_v19  ;;  %v3343_v40 = vmul.f32 1.442695, %v3271_v10  ;;  %v3464_v42 = vmul.f32 -0.016666668, %v7477_v53  ;;  %v5176_v1 = vpop.eup %5175  ;;  %v1688_v55 = vadd.f32 %v5174_v58, %v1496_v61 }
 0x189   :  { %5199 = vpow2.f32 %v2959_v12  ;;  %v3345_v36 = vmul.f32 1.442695, %v3272_v47  ;;  %v3655_v41 = vmul.f32 -0.014285714, %v9127_v22  ;;  %v1879_v28 = vadd.f32 %v5176_v1, %v1687_v14 }
 0x18a   :  { %v5178_v46 = vpop.eup %5177  ;;  %5201 = vpow2.f32 %v2961_v49  ;;  %v3535_v5 = vmul.f32 1.442695, %v3463_v52  ;;  %v3537_v3 = vmul.f32 1.442695, %v3464_v42  ;;  %v3656_v19 = vmul.f32 -0.014285714, %v7477_v53 }
 0x18b   :  { %v5180_v23 = vpop.eup %5179  ;;  %v1880_v34 = vadd.f32 %v5178_v46, %v1688_v55  ;;  %5203 = vpow2.f32 %v3151_v39  ;;  %v3727_v33 = vmul.f32 1.442695, %v3655_v41  ;;  %v3847_v61 = vmul.f32 -0.005, %v9127_v22 }
 0x18c   :  { %v5182_v10 = vpop.eup %5181  ;;  %v2071_v7 = vadd.f32 %v5180_v23, %v1879_v28  ;;  %5205 = vpow2.f32 %v3153_v38  ;;  %v3848_v12 = vmul.f32 -0.005, %v7477_v53  ;;  %v3729_v58 = vmul.f32 1.442695, %v3656_v19 }
 0x18d   :  { %v2072_v47 = vadd.f32 %v5182_v10, %v1880_v34  ;;  %5207 = vpow2.f32 %v3343_v40  ;;  %v4039_v14 = vmul.f32 -0.0005, %v9127_v22  ;;  %v3919_v52 = vmul.f32 1.442695, %v3847_v61 }
 0x18e   :  { %v5184_v49 = vpop.eup %5183  ;;  %5209 = vpow2.f32 %v3345_v36  ;;  %v3921_v42 = vmul.f32 1.442695, %v3848_v12  ;;  %v4040_v39 = vmul.f32 -0.0005, %v7477_v53  ;;  %v4231_v38 = vmul.f32 -5e-05, %v9127_v22 }
 0x18f   :  { %v5186_v1 = vpop.eup %5185  ;;  %v2263_v55 = vadd.f32 %v5184_v49, %v2071_v7  ;;  %5211 = vpow2.f32 %v3535_v5  ;;  %v4111_v41 = vmul.f32 1.442695, %v4039_v14  ;;  %v4232_v40 = vmul.f32 -5e-05, %v7477_v53 }
 0x190   :  { %v5188_v46 = vpop.eup %5187  ;;  %v2264_v28 = vadd.f32 %v5186_v1, %v2072_v47  ;;  %5213 = vpow2.f32 %v3537_v3  ;;  %v4113_v23 = vmul.f32 1.442695, %v4040_v39  ;;  %v4303_v36 = vmul.f32 1.442695, %v4231_v38 }
 0x191   :  { %v5190_v34 = vpop.eup %5189  ;;  %v2455_v19 = vadd.f32 %v5188_v46, %v2263_v55  ;;  %5215 = vpow2.f32 %v3727_v33  ;;  %v4423_v10 = vmul.f32 -5e-06, %v9127_v22  ;;  %v4305_v7 = vmul.f32 1.442695, %v4232_v40 }
 0x192   :  { %v5192_v61 = vpop.eup %5191  ;;  %v2456_v12 = vadd.f32 %v5190_v34, %v2264_v28  ;;  %5217 = vpow2.f32 %v3729_v58  ;;  %v4424_v5 = vmul.f32 -5e-06, %v7477_v53  ;;  %v4615_v3 = vmul.f32 -5e-07, %v9127_v22 }
 0x193   :  { %v5194_v14 = vpop.eup %5193  ;;  %v2647_v49 = vadd.f32 %v5192_v61, %v2455_v19  ;;  %5219 = vpow2.f32 %v3919_v52  ;;  %v4495_v47 = vmul.f32 1.442695, %v4423_v10  ;;  %v4616_v33 = vmul.f32 -5e-07, %v7477_v53 }
 0x194   :  { %v5196_v39 = vpop.eup %5195  ;;  %v2648_v1 = vadd.f32 %v5194_v14, %v2456_v12  ;;  %5221 = vpow2.f32 %v3921_v42  ;;  %v4497_v55 = vmul.f32 1.442695, %v4424_v5  ;;  %v4687_v28 = vmul.f32 1.442695, %v4615_v3 }
 0x195   :  { %v5198_v38 = vpop.eup %5197  ;;  %v2839_v46 = vadd.f32 %v5196_v39, %v2647_v49  ;;  %5223 = vpow2.f32 %v4111_v41  ;;  %v1135_v58 = vmul.f32 -500000.0, %v9141_v18  ;;  %v4689_v19 = vmul.f32 1.442695, %v4616_v33 }
 0x196   :  { %v5200_v40 = vpop.eup %5199  ;;  %v2840_v34 = vadd.f32 %v5198_v38, %v2648_v1  ;;  %5225 = vpow2.f32 %v4113_v23  ;;  %v1136_v52 = vmul.f32 -500000.0, %v7475_v59  ;;  %v1328_v42 = vmul.f32 -50000.0, %v7475_v59 }
 0x197   :  { %v5202_v10 = vpop.eup %5201  ;;  %v3031_v22 = vadd.f32 %v5200_v40, %v2839_v46  ;;  %5227 = vpow2.f32 %v4303_v36  ;;  %v1183_v61 = vmul.f32 1.442695, %v1135_v58  ;;  %v1375_v41 = vmul.f32 1.442695, %v7727_v43 }
 0x198   :  { %v5204_v12 = vpop.eup %5203  ;;  %v3032_v53 = vadd.f32 %v5202_v10, %v2840_v34  ;;  %5229 = vpow2.f32 %v4305_v7  ;;  %v1185_v5 = vmul.f32 1.442695, %v1136_v52  ;;  %v1377_v3 = vmul.f32 1.442695, %v1328_v42 }
 0x199   :  { %v5206_v14 = vpop.eup %5205  ;;  %v3223_v49 = vadd.f32 %v5204_v12, %v3031_v22  ;;  %5231 = vpow2.f32 %v4495_v47  ;;  %v1519_v23 = vmul.f32 -5000.0, %v9141_v18  ;;  %v1520_v36 = vmul.f32 -5000.0, %v7475_v59 }
 0x19a   :  { %v5208_v39 = vpop.eup %5207  ;;  %v3224_v1 = vadd.f32 %v5206_v14, %v3032_v53  ;;  %5233 = vpow2.f32 %v4497_v55  ;;  %v1711_v33 = vmul.f32 -500.0, %v9141_v18  ;;  %v1712_v58 = vmul.f32 -500.0, %v7475_v59 }
 0x19b   :  { %v5210_v38 = vpop.eup %5209  ;;  %v3415_v46 = vadd.f32 %v5208_v39, %v3223_v49  ;;  %5235 = vpow2.f32 %v4687_v28  ;;  %v1567_v7 = vmul.f32 1.442695, %v1519_v23  ;;  %v1569_v47 = vmul.f32 1.442695, %v1520_v36 }
 0x19c   :  { %v5212_v43 = vpop.eup %5211  ;;  %v3416_v40 = vadd.f32 %v5210_v38, %v3224_v1  ;;  %5237 = vpow2.f32 %v4689_v19  ;;  %v1759_v34 = vmul.f32 1.442695, %v1711_v33  ;;  %v1761_v22 = vmul.f32 1.442695, %v1712_v58 }
 0x19d   :  { %v5214_v52 = vpop.eup %5213  ;;  %v3607_v10 = vadd.f32 %v5212_v43, %v3415_v46  ;;  %5239 = vpow2.f32 %v1183_v61  ;;  %v1903_v55 = vmul.f32 -50.0, %v9141_v18  ;;  %v1904_v53 = vmul.f32 -50.0, %v7475_v59 }
 0x19e   :  { %v5216_v42 = vpop.eup %5215  ;;  %v3608_v12 = vadd.f32 %v5214_v52, %v3416_v40  ;;  %5241 = vpow2.f32 %v1185_v5  ;;  %v2095_v28 = vmul.f32 -5.0, %v9141_v18  ;;  %v2096_v19 = vmul.f32 -5.0, %v7475_v59 }
 0x19f   :  { %v5218_v14 = vpop.eup %5217  ;;  %v3799_v49 = vadd.f32 %v5216_v42, %v3607_v10  ;;  %5243 = vpow2.f32 %v1375_v41  ;;  %v1951_v23 = vmul.f32 1.442695, %v1903_v55  ;;  %v1953_v61 = vmul.f32 1.442695, %v1904_v53 }
 0x1a0   :  { %v5220_v39 = vpop.eup %5219  ;;  %v3800_v1 = vadd.f32 %v5218_v14, %v3608_v12  ;;  %5245 = vpow2.f32 %v1377_v3  ;;  %v2143_v36 = vmul.f32 1.442695, %v2095_v28  ;;  %vm4808_vm10 = vcmp.lt.s32.totalorder %v7382_v62, 192 }
 0x1a1   :  { %v5222_v33 = vpop.eup %5221  ;;  %v3991_v38 = vadd.f32 %v5220_v39, %v3799_v49  ;;  %5247 = vpow2.f32 %v1567_v7  ;;  %v2145_v5 = vmul.f32 1.442695, %v2096_v19  ;;  %v2287_v46 = vmul.f32 -0.5, %v9141_v18 }
 0x1a2   :  { %v5224_v58 = vpop.eup %5223  ;;  %v3992_v43 = vadd.f32 %v5222_v33, %v3800_v1  ;;  %5249 = vpow2.f32 %v1569_v47  ;;  %v2288_v41 = vmul.f32 -0.5, %v7475_v59  ;;  %v2479_v40 = vmul.f32 -0.1, %v9141_v18 }
 0x1a3   :  { %v5226_v52 = vpop.eup %5225  ;;  %v4183_v10 = vadd.f32 %v5224_v58, %v3991_v38  ;;  %5251 = vpow2.f32 %v1759_v34  ;;  %v2335_v3 = vmul.f32 1.442695, %v2287_v46  ;;  %v2480_v55 = vmul.f32 -0.1, %v7475_v59 }
 0x1a4   :  { %v5228_v42 = vpop.eup %5227  ;;  %v4184_v12 = vadd.f32 %v5226_v52, %v3992_v43  ;;  %5253 = vpow2.f32 %v1761_v22  ;;  %v2337_v7 = vmul.f32 1.442695, %v2288_v41  ;;  %v2527_v53 = vmul.f32 1.442695, %v2479_v40 }
 0x1a5   :  { %v5230_v28 = vpop.eup %5229  ;;  %v4375_v14 = vadd.f32 %v5228_v42, %v4183_v10  ;;  %5255 = vpow2.f32 %v1951_v23  ;;  %v2529_v49 = vmul.f32 1.442695, %v2480_v55  ;;  %v2671_v47 = vmul.f32 -0.05, %v9141_v18 }
 0x1a6   :  { %v5232_v19 = vpop.eup %5231  ;;  %v4376_v39 = vadd.f32 %v5230_v28, %v4184_v12  ;;  %5257 = vpow2.f32 %v1953_v61  ;;  %v2672_v1 = vmul.f32 -0.05, %v7475_v59  ;;  %v2863_v34 = vmul.f32 -0.033333335, %v9141_v18 }
 0x1a7   :  { %v5234_v33 = vpop.eup %5233  ;;  %v4567_v38 = vadd.f32 %v5232_v19, %v4375_v14  ;;  %5259 = vpow2.f32 %v2143_v36  ;;  %v2719_v46 = vmul.f32 1.442695, %v2671_v47  ;;  %v2864_v22 = vmul.f32 -0.033333335, %v7475_v59 }
 0x1a8   :  { %v5236_v58 = vpop.eup %5235  ;;  %v4568_v43 = vadd.f32 %v5234_v33, %v4376_v39  ;;  %5261 = vpow2.f32 %v2145_v5  ;;  %v2721_v23 = vmul.f32 1.442695, %v2672_v1  ;;  %v2911_v41 = vmul.f32 1.442695, %v2863_v34 }
 0x1a9   :  { %v5238_v40 = vpop.eup %5237  ;;  %v4759_v52 = vadd.f32 %v5236_v58, %v4567_v38  ;;  %5263 = vpow2.f32 %v2335_v3  ;;  %v2913_v10 = vmul.f32 1.442695, %v2864_v22  ;;  %v3055_v61 = vmul.f32 -0.025, %v9141_v18 }
 0x1aa   :  { %v5240_v55 = vpop.eup %5239  ;;  %v4760_v42 = vadd.f32 %v5238_v40, %v4568_v43  ;;  %5265 = vpow2.f32 %v2337_v7  ;;  %v3056_v12 = vmul.f32 -0.025, %v7475_v59  ;;  %v3247_v36 = vmul.f32 -0.02, %v9141_v18 }
 0x1ab   :  { %v5242_v28 = vpop.eup %5241  ;;  %5267 = vpow2.f32 %v2527_v53  ;;  %v3103_v14 = vmul.f32 1.442695, %v3055_v61  ;;  %v3248_v5 = vmul.f32 -0.02, %v7475_v59  ;;  %v3439_v47 = vmul.f32 -0.016666668, %v9141_v18 }
 0x1ac   :  { %v5244_v19 = vpop.eup %5243  ;;  %v4882_v3 = vsel %vm4808_vm10, %v4760_v42, 0.0  ;;  %5269 = vpow2.f32 %v2529_v49  ;;  %v3105_v39 = vmul.f32 1.442695, %v3056_v12  ;;  %v3295_v1 = vmul.f32 1.442695, %v3247_v36 }
 0x1ad   :  { %v5246_v34 = vpop.eup %5245  ;;  %v4953_v7 = vsel %vm84_vm0, %v4882_v3, 0.0  ;;  %v1471_v33 = vadd.f32 %v5244_v19, %v5240_v55  ;;  %5271 = vpow2.f32 %v2719_v46  ;;  %v3297_v38 = vmul.f32 1.442695, %v3248_v5 }
 0x1ae   :  { %v5248_v22 = vpop.eup %5247  ;;  %v4954_v53 = vadd.f32 %v4953_v7, %v4759_v52  ;;  %v1472_v58 = vadd.f32 %v5246_v34, %v5242_v28  ;;  %5273 = vpow2.f32 %v2721_v23  ;;  %v3440_v43 = vmul.f32 -0.016666668, %v7475_v59 }
 0x1af   :  { %v5250_v40 = vpop.eup %5249  ;;  %v1663_v61 = vadd.f32 %v5248_v22, %v1471_v33  ;;  %5275 = vpow2.f32 %v2911_v41  ;;  %v3487_v54 = vmul.f32 1.442695, %v3439_v47  ;;  %v3631_v49 = vmul.f32 -0.014285714, %v9141_v18 }
 0x1b0   :  { %v5252_v42 = vpop.eup %5251  ;;  %4955 = vadd.xlane.f32.xlu1 %v4954_v53  ;;  %v1664_v12 = vadd.f32 %v5250_v40, %v1472_v58  ;;  %5277 = vpow2.f32 %v2913_v10  ;;  %v3489_v36 = vmul.f32 1.442695, %v3440_v43  ;;  %v3632_v46 = vmul.f32 -0.014285714, %v7475_v59 }
 0x1b1   :  { %v5254_v55 = vpop.eup %5253  ;;  %v1855_v5 = vadd.f32 %v5252_v42, %v1663_v61  ;;  %5279 = vpow2.f32 %v3103_v14  ;;  %v3679_v52 = vmul.f32 1.442695, %v3631_v49  ;;  %v3823_v23 = vmul.f32 -0.005, %v9141_v18 }
 0x1b2   :  { %v5256_v28 = vpop.eup %5255  ;;  %v1856_v19 = vadd.f32 %v5254_v55, %v1664_v12  ;;  %5281 = vpow2.f32 %v3105_v39  ;;  %v3681_v41 = vmul.f32 1.442695, %v3632_v46  ;;  %v3824_v47 = vmul.f32 -0.005, %v7475_v59 }
 0x1b3   :  { %v5258_v3 = vpop.eup %5257  ;;  %v2047_v34 = vadd.f32 %v5256_v28, %v1855_v5  ;;  %5283 = vpow2.f32 %v3295_v1  ;;  %v3871_v7 = vmul.f32 1.442695, %v3823_v23  ;;  %v4015_v10 = vmul.f32 -0.0005, %v9141_v18 }
 0x1b4   :  { %v5260_v33 = vpop.eup %5259  ;;  %v2048_v22 = vadd.f32 %v5258_v3, %v1856_v19  ;;  %5285 = vpow2.f32 %v3297_v38  ;;  %v3873_v53 = vmul.f32 1.442695, %v3824_v47  ;;  %v4016_v14 = vmul.f32 -0.0005, %v7475_v59 }
 0x1b5   :  { %v5262_v58 = vpop.eup %5261  ;;  %v2239_v43 = vadd.f32 %v5260_v33, %v2047_v34  ;;  %5287 = vpow2.f32 %v3487_v54  ;;  %v4063_v40 = vmul.f32 1.442695, %v4015_v10  ;;  %v4207_v39 = vmul.f32 -5e-05, %v9141_v18 }
 0x1b6   :  { %v5264_v61 = vpop.eup %5263  ;;  %v2240_v49 = vadd.f32 %v5262_v58, %v2048_v22  ;;  %5289 = vpow2.f32 %v3489_v36  ;;  %v4065_v42 = vmul.f32 1.442695, %v4016_v14  ;;  %v4208_v1 = vmul.f32 -5e-05, %v7475_v59 }
 0x1b7   :  { %v5266_v12 = vpop.eup %5265  ;;  %v2431_v46 = vadd.f32 %v5264_v61, %v2239_v43  ;;  %5291 = vpow2.f32 %v3679_v52  ;;  %v4255_v55 = vmul.f32 1.442695, %v4207_v39  ;;  %v4399_v38 = vmul.f32 -5e-06, %v9141_v18 }
 0x1b8   :  { %v5268_v5 = vpop.eup %5267  ;;  %v2432_v23 = vadd.f32 %v5266_v12, %v2240_v49  ;;  %5293 = vpow2.f32 %v3681_v41  ;;  %v4257_v28 = vmul.f32 1.442695, %v4208_v1  ;;  %v4400_v54 = vmul.f32 -5e-06, %v7475_v59 }
 0x1b9   :  { %v5270_v19 = vpop.eup %5269  ;;  %v2623_v47 = vadd.f32 %v5268_v5, %v2431_v46  ;;  %5295 = vpow2.f32 %v3871_v7  ;;  %v4447_v3 = vmul.f32 1.442695, %v4399_v38  ;;  %v4591_v36 = vmul.f32 -5e-07, %v9141_v18 }
 0x1ba   :  { %v5272_v34 = vpop.eup %5271  ;;  %v2624_v10 = vadd.f32 %v5270_v19, %v2432_v23  ;;  %5297 = vpow2.f32 %v3873_v53  ;;  %v4449_v33 = vmul.f32 1.442695, %v4400_v54  ;;  %v4592_v52 = vmul.f32 -5e-07, %v7475_v59 }
 0x1bb   :  { %v5274_v22 = vpop.eup %5273  ;;  %v2815_v14 = vadd.f32 %v5272_v34, %v2623_v47  ;;  %5299 = vpow2.f32 %v4063_v40  ;;  %v4639_v58 = vmul.f32 1.442695, %v4591_v36  ;;  %v1137_v41 = vmul.f32 -500000.0, %v7460_v63 }
 0x1bc   :  { %v5276_v43 = vpop.eup %5275  ;;  %v2816_v39 = vadd.f32 %v5274_v22, %v2624_v10  ;;  %5301 = vpow2.f32 %v4065_v42  ;;  %v4641_v61 = vmul.f32 1.442695, %v4592_v52  ;;  %v1138_v7 = vmul.f32 -500000.0, %v7497_v29 }
 0x1bd   :  { %v5278_v49 = vpop.eup %5277  ;;  %v3007_v18 = vadd.f32 %v5276_v43, %v2815_v14  ;;  %5303 = vpow2.f32 %v4255_v55  ;;  %v1187_v1 = vmul.f32 1.442695, %v1137_v41  ;;  %v1329_v53 = vmul.f32 -50000.0, %v7460_v63 }
 0x1be   :  { %v5280_v12 = vpop.eup %5279  ;;  %v3008_v59 = vadd.f32 %v5278_v49, %v2816_v39  ;;  %5305 = vpow2.f32 %v4257_v28  ;;  %v1189_v46 = vmul.f32 1.442695, %v1138_v7  ;;  %v1330_v40 = vmul.f32 -50000.0, %v7497_v29 }
 0x1bf   :  { %v5282_v38 = vpop.eup %5281  ;;  %v3199_v5 = vadd.f32 %v5280_v12, %v3007_v18  ;;  %5307 = vpow2.f32 %v4447_v3  ;;  %v1379_v23 = vmul.f32 1.442695, %v1329_v53  ;;  %v1521_v42 = vmul.f32 -5000.0, %v7460_v63 }
 0x1c0   :  { %v5284_v54 = vpop.eup %5283  ;;  %v3200_v19 = vadd.f32 %v5282_v38, %v3008_v59  ;;  %5309 = vpow2.f32 %v4449_v33  ;;  %v1381_v47 = vmul.f32 1.442695, %v1330_v40  ;;  %v1522_v55 = vmul.f32 -5000.0, %v7497_v29 }
 0x1c1   :  { %v5286_v36 = vpop.eup %5285  ;;  %v3391_v34 = vadd.f32 %v5284_v54, %v3199_v5  ;;  %5311 = vpow2.f32 %v4639_v58  ;;  %v1571_v10 = vmul.f32 1.442695, %v1521_v42  ;;  %v1713_v28 = vmul.f32 -500.0, %v7460_v63 }
 0x1c2   :  { %v5288_v52 = vpop.eup %5287  ;;  %v3392_v22 = vadd.f32 %v5286_v36, %v3200_v19  ;;  %5313 = vpow2.f32 %v4641_v61  ;;  %v1573_v14 = vmul.f32 1.442695, %v1522_v55  ;;  %v1714_v3 = vmul.f32 -500.0, %v7497_v29 }
 0x1c3   :  { %v5290_v41 = vpop.eup %5289  ;;  %v3583_v43 = vadd.f32 %v5288_v52, %v3391_v34  ;;  %5315 = vpow2.f32 %v1187_v1  ;;  %v1763_v39 = vmul.f32 1.442695, %v1713_v28  ;;  %v1905_v33 = vmul.f32 -50.0, %v7460_v63 }
 0x1c4   :  { %v5292_v7 = vpop.eup %5291  ;;  %v3584_v49 = vadd.f32 %v5290_v41, %v3392_v22  ;;  %5317 = vpow2.f32 %v1189_v46  ;;  %v1765_v18 = vmul.f32 1.442695, %v1714_v3  ;;  %v1906_v58 = vmul.f32 -50.0, %v7497_v29 }
 0x1c5   :  { %v5294_v53 = vpop.eup %5293  ;;  %v3775_v12 = vadd.f32 %v5292_v7, %v3583_v43  ;;  %5319 = vpow2.f32 %v1379_v23  ;;  %v1955_v59 = vmul.f32 1.442695, %v1905_v33  ;;  %v2097_v61 = vmul.f32 -5.0, %v7460_v63 }
 0x1c6   :  { %v5296_v40 = vpop.eup %5295  ;;  %v3776_v38 = vadd.f32 %v5294_v53, %v3584_v49  ;;  %5321 = vpow2.f32 %v1381_v47  ;;  %v1957_v5 = vmul.f32 1.442695, %v1906_v58  ;;  %v2098_v1 = vmul.f32 -5.0, %v7497_v29 }
 0x1c7   :  { %v5298_v42 = vpop.eup %5297  ;;  %v3967_v54 = vadd.f32 %v5296_v40, %v3775_v12  ;;  %5323 = vpow2.f32 %v1571_v10  ;;  %v2147_v19 = vmul.f32 1.442695, %v2097_v61  ;;  %v2289_v46 = vmul.f32 -0.5, %v7460_v63 }
 0x1c8   :  { %v5300_v55 = vpop.eup %5299  ;;  %v3968_v36 = vadd.f32 %v5298_v42, %v3776_v38  ;;  %5325 = vpow2.f32 %v1573_v14  ;;  %v2149_v34 = vmul.f32 1.442695, %v2098_v1  ;;  %v2290_v23 = vmul.f32 -0.5, %v7497_v29 }
 0x1c9   :  { %v5302_v28 = vpop.eup %5301  ;;  %v4159_v52 = vadd.f32 %v5300_v55, %v3967_v54  ;;  %5327 = vpow2.f32 %v1763_v39  ;;  %v2339_v22 = vmul.f32 1.442695, %v2289_v46  ;;  %v2481_v47 = vmul.f32 -0.1, %v7460_v63 }
 0x1ca   :  { %v5304_v3 = vpop.eup %5303  ;;  %v4160_v41 = vadd.f32 %v5302_v28, %v3968_v36  ;;  %5329 = vpow2.f32 %v1765_v18  ;;  %v2341_v43 = vmul.f32 1.442695, %v2290_v23  ;;  %v2482_v10 = vmul.f32 -0.1, %v7497_v29 }
 0x1cb   :  { %v5306_v33 = vpop.eup %5305  ;;  %v4351_v7 = vadd.f32 %v5304_v3, %v4159_v52  ;;  %5331 = vpow2.f32 %v1955_v59  ;;  %v2531_v49 = vmul.f32 1.442695, %v2481_v47  ;;  %v2673_v14 = vmul.f32 -0.05, %v7460_v63 }
 0x1cc   :  { %v5308_v58 = vpop.eup %5307  ;;  %v4352_v53 = vadd.f32 %v5306_v33, %v4160_v41  ;;  %5333 = vpow2.f32 %v1957_v5  ;;  %v2533_v12 = vmul.f32 1.442695, %v2482_v10  ;;  %v2674_v39 = vmul.f32 -0.05, %v7497_v29 }
 0x1cd   :  { %v5310_v61 = vpop.eup %5309  ;;  %v4543_v40 = vadd.f32 %v5308_v58, %v4351_v7  ;;  %5335 = vpow2.f32 %v2147_v19  ;;  %v2723_v38 = vmul.f32 1.442695, %v2673_v14  ;;  %v2865_v18 = vmul.f32 -0.033333335, %v7460_v63 }
 0x1ce   :  { %v5312_v1 = vpop.eup %5311  ;;  %v4544_v42 = vadd.f32 %v5310_v61, %v4352_v53  ;;  %5337 = vpow2.f32 %v2149_v34  ;;  %v2725_v54 = vmul.f32 1.442695, %v2674_v39  ;;  %v2866_v59 = vmul.f32 -0.033333335, %v7497_v29 }
 0x1cf   :  { %v5314_v46 = vpop.eup %5313  ;;  %v4735_v55 = vadd.f32 %v5312_v1, %v4543_v40  ;;  %5339 = vpow2.f32 %v2339_v22  ;;  %v2915_v36 = vmul.f32 1.442695, %v2865_v18  ;;  %v3057_v5 = vmul.f32 -0.025, %v7460_v63 }
 0x1d0   :  { %v5316_v23 = vpop.eup %5315  ;;  %v4736_v28 = vadd.f32 %v5314_v46, %v4544_v42  ;;  %5341 = vpow2.f32 %v2341_v43  ;;  %v2917_v52 = vmul.f32 1.442695, %v2866_v59  ;;  %v3058_v19 = vmul.f32 -0.025, %v7497_v29 }
 0x1d1   :  { %v5318_v47 = vpop.eup %5317  ;;  %5343 = vpow2.f32 %v2531_v49  ;;  %v3107_v3 = vmul.f32 1.442695, %v3057_v5  ;;  %v3249_v34 = vmul.f32 -0.02, %v7460_v63  ;;  %v3250_v41 = vmul.f32 -0.02, %v7497_v29 }
 0x1d2   :  { %v5320_v10 = vpop.eup %5319  ;;  %v4858_v22 = vsel %vm4808_vm10, %v4736_v28, 0.0  ;;  %5345 = vpow2.f32 %v2533_v12  ;;  %v3109_v33 = vmul.f32 1.442695, %v3058_v19  ;;  %v3441_v7 = vmul.f32 -0.016666668, %v7460_v63 }
 0x1d3   :  { %v5322_v14 = vpop.eup %5321  ;;  %v4905_v43 = vsel %vm84_vm0, %v4858_v22, 0.0  ;;  %v1473_v58 = vadd.f32 %v5320_v10, %v5316_v23  ;;  %5347 = vpow2.f32 %v2723_v38  ;;  %v3299_v53 = vmul.f32 1.442695, %v3249_v34 }
 0x1d4   :  { %v5324_v49 = vpop.eup %5323  ;;  %v4906_v39 = vadd.f32 %v4905_v43, %v4735_v55  ;;  %v1474_v61 = vadd.f32 %v5322_v14, %v5318_v47  ;;  %5349 = vpow2.f32 %v2725_v54  ;;  %v3301_v40 = vmul.f32 1.442695, %v3250_v41 }
 0x1d5   :  { %v5326_v18 = vpop.eup %5325  ;;  %v1665_v1 = vadd.f32 %v5324_v49, %v1473_v58  ;;  %5351 = vpow2.f32 %v2915_v36  ;;  %v3442_v42 = vmul.f32 -0.016666668, %v7497_v29  ;;  %v3491_v12 = vmul.f32 1.442695, %v3441_v7 }
 0x1d6   :  { %v5328_v59 = vpop.eup %5327  ;;  %4907 = vadd.xlane.f32.xlu0 %v4906_v39  ;;  %v1666_v46 = vadd.f32 %v5326_v18, %v1474_v61  ;;  %5353 = vpow2.f32 %v2917_v52  ;;  %v3633_v5 = vmul.f32 -0.014285714, %v7460_v63  ;;  %v3634_v38 = vmul.f32 -0.014285714, %v7497_v29 }
 0x1d7   :  { %v5330_v23 = vpop.eup %5329  ;;  %v1857_v28 = vadd.f32 %v5328_v59, %v1665_v1  ;;  %5355 = vpow2.f32 %v3107_v3  ;;  %v3493_v55 = vmul.f32 1.442695, %v3442_v42  ;;  %v3825_v54 = vmul.f32 -0.005, %v7460_v63 }
 0x1d8   :  { %v5332_v19 = vpop.eup %5331  ;;  %v1858_v47 = vadd.f32 %v5330_v23, %v1666_v46  ;;  %5357 = vpow2.f32 %v3109_v33  ;;  %v3683_v36 = vmul.f32 1.442695, %v3633_v5  ;;  %v3685_v34 = vmul.f32 1.442695, %v3634_v38 }
 0x1d9   :  { %v5334_v41 = vpop.eup %5333  ;;  %v2049_v10 = vadd.f32 %v5332_v19, %v1857_v28  ;;  %5359 = vpow2.f32 %v3299_v53  ;;  %v3826_v52 = vmul.f32 -0.005, %v7497_v29  ;;  %v3875_v22 = vmul.f32 1.442695, %v3825_v54 }
 0x1da   :  { %v5336_v7 = vpop.eup %5335  ;;  %v2050_v14 = vadd.f32 %v5334_v41, %v1858_v47  ;;  %5361 = vpow2.f32 %v3301_v40  ;;  %v4017_v43 = vmul.f32 -0.0005, %v7460_v63  ;;  %v4018_v3 = vmul.f32 -0.0005, %v7497_v29 }
 0x1db   :  { %v5338_v58 = vpop.eup %5337  ;;  %v2241_v49 = vadd.f32 %v5336_v7, %v2049_v10  ;;  %5363 = vpow2.f32 %v3491_v12  ;;  %v3877_v39 = vmul.f32 1.442695, %v3826_v52  ;;  %v4209_v33 = vmul.f32 -5e-05, %v7460_v63 }
 0x1dc   :  { %v5340_v61 = vpop.eup %5339  ;;  %v2242_v18 = vadd.f32 %v5338_v58, %v2050_v14  ;;  %5365 = vpow2.f32 %v3493_v55  ;;  %v4067_v53 = vmul.f32 1.442695, %v4017_v43  ;;  %v4069_v1 = vmul.f32 1.442695, %v4018_v3 }
 0x1dd   :  { %v5342_v42 = vpop.eup %5341  ;;  %v2433_v59 = vadd.f32 %v5340_v61, %v2241_v49  ;;  %5367 = vpow2.f32 %v3683_v36  ;;  %v4210_v40 = vmul.f32 -5e-05, %v7497_v29  ;;  %v4259_v46 = vmul.f32 1.442695, %v4209_v33 }
 0x1de   :  { %v5344_v5 = vpop.eup %5343  ;;  %v2434_v38 = vadd.f32 %v5342_v42, %v2242_v18  ;;  %5369 = vpow2.f32 %v3685_v34  ;;  %v4401_v23 = vmul.f32 -5e-06, %v7460_v63  ;;  %v4402_v12 = vmul.f32 -5e-06, %v7497_v29 }
 0x1df   :  { %v5346_v28 = vpop.eup %5345  ;;  %v2625_v54 = vadd.f32 %v5344_v5, %v2433_v59  ;;  %5371 = vpow2.f32 %v3875_v22  ;;  %v4261_v19 = vmul.f32 1.442695, %v4210_v40  ;;  %v4593_v55 = vmul.f32 -5e-07, %v7460_v63 }
 0x1e0   :  { %v5348_v47 = vpop.eup %5347  ;;  %v2626_v41 = vadd.f32 %v5346_v28, %v2434_v38  ;;  %5373 = vpow2.f32 %v3877_v39  ;;  %v4451_v36 = vmul.f32 1.442695, %v4401_v23  ;;  %v4453_v10 = vmul.f32 1.442695, %v4402_v12 }
 0x1e1   :  { %v5350_v52 = vpop.eup %5349  ;;  %v2817_v7 = vadd.f32 %v5348_v47, %v2625_v54  ;;  %5375 = vpow2.f32 %v4067_v53  ;;  %v4594_v34 = vmul.f32 -5e-07, %v7497_v29  ;;  %v4643_v14 = vmul.f32 1.442695, %v4593_v55 }
 0x1e2   :  { %v5352_v43 = vpop.eup %5351  ;;  %v2818_v3 = vadd.f32 %v5350_v52, %v2626_v41  ;;  %5377 = vpow2.f32 %v4069_v1  ;;  %v1161_v58 = vmul.f32 -500000.0, %v7465_v11  ;;  %v1162_v22 = vmul.f32 -500000.0, %v7499_v45 }
 0x1e3   :  { %v5354_v49 = vpop.eup %5353  ;;  %v3009_v63 = vadd.f32 %v5352_v43, %v2817_v7  ;;  %5379 = vpow2.f32 %v4259_v46  ;;  %v4645_v33 = vmul.f32 1.442695, %v4594_v34  ;;  %v1353_v39 = vmul.f32 -50000.0, %v7465_v11 }
 0x1e4   :  { %v5356_v61 = vpop.eup %5355  ;;  %v3010_v18 = vadd.f32 %v5354_v49, %v2818_v3  ;;  %5381 = vpow2.f32 %v4261_v19  ;;  %v1235_v53 = vmul.f32 1.442695, %v1161_v58  ;;  %v1237_v42 = vmul.f32 1.442695, %v1162_v22 }
 0x1e5   :  { %v5358_v29 = vpop.eup %5357  ;;  %v3201_v59 = vadd.f32 %v5356_v61, %v3009_v63  ;;  %5383 = vpow2.f32 %v4451_v36  ;;  %v1354_v1 = vmul.f32 -50000.0, %v7499_v45  ;;  %v1427_v40 = vmul.f32 1.442695, %v1353_v39 }
 0x1e6   :  { %v5360_v5 = vpop.eup %5359  ;;  %v3202_v38 = vadd.f32 %v5358_v29, %v3010_v18  ;;  %5385 = vpow2.f32 %v4453_v10  ;;  %v1545_v23 = vmul.f32 -5000.0, %v7465_v11  ;;  %v1546_v46 = vmul.f32 -5000.0, %v7499_v45 }
 0x1e7   :  { %v5362_v12 = vpop.eup %5361  ;;  %v3393_v28 = vadd.f32 %v5360_v5, %v3201_v59  ;;  %5387 = vpow2.f32 %v4643_v14  ;;  %v1429_v54 = vmul.f32 1.442695, %v1354_v1  ;;  %v1737_v19 = vmul.f32 -500.0, %v7465_v11 }
 0x1e8   :  { %v5364_v55 = vpop.eup %5363  ;;  %v3394_v47 = vadd.f32 %v5362_v12, %v3202_v38  ;;  %5389 = vpow2.f32 %v4645_v33  ;;  %v1619_v41 = vmul.f32 1.442695, %v1545_v23  ;;  %v1621_v36 = vmul.f32 1.442695, %v1546_v46 }
 0x1e9   :  { %v5366_v52 = vpop.eup %5365  ;;  %v3585_v7 = vadd.f32 %v5364_v55, %v3393_v28  ;;  %5391 = vpow2.f32 %v1235_v53  ;;  %v1738_v10 = vmul.f32 -500.0, %v7499_v45  ;;  %v1811_v34 = vmul.f32 1.442695, %v1737_v19 }
 0x1ea   :  { %v5368_v43 = vpop.eup %5367  ;;  %v3586_v3 = vadd.f32 %v5366_v52, %v3394_v47  ;;  %5393 = vpow2.f32 %v1237_v42  ;;  %v1929_v58 = vmul.f32 -50.0, %v7465_v11  ;;  %v1930_v14 = vmul.f32 -50.0, %v7499_v45 }
 0x1eb   :  { %v5370_v22 = vpop.eup %5369  ;;  %v3777_v49 = vadd.f32 %v5368_v43, %v3585_v7  ;;  %5395 = vpow2.f32 %v1427_v40  ;;  %v1813_v63 = vmul.f32 1.442695, %v1738_v10  ;;  %v2121_v33 = vmul.f32 -5.0, %v7465_v11 }
 0x1ec   :  { %v5372_v39 = vpop.eup %5371  ;;  %v3778_v61 = vadd.f32 %v5370_v22, %v3586_v3  ;;  %5397 = vpow2.f32 %v1429_v54  ;;  %v2003_v18 = vmul.f32 1.442695, %v1929_v58  ;;  %v2005_v53 = vmul.f32 1.442695, %v1930_v14 }
 0x1ed   :  { %v5374_v29 = vpop.eup %5373  ;;  %v3969_v59 = vadd.f32 %v5372_v39, %v3777_v49  ;;  %5399 = vpow2.f32 %v1619_v41  ;;  %v2122_v42 = vmul.f32 -5.0, %v7499_v45  ;;  %v2195_v1 = vmul.f32 1.442695, %v2121_v33 }
 0x1ee   :  { %v5376_v5 = vpop.eup %5375  ;;  %v3970_v38 = vadd.f32 %v5374_v29, %v3778_v61  ;;  %5401 = vpow2.f32 %v1621_v36  ;;  %v2313_v23 = vmul.f32 -0.5, %v7465_v11  ;;  %v2314_v40 = vmul.f32 -0.5, %v7499_v45 }
 0x1ef   :  { %v5378_v46 = vpop.eup %5377  ;;  %v4161_v12 = vadd.f32 %v5376_v5, %v3969_v59  ;;  %5403 = vpow2.f32 %v1811_v34  ;;  %v2197_v28 = vmul.f32 1.442695, %v2122_v42  ;;  %v2505_v54 = vmul.f32 -0.1, %v7465_v11 }
 0x1f0   :  { %v5380_v19 = vpop.eup %5379  ;;  %v4162_v55 = vadd.f32 %v5378_v46, %v3970_v38  ;;  %5405 = vpow2.f32 %v1813_v63  ;;  %v2387_v47 = vmul.f32 1.442695, %v2313_v23  ;;  %v2389_v41 = vmul.f32 1.442695, %v2314_v40 }
 0x1f1   :  { %v5382_v52 = vpop.eup %5381  ;;  %v4353_v7 = vadd.f32 %v5380_v19, %v4161_v12  ;;  %5407 = vpow2.f32 %v2003_v18  ;;  %v2506_v36 = vmul.f32 -0.1, %v7499_v45  ;;  %v2579_v10 = vmul.f32 1.442695, %v2505_v54 }
 0x1f2   :  { %v5384_v43 = vpop.eup %5383  ;;  %v4354_v3 = vadd.f32 %v5382_v52, %v4162_v55  ;;  %5409 = vpow2.f32 %v2005_v53  ;;  %v2697_v58 = vmul.f32 -0.05, %v7465_v11  ;;  %v2698_v34 = vmul.f32 -0.05, %v7499_v45 }
 0x1f3   :  { %v5386_v14 = vpop.eup %5385  ;;  %v4545_v22 = vadd.f32 %v5384_v43, %v4353_v7  ;;  %5411 = vpow2.f32 %v2195_v1  ;;  %v2581_v49 = vmul.f32 1.442695, %v2506_v36  ;;  %v2889_v63 = vmul.f32 -0.033333335, %v7465_v11 }
 0x1f4   :  { %v5388_v33 = vpop.eup %5387  ;;  %v4546_v39 = vadd.f32 %v5386_v14, %v4354_v3  ;;  %5413 = vpow2.f32 %v2197_v28  ;;  %v2771_v61 = vmul.f32 1.442695, %v2697_v58  ;;  %v2773_v18 = vmul.f32 1.442695, %v2698_v34 }
 0x1f5   :  { %v5390_v29 = vpop.eup %5389  ;;  %v4737_v59 = vadd.f32 %v5388_v33, %v4545_v22  ;;  %5415 = vpow2.f32 %v2387_v47  ;;  %v2890_v53 = vmul.f32 -0.033333335, %v7499_v45  ;;  %v2963_v42 = vmul.f32 1.442695, %v2889_v63 }
 0x1f6   :  { %v5392_v5 = vpop.eup %5391  ;;  %v4738_v38 = vadd.f32 %v5390_v29, %v4546_v39  ;;  %5417 = vpow2.f32 %v2389_v41  ;;  %v3081_v23 = vmul.f32 -0.025, %v7465_v11  ;;  %v3082_v1 = vmul.f32 -0.025, %v7499_v45 }
 0x1f7   :  { %v5394_v40 = vpop.eup %5393  ;;  %5419 = vpow2.f32 %v2579_v10  ;;  %v2965_v46 = vmul.f32 1.442695, %v2890_v53  ;;  %v3273_v12 = vmul.f32 -0.02, %v7465_v11  ;;  %v3274_v28 = vmul.f32 -0.02, %v7499_v45 }
 0x1f8   :  { %v5396_v54 = vpop.eup %5395  ;;  %v4860_v19 = vsel %vm4808_vm10, %v4738_v38, 0.0  ;;  %5421 = vpow2.f32 %v2581_v49  ;;  %v3155_v55 = vmul.f32 1.442695, %v3081_v23  ;;  %v3157_v47 = vmul.f32 1.442695, %v3082_v1 }
 0x1f9   :  { %v5398_v52 = vpop.eup %5397  ;;  %v4909_v41 = vsel %vm84_vm0, %v4860_v19, 0.0  ;;  %v1497_v7 = vadd.f32 %v5396_v54, %v5392_v5  ;;  %5423 = vpow2.f32 %v2771_v61  ;;  %v3347_v36 = vmul.f32 1.442695, %v3273_v12 }
 0x1fa   :  { %v5400_v43 = vpop.eup %5399  ;;  %v4910_v10 = vadd.f32 %v4909_v41, %v4737_v59  ;;  %v1498_v3 = vadd.f32 %v5398_v52, %v5394_v40  ;;  %5425 = vpow2.f32 %v2773_v18  ;;  %v3349_v58 = vmul.f32 1.442695, %v3274_v28 }
 0x1fb   :  { %v5402_v34 = vpop.eup %5401  ;;  %v1689_v14 = vadd.f32 %v5400_v43, %v1497_v7  ;;  %5427 = vpow2.f32 %v2963_v42  ;;  %v3465_v22 = vmul.f32 -0.016666668, %v7465_v11  ;;  %v3466_v49 = vmul.f32 -0.016666668, %v7499_v45 }
 0x1fc   :  { %v5404_v63 = vpop.eup %5403  ;;  %4911 = vadd.xlane.f32.xlu1 %v4910_v10  ;;  %v1690_v33 = vadd.f32 %v5402_v34, %v1498_v3  ;;  %5429 = vpow2.f32 %v2965_v46  ;;  %v3657_v39 = vmul.f32 -0.014285714, %v7465_v11  ;;  %v3658_v61 = vmul.f32 -0.014285714, %v7499_v45 }
 0x1fd   :  { %v5406_v29 = vpop.eup %5405  ;;  %v1881_v59 = vadd.f32 %v5404_v63, %v1689_v14  ;;  %5431 = vpow2.f32 %v3155_v55  ;;  %v3539_v18 = vmul.f32 1.442695, %v3465_v22  ;;  %v3541_v53 = vmul.f32 1.442695, %v3466_v49 }
 0x1fe   :  { %v5408_v5 = vpop.eup %5407  ;;  %v1882_v38 = vadd.f32 %v5406_v29, %v1690_v33  ;;  %5433 = vpow2.f32 %v3157_v47  ;;  %v3731_v42 = vmul.f32 1.442695, %v3657_v39  ;;  %v3733_v23 = vmul.f32 1.442695, %v3658_v61 }
 0x1ff   :  { %v5410_v1 = vpop.eup %5409  ;;  %v2073_v40 = vadd.f32 %v5408_v5, %v1881_v59  ;;  %5435 = vpow2.f32 %v3347_v36  ;;  %v3849_v12 = vmul.f32 -0.005, %v7465_v11  ;;  %v3850_v46 = vmul.f32 -0.005, %v7499_v45 }
 0x200   :  { %v5412_v28 = vpop.eup %5411  ;;  %v2074_v54 = vadd.f32 %v5410_v1, %v1882_v38  ;;  %5437 = vpow2.f32 %v3349_v58  ;;  %v4041_v19 = vmul.f32 -0.0005, %v7465_v11  ;;  %v4042_v55 = vmul.f32 -0.0005, %v7499_v45 }
 0x201   :  { %v5414_v52 = vpop.eup %5413  ;;  %v2265_v41 = vadd.f32 %v5412_v28, %v2073_v40  ;;  %5439 = vpow2.f32 %v3539_v18  ;;  %v3923_v47 = vmul.f32 1.442695, %v3849_v12  ;;  %v3925_v7 = vmul.f32 1.442695, %v3850_v46 }
 0x202   :  { %v5416_v43 = vpop.eup %5415  ;;  %v2266_v10 = vadd.f32 %v5414_v52, %v2074_v54  ;;  %5441 = vpow2.f32 %v3541_v53  ;;  %v4115_v36 = vmul.f32 1.442695, %v4041_v19  ;;  %v4117_v3 = vmul.f32 1.442695, %v4042_v55  ;;  %v9142_v54 = vld [vmem:[#allocation40_spill] sm:$0xff] }
 0x203   :  { %v5418_v34 = vpop.eup %5417  ;;  %v2457_v14 = vadd.f32 %v5416_v43, %v2265_v41  ;;  %5443 = vpow2.f32 %v3731_v42  ;;  %v4233_v22 = vmul.f32 -5e-05, %v7465_v11  ;;  %v4234_v58 = vmul.f32 -5e-05, %v7499_v45 }
 0x204   :  { %v5420_v49 = vpop.eup %5419  ;;  %v2458_v63 = vadd.f32 %v5418_v34, %v2266_v10  ;;  %5445 = vpow2.f32 %v3733_v23  ;;  %v4425_v33 = vmul.f32 -5e-06, %v7465_v11  ;;  %v4426_v39 = vmul.f32 -5e-06, %v7499_v45 }
 0x205   :  { %v5422_v61 = vpop.eup %5421  ;;  %v2649_v29 = vadd.f32 %v5420_v49, %v2457_v14  ;;  %5447 = vpow2.f32 %v3923_v47  ;;  %v4307_v59 = vmul.f32 1.442695, %v4233_v22  ;;  %v4309_v18 = vmul.f32 1.442695, %v4234_v58 }
 0x206   :  { %v5424_v53 = vpop.eup %5423  ;;  %v2650_v5 = vadd.f32 %v5422_v61, %v2458_v63  ;;  %5449 = vpow2.f32 %v3925_v7  ;;  %v4499_v38 = vmul.f32 1.442695, %v4425_v33  ;;  %v4501_v42 = vmul.f32 1.442695, %v4426_v39 }
 0x207   :  { %v5426_v1 = vpop.eup %5425  ;;  %v2841_v40 = vadd.f32 %v5424_v53, %v2649_v29  ;;  %5451 = vpow2.f32 %v4115_v36  ;;  %v4617_v12 = vmul.f32 -5e-07, %v7465_v11  ;;  %v4618_v23 = vmul.f32 -5e-07, %v7499_v45 }
 0x208   :  { %v5428_v46 = vpop.eup %5427  ;;  %v2842_v28 = vadd.f32 %v5426_v1, %v2650_v5  ;;  %5453 = vpow2.f32 %v4117_v3  ;;  %v1163_v19 = vmul.f32 -500000.0, %v9142_v54  ;;  %v1164_v55 = vmul.f32 -500000.0, %v7523_v44 }
 0x209   :  { %v5430_v52 = vpop.eup %5429  ;;  %v3033_v41 = vadd.f32 %v5428_v46, %v2841_v40  ;;  %5455 = vpow2.f32 %v4307_v59  ;;  %v4691_v47 = vmul.f32 1.442695, %v4617_v12  ;;  %v4693_v7 = vmul.f32 1.442695, %v4618_v23 }
 0x20a   :  { %v5432_v43 = vpop.eup %5431  ;;  %v3034_v10 = vadd.f32 %v5430_v52, %v2842_v28  ;;  %5457 = vpow2.f32 %v4309_v18  ;;  %v1239_v36 = vmul.f32 1.442695, %v1163_v19  ;;  %v1241_v34 = vmul.f32 1.442695, %v1164_v55 }
 0x20b   :  { %v5434_v11 = vpop.eup %5433  ;;  %v3225_v14 = vadd.f32 %v5432_v43, %v3033_v41  ;;  %5459 = vpow2.f32 %v4499_v38  ;;  %v1355_v45 = vmul.f32 -50000.0, %v9142_v54  ;;  %v1356_v3 = vmul.f32 -50000.0, %v7523_v44 }
 0x20c   :  { %v5436_v22 = vpop.eup %5435  ;;  %v3226_v58 = vadd.f32 %v5434_v11, %v3034_v10  ;;  %5461 = vpow2.f32 %v4501_v42  ;;  %v1547_v49 = vmul.f32 -5000.0, %v9142_v54  ;;  %v1548_v63 = vmul.f32 -5000.0, %v7523_v44 }
 0x20d   :  { %v5438_v33 = vpop.eup %5437  ;;  %v3417_v39 = vadd.f32 %v5436_v22, %v3225_v14  ;;  %5463 = vpow2.f32 %v4691_v47  ;;  %v1431_v61 = vmul.f32 1.442695, %v1355_v45  ;;  %v1433_v29 = vmul.f32 1.442695, %v1356_v3 }
 0x20e   :  { %v5440_v59 = vpop.eup %5439  ;;  %v3418_v18 = vadd.f32 %v5438_v33, %v3226_v58  ;;  %5465 = vpow2.f32 %v4693_v7  ;;  %v1623_v53 = vmul.f32 1.442695, %v1547_v49  ;;  %v1625_v5 = vmul.f32 1.442695, %v1548_v63 }
 0x20f   :  { %v5442_v38 = vpop.eup %5441  ;;  %v3609_v1 = vadd.f32 %v5440_v59, %v3417_v39  ;;  %5467 = vpow2.f32 %v1239_v36  ;;  %v1739_v40 = vmul.f32 -500.0, %v9142_v54  ;;  %v1740_v42 = vmul.f32 -500.0, %v7523_v44 }
 0x210   :  { %v5444_v12 = vpop.eup %5443  ;;  %v3610_v23 = vadd.f32 %v5442_v38, %v3418_v18  ;;  %5469 = vpow2.f32 %v1241_v34  ;;  %v1931_v46 = vmul.f32 -50.0, %v9142_v54  ;;  %v1932_v28 = vmul.f32 -50.0, %v7523_v44 }
 0x211   :  { %v5446_v19 = vpop.eup %5445  ;;  %v3801_v55 = vadd.f32 %v5444_v12, %v3609_v1  ;;  %5471 = vpow2.f32 %v1431_v61  ;;  %v1815_v52 = vmul.f32 1.442695, %v1739_v40  ;;  %v1817_v41 = vmul.f32 1.442695, %v1740_v42 }
 0x212   :  { %v5448_v47 = vpop.eup %5447  ;;  %v3802_v7 = vadd.f32 %v5446_v19, %v3610_v23  ;;  %5473 = vpow2.f32 %v1433_v29  ;;  %v2007_v43 = vmul.f32 1.442695, %v1931_v46  ;;  %v2009_v10 = vmul.f32 1.442695, %v1932_v28 }
 0x213   :  { %v5450_v36 = vpop.eup %5449  ;;  %v3993_v11 = vadd.f32 %v5448_v47, %v3801_v55  ;;  %5475 = vpow2.f32 %v1623_v53  ;;  %v2123_v14 = vmul.f32 -5.0, %v9142_v54  ;;  %v2124_v34 = vmul.f32 -5.0, %v7523_v44 }
 0x214   :  { %v5452_v45 = vpop.eup %5451  ;;  %v3994_v3 = vadd.f32 %v5450_v36, %v3802_v7  ;;  %5477 = vpow2.f32 %v1625_v5  ;;  %v2315_v22 = vmul.f32 -0.5, %v9142_v54  ;;  %v2316_v58 = vmul.f32 -0.5, %v7523_v44 }
 0x215   :  { %v5454_v49 = vpop.eup %5453  ;;  %v4185_v63 = vadd.f32 %v5452_v45, %v3993_v11  ;;  %5479 = vpow2.f32 %v1815_v52  ;;  %v2199_v33 = vmul.f32 1.442695, %v2123_v14  ;;  %v2201_v39 = vmul.f32 1.442695, %v2124_v34 }
 0x216   :  { %v5456_v61 = vpop.eup %5455  ;;  %v4186_v29 = vadd.f32 %v5454_v49, %v3994_v3  ;;  %5481 = vpow2.f32 %v1817_v41  ;;  %v2391_v59 = vmul.f32 1.442695, %v2315_v22  ;;  %v2393_v18 = vmul.f32 1.442695, %v2316_v58 }
 0x217   :  { %v5458_v53 = vpop.eup %5457  ;;  %v4377_v38 = vadd.f32 %v5456_v61, %v4185_v63  ;;  %5483 = vpow2.f32 %v2007_v43  ;;  %v2507_v1 = vmul.f32 -0.1, %v9142_v54  ;;  %v2508_v5 = vmul.f32 -0.1, %v7523_v44 }
 0x218   :  { %v5460_v40 = vpop.eup %5459  ;;  %v4378_v42 = vadd.f32 %v5458_v53, %v4186_v29  ;;  %5485 = vpow2.f32 %v2009_v10  ;;  %v2699_v12 = vmul.f32 -0.05, %v9142_v54  ;;  %v2700_v23 = vmul.f32 -0.05, %v7523_v44 }
 0x219   :  { %v5462_v46 = vpop.eup %5461  ;;  %v4569_v28 = vadd.f32 %v5460_v40, %v4377_v38  ;;  %5487 = vpow2.f32 %v2199_v33  ;;  %v2583_v19 = vmul.f32 1.442695, %v2507_v1  ;;  %v2585_v55 = vmul.f32 1.442695, %v2508_v5 }
 0x21a   :  { %v5464_v52 = vpop.eup %5463  ;;  %v4570_v41 = vadd.f32 %v5462_v46, %v4378_v42  ;;  %5489 = vpow2.f32 %v2201_v39  ;;  %v2775_v47 = vmul.f32 1.442695, %v2699_v12  ;;  %v2777_v7 = vmul.f32 1.442695, %v2700_v23 }
 0x21b   :  { %v5466_v43 = vpop.eup %5465  ;;  %v4761_v36 = vadd.f32 %v5464_v52, %v4569_v28  ;;  %5491 = vpow2.f32 %v2391_v59  ;;  %v2891_v11 = vmul.f32 -0.033333335, %v9142_v54  ;;  %v2892_v10 = vmul.f32 -0.033333335, %v7523_v44 }
 0x21c   :  { %v5468_v14 = vpop.eup %5467  ;;  %v4762_v34 = vadd.f32 %v5466_v43, %v4570_v41  ;;  %5493 = vpow2.f32 %v2393_v18  ;;  %v3083_v45 = vmul.f32 -0.025, %v9142_v54  ;;  %v3084_v3 = vmul.f32 -0.025, %v7523_v44 }
 0x21d   :  { %v5470_v22 = vpop.eup %5469  ;;  %5495 = vpow2.f32 %v2583_v19  ;;  %v2967_v58 = vmul.f32 1.442695, %v2891_v11  ;;  %v2969_v49 = vmul.f32 1.442695, %v2892_v10  ;;  %v3275_v63 = vmul.f32 -0.02, %v9142_v54 }
 0x21e   :  { %v5472_v33 = vpop.eup %5471  ;;  %v4884_v39 = vsel %vm4808_vm10, %v4762_v34, 0.0  ;;  %5497 = vpow2.f32 %v2585_v55  ;;  %v3159_v61 = vmul.f32 1.442695, %v3083_v45  ;;  %v3161_v29 = vmul.f32 1.442695, %v3084_v3 }
 0x21f   :  { %v5474_v59 = vpop.eup %5473  ;;  %v4957_v18 = vsel %vm84_vm0, %v4884_v39, 0.0  ;;  %v1499_v53 = vadd.f32 %v5472_v33, %v5468_v14  ;;  %5499 = vpow2.f32 %v2775_v47  ;;  %v3276_v38 = vmul.f32 -0.02, %v7523_v44 }
 0x220   :  { %v5476_v1 = vpop.eup %5475  ;;  %v4958_v5 = vadd.f32 %v4957_v18, %v4761_v36  ;;  %v1500_v40 = vadd.f32 %v5474_v59, %v5470_v22  ;;  %5501 = vpow2.f32 %v2777_v7  ;;  %v3351_v42 = vmul.f32 1.442695, %v3275_v63 }
 0x221   :  { %v5478_v12 = vpop.eup %5477  ;;  %v1691_v23 = vadd.f32 %v5476_v1, %v1499_v53  ;;  %5503 = vpow2.f32 %v2967_v58  ;;  %v3353_v46 = vmul.f32 1.442695, %v3276_v38  ;;  %v3467_v28 = vmul.f32 -0.016666668, %v9142_v54 }
 0x222   :  { %v5480_v19 = vpop.eup %5479  ;;  %4959 = vadd.xlane.f32.xlu0 %v4958_v5  ;;  %v1692_v55 = vadd.f32 %v5478_v12, %v1500_v40  ;;  %5505 = vpow2.f32 %v2969_v49  ;;  %v3468_v52 = vmul.f32 -0.016666668, %v7523_v44  ;;  %v3659_v41 = vmul.f32 -0.014285714, %v9142_v54 }
 0x223   :  { %v5482_v47 = vpop.eup %5481  ;;  %v1883_v43 = vadd.f32 %v5480_v19, %v1691_v23  ;;  %5507 = vpow2.f32 %v3159_v61  ;;  %v3543_v36 = vmul.f32 1.442695, %v3467_v28  ;;  %v3660_v7 = vmul.f32 -0.014285714, %v7523_v44 }
 0x224   :  { %v5484_v11 = vpop.eup %5483  ;;  %v1884_v10 = vadd.f32 %v5482_v47, %v1692_v55  ;;  %5509 = vpow2.f32 %v3161_v29  ;;  %v3545_v14 = vmul.f32 1.442695, %v3468_v52  ;;  %v3735_v34 = vmul.f32 1.442695, %v3659_v41 }
 0x225   :  { %v5486_v45 = vpop.eup %5485  ;;  %v2075_v3 = vadd.f32 %v5484_v11, %v1883_v43  ;;  %5511 = vpow2.f32 %v3351_v42  ;;  %v3737_v22 = vmul.f32 1.442695, %v3660_v7  ;;  %v3851_v58 = vmul.f32 -0.005, %v9142_v54 }
 0x226   :  { %v5488_v49 = vpop.eup %5487  ;;  %v2076_v63 = vadd.f32 %v5486_v45, %v1884_v10  ;;  %5513 = vpow2.f32 %v3353_v46  ;;  %v3852_v33 = vmul.f32 -0.005, %v7523_v44  ;;  %v4043_v39 = vmul.f32 -0.0005, %v9142_v54 }
 0x227   :  { %v5490_v61 = vpop.eup %5489  ;;  %v2267_v59 = vadd.f32 %v5488_v49, %v2075_v3  ;;  %5515 = vpow2.f32 %v3543_v36  ;;  %v3927_v18 = vmul.f32 1.442695, %v3851_v58  ;;  %v4044_v29 = vmul.f32 -0.0005, %v7523_v44 }
 0x228   :  { %v5492_v53 = vpop.eup %5491  ;;  %v2268_v38 = vadd.f32 %v5490_v61, %v2076_v63  ;;  %5517 = vpow2.f32 %v3545_v14  ;;  %v3929_v1 = vmul.f32 1.442695, %v3852_v33  ;;  %v4119_v5 = vmul.f32 1.442695, %v4043_v39  ;;  %v9143_v63 = vld [vmem:[#allocation39_spill] sm:$0xff] }
 0x229   :  { %v5494_v40 = vpop.eup %5493  ;;  %v2459_v42 = vadd.f32 %v5492_v53, %v2267_v59  ;;  %5519 = vpow2.f32 %v3735_v34  ;;  %v4121_v12 = vmul.f32 1.442695, %v4044_v29  ;;  %v4235_v23 = vmul.f32 -5e-05, %v9142_v54 }
 0x22a   :  { %v5496_v46 = vpop.eup %5495  ;;  %v2460_v28 = vadd.f32 %v5494_v40, %v2268_v38  ;;  %5521 = vpow2.f32 %v3737_v22  ;;  %v4236_v19 = vmul.f32 -5e-05, %v7523_v44  ;;  %v4427_v55 = vmul.f32 -5e-06, %v9142_v54 }
 0x22b   :  { %v5498_v52 = vpop.eup %5497  ;;  %v2651_v41 = vadd.f32 %v5496_v46, %v2459_v42  ;;  %5523 = vpow2.f32 %v3927_v18  ;;  %v4311_v47 = vmul.f32 1.442695, %v4235_v23  ;;  %v4428_v43 = vmul.f32 -5e-06, %v7523_v44 }
 0x22c   :  { %v5500_v36 = vpop.eup %5499  ;;  %v2652_v7 = vadd.f32 %v5498_v52, %v2460_v28  ;;  %5525 = vpow2.f32 %v3929_v1  ;;  %v4313_v11 = vmul.f32 1.442695, %v4236_v19  ;;  %v4503_v10 = vmul.f32 1.442695, %v4427_v55 }
 0x22d   :  { %v5502_v14 = vpop.eup %5501  ;;  %v2843_v34 = vadd.f32 %v5500_v36, %v2651_v41  ;;  %5527 = vpow2.f32 %v4119_v5  ;;  %v4505_v45 = vmul.f32 1.442695, %v4428_v43  ;;  %v4619_v3 = vmul.f32 -5e-07, %v9142_v54 }
 0x22e   :  { %v5504_v22 = vpop.eup %5503  ;;  %v2844_v58 = vadd.f32 %v5502_v14, %v2652_v7  ;;  %5529 = vpow2.f32 %v4121_v12  ;;  %v4620_v49 = vmul.f32 -5e-07, %v7523_v44  ;;  %v1139_v33 = vmul.f32 -500000.0, %v9143_v63 }
 0x22f   :  { %v5506_v39 = vpop.eup %5505  ;;  %v3035_v61 = vadd.f32 %v5504_v22, %v2843_v34  ;;  %5531 = vpow2.f32 %v4311_v47  ;;  %v4695_v59 = vmul.f32 1.442695, %v4619_v3  ;;  %v1140_v18 = vmul.f32 -500000.0, %v7521_v27 }
 0x230   :  { %v5508_v29 = vpop.eup %5507  ;;  %v3036_v53 = vadd.f32 %v5506_v39, %v2844_v58  ;;  %5533 = vpow2.f32 %v4313_v11  ;;  %v4697_v38 = vmul.f32 1.442695, %v4620_v49  ;;  %v1191_v1 = vmul.f32 1.442695, %v1139_v33 }
 0x231   :  { %v5510_v5 = vpop.eup %5509  ;;  %v3227_v54 = vadd.f32 %v5508_v29, %v3035_v61  ;;  %5535 = vpow2.f32 %v4503_v10  ;;  %v1193_v40 = vmul.f32 1.442695, %v1140_v18  ;;  %v1331_v42 = vmul.f32 -50000.0, %v9143_v63 }
 0x232   :  { %v5512_v44 = vpop.eup %5511  ;;  %v3228_v12 = vadd.f32 %v5510_v5, %v3036_v53  ;;  %5537 = vpow2.f32 %v4505_v45  ;;  %v1332_v23 = vmul.f32 -50000.0, %v7521_v27  ;;  %v1523_v46 = vmul.f32 -5000.0, %v9143_v63 }
 0x233   :  { %v5514_v28 = vpop.eup %5513  ;;  %v3419_v19 = vadd.f32 %v5512_v44, %v3227_v54  ;;  %5539 = vpow2.f32 %v4695_v59  ;;  %v1383_v55 = vmul.f32 1.442695, %v1331_v42  ;;  %v1524_v52 = vmul.f32 -5000.0, %v7521_v27 }
 0x234   :  { %v5516_v41 = vpop.eup %5515  ;;  %v3420_v47 = vadd.f32 %v5514_v28, %v3228_v12  ;;  %5541 = vpow2.f32 %v4697_v38  ;;  %v1385_v43 = vmul.f32 1.442695, %v1332_v23  ;;  %v1575_v36 = vmul.f32 1.442695, %v1523_v46 }
 0x235   :  { %v5518_v7 = vpop.eup %5517  ;;  %v3611_v11 = vadd.f32 %v5516_v41, %v3419_v19  ;;  %5543 = vpow2.f32 %v1191_v1  ;;  %v1577_v10 = vmul.f32 1.442695, %v1524_v52  ;;  %v1715_v14 = vmul.f32 -500.0, %v9143_v63 }
 0x236   :  { %v5520_v34 = vpop.eup %5519  ;;  %v3612_v45 = vadd.f32 %v5518_v7, %v3420_v47  ;;  %5545 = vpow2.f32 %v1193_v40  ;;  %v1716_v3 = vmul.f32 -500.0, %v7521_v27  ;;  %v1907_v22 = vmul.f32 -50.0, %v9143_v63 }
 0x237   :  { %v5522_v58 = vpop.eup %5521  ;;  %v3803_v49 = vadd.f32 %v5520_v34, %v3611_v11  ;;  %5547 = vpow2.f32 %v1383_v55  ;;  %v1767_v33 = vmul.f32 1.442695, %v1715_v14  ;;  %v1908_v39 = vmul.f32 -50.0, %v7521_v27 }
 0x238   :  { %v5524_v61 = vpop.eup %5523  ;;  %v3804_v59 = vadd.f32 %v5522_v58, %v3612_v45  ;;  %5549 = vpow2.f32 %v1385_v43  ;;  %v1769_v18 = vmul.f32 1.442695, %v1716_v3  ;;  %v1959_v29 = vmul.f32 1.442695, %v1907_v22 }
 0x239   :  { %v5526_v53 = vpop.eup %5525  ;;  %v3995_v38 = vadd.f32 %v5524_v61, %v3803_v49  ;;  %5551 = vpow2.f32 %v1575_v36  ;;  %v1961_v1 = vmul.f32 1.442695, %v1908_v39  ;;  %v2099_v5 = vmul.f32 -5.0, %v9143_v63 }
 0x23a   :  { %v5528_v54 = vpop.eup %5527  ;;  %v3996_v40 = vadd.f32 %v5526_v53, %v3804_v59  ;;  %5553 = vpow2.f32 %v1577_v10  ;;  %v2100_v42 = vmul.f32 -5.0, %v7521_v27  ;;  %v2291_v44 = vmul.f32 -0.5, %v9143_v63 }
 0x23b   :  { %v5530_v12 = vpop.eup %5529  ;;  %v4187_v23 = vadd.f32 %v5528_v54, %v3995_v38  ;;  %5555 = vpow2.f32 %v1767_v33  ;;  %v2151_v46 = vmul.f32 1.442695, %v2099_v5  ;;  %v2292_v28 = vmul.f32 -0.5, %v7521_v27 }
 0x23c   :  { %v5532_v19 = vpop.eup %5531  ;;  %v4188_v55 = vadd.f32 %v5530_v12, %v3996_v40  ;;  %5557 = vpow2.f32 %v1769_v18  ;;  %v2153_v52 = vmul.f32 1.442695, %v2100_v42  ;;  %v2343_v41 = vmul.f32 1.442695, %v2291_v44 }
 0x23d   :  { %v5534_v47 = vpop.eup %5533  ;;  %v4379_v43 = vadd.f32 %v5532_v19, %v4187_v23  ;;  %5559 = vpow2.f32 %v1959_v29  ;;  %v2345_v36 = vmul.f32 1.442695, %v2292_v28  ;;  %v2483_v7 = vmul.f32 -0.1, %v9143_v63 }
 0x23e   :  { %v5536_v11 = vpop.eup %5535  ;;  %v4380_v10 = vadd.f32 %v5534_v47, %v4188_v55  ;;  %5561 = vpow2.f32 %v1961_v1  ;;  %v2484_v14 = vmul.f32 -0.1, %v7521_v27  ;;  %v2675_v34 = vmul.f32 -0.05, %v9143_v63 }
 0x23f   :  { %v5538_v45 = vpop.eup %5537  ;;  %v4571_v3 = vadd.f32 %v5536_v11, %v4379_v43  ;;  %5563 = vpow2.f32 %v2151_v46  ;;  %v2535_v22 = vmul.f32 1.442695, %v2483_v7  ;;  %v2676_v58 = vmul.f32 -0.05, %v7521_v27 }
 0x240   :  { %v5540_v49 = vpop.eup %5539  ;;  %v4572_v33 = vadd.f32 %v5538_v45, %v4380_v10  ;;  %5565 = vpow2.f32 %v2153_v52  ;;  %v2537_v39 = vmul.f32 1.442695, %v2484_v14  ;;  %v2727_v61 = vmul.f32 1.442695, %v2675_v34 }
 0x241   :  { %v5542_v59 = vpop.eup %5541  ;;  %v4763_v18 = vadd.f32 %v5540_v49, %v4571_v3  ;;  %5567 = vpow2.f32 %v2343_v41  ;;  %v2729_v29 = vmul.f32 1.442695, %v2676_v58  ;;  %v2867_v53 = vmul.f32 -0.033333335, %v9143_v63 }
 0x242   :  { %v5544_v38 = vpop.eup %5543  ;;  %v4764_v1 = vadd.f32 %v5542_v59, %v4572_v33  ;;  %5569 = vpow2.f32 %v2345_v36  ;;  %v2868_v5 = vmul.f32 -0.033333335, %v7521_v27  ;;  %v3059_v54 = vmul.f32 -0.025, %v9143_v63 }
 0x243   :  { %v5546_v40 = vpop.eup %5545  ;;  %5571 = vpow2.f32 %v2535_v22  ;;  %v2919_v42 = vmul.f32 1.442695, %v2867_v53  ;;  %v3060_v44 = vmul.f32 -0.025, %v7521_v27  ;;  %v3251_v12 = vmul.f32 -0.02, %v9143_v63 }
 0x244   :  { %v5548_v23 = vpop.eup %5547  ;;  %v4886_v46 = vsel %vm4808_vm10, %v4764_v1, 0.0  ;;  %5573 = vpow2.f32 %v2537_v39  ;;  %v2921_v28 = vmul.f32 1.442695, %v2868_v5  ;;  %v3111_v19 = vmul.f32 1.442695, %v3059_v54 }
 0x245   :  { %v5550_v55 = vpop.eup %5549  ;;  %v4961_v52 = vsel %vm84_vm0, %v4886_v46, 0.0  ;;  %v1475_v41 = vadd.f32 %v5548_v23, %v5544_v38  ;;  %5575 = vpow2.f32 %v2727_v61  ;;  %v3113_v47 = vmul.f32 1.442695, %v3060_v44 }
 0x246   :  { %v5552_v43 = vpop.eup %5551  ;;  %v4962_v36 = vadd.f32 %v4961_v52, %v4763_v18  ;;  %v1476_v7 = vadd.f32 %v5550_v55, %v5546_v40  ;;  %5577 = vpow2.f32 %v2729_v29  ;;  %v3252_v11 = vmul.f32 -0.02, %v7521_v27 }
 0x247   :  { %v5554_v10 = vpop.eup %5553  ;;  %v1667_v14 = vadd.f32 %v5552_v43, %v1475_v41  ;;  %5579 = vpow2.f32 %v2919_v42  ;;  %v3303_v34 = vmul.f32 1.442695, %v3251_v12  ;;  %v3443_v45 = vmul.f32 -0.016666668, %v9143_v63 }
 0x248   :  { %v5556_v3 = vpop.eup %5555  ;;  %4963 = vadd.xlane.f32.xlu1 %v4962_v36  ;;  %v1668_v22 = vadd.f32 %v5554_v10, %v1476_v7  ;;  %5581 = vpow2.f32 %v2921_v28  ;;  %v3305_v58 = vmul.f32 1.442695, %v3252_v11  ;;  %v3444_v49 = vmul.f32 -0.016666668, %v7521_v27 }
 0x249   :  { %v5558_v33 = vpop.eup %5557  ;;  %v1859_v39 = vadd.f32 %v5556_v3, %v1667_v14  ;;  %5583 = vpow2.f32 %v3111_v19  ;;  %v3495_v61 = vmul.f32 1.442695, %v3443_v45  ;;  %v3635_v59 = vmul.f32 -0.014285714, %v9143_v63 }
 0x24a   :  { %v5560_v18 = vpop.eup %5559  ;;  %v1860_v29 = vadd.f32 %v5558_v33, %v1668_v22  ;;  %5585 = vpow2.f32 %v3113_v47  ;;  %v3497_v53 = vmul.f32 1.442695, %v3444_v49  ;;  %v3636_v38 = vmul.f32 -0.014285714, %v7521_v27 }
 0x24b   :  { %v5562_v1 = vpop.eup %5561  ;;  %v2051_v5 = vadd.f32 %v5560_v18, %v1859_v39  ;;  %5587 = vpow2.f32 %v3303_v34  ;;  %v3687_v54 = vmul.f32 1.442695, %v3635_v59  ;;  %v3827_v40 = vmul.f32 -0.005, %v9143_v63 }
 0x24c   :  { %v5564_v42 = vpop.eup %5563  ;;  %v2052_v44 = vadd.f32 %v5562_v1, %v1860_v29  ;;  %5589 = vpow2.f32 %v3305_v58  ;;  %v3689_v12 = vmul.f32 1.442695, %v3636_v38  ;;  %v3828_v23 = vmul.f32 -0.005, %v7521_v27 }
 0x24d   :  { %v5566_v46 = vpop.eup %5565  ;;  %v2243_v28 = vadd.f32 %v5564_v42, %v2051_v5  ;;  %5591 = vpow2.f32 %v3495_v61  ;;  %v3879_v19 = vmul.f32 1.442695, %v3827_v40  ;;  %v4019_v55 = vmul.f32 -0.0005, %v9143_v63 }
 0x24e   :  { %v5568_v52 = vpop.eup %5567  ;;  %v2244_v41 = vadd.f32 %v5566_v46, %v2052_v44  ;;  %5593 = vpow2.f32 %v3497_v53  ;;  %v3881_v47 = vmul.f32 1.442695, %v3828_v23  ;;  %v4020_v43 = vmul.f32 -0.0005, %v7521_v27 }
 0x24f   :  { %v5570_v36 = vpop.eup %5569  ;;  %v2435_v7 = vadd.f32 %v5568_v52, %v2243_v28  ;;  %5595 = vpow2.f32 %v3687_v54  ;;  %v4071_v11 = vmul.f32 1.442695, %v4019_v55  ;;  %v4211_v10 = vmul.f32 -5e-05, %v9143_v63 }
 0x250   :  { %v5572_v14 = vpop.eup %5571  ;;  %v2436_v34 = vadd.f32 %v5570_v36, %v2244_v41  ;;  %5597 = vpow2.f32 %v3689_v12  ;;  %v4073_v45 = vmul.f32 1.442695, %v4020_v43  ;;  %v4212_v3 = vmul.f32 -5e-05, %v7521_v27 }
 0x251   :  { %v5574_v22 = vpop.eup %5573  ;;  %v2627_v58 = vadd.f32 %v5572_v14, %v2435_v7  ;;  %5599 = vpow2.f32 %v3879_v19  ;;  %v4263_v49 = vmul.f32 1.442695, %v4211_v10  ;;  %v4403_v33 = vmul.f32 -5e-06, %v9143_v63 }
 0x252   :  { %v5576_v39 = vpop.eup %5575  ;;  %v2628_v61 = vadd.f32 %v5574_v22, %v2436_v34  ;;  %5601 = vpow2.f32 %v3881_v47  ;;  %v4265_v59 = vmul.f32 1.442695, %v4212_v3  ;;  %v4404_v18 = vmul.f32 -5e-06, %v7521_v27 }
 0x253   :  { %v5578_v29 = vpop.eup %5577  ;;  %v2819_v53 = vadd.f32 %v5576_v39, %v2627_v58  ;;  %5603 = vpow2.f32 %v4071_v11  ;;  %v4455_v38 = vmul.f32 1.442695, %v4403_v33  ;;  %v4595_v1 = vmul.f32 -5e-07, %v9143_v63 }
 0x254   :  { %v5580_v5 = vpop.eup %5579  ;;  %v2820_v54 = vadd.f32 %v5578_v29, %v2628_v61  ;;  %5605 = vpow2.f32 %v4073_v45  ;;  %v4457_v40 = vmul.f32 1.442695, %v4404_v18  ;;  %v4596_v42 = vmul.f32 -5e-07, %v7521_v27 }
 0x255   :  { %v5582_v44 = vpop.eup %5581  ;;  %v3011_v12 = vadd.f32 %v5580_v5, %v2819_v53  ;;  %5607 = vpow2.f32 %v4263_v49  ;;  %v4647_v23 = vmul.f32 1.442695, %v4595_v1  ;;  %v1141_v46 = vmul.f32 -500000.0, %v7510_v31 }
 0x256   :  { %v5584_v28 = vpop.eup %5583  ;;  %v3012_v19 = vadd.f32 %v5582_v44, %v2820_v54  ;;  %5609 = vpow2.f32 %v4265_v59  ;;  %v4649_v55 = vmul.f32 1.442695, %v4596_v42  ;;  %v1142_v52 = vmul.f32 -500000.0, %v7539_v26 }
 0x257   :  { %v5586_v41 = vpop.eup %5585  ;;  %v3203_v63 = vadd.f32 %v5584_v28, %v3011_v12  ;;  %5611 = vpow2.f32 %v4455_v38  ;;  %v1195_v47 = vmul.f32 1.442695, %v1141_v46  ;;  %v1333_v43 = vmul.f32 -50000.0, %v7510_v31 }
 0x258   :  { %v5588_v36 = vpop.eup %5587  ;;  %v3204_v27 = vadd.f32 %v5586_v41, %v3012_v19  ;;  %5613 = vpow2.f32 %v4457_v40  ;;  %v1197_v7 = vmul.f32 1.442695, %v1142_v52  ;;  %v1334_v11 = vmul.f32 -50000.0, %v7539_v26 }
 0x259   :  { %v5590_v10 = vpop.eup %5589  ;;  %v3395_v14 = vadd.f32 %v5588_v36, %v3203_v63  ;;  %5615 = vpow2.f32 %v4647_v23  ;;  %v1387_v34 = vmul.f32 1.442695, %v1333_v43  ;;  %v1525_v45 = vmul.f32 -5000.0, %v7510_v31 }
 0x25a   :  { %v5592_v3 = vpop.eup %5591  ;;  %v3396_v22 = vadd.f32 %v5590_v10, %v3204_v27  ;;  %5617 = vpow2.f32 %v4649_v55  ;;  %v1389_v58 = vmul.f32 1.442695, %v1334_v11  ;;  %v1526_v49 = vmul.f32 -5000.0, %v7539_v26 }
 0x25b   :  { %v5594_v33 = vpop.eup %5593  ;;  %v3587_v39 = vadd.f32 %v5592_v3, %v3395_v14  ;;  %5619 = vpow2.f32 %v1195_v47  ;;  %v1579_v61 = vmul.f32 1.442695, %v1525_v45  ;;  %v1717_v59 = vmul.f32 -500.0, %v7510_v31 }
 0x25c   :  { %v5596_v18 = vpop.eup %5595  ;;  %v3588_v29 = vadd.f32 %v5594_v33, %v3396_v22  ;;  %5621 = vpow2.f32 %v1197_v7  ;;  %v1581_v53 = vmul.f32 1.442695, %v1526_v49  ;;  %v1718_v38 = vmul.f32 -500.0, %v7539_v26 }
 0x25d   :  { %v5598_v1 = vpop.eup %5597  ;;  %v3779_v5 = vadd.f32 %v5596_v18, %v3587_v39  ;;  %5623 = vpow2.f32 %v1387_v34  ;;  %v1771_v54 = vmul.f32 1.442695, %v1717_v59  ;;  %v1909_v40 = vmul.f32 -50.0, %v7510_v31 }
 0x25e   :  { %v5600_v42 = vpop.eup %5599  ;;  %v3780_v44 = vadd.f32 %v5598_v1, %v3588_v29  ;;  %5625 = vpow2.f32 %v1389_v58  ;;  %v1773_v12 = vmul.f32 1.442695, %v1718_v38  ;;  %v1910_v23 = vmul.f32 -50.0, %v7539_v26 }
 0x25f   :  { %v5602_v46 = vpop.eup %5601  ;;  %v3971_v28 = vadd.f32 %v5600_v42, %v3779_v5  ;;  %5627 = vpow2.f32 %v1579_v61  ;;  %v1963_v19 = vmul.f32 1.442695, %v1909_v40  ;;  %v2101_v55 = vmul.f32 -5.0, %v7510_v31 }
 0x260   :  { %v5604_v52 = vpop.eup %5603  ;;  %v3972_v41 = vadd.f32 %v5602_v46, %v3780_v44  ;;  %5629 = vpow2.f32 %v1581_v53  ;;  %v1965_v63 = vmul.f32 1.442695, %v1910_v23  ;;  %v2102_v47 = vmul.f32 -5.0, %v7539_v26 }
 0x261   :  { %v5606_v43 = vpop.eup %5605  ;;  %v4163_v36 = vadd.f32 %v5604_v52, %v3971_v28  ;;  %5631 = vpow2.f32 %v1771_v54  ;;  %v2155_v27 = vmul.f32 1.442695, %v2101_v55  ;;  %v2293_v7 = vmul.f32 -0.5, %v7510_v31 }
 0x262   :  { %v5608_v11 = vpop.eup %5607  ;;  %v4164_v10 = vadd.f32 %v5606_v43, %v3972_v41  ;;  %5633 = vpow2.f32 %v1773_v12  ;;  %v2157_v14 = vmul.f32 1.442695, %v2102_v47  ;;  %v2294_v34 = vmul.f32 -0.5, %v7539_v26 }
 0x263   :  { %v5610_v45 = vpop.eup %5609  ;;  %v4355_v3 = vadd.f32 %v5608_v11, %v4163_v36  ;;  %5635 = vpow2.f32 %v1963_v19  ;;  %v2347_v22 = vmul.f32 1.442695, %v2293_v7  ;;  %v2485_v58 = vmul.f32 -0.1, %v7510_v31 }
 0x264   :  { %v5612_v49 = vpop.eup %5611  ;;  %v4356_v33 = vadd.f32 %v5610_v45, %v4164_v10  ;;  %5637 = vpow2.f32 %v1965_v63  ;;  %v2349_v39 = vmul.f32 1.442695, %v2294_v34  ;;  %v2486_v61 = vmul.f32 -0.1, %v7539_v26 }
 0x265   :  { %v5614_v59 = vpop.eup %5613  ;;  %v4547_v18 = vadd.f32 %v5612_v49, %v4355_v3  ;;  %5639 = vpow2.f32 %v2155_v27  ;;  %v2539_v29 = vmul.f32 1.442695, %v2485_v58  ;;  %v2677_v53 = vmul.f32 -0.05, %v7510_v31 }
 0x266   :  { %v5616_v38 = vpop.eup %5615  ;;  %v4548_v1 = vadd.f32 %v5614_v59, %v4356_v33  ;;  %5641 = vpow2.f32 %v2157_v14  ;;  %v2541_v5 = vmul.f32 1.442695, %v2486_v61  ;;  %v2678_v54 = vmul.f32 -0.05, %v7539_v26 }
 0x267   :  { %v5618_v40 = vpop.eup %5617  ;;  %v4739_v42 = vadd.f32 %v5616_v38, %v4547_v18  ;;  %5643 = vpow2.f32 %v2347_v22  ;;  %v2731_v44 = vmul.f32 1.442695, %v2677_v53  ;;  %v2869_v12 = vmul.f32 -0.033333335, %v7510_v31 }
 0x268   :  { %v5620_v23 = vpop.eup %5619  ;;  %v4740_v46 = vadd.f32 %v5618_v40, %v4548_v1  ;;  %5645 = vpow2.f32 %v2349_v39  ;;  %v2733_v28 = vmul.f32 1.442695, %v2678_v54  ;;  %v2870_v19 = vmul.f32 -0.033333335, %v7539_v26 }
 0x269   :  { %v5622_v55 = vpop.eup %5621  ;;  %5647 = vpow2.f32 %v2539_v29  ;;  %v2923_v52 = vmul.f32 1.442695, %v2869_v12  ;;  %v3061_v41 = vmul.f32 -0.025, %v7510_v31  ;;  %v3062_v63 = vmul.f32 -0.025, %v7539_v26 }
 0x26a   :  { %v5624_v47 = vpop.eup %5623  ;;  %v4862_v43 = vsel %vm4808_vm10, %v4740_v46, 0.0  ;;  %5649 = vpow2.f32 %v2541_v5  ;;  %v2925_v36 = vmul.f32 1.442695, %v2870_v19  ;;  %v3253_v27 = vmul.f32 -0.02, %v7510_v31 }
 0x26b   :  { %v5626_v7 = vpop.eup %5625  ;;  %v4913_v11 = vsel %vm84_vm0, %v4862_v43, 0.0  ;;  %v1477_v10 = vadd.f32 %v5624_v47, %v5620_v23  ;;  %5651 = vpow2.f32 %v2731_v44  ;;  %v3115_v14 = vmul.f32 1.442695, %v3061_v41 }
 0x26c   :  { %v5628_v34 = vpop.eup %5627  ;;  %v4914_v45 = vadd.f32 %v4913_v11, %v4739_v42  ;;  %v1478_v3 = vadd.f32 %v5626_v7, %v5622_v55  ;;  %5653 = vpow2.f32 %v2733_v28  ;;  %v3117_v22 = vmul.f32 1.442695, %v3062_v63 }
 0x26d   :  { %v5630_v58 = vpop.eup %5629  ;;  %v1669_v49 = vadd.f32 %v5628_v34, %v1477_v10  ;;  %5655 = vpow2.f32 %v2923_v52  ;;  %v3254_v33 = vmul.f32 -0.02, %v7539_v26  ;;  %v3307_v39 = vmul.f32 1.442695, %v3253_v27 }
 0x26e   :  { %v5632_v61 = vpop.eup %5631  ;;  %4915 = vadd.xlane.f32.xlu0 %v4914_v45  ;;  %v1670_v59 = vadd.f32 %v5630_v58, %v1478_v3  ;;  %5657 = vpow2.f32 %v2925_v36  ;;  %v3445_v18 = vmul.f32 -0.016666668, %v7510_v31  ;;  %v3446_v29 = vmul.f32 -0.016666668, %v7539_v26 }
 0x26f   :  { %v5634_v53 = vpop.eup %5633  ;;  %v1861_v38 = vadd.f32 %v5632_v61, %v1669_v49  ;;  %5659 = vpow2.f32 %v3115_v14  ;;  %v3309_v1 = vmul.f32 1.442695, %v3254_v33  ;;  %v3637_v5 = vmul.f32 -0.014285714, %v7510_v31 }
 0x270   :  { %v5636_v54 = vpop.eup %5635  ;;  %v1862_v40 = vadd.f32 %v5634_v53, %v1670_v59  ;;  %5661 = vpow2.f32 %v3117_v22  ;;  %v3499_v42 = vmul.f32 1.442695, %v3445_v18  ;;  %v3501_v44 = vmul.f32 1.442695, %v3446_v29 }
 0x271   :  { %v5638_v12 = vpop.eup %5637  ;;  %v2053_v23 = vadd.f32 %v5636_v54, %v1861_v38  ;;  %5663 = vpow2.f32 %v3307_v39  ;;  %v3638_v46 = vmul.f32 -0.014285714, %v7539_v26  ;;  %v3691_v28 = vmul.f32 1.442695, %v3637_v5 }
 0x272   :  { %v5640_v19 = vpop.eup %5639  ;;  %v2054_v55 = vadd.f32 %v5638_v12, %v1862_v40  ;;  %5665 = vpow2.f32 %v3309_v1  ;;  %v3829_v52 = vmul.f32 -0.005, %v7510_v31  ;;  %v3830_v41 = vmul.f32 -0.005, %v7539_v26 }
 0x273   :  { %v5642_v63 = vpop.eup %5641  ;;  %v2245_v47 = vadd.f32 %v5640_v19, %v2053_v23  ;;  %5667 = vpow2.f32 %v3499_v42  ;;  %v3693_v43 = vmul.f32 1.442695, %v3638_v46  ;;  %v4021_v36 = vmul.f32 -0.0005, %v7510_v31 }
 0x274   :  { %v5644_v27 = vpop.eup %5643  ;;  %v2246_v7 = vadd.f32 %v5642_v63, %v2054_v55  ;;  %5669 = vpow2.f32 %v3501_v44  ;;  %v3883_v11 = vmul.f32 1.442695, %v3829_v52  ;;  %v3885_v10 = vmul.f32 1.442695, %v3830_v41 }
 0x275   :  { %v5646_v14 = vpop.eup %5645  ;;  %v2437_v34 = vadd.f32 %v5644_v27, %v2245_v47  ;;  %5671 = vpow2.f32 %v3691_v28  ;;  %v4022_v45 = vmul.f32 -0.0005, %v7539_v26  ;;  %v4075_v3 = vmul.f32 1.442695, %v4021_v36 }
 0x276   :  { %v5648_v22 = vpop.eup %5647  ;;  %v2438_v58 = vadd.f32 %v5646_v14, %v2246_v7  ;;  %5673 = vpow2.f32 %v3693_v43  ;;  %v4213_v49 = vmul.f32 -5e-05, %v7510_v31  ;;  %v4214_v33 = vmul.f32 -5e-05, %v7539_v26 }
 0x277   :  { %v5650_v39 = vpop.eup %5649  ;;  %v2629_v61 = vadd.f32 %v5648_v22, %v2437_v34  ;;  %5675 = vpow2.f32 %v3883_v11  ;;  %v4077_v59 = vmul.f32 1.442695, %v4022_v45  ;;  %v4405_v18 = vmul.f32 -5e-06, %v7510_v31 }
 0x278   :  { %v5652_v29 = vpop.eup %5651  ;;  %v2630_v53 = vadd.f32 %v5650_v39, %v2438_v58  ;;  %5677 = vpow2.f32 %v3885_v10  ;;  %v4267_v38 = vmul.f32 1.442695, %v4213_v49  ;;  %v4269_v1 = vmul.f32 1.442695, %v4214_v33 }
 0x279   :  { %v5654_v5 = vpop.eup %5653  ;;  %v2821_v54 = vadd.f32 %v5652_v29, %v2629_v61  ;;  %5679 = vpow2.f32 %v4075_v3  ;;  %v4406_v40 = vmul.f32 -5e-06, %v7539_v26  ;;  %v4459_v42 = vmul.f32 1.442695, %v4405_v18 }
 0x27a   :  { %v5656_v44 = vpop.eup %5655  ;;  %v2822_v12 = vadd.f32 %v5654_v5, %v2630_v53  ;;  %5681 = vpow2.f32 %v4077_v59  ;;  %v4597_v23 = vmul.f32 -5e-07, %v7510_v31  ;;  %v4598_v46 = vmul.f32 -5e-07, %v7539_v26 }
 0x27b   :  { %v5658_v28 = vpop.eup %5657  ;;  %v3013_v19 = vadd.f32 %v5656_v44, %v2821_v54  ;;  %5683 = vpow2.f32 %v4267_v38  ;;  %v4461_v55 = vmul.f32 1.442695, %v4406_v40  ;;  %v1143_v52 = vmul.f32 -500000.0, %v7530_v13 }
 0x27c   :  { %v5660_v41 = vpop.eup %5659  ;;  %v3014_v63 = vadd.f32 %v5658_v28, %v2822_v12  ;;  %5685 = vpow2.f32 %v4269_v1  ;;  %v4651_v47 = vmul.f32 1.442695, %v4597_v23  ;;  %v4653_v43 = vmul.f32 1.442695, %v4598_v46 }
 0x27d   :  { %v5662_v36 = vpop.eup %5661  ;;  %v3205_v27 = vadd.f32 %v5660_v41, %v3013_v19  ;;  %5687 = vpow2.f32 %v4459_v42  ;;  %v1144_v7 = vmul.f32 -500000.0, %v7561_v17  ;;  %v1199_v11 = vmul.f32 1.442695, %v1143_v52 }
 0x27e   :  { %v5664_v31 = vpop.eup %5663  ;;  %v3206_v10 = vadd.f32 %v5662_v36, %v3014_v63  ;;  %5689 = vpow2.f32 %v4461_v55  ;;  %v1335_v26 = vmul.f32 -50000.0, %v7530_v13  ;;  %v1336_v14 = vmul.f32 -50000.0, %v7561_v17 }
 0x27f   :  { %v5666_v34 = vpop.eup %5665  ;;  %v3397_v45 = vadd.f32 %v5664_v31, %v3205_v27  ;;  %5691 = vpow2.f32 %v4651_v47  ;;  %v1201_v3 = vmul.f32 1.442695, %v1144_v7  ;;  %v1527_v22 = vmul.f32 -5000.0, %v7530_v13 }
 0x280   :  { %v5668_v58 = vpop.eup %5667  ;;  %v3398_v49 = vadd.f32 %v5666_v34, %v3206_v10  ;;  %5693 = vpow2.f32 %v4653_v43  ;;  %v1391_v33 = vmul.f32 1.442695, %v1335_v26  ;;  %v1393_v39 = vmul.f32 1.442695, %v1336_v14 }
 0x281   :  { %v5670_v61 = vpop.eup %5669  ;;  %v3589_v59 = vadd.f32 %v5668_v58, %v3397_v45  ;;  %5695 = vpow2.f32 %v1199_v11  ;;  %v1528_v18 = vmul.f32 -5000.0, %v7561_v17  ;;  %v1583_v29 = vmul.f32 1.442695, %v1527_v22 }
 0x282   :  { %v5672_v53 = vpop.eup %5671  ;;  %v3590_v38 = vadd.f32 %v5670_v61, %v3398_v49  ;;  %5697 = vpow2.f32 %v1201_v3  ;;  %v1719_v1 = vmul.f32 -500.0, %v7530_v13  ;;  %v1720_v5 = vmul.f32 -500.0, %v7561_v17 }
 0x283   :  { %v5674_v54 = vpop.eup %5673  ;;  %v3781_v40 = vadd.f32 %v5672_v53, %v3589_v59  ;;  %5699 = vpow2.f32 %v1391_v33  ;;  %v1585_v42 = vmul.f32 1.442695, %v1528_v18  ;;  %v1911_v44 = vmul.f32 -50.0, %v7530_v13 }
 0x284   :  { %v5676_v12 = vpop.eup %5675  ;;  %v3782_v23 = vadd.f32 %v5674_v54, %v3590_v38  ;;  %5701 = vpow2.f32 %v1393_v39  ;;  %v1775_v46 = vmul.f32 1.442695, %v1719_v1  ;;  %v1777_v28 = vmul.f32 1.442695, %v1720_v5 }
 0x285   :  { %v5678_v19 = vpop.eup %5677  ;;  %v3973_v55 = vadd.f32 %v5676_v12, %v3781_v40  ;;  %5703 = vpow2.f32 %v1583_v29  ;;  %v1912_v52 = vmul.f32 -50.0, %v7561_v17  ;;  %v1967_v41 = vmul.f32 1.442695, %v1911_v44 }
 0x286   :  { %v5680_v63 = vpop.eup %5679  ;;  %v3974_v47 = vadd.f32 %v5678_v19, %v3782_v23  ;;  %5705 = vpow2.f32 %v1585_v42  ;;  %v2103_v43 = vmul.f32 -5.0, %v7530_v13  ;;  %v2104_v36 = vmul.f32 -5.0, %v7561_v17 }
 0x287   :  { %v5682_v27 = vpop.eup %5681  ;;  %v4165_v7 = vadd.f32 %v5680_v63, %v3973_v55  ;;  %5707 = vpow2.f32 %v1775_v46  ;;  %v1969_v11 = vmul.f32 1.442695, %v1912_v52  ;;  %v2295_v31 = vmul.f32 -0.5, %v7530_v13 }
 0x288   :  { %v5684_v10 = vpop.eup %5683  ;;  %v4166_v26 = vadd.f32 %v5682_v27, %v3974_v47  ;;  %5709 = vpow2.f32 %v1777_v28  ;;  %v2159_v14 = vmul.f32 1.442695, %v2103_v43  ;;  %v2161_v34 = vmul.f32 1.442695, %v2104_v36 }
 0x289   :  { %v5686_v45 = vpop.eup %5685  ;;  %v4357_v3 = vadd.f32 %v5684_v10, %v4165_v7  ;;  %5711 = vpow2.f32 %v1967_v41  ;;  %v2296_v22 = vmul.f32 -0.5, %v7561_v17  ;;  %v2351_v58 = vmul.f32 1.442695, %v2295_v31 }
 0x28a   :  { %v5688_v49 = vpop.eup %5687  ;;  %v4358_v33 = vadd.f32 %v5686_v45, %v4166_v26  ;;  %5713 = vpow2.f32 %v1969_v11  ;;  %v2487_v39 = vmul.f32 -0.1, %v7530_v13  ;;  %v2488_v61 = vmul.f32 -0.1, %v7561_v17 }
 0x28b   :  { %v5690_v59 = vpop.eup %5689  ;;  %v4549_v18 = vadd.f32 %v5688_v49, %v4357_v3  ;;  %5715 = vpow2.f32 %v2159_v14  ;;  %v2353_v29 = vmul.f32 1.442695, %v2296_v22  ;;  %v2679_v53 = vmul.f32 -0.05, %v7530_v13 }
 0x28c   :  { %v5692_v38 = vpop.eup %5691  ;;  %v4550_v1 = vadd.f32 %v5690_v59, %v4358_v33  ;;  %5717 = vpow2.f32 %v2161_v34  ;;  %v2543_v5 = vmul.f32 1.442695, %v2487_v39  ;;  %v2545_v54 = vmul.f32 1.442695, %v2488_v61 }
 0x28d   :  { %v5694_v40 = vpop.eup %5693  ;;  %v4741_v42 = vadd.f32 %v5692_v38, %v4549_v18  ;;  %5719 = vpow2.f32 %v2351_v58  ;;  %v2680_v44 = vmul.f32 -0.05, %v7561_v17  ;;  %v2735_v12 = vmul.f32 1.442695, %v2679_v53 }
 0x28e   :  { %v5696_v23 = vpop.eup %5695  ;;  %v4742_v46 = vadd.f32 %v5694_v40, %v4550_v1  ;;  %5721 = vpow2.f32 %v2353_v29  ;;  %v2871_v28 = vmul.f32 -0.033333335, %v7530_v13  ;;  %v2872_v19 = vmul.f32 -0.033333335, %v7561_v17 }
 0x28f   :  { %v5698_v55 = vpop.eup %5697  ;;  %5723 = vpow2.f32 %v2543_v5  ;;  %v2737_v52 = vmul.f32 1.442695, %v2680_v44  ;;  %v3063_v41 = vmul.f32 -0.025, %v7530_v13  ;;  %v3064_v63 = vmul.f32 -0.025, %v7561_v17 }
 0x290   :  { %v5700_v47 = vpop.eup %5699  ;;  %v4864_v43 = vsel %vm4808_vm10, %v4742_v46, 0.0  ;;  %5725 = vpow2.f32 %v2545_v54  ;;  %v2927_v36 = vmul.f32 1.442695, %v2871_v28  ;;  %v2929_v27 = vmul.f32 1.442695, %v2872_v19 }
 0x291   :  { %v5702_v7 = vpop.eup %5701  ;;  %v4917_v11 = vsel %vm84_vm0, %v4864_v43, 0.0  ;;  %v1479_v31 = vadd.f32 %v5700_v47, %v5696_v23  ;;  %5727 = vpow2.f32 %v2735_v12  ;;  %v3119_v10 = vmul.f32 1.442695, %v3063_v41 }
 0x292   :  { %v5704_v26 = vpop.eup %5703  ;;  %v4918_v14 = vadd.f32 %v4917_v11, %v4741_v42  ;;  %v1480_v34 = vadd.f32 %v5702_v7, %v5698_v55  ;;  %5729 = vpow2.f32 %v2737_v52  ;;  %v3121_v45 = vmul.f32 1.442695, %v3064_v63 }
 0x293   :  { %v5706_v3 = vpop.eup %5705  ;;  %v1671_v22 = vadd.f32 %v5704_v26, %v1479_v31  ;;  %5731 = vpow2.f32 %v2927_v36  ;;  %v3255_v58 = vmul.f32 -0.02, %v7530_v13  ;;  %v3256_v49 = vmul.f32 -0.02, %v7561_v17 }
 0x294   :  { %v5708_v33 = vpop.eup %5707  ;;  %4919 = vadd.xlane.f32.xlu0 %v4918_v14  ;;  %v1672_v39 = vadd.f32 %v5706_v3, %v1480_v34  ;;  %5733 = vpow2.f32 %v2929_v27  ;;  %v3447_v61 = vmul.f32 -0.016666668, %v7530_v13  ;;  %v3448_v59 = vmul.f32 -0.016666668, %v7561_v17 }
 0x295   :  { %v5710_v18 = vpop.eup %5709  ;;  %v1863_v29 = vadd.f32 %v5708_v33, %v1671_v22  ;;  %5735 = vpow2.f32 %v3119_v10  ;;  %v3311_v53 = vmul.f32 1.442695, %v3255_v58  ;;  %v3313_v38 = vmul.f32 1.442695, %v3256_v49 }
 0x296   :  { %v5712_v1 = vpop.eup %5711  ;;  %v1864_v5 = vadd.f32 %v5710_v18, %v1672_v39  ;;  %5737 = vpow2.f32 %v3121_v45  ;;  %v3503_v54 = vmul.f32 1.442695, %v3447_v61  ;;  %v3505_v40 = vmul.f32 1.442695, %v3448_v59 }
 0x297   :  { %v5714_v42 = vpop.eup %5713  ;;  %v2055_v44 = vadd.f32 %v5712_v1, %v1863_v29  ;;  %5739 = vpow2.f32 %v3311_v53  ;;  %v3639_v12 = vmul.f32 -0.014285714, %v7530_v13  ;;  %v3640_v23 = vmul.f32 -0.014285714, %v7561_v17 }
 0x298   :  { %v5716_v46 = vpop.eup %5715  ;;  %v2056_v28 = vadd.f32 %v5714_v42, %v1864_v5  ;;  %5741 = vpow2.f32 %v3313_v38  ;;  %v3831_v19 = vmul.f32 -0.005, %v7530_v13  ;;  %v3832_v55 = vmul.f32 -0.005, %v7561_v17 }
 0x299   :  { %v5718_v52 = vpop.eup %5717  ;;  %v2247_v41 = vadd.f32 %v5716_v46, %v2055_v44  ;;  %5743 = vpow2.f32 %v3503_v54  ;;  %v3695_v63 = vmul.f32 1.442695, %v3639_v12  ;;  %v3697_v47 = vmul.f32 1.442695, %v3640_v23 }
 0x29a   :  { %v5720_v43 = vpop.eup %5719  ;;  %v2248_v36 = vadd.f32 %v5718_v52, %v2056_v28  ;;  %5745 = vpow2.f32 %v3505_v40  ;;  %v3887_v27 = vmul.f32 1.442695, %v3831_v19  ;;  %v3889_v7 = vmul.f32 1.442695, %v3832_v55 }
 0x29b   :  { %v5722_v11 = vpop.eup %5721  ;;  %v2439_v31 = vadd.f32 %v5720_v43, %v2247_v41  ;;  %5747 = vpow2.f32 %v3695_v63  ;;  %v4023_v10 = vmul.f32 -0.0005, %v7530_v13  ;;  %v4024_v26 = vmul.f32 -0.0005, %v7561_v17 }
 0x29c   :  { %v5724_v14 = vpop.eup %5723  ;;  %v2440_v34 = vadd.f32 %v5722_v11, %v2248_v36  ;;  %5749 = vpow2.f32 %v3697_v47  ;;  %v4215_v45 = vmul.f32 -5e-05, %v7530_v13  ;;  %v4216_v3 = vmul.f32 -5e-05, %v7561_v17 }
 0x29d   :  { %v5726_v22 = vpop.eup %5725  ;;  %v2631_v58 = vadd.f32 %v5724_v14, %v2439_v31  ;;  %5751 = vpow2.f32 %v3887_v27  ;;  %v4079_v49 = vmul.f32 1.442695, %v4023_v10  ;;  %v4081_v33 = vmul.f32 1.442695, %v4024_v26 }
 0x29e   :  { %v5728_v39 = vpop.eup %5727  ;;  %v2632_v61 = vadd.f32 %v5726_v22, %v2440_v34  ;;  %5753 = vpow2.f32 %v3889_v7  ;;  %v4271_v59 = vmul.f32 1.442695, %v4215_v45  ;;  %v4273_v18 = vmul.f32 1.442695, %v4216_v3 }
 0x29f   :  { %v5730_v29 = vpop.eup %5729  ;;  %v2823_v53 = vadd.f32 %v5728_v39, %v2631_v58  ;;  %5755 = vpow2.f32 %v4079_v49  ;;  %v4407_v38 = vmul.f32 -5e-06, %v7530_v13  ;;  %v4408_v1 = vmul.f32 -5e-06, %v7561_v17 }
 0x2a0   :  { %v5732_v5 = vpop.eup %5731  ;;  %v2824_v54 = vadd.f32 %v5730_v29, %v2632_v61  ;;  %5757 = vpow2.f32 %v4081_v33  ;;  %v4599_v40 = vmul.f32 -5e-07, %v7530_v13  ;;  %v4600_v42 = vmul.f32 -5e-07, %v7561_v17 }
 0x2a1   :  { %v5734_v44 = vpop.eup %5733  ;;  %v3015_v12 = vadd.f32 %v5732_v5, %v2823_v53  ;;  %5759 = vpow2.f32 %v4271_v59  ;;  %v4463_v23 = vmul.f32 1.442695, %v4407_v38  ;;  %v4465_v46 = vmul.f32 1.442695, %v4408_v1 }
 0x2a2   :  { %v5736_v28 = vpop.eup %5735  ;;  %v3016_v19 = vadd.f32 %v5734_v44, %v2824_v54  ;;  %5761 = vpow2.f32 %v4273_v18  ;;  %v4655_v55 = vmul.f32 1.442695, %v4599_v40  ;;  %v4657_v52 = vmul.f32 1.442695, %v4600_v42 }
 0x2a3   :  { %v5738_v41 = vpop.eup %5737  ;;  %v3207_v63 = vadd.f32 %v5736_v28, %v3015_v12  ;;  %5763 = vpow2.f32 %v4463_v23  ;;  %v1165_v47 = vmul.f32 -500000.0, %v7515_v37  ;;  %v1166_v43 = vmul.f32 -500000.0, %v7541_v0 }
 0x2a4   :  { %v5740_v13 = vpop.eup %5739  ;;  %v3208_v36 = vadd.f32 %v5738_v41, %v3016_v19  ;;  %5765 = vpow2.f32 %v4465_v46  ;;  %v1357_v17 = vmul.f32 -50000.0, %v7515_v37  ;;  %v1358_v27 = vmul.f32 -50000.0, %v7541_v0 }
 0x2a5   :  { %v5742_v7 = vpop.eup %5741  ;;  %v3399_v11 = vadd.f32 %v5740_v13, %v3207_v63  ;;  %5767 = vpow2.f32 %v4655_v55  ;;  %v1243_v31 = vmul.f32 1.442695, %v1165_v47  ;;  %v1245_v10 = vmul.f32 1.442695, %v1166_v43 }
 0x2a6   :  { %v5744_v26 = vpop.eup %5743  ;;  %v3400_v14 = vadd.f32 %v5742_v7, %v3208_v36  ;;  %5769 = vpow2.f32 %v4657_v52  ;;  %v1435_v34 = vmul.f32 1.442695, %v1357_v17  ;;  %v1437_v45 = vmul.f32 1.442695, %v1358_v27 }
 0x2a7   :  { %v5746_v3 = vpop.eup %5745  ;;  %v3591_v22 = vadd.f32 %v5744_v26, %v3399_v11  ;;  %5771 = vpow2.f32 %v1243_v31  ;;  %v1549_v58 = vmul.f32 -5000.0, %v7515_v37  ;;  %v1550_v49 = vmul.f32 -5000.0, %v7541_v0 }
 0x2a8   :  { %v5748_v33 = vpop.eup %5747  ;;  %v3592_v39 = vadd.f32 %v5746_v3, %v3400_v14  ;;  %5773 = vpow2.f32 %v1245_v10  ;;  %v1741_v61 = vmul.f32 -500.0, %v7515_v37  ;;  %v1742_v59 = vmul.f32 -500.0, %v7541_v0 }
 0x2a9   :  { %v5750_v18 = vpop.eup %5749  ;;  %v3783_v29 = vadd.f32 %v5748_v33, %v3591_v22  ;;  %5775 = vpow2.f32 %v1435_v34  ;;  %v1627_v53 = vmul.f32 1.442695, %v1549_v58  ;;  %v1629_v38 = vmul.f32 1.442695, %v1550_v49 }
 0x2aa   :  { %v5752_v1 = vpop.eup %5751  ;;  %v3784_v5 = vadd.f32 %v5750_v18, %v3592_v39  ;;  %5777 = vpow2.f32 %v1437_v45  ;;  %v1819_v54 = vmul.f32 1.442695, %v1741_v61  ;;  %v1821_v40 = vmul.f32 1.442695, %v1742_v59 }
 0x2ab   :  { %v5754_v42 = vpop.eup %5753  ;;  %v3975_v44 = vadd.f32 %v5752_v1, %v3783_v29  ;;  %5779 = vpow2.f32 %v1627_v53  ;;  %v1933_v12 = vmul.f32 -50.0, %v7515_v37  ;;  %v1934_v23 = vmul.f32 -50.0, %v7541_v0 }
 0x2ac   :  { %v5756_v46 = vpop.eup %5755  ;;  %v3976_v28 = vadd.f32 %v5754_v42, %v3784_v5  ;;  %5781 = vpow2.f32 %v1629_v38  ;;  %v2125_v19 = vmul.f32 -5.0, %v7515_v37  ;;  %v2126_v55 = vmul.f32 -5.0, %v7541_v0 }
 0x2ad   :  { %v5758_v52 = vpop.eup %5757  ;;  %v4167_v41 = vadd.f32 %v5756_v46, %v3975_v44  ;;  %5783 = vpow2.f32 %v1819_v54  ;;  %v2011_v63 = vmul.f32 1.442695, %v1933_v12  ;;  %v2013_v47 = vmul.f32 1.442695, %v1934_v23 }
 0x2ae   :  { %v5760_v43 = vpop.eup %5759  ;;  %v4168_v13 = vadd.f32 %v5758_v52, %v3976_v28  ;;  %5785 = vpow2.f32 %v1821_v40  ;;  %v2203_v36 = vmul.f32 1.442695, %v2125_v19  ;;  %v2205_v17 = vmul.f32 1.442695, %v2126_v55 }
 0x2af   :  { %v5762_v27 = vpop.eup %5761  ;;  %v4359_v7 = vadd.f32 %v5760_v43, %v4167_v41  ;;  %5787 = vpow2.f32 %v2011_v63  ;;  %v2317_v11 = vmul.f32 -0.5, %v7515_v37  ;;  %v2318_v31 = vmul.f32 -0.5, %v7541_v0 }
 0x2b0   :  { %v5764_v10 = vpop.eup %5763  ;;  %v4360_v26 = vadd.f32 %v5762_v27, %v4168_v13  ;;  %5789 = vpow2.f32 %v2013_v47  ;;  %v2509_v14 = vmul.f32 -0.1, %v7515_v37  ;;  %v2510_v34 = vmul.f32 -0.1, %v7541_v0 }
 0x2b1   :  { %v5766_v45 = vpop.eup %5765  ;;  %v4551_v3 = vadd.f32 %v5764_v10, %v4359_v7  ;;  %5791 = vpow2.f32 %v2203_v36  ;;  %v2395_v22 = vmul.f32 1.442695, %v2317_v11  ;;  %v2397_v58 = vmul.f32 1.442695, %v2318_v31 }
 0x2b2   :  { %v5768_v49 = vpop.eup %5767  ;;  %v4552_v33 = vadd.f32 %v5766_v45, %v4360_v26  ;;  %5793 = vpow2.f32 %v2205_v17  ;;  %v2587_v39 = vmul.f32 1.442695, %v2509_v14  ;;  %v2589_v61 = vmul.f32 1.442695, %v2510_v34 }
 0x2b3   :  { %v5770_v59 = vpop.eup %5769  ;;  %v4743_v18 = vadd.f32 %v5768_v49, %v4551_v3  ;;  %5795 = vpow2.f32 %v2395_v22  ;;  %v2701_v29 = vmul.f32 -0.05, %v7515_v37  ;;  %v2702_v53 = vmul.f32 -0.05, %v7541_v0 }
 0x2b4   :  { %v5772_v38 = vpop.eup %5771  ;;  %v4744_v1 = vadd.f32 %v5770_v59, %v4552_v33  ;;  %5797 = vpow2.f32 %v2397_v58  ;;  %v2893_v5 = vmul.f32 -0.033333335, %v7515_v37  ;;  %v2894_v54 = vmul.f32 -0.033333335, %v7541_v0 }
 0x2b5   :  { %v5774_v40 = vpop.eup %5773  ;;  %5799 = vpow2.f32 %v2587_v39  ;;  %v2779_v42 = vmul.f32 1.442695, %v2701_v29  ;;  %v2781_v44 = vmul.f32 1.442695, %v2702_v53  ;;  %v3085_v12 = vmul.f32 -0.025, %v7515_v37 }
 0x2b6   :  { %v5776_v23 = vpop.eup %5775  ;;  %v4866_v46 = vsel %vm4808_vm10, %v4744_v1, 0.0  ;;  %5801 = vpow2.f32 %v2589_v61  ;;  %v2971_v28 = vmul.f32 1.442695, %v2893_v5  ;;  %v2973_v19 = vmul.f32 1.442695, %v2894_v54 }
 0x2b7   :  { %v5778_v55 = vpop.eup %5777  ;;  %v4921_v52 = vsel %vm84_vm0, %v4866_v46, 0.0  ;;  %v1501_v41 = vadd.f32 %v5776_v23, %v5772_v38  ;;  %5803 = vpow2.f32 %v2779_v42  ;;  %v3086_v63 = vmul.f32 -0.025, %v7541_v0 }
 0x2b8   :  { %v5780_v47 = vpop.eup %5779  ;;  %v4922_v43 = vadd.f32 %v4921_v52, %v4743_v18  ;;  %v1502_v13 = vadd.f32 %v5778_v55, %v5774_v40  ;;  %5805 = vpow2.f32 %v2781_v44  ;;  %v3163_v36 = vmul.f32 1.442695, %v3085_v12 }
 0x2b9   :  { %v5782_v17 = vpop.eup %5781  ;;  %v1693_v27 = vadd.f32 %v5780_v47, %v1501_v41  ;;  %5807 = vpow2.f32 %v2971_v28  ;;  %v3165_v7 = vmul.f32 1.442695, %v3086_v63  ;;  %v3277_v11 = vmul.f32 -0.02, %v7515_v37 }
 0x2ba   :  { %v5784_v31 = vpop.eup %5783  ;;  %4923 = vadd.xlane.f32.xlu1 %v4922_v43  ;;  %v1694_v10 = vadd.f32 %v5782_v17, %v1502_v13  ;;  %5809 = vpow2.f32 %v2973_v19  ;;  %v3278_v26 = vmul.f32 -0.02, %v7541_v0  ;;  %v3469_v14 = vmul.f32 -0.016666668, %v7515_v37 }
 0x2bb   :  { %v5786_v34 = vpop.eup %5785  ;;  %v1885_v45 = vadd.f32 %v5784_v31, %v1693_v27  ;;  %5811 = vpow2.f32 %v3163_v36  ;;  %v3355_v3 = vmul.f32 1.442695, %v3277_v11  ;;  %v3470_v22 = vmul.f32 -0.016666668, %v7541_v0 }
 0x2bc   :  { %v5788_v58 = vpop.eup %5787  ;;  %v1886_v49 = vadd.f32 %v5786_v34, %v1694_v10  ;;  %5813 = vpow2.f32 %v3165_v7  ;;  %v3357_v33 = vmul.f32 1.442695, %v3278_v26  ;;  %v3547_v39 = vmul.f32 1.442695, %v3469_v14 }
 0x2bd   :  { %v5790_v61 = vpop.eup %5789  ;;  %v2077_v59 = vadd.f32 %v5788_v58, %v1885_v45  ;;  %5815 = vpow2.f32 %v3355_v3  ;;  %v3549_v18 = vmul.f32 1.442695, %v3470_v22  ;;  %v3661_v29 = vmul.f32 -0.014285714, %v7515_v37 }
 0x2be   :  { %v5792_v53 = vpop.eup %5791  ;;  %v2078_v38 = vadd.f32 %v5790_v61, %v1886_v49  ;;  %5817 = vpow2.f32 %v3357_v33  ;;  %v3662_v1 = vmul.f32 -0.014285714, %v7541_v0  ;;  %v3853_v5 = vmul.f32 -0.005, %v7515_v37 }
 0x2bf   :  { %v5794_v54 = vpop.eup %5793  ;;  %v2269_v40 = vadd.f32 %v5792_v53, %v2077_v59  ;;  %5819 = vpow2.f32 %v3547_v39  ;;  %v3739_v42 = vmul.f32 1.442695, %v3661_v29  ;;  %v3854_v44 = vmul.f32 -0.005, %v7541_v0 }
 0x2c0   :  { %v5796_v12 = vpop.eup %5795  ;;  %v2270_v23 = vadd.f32 %v5794_v54, %v2078_v38  ;;  %5821 = vpow2.f32 %v3549_v18  ;;  %v3741_v46 = vmul.f32 1.442695, %v3662_v1  ;;  %v3931_v28 = vmul.f32 1.442695, %v3853_v5 }
 0x2c1   :  { %v5798_v19 = vpop.eup %5797  ;;  %v2461_v55 = vadd.f32 %v5796_v12, %v2269_v40  ;;  %5823 = vpow2.f32 %v3739_v42  ;;  %v3933_v52 = vmul.f32 1.442695, %v3854_v44  ;;  %v4045_v41 = vmul.f32 -0.0005, %v7515_v37 }
 0x2c2   :  { %v5800_v63 = vpop.eup %5799  ;;  %v2462_v47 = vadd.f32 %v5798_v19, %v2270_v23  ;;  %5825 = vpow2.f32 %v3741_v46  ;;  %v4046_v43 = vmul.f32 -0.0005, %v7541_v0  ;;  %v4237_v13 = vmul.f32 -5e-05, %v7515_v37 }
 0x2c3   :  { %v5802_v36 = vpop.eup %5801  ;;  %v2653_v17 = vadd.f32 %v5800_v63, %v2461_v55  ;;  %5827 = vpow2.f32 %v3931_v28  ;;  %v4123_v27 = vmul.f32 1.442695, %v4045_v41  ;;  %v4238_v7 = vmul.f32 -5e-05, %v7541_v0 }
 0x2c4   :  { %v5804_v11 = vpop.eup %5803  ;;  %v2654_v31 = vadd.f32 %v5802_v36, %v2462_v47  ;;  %5829 = vpow2.f32 %v3933_v52  ;;  %v4125_v10 = vmul.f32 1.442695, %v4046_v43  ;;  %v4315_v26 = vmul.f32 1.442695, %v4237_v13 }
 0x2c5   :  { %v5806_v14 = vpop.eup %5805  ;;  %v2845_v34 = vadd.f32 %v5804_v11, %v2653_v17  ;;  %5831 = vpow2.f32 %v4123_v27  ;;  %v4317_v45 = vmul.f32 1.442695, %v4238_v7  ;;  %v4429_v3 = vmul.f32 -5e-06, %v7515_v37 }
 0x2c6   :  { %v5808_v22 = vpop.eup %5807  ;;  %v2846_v58 = vadd.f32 %v5806_v14, %v2654_v31  ;;  %5833 = vpow2.f32 %v4125_v10  ;;  %v4430_v49 = vmul.f32 -5e-06, %v7541_v0  ;;  %v4621_v33 = vmul.f32 -5e-07, %v7515_v37 }
 0x2c7   :  { %v5810_v39 = vpop.eup %5809  ;;  %v3037_v61 = vadd.f32 %v5808_v22, %v2845_v34  ;;  %5835 = vpow2.f32 %v4315_v26  ;;  %v4507_v59 = vmul.f32 1.442695, %v4429_v3  ;;  %v4622_v18 = vmul.f32 -5e-07, %v7541_v0 }
 0x2c8   :  { %v5812_v29 = vpop.eup %5811  ;;  %v3038_v53 = vadd.f32 %v5810_v39, %v2846_v58  ;;  %5837 = vpow2.f32 %v4317_v45  ;;  %v4509_v38 = vmul.f32 1.442695, %v4430_v49  ;;  %v4699_v1 = vmul.f32 1.442695, %v4621_v33 }
 0x2c9   :  { %v5814_v5 = vpop.eup %5813  ;;  %v3229_v54 = vadd.f32 %v5812_v29, %v3037_v61  ;;  %5839 = vpow2.f32 %v4507_v59  ;;  %v4701_v40 = vmul.f32 1.442695, %v4622_v18  ;;  %v1167_v42 = vmul.f32 -500000.0, %v7517_v50 }
 0x2ca   :  { %v5816_v44 = vpop.eup %5815  ;;  %v3230_v12 = vadd.f32 %v5814_v5, %v3038_v53  ;;  %5841 = vpow2.f32 %v4509_v38  ;;  %v1168_v37 = vmul.f32 -500000.0, %v7578_v57  ;;  %v1359_v23 = vmul.f32 -50000.0, %v7517_v50 }
 0x2cb   :  { %v5818_v46 = vpop.eup %5817  ;;  %v3421_v0 = vadd.f32 %v5816_v44, %v3229_v54  ;;  %5843 = vpow2.f32 %v4699_v1  ;;  %v1247_v28 = vmul.f32 1.442695, %v1167_v42  ;;  %v1360_v19 = vmul.f32 -50000.0, %v7578_v57 }
 0x2cc   :  { %v5820_v55 = vpop.eup %5819  ;;  %v3422_v52 = vadd.f32 %v5818_v46, %v3230_v12  ;;  %5845 = vpow2.f32 %v4701_v40  ;;  %v1249_v41 = vmul.f32 1.442695, %v1168_v37  ;;  %v1439_v63 = vmul.f32 1.442695, %v1359_v23 }
 0x2cd   :  { %v5822_v47 = vpop.eup %5821  ;;  %v3613_v43 = vadd.f32 %v5820_v55, %v3421_v0  ;;  %5847 = vpow2.f32 %v1247_v28  ;;  %v1441_v13 = vmul.f32 1.442695, %v1360_v19  ;;  %v1551_v36 = vmul.f32 -5000.0, %v7517_v50 }
 0x2ce   :  { %v5824_v17 = vpop.eup %5823  ;;  %v3614_v27 = vadd.f32 %v5822_v47, %v3422_v52  ;;  %5849 = vpow2.f32 %v1249_v41  ;;  %v1552_v7 = vmul.f32 -5000.0, %v7578_v57  ;;  %v1743_v11 = vmul.f32 -500.0, %v7517_v50 }
 0x2cf   :  { %v5826_v31 = vpop.eup %5825  ;;  %v3805_v10 = vadd.f32 %v5824_v17, %v3613_v43  ;;  %5851 = vpow2.f32 %v1439_v63  ;;  %v1631_v26 = vmul.f32 1.442695, %v1551_v36  ;;  %v1744_v14 = vmul.f32 -500.0, %v7578_v57 }
 0x2d0   :  { %v5828_v34 = vpop.eup %5827  ;;  %v3806_v45 = vadd.f32 %v5826_v31, %v3614_v27  ;;  %5853 = vpow2.f32 %v1441_v13  ;;  %v1633_v3 = vmul.f32 1.442695, %v1552_v7  ;;  %v1823_v22 = vmul.f32 1.442695, %v1743_v11 }
 0x2d1   :  { %v5830_v58 = vpop.eup %5829  ;;  %v3997_v49 = vadd.f32 %v5828_v34, %v3805_v10  ;;  %5855 = vpow2.f32 %v1631_v26  ;;  %v1825_v33 = vmul.f32 1.442695, %v1744_v14  ;;  %v1935_v39 = vmul.f32 -50.0, %v7517_v50 }
 0x2d2   :  { %v5832_v61 = vpop.eup %5831  ;;  %v3998_v59 = vadd.f32 %v5830_v58, %v3806_v45  ;;  %5857 = vpow2.f32 %v1633_v3  ;;  %v1936_v18 = vmul.f32 -50.0, %v7578_v57  ;;  %v2127_v29 = vmul.f32 -5.0, %v7517_v50 }
 0x2d3   :  { %v5834_v53 = vpop.eup %5833  ;;  %v4189_v38 = vadd.f32 %v5832_v61, %v3997_v49  ;;  %5859 = vpow2.f32 %v1823_v22  ;;  %v2015_v1 = vmul.f32 1.442695, %v1935_v39  ;;  %v2128_v5 = vmul.f32 -5.0, %v7578_v57 }
 0x2d4   :  { %v5836_v54 = vpop.eup %5835  ;;  %v4190_v40 = vadd.f32 %v5834_v53, %v3998_v59  ;;  %5861 = vpow2.f32 %v1825_v33  ;;  %v2017_v42 = vmul.f32 1.442695, %v1936_v18  ;;  %v2207_v44 = vmul.f32 1.442695, %v2127_v29 }
 0x2d5   :  { %v5838_v12 = vpop.eup %5837  ;;  %v4381_v37 = vadd.f32 %v5836_v54, %v4189_v38  ;;  %5863 = vpow2.f32 %v2015_v1  ;;  %v2209_v23 = vmul.f32 1.442695, %v2128_v5  ;;  %v2319_v46 = vmul.f32 -0.5, %v7517_v50 }
 0x2d6   :  { %v5840_v0 = vpop.eup %5839  ;;  %v4382_v28 = vadd.f32 %v5838_v12, %v4190_v40  ;;  %5865 = vpow2.f32 %v2017_v42  ;;  %v2320_v19 = vmul.f32 -0.5, %v7578_v57  ;;  %v2511_v55 = vmul.f32 -0.1, %v7517_v50 }
 0x2d7   :  { %v5842_v52 = vpop.eup %5841  ;;  %v4573_v41 = vadd.f32 %v5840_v0, %v4381_v37  ;;  %5867 = vpow2.f32 %v2207_v44  ;;  %v2399_v63 = vmul.f32 1.442695, %v2319_v46  ;;  %v2512_v47 = vmul.f32 -0.1, %v7578_v57 }
 0x2d8   :  { %v5844_v43 = vpop.eup %5843  ;;  %v4574_v13 = vadd.f32 %v5842_v52, %v4382_v28  ;;  %5869 = vpow2.f32 %v2209_v23  ;;  %v2401_v36 = vmul.f32 1.442695, %v2320_v19  ;;  %v2591_v17 = vmul.f32 1.442695, %v2511_v55 }
 0x2d9   :  { %v5846_v27 = vpop.eup %5845  ;;  %v4765_v7 = vadd.f32 %v5844_v43, %v4573_v41  ;;  %5871 = vpow2.f32 %v2399_v63  ;;  %v2593_v11 = vmul.f32 1.442695, %v2512_v47  ;;  %v2703_v31 = vmul.f32 -0.05, %v7517_v50 }
 0x2da   :  { %v5848_v10 = vpop.eup %5847  ;;  %v4766_v26 = vadd.f32 %v5846_v27, %v4574_v13  ;;  %5873 = vpow2.f32 %v2401_v36  ;;  %v2704_v14 = vmul.f32 -0.05, %v7578_v57  ;;  %v2895_v34 = vmul.f32 -0.033333335, %v7517_v50 }
 0x2db   :  { %v5850_v45 = vpop.eup %5849  ;;  %5875 = vpow2.f32 %v2591_v17  ;;  %v2783_v3 = vmul.f32 1.442695, %v2703_v31  ;;  %v2896_v22 = vmul.f32 -0.033333335, %v7578_v57  ;;  %v3087_v58 = vmul.f32 -0.025, %v7517_v50 }
 0x2dc   :  { %v5852_v49 = vpop.eup %5851  ;;  %v4888_v33 = vsel %vm4808_vm10, %v4766_v26, 0.0  ;;  %5877 = vpow2.f32 %v2593_v11  ;;  %v2785_v39 = vmul.f32 1.442695, %v2704_v14  ;;  %v2975_v61 = vmul.f32 1.442695, %v2895_v34 }
 0x2dd   :  { %v5854_v59 = vpop.eup %5853  ;;  %v4965_v18 = vsel %vm84_vm0, %v4888_v33, 0.0  ;;  %v1503_v29 = vadd.f32 %v5852_v49, %v5848_v10  ;;  %5879 = vpow2.f32 %v2783_v3  ;;  %v2977_v53 = vmul.f32 1.442695, %v2896_v22 }
 0x2de   :  { %v5856_v38 = vpop.eup %5855  ;;  %v4966_v1 = vadd.f32 %v4965_v18, %v4765_v7  ;;  %v1504_v5 = vadd.f32 %v5854_v59, %v5850_v45  ;;  %5881 = vpow2.f32 %v2785_v39  ;;  %v3088_v54 = vmul.f32 -0.025, %v7578_v57 }
 0x2df   :  { %v5858_v40 = vpop.eup %5857  ;;  %v1695_v42 = vadd.f32 %v5856_v38, %v1503_v29  ;;  %5883 = vpow2.f32 %v2975_v61  ;;  %v3167_v44 = vmul.f32 1.442695, %v3087_v58  ;;  %v3279_v12 = vmul.f32 -0.02, %v7517_v50 }
 0x2e0   :  { %v5860_v37 = vpop.eup %5859  ;;  %4967 = vadd.xlane.f32.xlu0 %v4966_v1  ;;  %v1696_v23 = vadd.f32 %v5858_v40, %v1504_v5  ;;  %5885 = vpow2.f32 %v2977_v53  ;;  %v3169_v46 = vmul.f32 1.442695, %v3088_v54  ;;  %v3280_v0 = vmul.f32 -0.02, %v7578_v57 }
 0x2e1   :  { %v5862_v28 = vpop.eup %5861  ;;  %v1887_v19 = vadd.f32 %v5860_v37, %v1695_v42  ;;  %5887 = vpow2.f32 %v3167_v44  ;;  %v3359_v55 = vmul.f32 1.442695, %v3279_v12  ;;  %v3471_v52 = vmul.f32 -0.016666668, %v7517_v50 }
 0x2e2   :  { %v5864_v41 = vpop.eup %5863  ;;  %v1888_v63 = vadd.f32 %v5862_v28, %v1696_v23  ;;  %5889 = vpow2.f32 %v3169_v46  ;;  %v3361_v47 = vmul.f32 1.442695, %v3280_v0  ;;  %v3472_v43 = vmul.f32 -0.016666668, %v7578_v57 }
 0x2e3   :  { %v5866_v13 = vpop.eup %5865  ;;  %v2079_v36 = vadd.f32 %v5864_v41, %v1887_v19  ;;  %5891 = vpow2.f32 %v3359_v55  ;;  %v3551_v17 = vmul.f32 1.442695, %v3471_v52  ;;  %v3663_v27 = vmul.f32 -0.014285714, %v7517_v50 }
 0x2e4   :  { %v5868_v7 = vpop.eup %5867  ;;  %v2080_v11 = vadd.f32 %v5866_v13, %v1888_v63  ;;  %5893 = vpow2.f32 %v3361_v47  ;;  %v3553_v31 = vmul.f32 1.442695, %v3472_v43  ;;  %v3664_v10 = vmul.f32 -0.014285714, %v7578_v57 }
 0x2e5   :  { %v5870_v26 = vpop.eup %5869  ;;  %v2271_v14 = vadd.f32 %v5868_v7, %v2079_v36  ;;  %5895 = vpow2.f32 %v3551_v17  ;;  %v3743_v34 = vmul.f32 1.442695, %v3663_v27  ;;  %v3855_v45 = vmul.f32 -0.005, %v7517_v50 }
 0x2e6   :  { %v5872_v3 = vpop.eup %5871  ;;  %v2272_v22 = vadd.f32 %v5870_v26, %v2080_v11  ;;  %5897 = vpow2.f32 %v3553_v31  ;;  %v3745_v58 = vmul.f32 1.442695, %v3664_v10  ;;  %v3856_v49 = vmul.f32 -0.005, %v7578_v57 }
 0x2e7   :  { %v5874_v33 = vpop.eup %5873  ;;  %v2463_v39 = vadd.f32 %v5872_v3, %v2271_v14  ;;  %5899 = vpow2.f32 %v3743_v34  ;;  %v3935_v61 = vmul.f32 1.442695, %v3855_v45  ;;  %v4047_v59 = vmul.f32 -0.0005, %v7517_v50 }
 0x2e8   :  { %v5876_v18 = vpop.eup %5875  ;;  %v2464_v29 = vadd.f32 %v5874_v33, %v2272_v22  ;;  %5901 = vpow2.f32 %v3745_v58  ;;  %v3937_v53 = vmul.f32 1.442695, %v3856_v49  ;;  %v4048_v38 = vmul.f32 -0.0005, %v7578_v57 }
 0x2e9   :  { %v5878_v1 = vpop.eup %5877  ;;  %v2655_v5 = vadd.f32 %v5876_v18, %v2463_v39  ;;  %5903 = vpow2.f32 %v3935_v61  ;;  %v4127_v54 = vmul.f32 1.442695, %v4047_v59  ;;  %v4239_v40 = vmul.f32 -5e-05, %v7517_v50 }
 0x2ea   :  { %v5880_v42 = vpop.eup %5879  ;;  %v2656_v44 = vadd.f32 %v5878_v1, %v2464_v29  ;;  %5905 = vpow2.f32 %v3937_v53  ;;  %v4129_v12 = vmul.f32 1.442695, %v4048_v38  ;;  %v4240_v37 = vmul.f32 -5e-05, %v7578_v57 }
 0x2eb   :  { %v5882_v23 = vpop.eup %5881  ;;  %v2847_v46 = vadd.f32 %v5880_v42, %v2655_v5  ;;  %5907 = vpow2.f32 %v4127_v54  ;;  %v4319_v0 = vmul.f32 1.442695, %v4239_v40  ;;  %v4431_v28 = vmul.f32 -5e-06, %v7517_v50 }
 0x2ec   :  { %v5884_v19 = vpop.eup %5883  ;;  %v2848_v55 = vadd.f32 %v5882_v23, %v2656_v44  ;;  %5909 = vpow2.f32 %v4129_v12  ;;  %v4321_v52 = vmul.f32 1.442695, %v4240_v37  ;;  %v4432_v41 = vmul.f32 -5e-06, %v7578_v57 }
 0x2ed   :  { %v5886_v63 = vpop.eup %5885  ;;  %v3039_v47 = vadd.f32 %v5884_v19, %v2847_v46  ;;  %5911 = vpow2.f32 %v4319_v0  ;;  %v4511_v43 = vmul.f32 1.442695, %v4431_v28  ;;  %v4623_v13 = vmul.f32 -5e-07, %v7517_v50 }
 0x2ee   :  { %v5888_v36 = vpop.eup %5887  ;;  %v3040_v17 = vadd.f32 %v5886_v63, %v2848_v55  ;;  %5913 = vpow2.f32 %v4321_v52  ;;  %v4513_v27 = vmul.f32 1.442695, %v4432_v41  ;;  %v4624_v7 = vmul.f32 -5e-07, %v7578_v57 }
 0x2ef   :  { %v5890_v11 = vpop.eup %5889  ;;  %v3231_v31 = vadd.f32 %v5888_v36, %v3039_v47  ;;  %5915 = vpow2.f32 %v4511_v43  ;;  %v4703_v10 = vmul.f32 1.442695, %v4623_v13  ;;  %v1145_v26 = vmul.f32 -500000.0, %v7556_v21 }
 0x2f0   :  { %v5892_v14 = vpop.eup %5891  ;;  %v3232_v34 = vadd.f32 %v5890_v11, %v3040_v17  ;;  %5917 = vpow2.f32 %v4513_v27  ;;  %v4705_v45 = vmul.f32 1.442695, %v4624_v7  ;;  %v1146_v3 = vmul.f32 -500000.0, %v7596_v24 }
 0x2f1   :  { %v5894_v22 = vpop.eup %5893  ;;  %v3423_v50 = vadd.f32 %v5892_v14, %v3231_v31  ;;  %5919 = vpow2.f32 %v4703_v10  ;;  %v1203_v58 = vmul.f32 1.442695, %v1145_v26  ;;  %v1337_v49 = vmul.f32 -50000.0, %v7556_v21 }
 0x2f2   :  { %v5896_v33 = vpop.eup %5895  ;;  %v3424_v57 = vadd.f32 %v5894_v22, %v3232_v34  ;;  %5921 = vpow2.f32 %v4705_v45  ;;  %v1205_v39 = vmul.f32 1.442695, %v1146_v3  ;;  %v1338_v61 = vmul.f32 -50000.0, %v7596_v24 }
 0x2f3   :  { %v5898_v59 = vpop.eup %5897  ;;  %v3615_v18 = vadd.f32 %v5896_v33, %v3423_v50  ;;  %5923 = vpow2.f32 %v1203_v58  ;;  %v1395_v29 = vmul.f32 1.442695, %v1337_v49  ;;  %v1529_v53 = vmul.f32 -5000.0, %v7556_v21 }
 0x2f4   :  { %v5900_v38 = vpop.eup %5899  ;;  %v3616_v1 = vadd.f32 %v5898_v59, %v3424_v57  ;;  %5925 = vpow2.f32 %v1205_v39  ;;  %v1397_v5 = vmul.f32 1.442695, %v1338_v61  ;;  %v1530_v54 = vmul.f32 -5000.0, %v7596_v24 }
 0x2f5   :  { %v5902_v40 = vpop.eup %5901  ;;  %v3807_v42 = vadd.f32 %v5900_v38, %v3615_v18  ;;  %5927 = vpow2.f32 %v1395_v29  ;;  %v1587_v44 = vmul.f32 1.442695, %v1529_v53  ;;  %v1721_v12 = vmul.f32 -500.0, %v7556_v21 }
 0x2f6   :  { %v5904_v37 = vpop.eup %5903  ;;  %v3808_v23 = vadd.f32 %v5902_v40, %v3616_v1  ;;  %5929 = vpow2.f32 %v1397_v5  ;;  %v1589_v46 = vmul.f32 1.442695, %v1530_v54  ;;  %v1722_v0 = vmul.f32 -500.0, %v7596_v24 }
 0x2f7   :  { %v5906_v28 = vpop.eup %5905  ;;  %v3999_v19 = vadd.f32 %v5904_v37, %v3807_v42  ;;  %5931 = vpow2.f32 %v1587_v44  ;;  %v1779_v55 = vmul.f32 1.442695, %v1721_v12  ;;  %v1913_v52 = vmul.f32 -50.0, %v7556_v21 }
 0x2f8   :  { %v5908_v41 = vpop.eup %5907  ;;  %v4000_v63 = vadd.f32 %v5906_v28, %v3808_v23  ;;  %5933 = vpow2.f32 %v1589_v46  ;;  %v1781_v47 = vmul.f32 1.442695, %v1722_v0  ;;  %v1914_v43 = vmul.f32 -50.0, %v7596_v24 }
 0x2f9   :  { %v5910_v13 = vpop.eup %5909  ;;  %v4191_v36 = vadd.f32 %v5908_v41, %v3999_v19  ;;  %5935 = vpow2.f32 %v1779_v55  ;;  %v1971_v17 = vmul.f32 1.442695, %v1913_v52  ;;  %v2105_v27 = vmul.f32 -5.0, %v7556_v21 }
 0x2fa   :  { %v5912_v7 = vpop.eup %5911  ;;  %v4192_v11 = vadd.f32 %v5910_v13, %v4000_v63  ;;  %5937 = vpow2.f32 %v1781_v47  ;;  %v1973_v31 = vmul.f32 1.442695, %v1914_v43  ;;  %v2106_v10 = vmul.f32 -5.0, %v7596_v24 }
 0x2fb   :  { %v5914_v26 = vpop.eup %5913  ;;  %v4383_v14 = vadd.f32 %v5912_v7, %v4191_v36  ;;  %5939 = vpow2.f32 %v1971_v17  ;;  %v2163_v34 = vmul.f32 1.442695, %v2105_v27  ;;  %v2297_v45 = vmul.f32 -0.5, %v7556_v21 }
 0x2fc   :  { %v5916_v3 = vpop.eup %5915  ;;  %v4384_v22 = vadd.f32 %v5914_v26, %v4192_v11  ;;  %5941 = vpow2.f32 %v1973_v31  ;;  %v2165_v50 = vmul.f32 1.442695, %v2106_v10  ;;  %v2298_v58 = vmul.f32 -0.5, %v7596_v24 }
 0x2fd   :  { %v5918_v49 = vpop.eup %5917  ;;  %v4575_v33 = vadd.f32 %v5916_v3, %v4383_v14  ;;  %5943 = vpow2.f32 %v2163_v34  ;;  %v2355_v57 = vmul.f32 1.442695, %v2297_v45  ;;  %v2489_v39 = vmul.f32 -0.1, %v7556_v21 }
 0x2fe   :  { %v5920_v61 = vpop.eup %5919  ;;  %v4576_v59 = vadd.f32 %v5918_v49, %v4384_v22  ;;  %5945 = vpow2.f32 %v2165_v50  ;;  %v2357_v18 = vmul.f32 1.442695, %v2298_v58  ;;  %v2490_v29 = vmul.f32 -0.1, %v7596_v24 }
 0x2ff   :  { %v5922_v53 = vpop.eup %5921  ;;  %v4767_v38 = vadd.f32 %v5920_v61, %v4575_v33  ;;  %5947 = vpow2.f32 %v2355_v57  ;;  %v2547_v1 = vmul.f32 1.442695, %v2489_v39  ;;  %v2681_v5 = vmul.f32 -0.05, %v7556_v21 }
 0x300   :  { %v5924_v54 = vpop.eup %5923  ;;  %v4768_v40 = vadd.f32 %v5922_v53, %v4576_v59  ;;  %5949 = vpow2.f32 %v2357_v18  ;;  %v2549_v42 = vmul.f32 1.442695, %v2490_v29  ;;  %v2682_v44 = vmul.f32 -0.05, %v7596_v24 }
 0x301   :  { %v5926_v12 = vpop.eup %5925  ;;  %5951 = vpow2.f32 %v2547_v1  ;;  %v2739_v37 = vmul.f32 1.442695, %v2681_v5  ;;  %v2873_v23 = vmul.f32 -0.033333335, %v7556_v21  ;;  %v2874_v46 = vmul.f32 -0.033333335, %v7596_v24 }
 0x302   :  { %v5928_v0 = vpop.eup %5927  ;;  %v4890_v28 = vsel %vm4808_vm10, %v4768_v40, 0.0  ;;  %5953 = vpow2.f32 %v2549_v42  ;;  %v2741_v19 = vmul.f32 1.442695, %v2682_v44  ;;  %v3065_v55 = vmul.f32 -0.025, %v7556_v21 }
 0x303   :  { %v5930_v52 = vpop.eup %5929  ;;  %v4969_v41 = vsel %vm84_vm0, %v4890_v28, 0.0  ;;  %v1481_v63 = vadd.f32 %v5928_v0, %v5924_v54  ;;  %5955 = vpow2.f32 %v2739_v37  ;;  %v2931_v47 = vmul.f32 1.442695, %v2873_v23 }
 0x304   :  { %v5932_v43 = vpop.eup %5931  ;;  %v4970_v13 = vadd.f32 %v4969_v41, %v4767_v38  ;;  %v1482_v36 = vadd.f32 %v5930_v52, %v5926_v12  ;;  %5957 = vpow2.f32 %v2741_v19  ;;  %v2933_v17 = vmul.f32 1.442695, %v2874_v46 }
 0x305   :  { %v5934_v27 = vpop.eup %5933  ;;  %v1673_v7 = vadd.f32 %v5932_v43, %v1481_v63  ;;  %5959 = vpow2.f32 %v2931_v47  ;;  %v3066_v11 = vmul.f32 -0.025, %v7596_v24  ;;  %v3123_v31 = vmul.f32 1.442695, %v3065_v55 }
 0x306   :  { %v5936_v10 = vpop.eup %5935  ;;  %4971 = vadd.xlane.f32.xlu1 %v4970_v13  ;;  %v1674_v26 = vadd.f32 %v5934_v27, %v1482_v36  ;;  %5961 = vpow2.f32 %v2933_v17  ;;  %v3257_v14 = vmul.f32 -0.02, %v7556_v21  ;;  %v3258_v34 = vmul.f32 -0.02, %v7596_v24 }
 0x307   :  { %v5938_v45 = vpop.eup %5937  ;;  %v1865_v3 = vadd.f32 %v5936_v10, %v1673_v7  ;;  %5963 = vpow2.f32 %v3123_v31  ;;  %v3125_v22 = vmul.f32 1.442695, %v3066_v11  ;;  %v3449_v50 = vmul.f32 -0.016666668, %v7556_v21 }
 0x308   :  { %v5940_v58 = vpop.eup %5939  ;;  %v1866_v49 = vadd.f32 %v5938_v45, %v1674_v26  ;;  %v3315_v33 = vmul.f32 1.442695, %v3257_v14  ;;  %v3317_v57 = vmul.f32 1.442695, %v3258_v34  ;;  %v3450_v39 = vmul.f32 -0.016666668, %v7596_v24 }
 0x309   :  { %v5942_v61 = vpop.eup %5941  ;;  %v2057_v59 = vadd.f32 %v5940_v58, %v1865_v3  ;;  %5965 = vpow2.f32 %v3125_v22  ;;  %v3507_v18 = vmul.f32 1.442695, %v3449_v50  ;;  %v3641_v29 = vmul.f32 -0.014285714, %v7556_v21 }
 0x30a   :  { %v5944_v53 = vpop.eup %5943  ;;  %v2058_v38 = vadd.f32 %v5942_v61, %v1866_v49  ;;  %5967 = vpow2.f32 %v3315_v33  ;;  %v3509_v1 = vmul.f32 1.442695, %v3450_v39  ;;  %v3642_v5 = vmul.f32 -0.014285714, %v7596_v24 }
 0x30b   :  { %v5946_v54 = vpop.eup %5945  ;;  %v2249_v40 = vadd.f32 %v5944_v53, %v2057_v59  ;;  %5969 = vpow2.f32 %v3317_v57  ;;  %v3699_v42 = vmul.f32 1.442695, %v3641_v29  ;;  %v3833_v44 = vmul.f32 -0.005, %v7556_v21 }
 0x30c   :  { %v5948_v12 = vpop.eup %5947  ;;  %v2250_v37 = vadd.f32 %v5946_v54, %v2058_v38  ;;  %5971 = vpow2.f32 %v3507_v18  ;;  %v3701_v23 = vmul.f32 1.442695, %v3642_v5  ;;  %v3834_v46 = vmul.f32 -0.005, %v7596_v24 }
 0x30d   :  { %v5950_v0 = vpop.eup %5949  ;;  %v2441_v28 = vadd.f32 %v5948_v12, %v2249_v40  ;;  %5973 = vpow2.f32 %v3509_v1  ;;  %v3891_v19 = vmul.f32 1.442695, %v3833_v44  ;;  %v4025_v55 = vmul.f32 -0.0005, %v7556_v21 }
 0x30e   :  { %v5952_v52 = vpop.eup %5951  ;;  %v2442_v41 = vadd.f32 %v5950_v0, %v2250_v37  ;;  %5975 = vpow2.f32 %v3699_v42  ;;  %v3893_v63 = vmul.f32 1.442695, %v3834_v46  ;;  %v4026_v47 = vmul.f32 -0.0005, %v7596_v24 }
 0x30f   :  { %v5954_v43 = vpop.eup %5953  ;;  %v2633_v13 = vadd.f32 %v5952_v52, %v2441_v28  ;;  %5977 = vpow2.f32 %v3701_v23  ;;  %v4083_v36 = vmul.f32 1.442695, %v4025_v55  ;;  %v4217_v17 = vmul.f32 -5e-05, %v7556_v21 }
 0x310   :  { %v5956_v27 = vpop.eup %5955  ;;  %v2634_v7 = vadd.f32 %v5954_v43, %v2442_v41  ;;  %5979 = vpow2.f32 %v3891_v19  ;;  %v4085_v11 = vmul.f32 1.442695, %v4026_v47  ;;  %v4218_v31 = vmul.f32 -5e-05, %v7596_v24 }
 0x311   :  { %v5958_v10 = vpop.eup %5957  ;;  %v2825_v26 = vadd.f32 %v5956_v27, %v2633_v13  ;;  %5981 = vpow2.f32 %v3893_v63  ;;  %v4275_v14 = vmul.f32 1.442695, %v4217_v17  ;;  %v4409_v34 = vmul.f32 -5e-06, %v7556_v21 }
 0x312   :  { %v5960_v45 = vpop.eup %5959  ;;  %v2826_v3 = vadd.f32 %v5958_v10, %v2634_v7  ;;  %5983 = vpow2.f32 %v4083_v36  ;;  %v4277_v22 = vmul.f32 1.442695, %v4218_v31  ;;  %v4410_v50 = vmul.f32 -5e-06, %v7596_v24 }
 0x313   :  { %v5962_v58 = vpop.eup %5961  ;;  %v3017_v49 = vadd.f32 %v5960_v45, %v2825_v26  ;;  %5985 = vpow2.f32 %v4085_v11  ;;  %v4467_v33 = vmul.f32 1.442695, %v4409_v34  ;;  %v4601_v57 = vmul.f32 -5e-07, %v7556_v21 }
 0x314   :  { %v5964_v39 = vpop.eup %5963  ;;  %v3018_v61 = vadd.f32 %v5962_v58, %v2826_v3  ;;  %5987 = vpow2.f32 %v4275_v14  ;;  %v4469_v59 = vmul.f32 1.442695, %v4410_v50  ;;  %v4602_v18 = vmul.f32 -5e-07, %v7596_v24 }
 0x315   :  { %v3209_v29 = vadd.f32 %v5964_v39, %v3017_v49  ;;  %5989 = vpow2.f32 %v4277_v22  ;;  %v4659_v53 = vmul.f32 1.442695, %v4601_v57  ;;  %v1147_v38 = vmul.f32 -500000.0, %v7569_v6 }
 0x316   :  { %v5966_v1 = vpop.eup %5965  ;;  %5991 = vpow2.f32 %v4467_v33  ;;  %v4661_v5 = vmul.f32 1.442695, %v4602_v18  ;;  %v1148_v54 = vmul.f32 -500000.0, %v7602_v4  ;;  %v1339_v40 = vmul.f32 -50000.0, %v7569_v6 }
 0x317   :  { %v5968_v42 = vpop.eup %5967  ;;  %v3210_v21 = vadd.f32 %v5966_v1, %v3018_v61  ;;  %5993 = vpow2.f32 %v4469_v59  ;;  %v1207_v44 = vmul.f32 1.442695, %v1147_v38  ;;  %v1340_v12 = vmul.f32 -50000.0, %v7602_v4 }
 0x318   :  { %v5970_v37 = vpop.eup %5969  ;;  %v3401_v24 = vadd.f32 %v5968_v42, %v3209_v29  ;;  %5995 = vpow2.f32 %v4659_v53  ;;  %v1209_v23 = vmul.f32 1.442695, %v1148_v54  ;;  %v1399_v46 = vmul.f32 1.442695, %v1339_v40 }
 0x319   :  { %v5972_v0 = vpop.eup %5971  ;;  %v3402_v28 = vadd.f32 %v5970_v37, %v3210_v21  ;;  %5997 = vpow2.f32 %v4661_v5  ;;  %v1401_v19 = vmul.f32 1.442695, %v1340_v12  ;;  %v1531_v55 = vmul.f32 -5000.0, %v7569_v6 }
 0x31a   :  { %v5974_v52 = vpop.eup %5973  ;;  %v3593_v41 = vadd.f32 %v5972_v0, %v3401_v24  ;;  %5999 = vpow2.f32 %v1207_v44  ;;  %v1532_v63 = vmul.f32 -5000.0, %v7602_v4  ;;  %v1723_v47 = vmul.f32 -500.0, %v7569_v6 }
 0x31b   :  { %v5976_v43 = vpop.eup %5975  ;;  %v3594_v13 = vadd.f32 %v5974_v52, %v3402_v28  ;;  %6001 = vpow2.f32 %v1209_v23  ;;  %v1591_v36 = vmul.f32 1.442695, %v1531_v55  ;;  %v1724_v17 = vmul.f32 -500.0, %v7602_v4 }
 0x31c   :  { %v5978_v27 = vpop.eup %5977  ;;  %v3785_v7 = vadd.f32 %v5976_v43, %v3593_v41  ;;  %6003 = vpow2.f32 %v1399_v46  ;;  %v1593_v11 = vmul.f32 1.442695, %v1532_v63  ;;  %v1783_v31 = vmul.f32 1.442695, %v1723_v47 }
 0x31d   :  { %v5980_v10 = vpop.eup %5979  ;;  %v3786_v26 = vadd.f32 %v5978_v27, %v3594_v13  ;;  %6005 = vpow2.f32 %v1401_v19  ;;  %v1785_v14 = vmul.f32 1.442695, %v1724_v17  ;;  %v1915_v34 = vmul.f32 -50.0, %v7569_v6 }
 0x31e   :  { %v5982_v45 = vpop.eup %5981  ;;  %v3977_v3 = vadd.f32 %v5980_v10, %v3785_v7  ;;  %6007 = vpow2.f32 %v1591_v36  ;;  %v1916_v22 = vmul.f32 -50.0, %v7602_v4  ;;  %v2107_v50 = vmul.f32 -5.0, %v7569_v6 }
 0x31f   :  { %v5984_v58 = vpop.eup %5983  ;;  %v3978_v49 = vadd.f32 %v5982_v45, %v3786_v26  ;;  %6009 = vpow2.f32 %v1593_v11  ;;  %v1975_v33 = vmul.f32 1.442695, %v1915_v34  ;;  %v2108_v57 = vmul.f32 -5.0, %v7602_v4 }
 0x320   :  { %v5986_v39 = vpop.eup %5985  ;;  %v4169_v61 = vadd.f32 %v5984_v58, %v3977_v3  ;;  %6011 = vpow2.f32 %v1783_v31  ;;  %v1977_v59 = vmul.f32 1.442695, %v1916_v22  ;;  %v2167_v18 = vmul.f32 1.442695, %v2107_v50 }
 0x321   :  { %v5988_v29 = vpop.eup %5987  ;;  %v4170_v53 = vadd.f32 %v5986_v39, %v3978_v49  ;;  %6013 = vpow2.f32 %v1785_v14  ;;  %v2169_v38 = vmul.f32 1.442695, %v2108_v57  ;;  %v2299_v1 = vmul.f32 -0.5, %v7569_v6 }
 0x322   :  { %v5990_v5 = vpop.eup %5989  ;;  %v4361_v54 = vadd.f32 %v5988_v29, %v4169_v61  ;;  %6015 = vpow2.f32 %v1975_v33  ;;  %v2300_v40 = vmul.f32 -0.5, %v7602_v4  ;;  %v2491_v42 = vmul.f32 -0.1, %v7569_v6 }
 0x323   :  { %v5992_v21 = vpop.eup %5991  ;;  %v4362_v44 = vadd.f32 %v5990_v5, %v4170_v53  ;;  %6017 = vpow2.f32 %v1977_v59  ;;  %v2359_v12 = vmul.f32 1.442695, %v2299_v1  ;;  %v2492_v37 = vmul.f32 -0.1, %v7602_v4 }
 0x324   :  { %v5994_v24 = vpop.eup %5993  ;;  %v4553_v23 = vadd.f32 %v5992_v21, %v4361_v54  ;;  %6019 = vpow2.f32 %v2167_v18  ;;  %v2361_v46 = vmul.f32 1.442695, %v2300_v40  ;;  %v2551_v0 = vmul.f32 1.442695, %v2491_v42 }
 0x325   :  { %v5996_v28 = vpop.eup %5995  ;;  %v4554_v19 = vadd.f32 %v5994_v24, %v4362_v44  ;;  %6021 = vpow2.f32 %v2169_v38  ;;  %v2553_v55 = vmul.f32 1.442695, %v2492_v37  ;;  %v2683_v52 = vmul.f32 -0.05, %v7569_v6 }
 0x326   :  { %v5998_v41 = vpop.eup %5997  ;;  %v4745_v63 = vadd.f32 %v5996_v28, %v4553_v23  ;;  %6023 = vpow2.f32 %v2359_v12  ;;  %v2684_v47 = vmul.f32 -0.05, %v7602_v4  ;;  %v2875_v43 = vmul.f32 -0.033333335, %v7569_v6 }
 0x327   :  { %v6000_v13 = vpop.eup %5999  ;;  %v4746_v36 = vadd.f32 %v5998_v41, %v4554_v19  ;;  %6025 = vpow2.f32 %v2361_v46  ;;  %v2743_v17 = vmul.f32 1.442695, %v2683_v52  ;;  %v2876_v27 = vmul.f32 -0.033333335, %v7602_v4 }
 0x328   :  { %v6002_v7 = vpop.eup %6001  ;;  %6027 = vpow2.f32 %v2551_v0  ;;  %v2745_v11 = vmul.f32 1.442695, %v2684_v47  ;;  %v2935_v31 = vmul.f32 1.442695, %v2875_v43  ;;  %v3067_v10 = vmul.f32 -0.025, %v7569_v6 }
 0x329   :  { %v6004_v26 = vpop.eup %6003  ;;  %v4868_v14 = vsel %vm4808_vm10, %v4746_v36, 0.0  ;;  %6029 = vpow2.f32 %v2553_v55  ;;  %v2937_v34 = vmul.f32 1.442695, %v2876_v27  ;;  %v3068_v45 = vmul.f32 -0.025, %v7602_v4 }
 0x32a   :  { %v6006_v3 = vpop.eup %6005  ;;  %v4925_v22 = vsel %vm84_vm0, %v4868_v14, 0.0  ;;  %v1483_v50 = vadd.f32 %v6004_v26, %v6000_v13  ;;  %6031 = vpow2.f32 %v2743_v17  ;;  %v3127_v58 = vmul.f32 1.442695, %v3067_v10 }
 0x32b   :  { %v6008_v49 = vpop.eup %6007  ;;  %v4926_v33 = vadd.f32 %v4925_v22, %v4745_v63  ;;  %v1484_v57 = vadd.f32 %v6006_v3, %v6002_v7  ;;  %6033 = vpow2.f32 %v2745_v11  ;;  %v3129_v39 = vmul.f32 1.442695, %v3068_v45 }
 0x32c   :  { %v6010_v61 = vpop.eup %6009  ;;  %v1675_v59 = vadd.f32 %v6008_v49, %v1483_v50  ;;  %6035 = vpow2.f32 %v2935_v31  ;;  %v3259_v18 = vmul.f32 -0.02, %v7569_v6  ;;  %v3260_v29 = vmul.f32 -0.02, %v7602_v4 }
 0x32d   :  { %v6012_v53 = vpop.eup %6011  ;;  %4927 = vadd.xlane.f32.xlu0 %v4926_v33  ;;  %v1676_v38 = vadd.f32 %v6010_v61, %v1484_v57  ;;  %6037 = vpow2.f32 %v2937_v34  ;;  %v3451_v1 = vmul.f32 -0.016666668, %v7569_v6  ;;  %v3452_v5 = vmul.f32 -0.016666668, %v7602_v4 }
 0x32e   :  { %v6014_v54 = vpop.eup %6013  ;;  %v1867_v40 = vadd.f32 %v6012_v53, %v1675_v59  ;;  %6039 = vpow2.f32 %v3127_v58  ;;  %v3319_v42 = vmul.f32 1.442695, %v3259_v18  ;;  %v3321_v21 = vmul.f32 1.442695, %v3260_v29 }
 0x32f   :  { %v6016_v44 = vpop.eup %6015  ;;  %v1868_v12 = vadd.f32 %v6014_v54, %v1676_v38  ;;  %6041 = vpow2.f32 %v3129_v39  ;;  %v3511_v37 = vmul.f32 1.442695, %v3451_v1  ;;  %v3513_v24 = vmul.f32 1.442695, %v3452_v5 }
 0x330   :  { %v6018_v23 = vpop.eup %6017  ;;  %v2059_v46 = vadd.f32 %v6016_v44, %v1867_v40  ;;  %6043 = vpow2.f32 %v3319_v42  ;;  %v3643_v0 = vmul.f32 -0.014285714, %v7569_v6  ;;  %v3644_v28 = vmul.f32 -0.014285714, %v7602_v4 }
 0x331   :  { %v6020_v19 = vpop.eup %6019  ;;  %v2060_v55 = vadd.f32 %v6018_v23, %v1868_v12  ;;  %6045 = vpow2.f32 %v3321_v21  ;;  %v3835_v52 = vmul.f32 -0.005, %v7569_v6  ;;  %v3836_v41 = vmul.f32 -0.005, %v7602_v4 }
 0x332   :  { %v6022_v63 = vpop.eup %6021  ;;  %v2251_v47 = vadd.f32 %v6020_v19, %v2059_v46  ;;  %6047 = vpow2.f32 %v3511_v37  ;;  %v3703_v43 = vmul.f32 1.442695, %v3643_v0  ;;  %v3705_v13 = vmul.f32 1.442695, %v3644_v28 }
 0x333   :  { %v6024_v36 = vpop.eup %6023  ;;  %v2252_v17 = vadd.f32 %v6022_v63, %v2060_v55  ;;  %6049 = vpow2.f32 %v3513_v24  ;;  %v3895_v27 = vmul.f32 1.442695, %v3835_v52  ;;  %v3897_v7 = vmul.f32 1.442695, %v3836_v41 }
 0x334   :  { %v6026_v11 = vpop.eup %6025  ;;  %v2443_v31 = vadd.f32 %v6024_v36, %v2251_v47  ;;  %6051 = vpow2.f32 %v3703_v43  ;;  %v4027_v10 = vmul.f32 -0.0005, %v7569_v6  ;;  %v4028_v26 = vmul.f32 -0.0005, %v7602_v4 }
 0x335   :  { %v6028_v14 = vpop.eup %6027  ;;  %v2444_v34 = vadd.f32 %v6026_v11, %v2252_v17  ;;  %6053 = vpow2.f32 %v3705_v13  ;;  %v4219_v45 = vmul.f32 -5e-05, %v7569_v6  ;;  %v4220_v3 = vmul.f32 -5e-05, %v7602_v4 }
 0x336   :  { %v6030_v22 = vpop.eup %6029  ;;  %v2635_v50 = vadd.f32 %v6028_v14, %v2443_v31  ;;  %6055 = vpow2.f32 %v3895_v27  ;;  %v4087_v58 = vmul.f32 1.442695, %v4027_v10  ;;  %v4089_v49 = vmul.f32 1.442695, %v4028_v26 }
 0x337   :  { %v6032_v33 = vpop.eup %6031  ;;  %v2636_v57 = vadd.f32 %v6030_v22, %v2444_v34  ;;  %6057 = vpow2.f32 %v3897_v7  ;;  %v4279_v39 = vmul.f32 1.442695, %v4219_v45  ;;  %v4281_v61 = vmul.f32 1.442695, %v4220_v3 }
 0x338   :  { %v6034_v59 = vpop.eup %6033  ;;  %v2827_v18 = vadd.f32 %v6032_v33, %v2635_v50  ;;  %6059 = vpow2.f32 %v4087_v58  ;;  %v4411_v29 = vmul.f32 -5e-06, %v7569_v6  ;;  %v4412_v53 = vmul.f32 -5e-06, %v7602_v4 }
 0x339   :  { %v6036_v38 = vpop.eup %6035  ;;  %v2828_v1 = vadd.f32 %v6034_v59, %v2636_v57  ;;  %6061 = vpow2.f32 %v4089_v49  ;;  %v4603_v5 = vmul.f32 -5e-07, %v7569_v6  ;;  %v4604_v54 = vmul.f32 -5e-07, %v7602_v4 }
 0x33a   :  { %v6038_v40 = vpop.eup %6037  ;;  %v3019_v42 = vadd.f32 %v6036_v38, %v2827_v18  ;;  %6063 = vpow2.f32 %v4279_v39  ;;  %v4471_v21 = vmul.f32 1.442695, %v4411_v29  ;;  %v4473_v44 = vmul.f32 1.442695, %v4412_v53 }
 0x33b   :  { %v6040_v12 = vpop.eup %6039  ;;  %v3020_v37 = vadd.f32 %v6038_v40, %v2828_v1  ;;  %6065 = vpow2.f32 %v4281_v61  ;;  %v4663_v24 = vmul.f32 1.442695, %v4603_v5  ;;  %v4665_v23 = vmul.f32 1.442695, %v4604_v54 }
 0x33c   :  { %v6042_v46 = vpop.eup %6041  ;;  %v3211_v0 = vadd.f32 %v6040_v12, %v3019_v42  ;;  %6067 = vpow2.f32 %v4471_v21  ;;  %v1169_v28 = vmul.f32 -500000.0, %v7544_v48  ;;  %v1170_v19 = vmul.f32 -500000.0, %v7616_v51 }
 0x33d   :  { %v6044_v6 = vpop.eup %6043  ;;  %v3212_v55 = vadd.f32 %v6042_v46, %v3020_v37  ;;  %6069 = vpow2.f32 %v4473_v44  ;;  %v1361_v4 = vmul.f32 -50000.0, %v7544_v48  ;;  %v1362_v52 = vmul.f32 -50000.0, %v7616_v51 }
 0x33e   :  { %v6046_v41 = vpop.eup %6045  ;;  %v3403_v63 = vadd.f32 %v6044_v6, %v3211_v0  ;;  %6071 = vpow2.f32 %v4663_v24  ;;  %v1251_v47 = vmul.f32 1.442695, %v1169_v28  ;;  %v1253_v43 = vmul.f32 1.442695, %v1170_v19 }
 0x33f   :  { %v6048_v13 = vpop.eup %6047  ;;  %v3404_v36 = vadd.f32 %v6046_v41, %v3212_v55  ;;  %6073 = vpow2.f32 %v4665_v23  ;;  %v1443_v17 = vmul.f32 1.442695, %v1361_v4  ;;  %v1445_v27 = vmul.f32 1.442695, %v1362_v52 }
 0x340   :  { %v6050_v7 = vpop.eup %6049  ;;  %v3595_v11 = vadd.f32 %v6048_v13, %v3403_v63  ;;  %6075 = vpow2.f32 %v1251_v47  ;;  %v1553_v31 = vmul.f32 -5000.0, %v7544_v48  ;;  %v1554_v10 = vmul.f32 -5000.0, %v7616_v51 }
 0x341   :  { %v6052_v26 = vpop.eup %6051  ;;  %v3596_v14 = vadd.f32 %v6050_v7, %v3404_v36  ;;  %6077 = vpow2.f32 %v1253_v43  ;;  %v1745_v34 = vmul.f32 -500.0, %v7544_v48  ;;  %v1746_v45 = vmul.f32 -500.0, %v7616_v51 }
 0x342   :  { %v6054_v3 = vpop.eup %6053  ;;  %v3787_v22 = vadd.f32 %v6052_v26, %v3595_v11  ;;  %6079 = vpow2.f32 %v1443_v17  ;;  %v1635_v50 = vmul.f32 1.442695, %v1553_v31  ;;  %v1637_v58 = vmul.f32 1.442695, %v1554_v10 }
 0x343   :  { %v6056_v49 = vpop.eup %6055  ;;  %v3788_v33 = vadd.f32 %v6054_v3, %v3596_v14  ;;  %6081 = vpow2.f32 %v1445_v27  ;;  %v1827_v57 = vmul.f32 1.442695, %v1745_v34  ;;  %v1829_v39 = vmul.f32 1.442695, %v1746_v45 }
 0x344   :  { %v6058_v61 = vpop.eup %6057  ;;  %v3979_v59 = vadd.f32 %v6056_v49, %v3787_v22  ;;  %6083 = vpow2.f32 %v1635_v50  ;;  %v1937_v18 = vmul.f32 -50.0, %v7544_v48  ;;  %v1938_v29 = vmul.f32 -50.0, %v7616_v51 }
 0x345   :  { %v6060_v53 = vpop.eup %6059  ;;  %v3980_v38 = vadd.f32 %v6058_v61, %v3788_v33  ;;  %6085 = vpow2.f32 %v1637_v58  ;;  %v2129_v1 = vmul.f32 -5.0, %v7544_v48  ;;  %v2130_v5 = vmul.f32 -5.0, %v7616_v51 }
 0x346   :  { %v6062_v54 = vpop.eup %6061  ;;  %v4171_v40 = vadd.f32 %v6060_v53, %v3979_v59  ;;  %6087 = vpow2.f32 %v1827_v57  ;;  %v2019_v42 = vmul.f32 1.442695, %v1937_v18  ;;  %v2021_v21 = vmul.f32 1.442695, %v1938_v29 }
 0x347   :  { %v6064_v44 = vpop.eup %6063  ;;  %v4172_v12 = vadd.f32 %v6062_v54, %v3980_v38  ;;  %6089 = vpow2.f32 %v1829_v39  ;;  %v2211_v37 = vmul.f32 1.442695, %v2129_v1  ;;  %v2213_v24 = vmul.f32 1.442695, %v2130_v5 }
 0x348   :  { %v6066_v23 = vpop.eup %6065  ;;  %v4363_v46 = vadd.f32 %v6064_v44, %v4171_v40  ;;  %6091 = vpow2.f32 %v2019_v42  ;;  %v2321_v0 = vmul.f32 -0.5, %v7544_v48  ;;  %v2322_v28 = vmul.f32 -0.5, %v7616_v51 }
 0x349   :  { %v6068_v19 = vpop.eup %6067  ;;  %v4364_v6 = vadd.f32 %v6066_v23, %v4172_v12  ;;  %6093 = vpow2.f32 %v2021_v21  ;;  %v2513_v55 = vmul.f32 -0.1, %v7544_v48  ;;  %v2514_v4 = vmul.f32 -0.1, %v7616_v51 }
 0x34a   :  { %v6070_v52 = vpop.eup %6069  ;;  %v4555_v41 = vadd.f32 %v6068_v19, %v4363_v46  ;;  %6095 = vpow2.f32 %v2211_v37  ;;  %v2403_v63 = vmul.f32 1.442695, %v2321_v0  ;;  %v2405_v47 = vmul.f32 1.442695, %v2322_v28 }
 0x34b   :  { %v6072_v43 = vpop.eup %6071  ;;  %v4556_v13 = vadd.f32 %v6070_v52, %v4364_v6  ;;  %6097 = vpow2.f32 %v2213_v24  ;;  %v2595_v36 = vmul.f32 1.442695, %v2513_v55  ;;  %v2597_v17 = vmul.f32 1.442695, %v2514_v4 }
 0x34c   :  { %v6074_v27 = vpop.eup %6073  ;;  %v4747_v7 = vadd.f32 %v6072_v43, %v4555_v41  ;;  %6099 = vpow2.f32 %v2403_v63  ;;  %v2705_v11 = vmul.f32 -0.05, %v7544_v48  ;;  %v2706_v31 = vmul.f32 -0.05, %v7616_v51 }
 0x34d   :  { %v6076_v10 = vpop.eup %6075  ;;  %v4748_v26 = vadd.f32 %v6074_v27, %v4556_v13  ;;  %6101 = vpow2.f32 %v2405_v47  ;;  %v2897_v14 = vmul.f32 -0.033333335, %v7544_v48  ;;  %v2898_v34 = vmul.f32 -0.033333335, %v7616_v51 }
 0x34e   :  { %v6078_v45 = vpop.eup %6077  ;;  %6103 = vpow2.f32 %v2595_v36  ;;  %v2787_v3 = vmul.f32 1.442695, %v2705_v11  ;;  %v2789_v22 = vmul.f32 1.442695, %v2706_v31  ;;  %v3089_v50 = vmul.f32 -0.025, %v7544_v48 }
 0x34f   :  { %v6080_v58 = vpop.eup %6079  ;;  %v4870_v49 = vsel %vm4808_vm10, %v4748_v26, 0.0  ;;  %6105 = vpow2.f32 %v2597_v17  ;;  %v2979_v33 = vmul.f32 1.442695, %v2897_v14  ;;  %v2981_v57 = vmul.f32 1.442695, %v2898_v34 }
 0x350   :  { %v6082_v39 = vpop.eup %6081  ;;  %v4929_v61 = vsel %vm84_vm0, %v4870_v49, 0.0  ;;  %v1505_v59 = vadd.f32 %v6080_v58, %v6076_v10  ;;  %6107 = vpow2.f32 %v2787_v3  ;;  %v3090_v18 = vmul.f32 -0.025, %v7616_v51 }
 0x351   :  { %v6084_v29 = vpop.eup %6083  ;;  %v4930_v53 = vadd.f32 %v4929_v61, %v4747_v7  ;;  %v1506_v38 = vadd.f32 %v6082_v39, %v6078_v45  ;;  %6109 = vpow2.f32 %v2789_v22  ;;  %v3171_v1 = vmul.f32 1.442695, %v3089_v50 }
 0x352   :  { %v6086_v5 = vpop.eup %6085  ;;  %v1697_v54 = vadd.f32 %v6084_v29, %v1505_v59  ;;  %6111 = vpow2.f32 %v2979_v33  ;;  %v3173_v40 = vmul.f32 1.442695, %v3090_v18  ;;  %v3281_v42 = vmul.f32 -0.02, %v7544_v48 }
 0x353   :  { %v6088_v21 = vpop.eup %6087  ;;  %4931 = vadd.xlane.f32.xlu1 %v4930_v53  ;;  %v1698_v44 = vadd.f32 %v6086_v5, %v1506_v38  ;;  %6113 = vpow2.f32 %v2981_v57  ;;  %v3282_v12 = vmul.f32 -0.02, %v7616_v51  ;;  %v3473_v37 = vmul.f32 -0.016666668, %v7544_v48 }
 0x354   :  { %v6090_v24 = vpop.eup %6089  ;;  %v1889_v23 = vadd.f32 %v6088_v21, %v1697_v54  ;;  %6115 = vpow2.f32 %v3171_v1  ;;  %v3363_v46 = vmul.f32 1.442695, %v3281_v42  ;;  %v3474_v0 = vmul.f32 -0.016666668, %v7616_v51 }
 0x355   :  { %v6092_v28 = vpop.eup %6091  ;;  %v1890_v19 = vadd.f32 %v6090_v24, %v1698_v44  ;;  %6117 = vpow2.f32 %v3173_v40  ;;  %v3365_v6 = vmul.f32 1.442695, %v3282_v12  ;;  %v3555_v55 = vmul.f32 1.442695, %v3473_v37 }
 0x356   :  { %v6094_v4 = vpop.eup %6093  ;;  %v2081_v52 = vadd.f32 %v6092_v28, %v1889_v23  ;;  %6119 = vpow2.f32 %v3363_v46  ;;  %v3557_v41 = vmul.f32 1.442695, %v3474_v0  ;;  %v3665_v63 = vmul.f32 -0.014285714, %v7544_v48 }
 0x357   :  { %v6096_v47 = vpop.eup %6095  ;;  %v2082_v43 = vadd.f32 %v6094_v4, %v1890_v19  ;;  %6121 = vpow2.f32 %v3365_v6  ;;  %v3666_v13 = vmul.f32 -0.014285714, %v7616_v51  ;;  %v3857_v36 = vmul.f32 -0.005, %v7544_v48 }
 0x358   :  { %v6098_v17 = vpop.eup %6097  ;;  %v2273_v27 = vadd.f32 %v6096_v47, %v2081_v52  ;;  %6123 = vpow2.f32 %v3555_v55  ;;  %v3747_v7 = vmul.f32 1.442695, %v3665_v63  ;;  %v3858_v11 = vmul.f32 -0.005, %v7616_v51 }
 0x359   :  { %v6100_v31 = vpop.eup %6099  ;;  %v2274_v10 = vadd.f32 %v6098_v17, %v2082_v43  ;;  %6125 = vpow2.f32 %v3557_v41  ;;  %v3749_v26 = vmul.f32 1.442695, %v3666_v13  ;;  %v3939_v14 = vmul.f32 1.442695, %v3857_v36 }
 0x35a   :  { %v6102_v34 = vpop.eup %6101  ;;  %v2465_v45 = vadd.f32 %v6100_v31, %v2273_v27  ;;  %6127 = vpow2.f32 %v3747_v7  ;;  %v3941_v3 = vmul.f32 1.442695, %v3858_v11  ;;  %v4049_v22 = vmul.f32 -0.0005, %v7544_v48 }
 0x35b   :  { %v6104_v50 = vpop.eup %6103  ;;  %v2466_v58 = vadd.f32 %v6102_v34, %v2274_v10  ;;  %6129 = vpow2.f32 %v3749_v26  ;;  %v4050_v49 = vmul.f32 -0.0005, %v7616_v51  ;;  %v4241_v33 = vmul.f32 -5e-05, %v7544_v48 }
 0x35c   :  { %v6106_v57 = vpop.eup %6105  ;;  %v2657_v39 = vadd.f32 %v6104_v50, %v2465_v45  ;;  %6131 = vpow2.f32 %v3939_v14  ;;  %v4131_v61 = vmul.f32 1.442695, %v4049_v22  ;;  %v4242_v59 = vmul.f32 -5e-05, %v7616_v51 }
 0x35d   :  { %v6108_v18 = vpop.eup %6107  ;;  %v2658_v29 = vadd.f32 %v6106_v57, %v2466_v58  ;;  %6133 = vpow2.f32 %v3941_v3  ;;  %v4133_v53 = vmul.f32 1.442695, %v4050_v49  ;;  %v4323_v38 = vmul.f32 1.442695, %v4241_v33 }
 0x35e   :  { %v6110_v1 = vpop.eup %6109  ;;  %v2849_v5 = vadd.f32 %v6108_v18, %v2657_v39  ;;  %6135 = vpow2.f32 %v4131_v61  ;;  %v4325_v54 = vmul.f32 1.442695, %v4242_v59  ;;  %v4433_v40 = vmul.f32 -5e-06, %v7544_v48 }
 0x35f   :  { %v6112_v42 = vpop.eup %6111  ;;  %v2850_v21 = vadd.f32 %v6110_v1, %v2658_v29  ;;  %6137 = vpow2.f32 %v4133_v53  ;;  %v4434_v44 = vmul.f32 -5e-06, %v7616_v51  ;;  %v4625_v12 = vmul.f32 -5e-07, %v7544_v48 }
 0x360   :  { %v6114_v37 = vpop.eup %6113  ;;  %v3041_v24 = vadd.f32 %v6112_v42, %v2849_v5  ;;  %6139 = vpow2.f32 %v4323_v38  ;;  %v4515_v23 = vmul.f32 1.442695, %v4433_v40  ;;  %v4626_v46 = vmul.f32 -5e-07, %v7616_v51 }
 0x361   :  { %v6116_v0 = vpop.eup %6115  ;;  %v3042_v28 = vadd.f32 %v6114_v37, %v2850_v21  ;;  %6141 = vpow2.f32 %v4325_v54  ;;  %v4517_v19 = vmul.f32 1.442695, %v4434_v44  ;;  %v4707_v6 = vmul.f32 1.442695, %v4625_v12 }
 0x362   :  { %v6118_v55 = vpop.eup %6117  ;;  %v3233_v4 = vadd.f32 %v6116_v0, %v3041_v24  ;;  %6143 = vpow2.f32 %v4515_v23  ;;  %v4709_v52 = vmul.f32 1.442695, %v4626_v46  ;;  %v1171_v41 = vmul.f32 -500000.0, %v7571_v2 }
 0x363   :  { %v6120_v63 = vpop.eup %6119  ;;  %v3234_v47 = vadd.f32 %v6118_v55, %v3042_v28  ;;  %6145 = vpow2.f32 %v4517_v19  ;;  %v1172_v48 = vmul.f32 -500000.0, %v7624_v15  ;;  %v1363_v43 = vmul.f32 -50000.0, %v7571_v2 }
 0x364   :  { %v6122_v13 = vpop.eup %6121  ;;  %v3425_v51 = vadd.f32 %v6120_v63, %v3233_v4  ;;  %6147 = vpow2.f32 %v4707_v6  ;;  %v1255_v36 = vmul.f32 1.442695, %v1171_v41  ;;  %v1364_v17 = vmul.f32 -50000.0, %v7624_v15 }
 0x365   :  { %v6124_v27 = vpop.eup %6123  ;;  %v3426_v7 = vadd.f32 %v6122_v13, %v3234_v47  ;;  %6149 = vpow2.f32 %v4709_v52  ;;  %v1257_v11 = vmul.f32 1.442695, %v1172_v48  ;;  %v1447_v31 = vmul.f32 1.442695, %v1363_v43 }
 0x366   :  { %v6126_v10 = vpop.eup %6125  ;;  %v3617_v26 = vadd.f32 %v6124_v27, %v3425_v51  ;;  %6151 = vpow2.f32 %v1255_v36  ;;  %v1449_v14 = vmul.f32 1.442695, %v1364_v17  ;;  %v1555_v34 = vmul.f32 -5000.0, %v7571_v2 }
 0x367   :  { %v6128_v45 = vpop.eup %6127  ;;  %v3618_v3 = vadd.f32 %v6126_v10, %v3426_v7  ;;  %6153 = vpow2.f32 %v1257_v11  ;;  %v1556_v22 = vmul.f32 -5000.0, %v7624_v15  ;;  %v1747_v50 = vmul.f32 -500.0, %v7571_v2 }
 0x368   :  { %v6130_v58 = vpop.eup %6129  ;;  %v3809_v49 = vadd.f32 %v6128_v45, %v3617_v26  ;;  %6155 = vpow2.f32 %v1447_v31  ;;  %v1639_v33 = vmul.f32 1.442695, %v1555_v34  ;;  %v1748_v57 = vmul.f32 -500.0, %v7624_v15 }
 0x369   :  { %v6132_v39 = vpop.eup %6131  ;;  %v3810_v61 = vadd.f32 %v6130_v58, %v3618_v3  ;;  %6157 = vpow2.f32 %v1449_v14  ;;  %v1641_v59 = vmul.f32 1.442695, %v1556_v22  ;;  %v1831_v18 = vmul.f32 1.442695, %v1747_v50 }
 0x36a   :  { %v6134_v29 = vpop.eup %6133  ;;  %v4001_v53 = vadd.f32 %v6132_v39, %v3809_v49  ;;  %6159 = vpow2.f32 %v1639_v33  ;;  %v1833_v38 = vmul.f32 1.442695, %v1748_v57  ;;  %v1939_v1 = vmul.f32 -50.0, %v7571_v2 }
 0x36b   :  { %v6136_v5 = vpop.eup %6135  ;;  %v4002_v54 = vadd.f32 %v6134_v29, %v3810_v61  ;;  %6161 = vpow2.f32 %v1641_v59  ;;  %v1940_v40 = vmul.f32 -50.0, %v7624_v15  ;;  %v2131_v42 = vmul.f32 -5.0, %v7571_v2 }
 0x36c   :  { %v6138_v21 = vpop.eup %6137  ;;  %v4193_v44 = vadd.f32 %v6136_v5, %v4001_v53  ;;  %6163 = vpow2.f32 %v1831_v18  ;;  %v2023_v12 = vmul.f32 1.442695, %v1939_v1  ;;  %v2132_v37 = vmul.f32 -5.0, %v7624_v15 }
 0x36d   :  { %v6140_v24 = vpop.eup %6139  ;;  %v4194_v23 = vadd.f32 %v6138_v21, %v4002_v54  ;;  %6165 = vpow2.f32 %v1833_v38  ;;  %v2025_v46 = vmul.f32 1.442695, %v1940_v40  ;;  %v2215_v0 = vmul.f32 1.442695, %v2131_v42 }
 0x36e   :  { %v6142_v28 = vpop.eup %6141  ;;  %v4385_v19 = vadd.f32 %v6140_v24, %v4193_v44  ;;  %6167 = vpow2.f32 %v2023_v12  ;;  %v2217_v6 = vmul.f32 1.442695, %v2132_v37  ;;  %v2323_v55 = vmul.f32 -0.5, %v7571_v2 }
 0x36f   :  { %v6144_v4 = vpop.eup %6143  ;;  %v4386_v52 = vadd.f32 %v6142_v28, %v4194_v23  ;;  %6169 = vpow2.f32 %v2025_v46  ;;  %v2324_v41 = vmul.f32 -0.5, %v7624_v15  ;;  %v2515_v63 = vmul.f32 -0.1, %v7571_v2 }
 0x370   :  { %v6146_v47 = vpop.eup %6145  ;;  %v4577_v48 = vadd.f32 %v6144_v4, %v4385_v19  ;;  %6171 = vpow2.f32 %v2215_v0  ;;  %v2407_v43 = vmul.f32 1.442695, %v2323_v55  ;;  %v2516_v13 = vmul.f32 -0.1, %v7624_v15 }
 0x371   :  { %v6148_v51 = vpop.eup %6147  ;;  %v4578_v36 = vadd.f32 %v6146_v47, %v4386_v52  ;;  %6173 = vpow2.f32 %v2217_v6  ;;  %v2409_v17 = vmul.f32 1.442695, %v2324_v41  ;;  %v2599_v27 = vmul.f32 1.442695, %v2515_v63 }
 0x372   :  { %v6150_v7 = vpop.eup %6149  ;;  %v4769_v11 = vadd.f32 %v6148_v51, %v4577_v48  ;;  %6175 = vpow2.f32 %v2407_v43  ;;  %v2601_v31 = vmul.f32 1.442695, %v2516_v13  ;;  %v2707_v10 = vmul.f32 -0.05, %v7571_v2 }
 0x373   :  { %v6152_v26 = vpop.eup %6151  ;;  %v4770_v14 = vadd.f32 %v6150_v7, %v4578_v36  ;;  %6177 = vpow2.f32 %v2409_v17  ;;  %v2708_v34 = vmul.f32 -0.05, %v7624_v15  ;;  %v2899_v45 = vmul.f32 -0.033333335, %v7571_v2 }
 0x374   :  { %v6154_v3 = vpop.eup %6153  ;;  %6179 = vpow2.f32 %v2599_v27  ;;  %v2791_v22 = vmul.f32 1.442695, %v2707_v10  ;;  %v2900_v50 = vmul.f32 -0.033333335, %v7624_v15  ;;  %v3091_v58 = vmul.f32 -0.025, %v7571_v2 }
 0x375   :  { %v6156_v49 = vpop.eup %6155  ;;  %v4892_v33 = vsel %vm4808_vm10, %v4770_v14, 0.0  ;;  %6181 = vpow2.f32 %v2601_v31  ;;  %v2793_v57 = vmul.f32 1.442695, %v2708_v34  ;;  %v2983_v39 = vmul.f32 1.442695, %v2899_v45 }
 0x376   :  { %v6158_v61 = vpop.eup %6157  ;;  %v4973_v59 = vsel %vm84_vm0, %v4892_v33, 0.0  ;;  %v1507_v18 = vadd.f32 %v6156_v49, %v6152_v26  ;;  %6183 = vpow2.f32 %v2791_v22  ;;  %v2985_v29 = vmul.f32 1.442695, %v2900_v50 }
 0x377   :  { %v6160_v53 = vpop.eup %6159  ;;  %v4974_v38 = vadd.f32 %v4973_v59, %v4769_v11  ;;  %v1508_v1 = vadd.f32 %v6158_v61, %v6154_v3  ;;  %6185 = vpow2.f32 %v2793_v57  ;;  %v3092_v5 = vmul.f32 -0.025, %v7624_v15 }
 0x378   :  { %v6162_v54 = vpop.eup %6161  ;;  %v1699_v40 = vadd.f32 %v6160_v53, %v1507_v18  ;;  %6187 = vpow2.f32 %v2983_v39  ;;  %v3175_v42 = vmul.f32 1.442695, %v3091_v58  ;;  %v3283_v21 = vmul.f32 -0.02, %v7571_v2 }
 0x379   :  { %v6164_v44 = vpop.eup %6163  ;;  %4975 = vadd.xlane.f32.xlu0 %v4974_v38  ;;  %v1700_v12 = vadd.f32 %v6162_v54, %v1508_v1  ;;  %6189 = vpow2.f32 %v2985_v29  ;;  %v3177_v37 = vmul.f32 1.442695, %v3092_v5  ;;  %v3284_v24 = vmul.f32 -0.02, %v7624_v15 }
 0x37a   :  { %v6166_v23 = vpop.eup %6165  ;;  %v1891_v46 = vadd.f32 %v6164_v44, %v1699_v40  ;;  %6191 = vpow2.f32 %v3175_v42  ;;  %v3367_v0 = vmul.f32 1.442695, %v3283_v21  ;;  %v3475_v28 = vmul.f32 -0.016666668, %v7571_v2 }
 0x37b   :  { %v6168_v19 = vpop.eup %6167  ;;  %v1892_v6 = vadd.f32 %v6166_v23, %v1700_v12  ;;  %6193 = vpow2.f32 %v3177_v37  ;;  %v3369_v55 = vmul.f32 1.442695, %v3284_v24  ;;  %v3476_v4 = vmul.f32 -0.016666668, %v7624_v15 }
 0x37c   :  { %v6170_v52 = vpop.eup %6169  ;;  %v2083_v41 = vadd.f32 %v6168_v19, %v1891_v46  ;;  %6195 = vpow2.f32 %v3367_v0  ;;  %v3559_v63 = vmul.f32 1.442695, %v3475_v28  ;;  %v3667_v47 = vmul.f32 -0.014285714, %v7571_v2 }
 0x37d   :  { %v6172_v48 = vpop.eup %6171  ;;  %v2084_v43 = vadd.f32 %v6170_v52, %v1892_v6  ;;  %6197 = vpow2.f32 %v3369_v55  ;;  %v3561_v13 = vmul.f32 1.442695, %v3476_v4  ;;  %v3668_v51 = vmul.f32 -0.014285714, %v7624_v15 }
 0x37e   :  { %v6174_v36 = vpop.eup %6173  ;;  %v2275_v17 = vadd.f32 %v6172_v48, %v2083_v41  ;;  %6199 = vpow2.f32 %v3559_v63  ;;  %v3751_v27 = vmul.f32 1.442695, %v3667_v47  ;;  %v3859_v7 = vmul.f32 -0.005, %v7571_v2 }
 0x37f   :  { %v6176_v11 = vpop.eup %6175  ;;  %v2276_v31 = vadd.f32 %v6174_v36, %v2084_v43  ;;  %6201 = vpow2.f32 %v3561_v13  ;;  %v3753_v10 = vmul.f32 1.442695, %v3668_v51  ;;  %v3860_v26 = vmul.f32 -0.005, %v7624_v15 }
 0x380   :  { %v6178_v14 = vpop.eup %6177  ;;  %v2467_v34 = vadd.f32 %v6176_v11, %v2275_v17  ;;  %6203 = vpow2.f32 %v3751_v27  ;;  %v3943_v45 = vmul.f32 1.442695, %v3859_v7  ;;  %v4051_v3 = vmul.f32 -0.0005, %v7571_v2 }
 0x381   :  { %v6180_v22 = vpop.eup %6179  ;;  %v2468_v50 = vadd.f32 %v6178_v14, %v2276_v31  ;;  %6205 = vpow2.f32 %v3753_v10  ;;  %v3945_v58 = vmul.f32 1.442695, %v3860_v26  ;;  %v4052_v49 = vmul.f32 -0.0005, %v7624_v15 }
 0x382   :  { %v6182_v33 = vpop.eup %6181  ;;  %v2659_v57 = vadd.f32 %v6180_v22, %v2467_v34  ;;  %6207 = vpow2.f32 %v3943_v45  ;;  %v4135_v39 = vmul.f32 1.442695, %v4051_v3  ;;  %v4243_v61 = vmul.f32 -5e-05, %v7571_v2 }
 0x383   :  { %v6184_v59 = vpop.eup %6183  ;;  %v2660_v18 = vadd.f32 %v6182_v33, %v2468_v50  ;;  %6209 = vpow2.f32 %v3945_v58  ;;  %v4137_v29 = vmul.f32 1.442695, %v4052_v49  ;;  %v4244_v53 = vmul.f32 -5e-05, %v7624_v15 }
 0x384   :  { %v6186_v38 = vpop.eup %6185  ;;  %v2851_v1 = vadd.f32 %v6184_v59, %v2659_v57  ;;  %6211 = vpow2.f32 %v4135_v39  ;;  %v4327_v5 = vmul.f32 1.442695, %v4243_v61  ;;  %v4435_v54 = vmul.f32 -5e-06, %v7571_v2 }
 0x385   :  { %v6188_v40 = vpop.eup %6187  ;;  %v2852_v42 = vadd.f32 %v6186_v38, %v2660_v18  ;;  %6213 = vpow2.f32 %v4137_v29  ;;  %v4329_v21 = vmul.f32 1.442695, %v4244_v53  ;;  %v4436_v44 = vmul.f32 -5e-06, %v7624_v15 }
 0x386   :  { %v6190_v12 = vpop.eup %6189  ;;  %v3043_v37 = vadd.f32 %v6188_v40, %v2851_v1  ;;  %6215 = vpow2.f32 %v4327_v5  ;;  %v4519_v24 = vmul.f32 1.442695, %v4435_v54  ;;  %v4627_v23 = vmul.f32 -5e-07, %v7571_v2 }
 0x387   :  { %v6192_v46 = vpop.eup %6191  ;;  %v3044_v0 = vadd.f32 %v6190_v12, %v2852_v42  ;;  %6217 = vpow2.f32 %v4329_v21  ;;  %v4521_v28 = vmul.f32 1.442695, %v4436_v44  ;;  %v4628_v19 = vmul.f32 -5e-07, %v7624_v15 }
 0x388   :  { %v6194_v6 = vpop.eup %6193  ;;  %v3235_v55 = vadd.f32 %v6192_v46, %v3043_v37  ;;  %6219 = vpow2.f32 %v4519_v24  ;;  %v4711_v4 = vmul.f32 1.442695, %v4627_v23  ;;  %v1149_v52 = vmul.f32 -500000.0, %v7591_v25 }
 0x389   :  { %v6196_v41 = vpop.eup %6195  ;;  %v3236_v63 = vadd.f32 %v6194_v6, %v3044_v0  ;;  %6221 = vpow2.f32 %v4521_v28  ;;  %v4713_v47 = vmul.f32 1.442695, %v4628_v19  ;;  %v1150_v48 = vmul.f32 -500000.0, %v7630_v9 }
 0x38a   :  { %v6198_v43 = vpop.eup %6197  ;;  %v3427_v2 = vadd.f32 %v6196_v41, %v3235_v55  ;;  %6223 = vpow2.f32 %v4711_v4  ;;  %v1211_v13 = vmul.f32 1.442695, %v1149_v52  ;;  %v1341_v51 = vmul.f32 -50000.0, %v7591_v25 }
 0x38b   :  { %v6200_v36 = vpop.eup %6199  ;;  %v3428_v15 = vadd.f32 %v6198_v43, %v3236_v63  ;;  %6225 = vpow2.f32 %v4713_v47  ;;  %v1213_v17 = vmul.f32 1.442695, %v1150_v48  ;;  %v1342_v27 = vmul.f32 -50000.0, %v7630_v9 }
 0x38c   :  { %v6202_v7 = vpop.eup %6201  ;;  %v3619_v11 = vadd.f32 %v6200_v36, %v3427_v2  ;;  %6227 = vpow2.f32 %v1211_v13  ;;  %v1403_v31 = vmul.f32 1.442695, %v1341_v51  ;;  %v1533_v10 = vmul.f32 -5000.0, %v7591_v25 }
 0x38d   :  { %v6204_v26 = vpop.eup %6203  ;;  %v3620_v14 = vadd.f32 %v6202_v7, %v3428_v15  ;;  %6229 = vpow2.f32 %v1213_v17  ;;  %v1405_v34 = vmul.f32 1.442695, %v1342_v27  ;;  %v1534_v45 = vmul.f32 -5000.0, %v7630_v9 }
 0x38e   :  { %v6206_v3 = vpop.eup %6205  ;;  %v3811_v22 = vadd.f32 %v6204_v26, %v3619_v11  ;;  %6231 = vpow2.f32 %v1403_v31  ;;  %v1595_v50 = vmul.f32 1.442695, %v1533_v10  ;;  %v1725_v58 = vmul.f32 -500.0, %v7591_v25 }
 0x38f   :  { %v6208_v49 = vpop.eup %6207  ;;  %v3812_v33 = vadd.f32 %v6206_v3, %v3620_v14  ;;  %6233 = vpow2.f32 %v1405_v34  ;;  %v1597_v57 = vmul.f32 1.442695, %v1534_v45  ;;  %v1726_v39 = vmul.f32 -500.0, %v7630_v9 }
 0x390   :  { %v6210_v61 = vpop.eup %6209  ;;  %v4003_v59 = vadd.f32 %v6208_v49, %v3811_v22  ;;  %6235 = vpow2.f32 %v1595_v50  ;;  %v1787_v18 = vmul.f32 1.442695, %v1725_v58  ;;  %v1917_v29 = vmul.f32 -50.0, %v7591_v25 }
 0x391   :  { %v6212_v53 = vpop.eup %6211  ;;  %v4004_v38 = vadd.f32 %v6210_v61, %v3812_v33  ;;  %6237 = vpow2.f32 %v1597_v57  ;;  %v1789_v1 = vmul.f32 1.442695, %v1726_v39  ;;  %v1918_v5 = vmul.f32 -50.0, %v7630_v9 }
 0x392   :  { %v6214_v54 = vpop.eup %6213  ;;  %v4195_v40 = vadd.f32 %v6212_v53, %v4003_v59  ;;  %6239 = vpow2.f32 %v1787_v18  ;;  %v1979_v42 = vmul.f32 1.442695, %v1917_v29  ;;  %v2109_v21 = vmul.f32 -5.0, %v7591_v25 }
 0x393   :  { %v6216_v44 = vpop.eup %6215  ;;  %v4196_v12 = vadd.f32 %v6214_v54, %v4004_v38  ;;  %6241 = vpow2.f32 %v1789_v1  ;;  %v1981_v37 = vmul.f32 1.442695, %v1918_v5  ;;  %v2110_v24 = vmul.f32 -5.0, %v7630_v9 }
 0x394   :  { %v6218_v23 = vpop.eup %6217  ;;  %v4387_v46 = vadd.f32 %v6216_v44, %v4195_v40  ;;  %6243 = vpow2.f32 %v1979_v42  ;;  %v2171_v0 = vmul.f32 1.442695, %v2109_v21  ;;  %v2301_v28 = vmul.f32 -0.5, %v7591_v25 }
 0x395   :  { %v6220_v19 = vpop.eup %6219  ;;  %v4388_v6 = vadd.f32 %v6218_v23, %v4196_v12  ;;  %6245 = vpow2.f32 %v1981_v37  ;;  %v2173_v55 = vmul.f32 1.442695, %v2110_v24  ;;  %v2302_v4 = vmul.f32 -0.5, %v7630_v9 }
 0x396   :  { %v6222_v52 = vpop.eup %6221  ;;  %v4579_v41 = vadd.f32 %v6220_v19, %v4387_v46  ;;  %6247 = vpow2.f32 %v2171_v0  ;;  %v2363_v63 = vmul.f32 1.442695, %v2301_v28  ;;  %v2493_v47 = vmul.f32 -0.1, %v7591_v25 }
 0x397   :  { %v6224_v48 = vpop.eup %6223  ;;  %v4580_v43 = vadd.f32 %v6222_v52, %v4388_v6  ;;  %6249 = vpow2.f32 %v2173_v55  ;;  %v2365_v2 = vmul.f32 1.442695, %v2302_v4  ;;  %v2494_v13 = vmul.f32 -0.1, %v7630_v9 }
 0x398   :  { %v6226_v51 = vpop.eup %6225  ;;  %v4771_v36 = vadd.f32 %v6224_v48, %v4579_v41  ;;  %6251 = vpow2.f32 %v2363_v63  ;;  %v2555_v15 = vmul.f32 1.442695, %v2493_v47  ;;  %v2685_v17 = vmul.f32 -0.05, %v7591_v25 }
 0x399   :  { %v6228_v27 = vpop.eup %6227  ;;  %v4772_v7 = vadd.f32 %v6226_v51, %v4580_v43  ;;  %6253 = vpow2.f32 %v2365_v2  ;;  %v2557_v11 = vmul.f32 1.442695, %v2494_v13  ;;  %v2686_v31 = vmul.f32 -0.05, %v7630_v9 }
 0x39a   :  { %v6230_v10 = vpop.eup %6229  ;;  %6255 = vpow2.f32 %v2555_v15  ;;  %v2747_v26 = vmul.f32 1.442695, %v2685_v17  ;;  %v2877_v14 = vmul.f32 -0.033333335, %v7591_v25  ;;  %v2878_v34 = vmul.f32 -0.033333335, %v7630_v9 }
 0x39b   :  { %v6232_v45 = vpop.eup %6231  ;;  %v4894_v3 = vsel %vm4808_vm10, %v4772_v7, 0.0  ;;  %6257 = vpow2.f32 %v2557_v11  ;;  %v2749_v22 = vmul.f32 1.442695, %v2686_v31  ;;  %v3069_v50 = vmul.f32 -0.025, %v7591_v25 }
 0x39c   :  { %v6234_v58 = vpop.eup %6233  ;;  %v4977_v49 = vsel %vm84_vm0, %v4894_v3, 0.0  ;;  %v1485_v33 = vadd.f32 %v6232_v45, %v6228_v27  ;;  %6259 = vpow2.f32 %v2747_v26  ;;  %v2939_v57 = vmul.f32 1.442695, %v2877_v14 }
 0x39d   :  { %v6236_v39 = vpop.eup %6235  ;;  %v4978_v61 = vadd.f32 %v4977_v49, %v4771_v36  ;;  %v1486_v59 = vadd.f32 %v6234_v58, %v6230_v10  ;;  %6261 = vpow2.f32 %v2749_v22  ;;  %v2941_v18 = vmul.f32 1.442695, %v2878_v34 }
 0x39e   :  { %v6238_v29 = vpop.eup %6237  ;;  %v1677_v53 = vadd.f32 %v6236_v39, %v1485_v33  ;;  %6263 = vpow2.f32 %v2939_v57  ;;  %v3070_v38 = vmul.f32 -0.025, %v7630_v9  ;;  %v3131_v1 = vmul.f32 1.442695, %v3069_v50 }
 0x39f   :  { %v6240_v5 = vpop.eup %6239  ;;  %4979 = vadd.xlane.f32.xlu1 %v4978_v61  ;;  %v1678_v54 = vadd.f32 %v6238_v29, %v1486_v59  ;;  %6265 = vpow2.f32 %v2941_v18  ;;  %v3261_v40 = vmul.f32 -0.02, %v7591_v25  ;;  %v3262_v42 = vmul.f32 -0.02, %v7630_v9 }
 0x3a0   :  { %v6242_v21 = vpop.eup %6241  ;;  %v1869_v44 = vadd.f32 %v6240_v5, %v1677_v53  ;;  %6267 = vpow2.f32 %v3131_v1  ;;  %v3133_v12 = vmul.f32 1.442695, %v3070_v38  ;;  %v3453_v37 = vmul.f32 -0.016666668, %v7591_v25 }
 0x3a1   :  { %v6244_v24 = vpop.eup %6243  ;;  %v1870_v23 = vadd.f32 %v6242_v21, %v1678_v54  ;;  %v3323_v46 = vmul.f32 1.442695, %v3261_v40  ;;  %v3325_v0 = vmul.f32 1.442695, %v3262_v42  ;;  %v3454_v28 = vmul.f32 -0.016666668, %v7630_v9 }
 0x3a2   :  { %v6246_v19 = vpop.eup %6245  ;;  %v2061_v6 = vadd.f32 %v6244_v24, %v1869_v44  ;;  %6269 = vpow2.f32 %v3133_v12  ;;  %v3515_v55 = vmul.f32 1.442695, %v3453_v37  ;;  %v3645_v4 = vmul.f32 -0.014285714, %v7591_v25 }
 0x3a3   :  { %v6248_v52 = vpop.eup %6247  ;;  %v2062_v41 = vadd.f32 %v6246_v19, %v1870_v23  ;;  %6271 = vpow2.f32 %v3323_v46  ;;  %v3517_v63 = vmul.f32 1.442695, %v3454_v28  ;;  %v3646_v47 = vmul.f32 -0.014285714, %v7630_v9 }
 0x3a4   :  { %v6250_v48 = vpop.eup %6249  ;;  %v2253_v43 = vadd.f32 %v6248_v52, %v2061_v6  ;;  %6273 = vpow2.f32 %v3325_v0  ;;  %v3707_v2 = vmul.f32 1.442695, %v3645_v4  ;;  %v3837_v13 = vmul.f32 -0.005, %v7591_v25 }
 0x3a5   :  { %v6252_v51 = vpop.eup %6251  ;;  %v2254_v36 = vadd.f32 %v6250_v48, %v2062_v41  ;;  %6275 = vpow2.f32 %v3515_v55  ;;  %v3709_v15 = vmul.f32 1.442695, %v3646_v47  ;;  %v3838_v17 = vmul.f32 -0.005, %v7630_v9 }
 0x3a6   :  { %v6254_v27 = vpop.eup %6253  ;;  %v2445_v7 = vadd.f32 %v6252_v51, %v2253_v43  ;;  %6277 = vpow2.f32 %v3517_v63  ;;  %v3899_v11 = vmul.f32 1.442695, %v3837_v13  ;;  %v4029_v31 = vmul.f32 -0.0005, %v7591_v25 }
 0x3a7   :  { %v6256_v10 = vpop.eup %6255  ;;  %v2446_v26 = vadd.f32 %v6254_v27, %v2254_v36  ;;  %6279 = vpow2.f32 %v3707_v2  ;;  %v3901_v14 = vmul.f32 1.442695, %v3838_v17  ;;  %v4030_v34 = vmul.f32 -0.0005, %v7630_v9 }
 0x3a8   :  { %v6258_v45 = vpop.eup %6257  ;;  %v2637_v3 = vadd.f32 %v6256_v10, %v2445_v7  ;;  %6281 = vpow2.f32 %v3709_v15  ;;  %v4091_v22 = vmul.f32 1.442695, %v4029_v31  ;;  %v4221_v50 = vmul.f32 -5e-05, %v7591_v25 }
 0x3a9   :  { %v6260_v58 = vpop.eup %6259  ;;  %v2638_v49 = vadd.f32 %v6258_v45, %v2446_v26  ;;  %6283 = vpow2.f32 %v3899_v11  ;;  %v4093_v33 = vmul.f32 1.442695, %v4030_v34  ;;  %v4222_v57 = vmul.f32 -5e-05, %v7630_v9 }
 0x3aa   :  { %v6262_v39 = vpop.eup %6261  ;;  %v2829_v61 = vadd.f32 %v6260_v58, %v2637_v3  ;;  %6285 = vpow2.f32 %v3901_v14  ;;  %v4283_v59 = vmul.f32 1.442695, %v4221_v50  ;;  %v4413_v18 = vmul.f32 -5e-06, %v7591_v25 }
 0x3ab   :  { %v6264_v29 = vpop.eup %6263  ;;  %v2830_v53 = vadd.f32 %v6262_v39, %v2638_v49  ;;  %6287 = vpow2.f32 %v4091_v22  ;;  %v4285_v38 = vmul.f32 1.442695, %v4222_v57  ;;  %v4414_v1 = vmul.f32 -5e-06, %v7630_v9 }
 0x3ac   :  { %v6266_v5 = vpop.eup %6265  ;;  %v3021_v54 = vadd.f32 %v6264_v29, %v2829_v61  ;;  %6289 = vpow2.f32 %v4093_v33  ;;  %v4475_v40 = vmul.f32 1.442695, %v4413_v18  ;;  %v4605_v42 = vmul.f32 -5e-07, %v7591_v25 }
 0x3ad   :  { %v6268_v21 = vpop.eup %6267  ;;  %v3022_v44 = vadd.f32 %v6266_v5, %v2830_v53  ;;  %6291 = vpow2.f32 %v4283_v59  ;;  %v4477_v12 = vmul.f32 1.442695, %v4414_v1  ;;  %v4606_v37 = vmul.f32 -5e-07, %v7630_v9 }
 0x3ae   :  { %v3213_v24 = vadd.f32 %v6268_v21, %v3021_v54  ;;  %6293 = vpow2.f32 %v4285_v38  ;;  %v4667_v23 = vmul.f32 1.442695, %v4605_v42  ;;  %v1151_v46 = vmul.f32 -500000.0, %v7607_v35 }
 0x3af   :  { %v6270_v0 = vpop.eup %6269  ;;  %6295 = vpow2.f32 %v4475_v40  ;;  %v4669_v28 = vmul.f32 1.442695, %v4606_v37  ;;  %v1152_v19 = vmul.f32 -500000.0, %v7654_v32  ;;  %v1343_v6 = vmul.f32 -50000.0, %v7607_v35 }
 0x3b0   :  { %v6272_v55 = vpop.eup %6271  ;;  %v3214_v25 = vadd.f32 %v6270_v0, %v3022_v44  ;;  %6297 = vpow2.f32 %v4477_v12  ;;  %v1215_v4 = vmul.f32 1.442695, %v1151_v46  ;;  %v1344_v52 = vmul.f32 -50000.0, %v7654_v32 }
 0x3b1   :  { %v6274_v41 = vpop.eup %6273  ;;  %v3405_v9 = vadd.f32 %v6272_v55, %v3213_v24  ;;  %6299 = vpow2.f32 %v4667_v23  ;;  %v1217_v63 = vmul.f32 1.442695, %v1152_v19  ;;  %v1407_v47 = vmul.f32 1.442695, %v1343_v6 }
 0x3b2   :  { %v6276_v48 = vpop.eup %6275  ;;  %v3406_v43 = vadd.f32 %v6274_v41, %v3214_v25  ;;  %6301 = vpow2.f32 %v4669_v28  ;;  %v1409_v2 = vmul.f32 1.442695, %v1344_v52  ;;  %v1535_v13 = vmul.f32 -5000.0, %v7607_v35 }
 0x3b3   :  { %v6278_v51 = vpop.eup %6277  ;;  %v3597_v36 = vadd.f32 %v6276_v48, %v3405_v9  ;;  %6303 = vpow2.f32 %v1215_v4  ;;  %v1536_v15 = vmul.f32 -5000.0, %v7654_v32  ;;  %v1727_v17 = vmul.f32 -500.0, %v7607_v35 }
 0x3b4   :  { %v6280_v27 = vpop.eup %6279  ;;  %v3598_v7 = vadd.f32 %v6278_v51, %v3406_v43  ;;  %6305 = vpow2.f32 %v1217_v63  ;;  %v1599_v11 = vmul.f32 1.442695, %v1535_v13  ;;  %v1728_v31 = vmul.f32 -500.0, %v7654_v32 }
 0x3b5   :  { %v6282_v10 = vpop.eup %6281  ;;  %v3789_v26 = vadd.f32 %v6280_v27, %v3597_v36  ;;  %6307 = vpow2.f32 %v1407_v47  ;;  %v1601_v14 = vmul.f32 1.442695, %v1536_v15  ;;  %v1791_v34 = vmul.f32 1.442695, %v1727_v17 }
 0x3b6   :  { %v6284_v45 = vpop.eup %6283  ;;  %v3790_v3 = vadd.f32 %v6282_v10, %v3598_v7  ;;  %6309 = vpow2.f32 %v1409_v2  ;;  %v1793_v22 = vmul.f32 1.442695, %v1728_v31  ;;  %v1919_v50 = vmul.f32 -50.0, %v7607_v35 }
 0x3b7   :  { %v6286_v58 = vpop.eup %6285  ;;  %v3981_v49 = vadd.f32 %v6284_v45, %v3789_v26  ;;  %6311 = vpow2.f32 %v1599_v11  ;;  %v1920_v33 = vmul.f32 -50.0, %v7654_v32  ;;  %v2111_v57 = vmul.f32 -5.0, %v7607_v35 }
 0x3b8   :  { %v6288_v39 = vpop.eup %6287  ;;  %v3982_v61 = vadd.f32 %v6286_v58, %v3790_v3  ;;  %6313 = vpow2.f32 %v1601_v14  ;;  %v1983_v59 = vmul.f32 1.442695, %v1919_v50  ;;  %v2112_v18 = vmul.f32 -5.0, %v7654_v32 }
 0x3b9   :  { %v6290_v29 = vpop.eup %6289  ;;  %v4173_v53 = vadd.f32 %v6288_v39, %v3981_v49  ;;  %6315 = vpow2.f32 %v1791_v34  ;;  %v1985_v38 = vmul.f32 1.442695, %v1920_v33  ;;  %v2175_v1 = vmul.f32 1.442695, %v2111_v57 }
 0x3ba   :  { %v6292_v5 = vpop.eup %6291  ;;  %v4174_v54 = vadd.f32 %v6290_v29, %v3982_v61  ;;  %6317 = vpow2.f32 %v1793_v22  ;;  %v2177_v40 = vmul.f32 1.442695, %v2112_v18  ;;  %v2303_v42 = vmul.f32 -0.5, %v7607_v35 }
 0x3bb   :  { %v6294_v21 = vpop.eup %6293  ;;  %v4365_v44 = vadd.f32 %v6292_v5, %v4173_v53  ;;  %6319 = vpow2.f32 %v1983_v59  ;;  %v2304_v12 = vmul.f32 -0.5, %v7654_v32  ;;  %v2495_v37 = vmul.f32 -0.1, %v7607_v35 }
 0x3bc   :  { %v6296_v24 = vpop.eup %6295  ;;  %v4366_v23 = vadd.f32 %v6294_v21, %v4174_v54  ;;  %6321 = vpow2.f32 %v1985_v38  ;;  %v2367_v46 = vmul.f32 1.442695, %v2303_v42  ;;  %v2496_v0 = vmul.f32 -0.1, %v7654_v32 }
 0x3bd   :  { %v6298_v28 = vpop.eup %6297  ;;  %v4557_v19 = vadd.f32 %v6296_v24, %v4365_v44  ;;  %6323 = vpow2.f32 %v2175_v1  ;;  %v2369_v6 = vmul.f32 1.442695, %v2304_v12  ;;  %v2559_v55 = vmul.f32 1.442695, %v2495_v37 }
 0x3be   :  { %v6300_v25 = vpop.eup %6299  ;;  %v4558_v4 = vadd.f32 %v6298_v28, %v4366_v23  ;;  %6325 = vpow2.f32 %v2177_v40  ;;  %v2561_v52 = vmul.f32 1.442695, %v2496_v0  ;;  %v2687_v41 = vmul.f32 -0.05, %v7607_v35 }
 0x3bf   :  { %v6302_v9 = vpop.eup %6301  ;;  %v4749_v63 = vadd.f32 %v6300_v25, %v4557_v19  ;;  %6327 = vpow2.f32 %v2367_v46  ;;  %v2688_v47 = vmul.f32 -0.05, %v7654_v32  ;;  %v2879_v48 = vmul.f32 -0.033333335, %v7607_v35 }
 0x3c0   :  { %v6304_v43 = vpop.eup %6303  ;;  %v4750_v2 = vadd.f32 %v6302_v9, %v4558_v4  ;;  %6329 = vpow2.f32 %v2369_v6  ;;  %v2751_v13 = vmul.f32 1.442695, %v2687_v41  ;;  %v2880_v51 = vmul.f32 -0.033333335, %v7654_v32 }
 0x3c1   :  { %v6306_v36 = vpop.eup %6305  ;;  %6331 = vpow2.f32 %v2559_v55  ;;  %v2753_v15 = vmul.f32 1.442695, %v2688_v47  ;;  %v2943_v17 = vmul.f32 1.442695, %v2879_v48  ;;  %v3071_v27 = vmul.f32 -0.025, %v7607_v35 }
 0x3c2   :  { %v6308_v7 = vpop.eup %6307  ;;  %v4872_v11 = vsel %vm4808_vm10, %v4750_v2, 0.0  ;;  %6333 = vpow2.f32 %v2561_v52  ;;  %v2945_v31 = vmul.f32 1.442695, %v2880_v51  ;;  %v3072_v10 = vmul.f32 -0.025, %v7654_v32 }
 0x3c3   :  { %v6310_v26 = vpop.eup %6309  ;;  %v4933_v14 = vsel %vm84_vm0, %v4872_v11, 0.0  ;;  %v1487_v34 = vadd.f32 %v6308_v7, %v6304_v43  ;;  %6335 = vpow2.f32 %v2751_v13  ;;  %v3135_v45 = vmul.f32 1.442695, %v3071_v27 }
 0x3c4   :  { %v6312_v3 = vpop.eup %6311  ;;  %v4934_v22 = vadd.f32 %v4933_v14, %v4749_v63  ;;  %v1488_v50 = vadd.f32 %v6310_v26, %v6306_v36  ;;  %6337 = vpow2.f32 %v2753_v15  ;;  %v3137_v58 = vmul.f32 1.442695, %v3072_v10 }
 0x3c5   :  { %v6314_v49 = vpop.eup %6313  ;;  %v1679_v33 = vadd.f32 %v6312_v3, %v1487_v34  ;;  %6339 = vpow2.f32 %v2943_v17  ;;  %v3263_v57 = vmul.f32 -0.02, %v7607_v35  ;;  %v3264_v39 = vmul.f32 -0.02, %v7654_v32 }
 0x3c6   :  { %v6316_v61 = vpop.eup %6315  ;;  %4935 = vadd.xlane.f32.xlu0 %v4934_v22  ;;  %v1680_v59 = vadd.f32 %v6314_v49, %v1488_v50  ;;  %6341 = vpow2.f32 %v2945_v31  ;;  %v3455_v18 = vmul.f32 -0.016666668, %v7607_v35  ;;  %v3456_v29 = vmul.f32 -0.016666668, %v7654_v32 }
 0x3c7   :  { %v6318_v53 = vpop.eup %6317  ;;  %v1871_v38 = vadd.f32 %v6316_v61, %v1679_v33  ;;  %6343 = vpow2.f32 %v3135_v45  ;;  %v3327_v1 = vmul.f32 1.442695, %v3263_v57  ;;  %v3329_v5 = vmul.f32 1.442695, %v3264_v39 }
 0x3c8   :  { %v6320_v54 = vpop.eup %6319  ;;  %v1872_v40 = vadd.f32 %v6318_v53, %v1680_v59  ;;  %6345 = vpow2.f32 %v3137_v58  ;;  %v3519_v42 = vmul.f32 1.442695, %v3455_v18  ;;  %v3521_v21 = vmul.f32 1.442695, %v3456_v29 }
 0x3c9   :  { %v6322_v44 = vpop.eup %6321  ;;  %v2063_v12 = vadd.f32 %v6320_v54, %v1871_v38  ;;  %6347 = vpow2.f32 %v3327_v1  ;;  %v3647_v37 = vmul.f32 -0.014285714, %v7607_v35  ;;  %v3648_v24 = vmul.f32 -0.014285714, %v7654_v32 }
 0x3ca   :  { %v6324_v23 = vpop.eup %6323  ;;  %v2064_v46 = vadd.f32 %v6322_v44, %v1872_v40  ;;  %6349 = vpow2.f32 %v3329_v5  ;;  %v3839_v0 = vmul.f32 -0.005, %v7607_v35  ;;  %v3840_v28 = vmul.f32 -0.005, %v7654_v32  ;;  %v9144_v5 = vld [vmem:[#allocation41_spill] sm:$0xff] }
 0x3cb   :  { %v6326_v19 = vpop.eup %6325  ;;  %v2255_v6 = vadd.f32 %v6324_v23, %v2063_v12  ;;  %6351 = vpow2.f32 %v3519_v42  ;;  %v3711_v55 = vmul.f32 1.442695, %v3647_v37  ;;  %v3713_v25 = vmul.f32 1.442695, %v3648_v24 }
 0x3cc   :  { %v6328_v4 = vpop.eup %6327  ;;  %v2256_v52 = vadd.f32 %v6326_v19, %v2064_v46  ;;  %6353 = vpow2.f32 %v3521_v21  ;;  %v3903_v41 = vmul.f32 1.442695, %v3839_v0  ;;  %v3905_v9 = vmul.f32 1.442695, %v3840_v28 }
 0x3cd   :  { %v6330_v63 = vpop.eup %6329  ;;  %v2447_v47 = vadd.f32 %v6328_v4, %v2255_v6  ;;  %6355 = vpow2.f32 %v3711_v55  ;;  %v4031_v48 = vmul.f32 -0.0005, %v7607_v35  ;;  %v4032_v43 = vmul.f32 -0.0005, %v7654_v32 }
 0x3ce   :  { %v6332_v2 = vpop.eup %6331  ;;  %v2448_v13 = vadd.f32 %v6330_v63, %v2256_v52  ;;  %6357 = vpow2.f32 %v3713_v25  ;;  %v4223_v51 = vmul.f32 -5e-05, %v7607_v35  ;;  %v4224_v36 = vmul.f32 -5e-05, %v7654_v32 }
 0x3cf   :  { %v6334_v15 = vpop.eup %6333  ;;  %v2639_v17 = vadd.f32 %v6332_v2, %v2447_v47  ;;  %6359 = vpow2.f32 %v3903_v41  ;;  %v4095_v27 = vmul.f32 1.442695, %v4031_v48  ;;  %v4097_v7 = vmul.f32 1.442695, %v4032_v43 }
 0x3d0   :  { %v6336_v11 = vpop.eup %6335  ;;  %v2640_v31 = vadd.f32 %v6334_v15, %v2448_v13  ;;  %6361 = vpow2.f32 %v3905_v9  ;;  %v4287_v10 = vmul.f32 1.442695, %v4223_v51  ;;  %v4289_v26 = vmul.f32 1.442695, %v4224_v36 }
 0x3d1   :  { %v6338_v14 = vpop.eup %6337  ;;  %v2831_v34 = vadd.f32 %v6336_v11, %v2639_v17  ;;  %6363 = vpow2.f32 %v4095_v27  ;;  %v4415_v45 = vmul.f32 -5e-06, %v7607_v35  ;;  %v4416_v3 = vmul.f32 -5e-06, %v7654_v32 }
 0x3d2   :  { %v6340_v22 = vpop.eup %6339  ;;  %v2832_v50 = vadd.f32 %v6338_v14, %v2640_v31  ;;  %6365 = vpow2.f32 %v4097_v7  ;;  %v4607_v58 = vmul.f32 -5e-07, %v7607_v35  ;;  %v4608_v49 = vmul.f32 -5e-07, %v7654_v32 }
 0x3d3   :  { %v6342_v33 = vpop.eup %6341  ;;  %v3023_v57 = vadd.f32 %v6340_v22, %v2831_v34  ;;  %6367 = vpow2.f32 %v4287_v10  ;;  %v4479_v39 = vmul.f32 1.442695, %v4415_v45  ;;  %v4481_v61 = vmul.f32 1.442695, %v4416_v3 }
 0x3d4   :  { %v6344_v59 = vpop.eup %6343  ;;  %v3024_v18 = vadd.f32 %v6342_v33, %v2832_v50  ;;  %6369 = vpow2.f32 %v4289_v26  ;;  %v4671_v29 = vmul.f32 1.442695, %v4607_v58  ;;  %v4673_v53 = vmul.f32 1.442695, %v4608_v49 }
 0x3d5   :  { %v6346_v38 = vpop.eup %6345  ;;  %v3215_v1 = vadd.f32 %v6344_v59, %v3023_v57  ;;  %6371 = vpow2.f32 %v4479_v39  ;;  %v1173_v54 = vmul.f32 -500000.0, %v9144_v5  ;;  %v1174_v40 = vmul.f32 -500000.0, %v7650_v60 }
 0x3d6   :  { %v6348_v35 = vpop.eup %6347  ;;  %v3216_v42 = vadd.f32 %v6346_v38, %v3024_v18  ;;  %6373 = vpow2.f32 %v4481_v61  ;;  %v1365_v32 = vmul.f32 -50000.0, %v9144_v5  ;;  %v1366_v21 = vmul.f32 -50000.0, %v7650_v60 }
 0x3d7   :  { %v6350_v44 = vpop.eup %6349  ;;  %v3407_v12 = vadd.f32 %v6348_v35, %v3215_v1  ;;  %6375 = vpow2.f32 %v4671_v29  ;;  %v1259_v37 = vmul.f32 1.442695, %v1173_v54  ;;  %v1261_v24 = vmul.f32 1.442695, %v1174_v40 }
 0x3d8   :  { %v6352_v23 = vpop.eup %6351  ;;  %v3408_v46 = vadd.f32 %v6350_v44, %v3216_v42  ;;  %6377 = vpow2.f32 %v4673_v53  ;;  %v1451_v0 = vmul.f32 1.442695, %v1365_v32  ;;  %v1453_v28 = vmul.f32 1.442695, %v1366_v21 }
 0x3d9   :  { %v6354_v19 = vpop.eup %6353  ;;  %v3599_v6 = vadd.f32 %v6352_v23, %v3407_v12  ;;  %6379 = vpow2.f32 %v1259_v37  ;;  %v1557_v55 = vmul.f32 -5000.0, %v9144_v5  ;;  %v1558_v25 = vmul.f32 -5000.0, %v7650_v60 }
 0x3da   :  { %v6356_v4 = vpop.eup %6355  ;;  %v3600_v52 = vadd.f32 %v6354_v19, %v3408_v46  ;;  %6381 = vpow2.f32 %v1261_v24  ;;  %v1749_v41 = vmul.f32 -500.0, %v9144_v5  ;;  %v1750_v9 = vmul.f32 -500.0, %v7650_v60 }
 0x3db   :  { %v6358_v63 = vpop.eup %6357  ;;  %v3791_v47 = vadd.f32 %v6356_v4, %v3599_v6  ;;  %6383 = vpow2.f32 %v1451_v0  ;;  %v1643_v48 = vmul.f32 1.442695, %v1557_v55  ;;  %v1645_v43 = vmul.f32 1.442695, %v1558_v25 }
 0x3dc   :  { %v6360_v2 = vpop.eup %6359  ;;  %v3792_v13 = vadd.f32 %v6358_v63, %v3600_v52  ;;  %6385 = vpow2.f32 %v1453_v28  ;;  %v1835_v51 = vmul.f32 1.442695, %v1749_v41  ;;  %v1837_v36 = vmul.f32 1.442695, %v1750_v9 }
 0x3dd   :  { %v6362_v15 = vpop.eup %6361  ;;  %v3983_v17 = vadd.f32 %v6360_v2, %v3791_v47  ;;  %6387 = vpow2.f32 %v1643_v48  ;;  %v1941_v27 = vmul.f32 -50.0, %v9144_v5  ;;  %v1942_v7 = vmul.f32 -50.0, %v7650_v60 }
 0x3de   :  { %v6364_v11 = vpop.eup %6363  ;;  %v3984_v31 = vadd.f32 %v6362_v15, %v3792_v13  ;;  %6389 = vpow2.f32 %v1645_v43  ;;  %v2133_v10 = vmul.f32 -5.0, %v9144_v5  ;;  %v2134_v26 = vmul.f32 -5.0, %v7650_v60 }
 0x3df   :  { %v6366_v14 = vpop.eup %6365  ;;  %v4175_v34 = vadd.f32 %v6364_v11, %v3983_v17  ;;  %6391 = vpow2.f32 %v1835_v51  ;;  %v2027_v45 = vmul.f32 1.442695, %v1941_v27  ;;  %v2029_v3 = vmul.f32 1.442695, %v1942_v7 }
 0x3e0   :  { %v6368_v22 = vpop.eup %6367  ;;  %v4176_v50 = vadd.f32 %v6366_v14, %v3984_v31  ;;  %6393 = vpow2.f32 %v1837_v36  ;;  %v2219_v58 = vmul.f32 1.442695, %v2133_v10  ;;  %v2221_v49 = vmul.f32 1.442695, %v2134_v26 }
 0x3e1   :  { %v6370_v33 = vpop.eup %6369  ;;  %v4367_v57 = vadd.f32 %v6368_v22, %v4175_v34  ;;  %6395 = vpow2.f32 %v2027_v45  ;;  %v2325_v39 = vmul.f32 -0.5, %v9144_v5  ;;  %v2326_v61 = vmul.f32 -0.5, %v7650_v60 }
 0x3e2   :  { %v6372_v59 = vpop.eup %6371  ;;  %v4368_v18 = vadd.f32 %v6370_v33, %v4176_v50  ;;  %6397 = vpow2.f32 %v2029_v3  ;;  %v2517_v29 = vmul.f32 -0.1, %v9144_v5  ;;  %v2518_v53 = vmul.f32 -0.1, %v7650_v60 }
 0x3e3   :  { %v6374_v38 = vpop.eup %6373  ;;  %v4559_v1 = vadd.f32 %v6372_v59, %v4367_v57  ;;  %6399 = vpow2.f32 %v2219_v58  ;;  %v2411_v54 = vmul.f32 1.442695, %v2325_v39  ;;  %v2413_v40 = vmul.f32 1.442695, %v2326_v61 }
 0x3e4   :  { %v6376_v35 = vpop.eup %6375  ;;  %v4560_v42 = vadd.f32 %v6374_v38, %v4368_v18  ;;  %6401 = vpow2.f32 %v2221_v49  ;;  %v2603_v32 = vmul.f32 1.442695, %v2517_v29  ;;  %v2605_v21 = vmul.f32 1.442695, %v2518_v53 }
 0x3e5   :  { %v6378_v44 = vpop.eup %6377  ;;  %v4751_v12 = vadd.f32 %v6376_v35, %v4559_v1  ;;  %6403 = vpow2.f32 %v2411_v54  ;;  %v2709_v37 = vmul.f32 -0.05, %v9144_v5  ;;  %v2710_v24 = vmul.f32 -0.05, %v7650_v60 }
 0x3e6   :  { %v6380_v23 = vpop.eup %6379  ;;  %v4752_v46 = vadd.f32 %v6378_v44, %v4560_v42  ;;  %6405 = vpow2.f32 %v2413_v40  ;;  %v2901_v0 = vmul.f32 -0.033333335, %v9144_v5  ;;  %v2902_v28 = vmul.f32 -0.033333335, %v7650_v60 }
 0x3e7   :  { %v6382_v19 = vpop.eup %6381  ;;  %6407 = vpow2.f32 %v2603_v32  ;;  %v2795_v6 = vmul.f32 1.442695, %v2709_v37  ;;  %v2797_v55 = vmul.f32 1.442695, %v2710_v24  ;;  %v3093_v25 = vmul.f32 -0.025, %v9144_v5 }
 0x3e8   :  { %v6384_v4 = vpop.eup %6383  ;;  %v4874_v52 = vsel %vm4808_vm10, %v4752_v46, 0.0  ;;  %6409 = vpow2.f32 %v2605_v21  ;;  %v2987_v41 = vmul.f32 1.442695, %v2901_v0  ;;  %v2989_v9 = vmul.f32 1.442695, %v2902_v28 }
 0x3e9   :  { %v6386_v63 = vpop.eup %6385  ;;  %v4937_v47 = vsel %vm84_vm0, %v4874_v52, 0.0  ;;  %v1509_v48 = vadd.f32 %v6384_v4, %v6380_v23  ;;  %6411 = vpow2.f32 %v2795_v6  ;;  %v3094_v43 = vmul.f32 -0.025, %v7650_v60 }
 0x3ea   :  { %v6388_v2 = vpop.eup %6387  ;;  %v4938_v13 = vadd.f32 %v4937_v47, %v4751_v12  ;;  %v1510_v51 = vadd.f32 %v6386_v63, %v6382_v19  ;;  %6413 = vpow2.f32 %v2797_v55  ;;  %v3179_v36 = vmul.f32 1.442695, %v3093_v25 }
 0x3eb   :  { %v6390_v15 = vpop.eup %6389  ;;  %v1701_v17 = vadd.f32 %v6388_v2, %v1509_v48  ;;  %6415 = vpow2.f32 %v2987_v41  ;;  %v3181_v27 = vmul.f32 1.442695, %v3094_v43  ;;  %v3285_v7 = vmul.f32 -0.02, %v9144_v5 }
 0x3ec   :  { %v6392_v11 = vpop.eup %6391  ;;  %4939 = vadd.xlane.f32.xlu1 %v4938_v13  ;;  %v1702_v31 = vadd.f32 %v6390_v15, %v1510_v51  ;;  %6417 = vpow2.f32 %v2989_v9  ;;  %v3286_v10 = vmul.f32 -0.02, %v7650_v60  ;;  %v3477_v26 = vmul.f32 -0.016666668, %v9144_v5 }
 0x3ed   :  { %v6394_v14 = vpop.eup %6393  ;;  %v1893_v34 = vadd.f32 %v6392_v11, %v1701_v17  ;;  %6419 = vpow2.f32 %v3179_v36  ;;  %v3371_v45 = vmul.f32 1.442695, %v3285_v7  ;;  %v3478_v3 = vmul.f32 -0.016666668, %v7650_v60 }
 0x3ee   :  { %v6396_v22 = vpop.eup %6395  ;;  %v1894_v50 = vadd.f32 %v6394_v14, %v1702_v31  ;;  %6421 = vpow2.f32 %v3181_v27  ;;  %v3373_v58 = vmul.f32 1.442695, %v3286_v10  ;;  %v3563_v49 = vmul.f32 1.442695, %v3477_v26 }
 0x3ef   :  { %v6398_v33 = vpop.eup %6397  ;;  %v2085_v57 = vadd.f32 %v6396_v22, %v1893_v34  ;;  %6423 = vpow2.f32 %v3371_v45  ;;  %v3565_v39 = vmul.f32 1.442695, %v3478_v3  ;;  %v3669_v61 = vmul.f32 -0.014285714, %v9144_v5  ;;  %v9145_v3 = vld [vmem:[#allocation24_spill] sm:$0xff] }
 0x3f0   :  { %v6400_v59 = vpop.eup %6399  ;;  %v2086_v18 = vadd.f32 %v6398_v33, %v1894_v50  ;;  %6425 = vpow2.f32 %v3373_v58  ;;  %v3670_v29 = vmul.f32 -0.014285714, %v7650_v60  ;;  %v3861_v53 = vmul.f32 -0.005, %v9144_v5 }
 0x3f1   :  { %v6402_v38 = vpop.eup %6401  ;;  %v2277_v1 = vadd.f32 %v6400_v59, %v2085_v57  ;;  %6427 = vpow2.f32 %v3563_v49  ;;  %v3755_v54 = vmul.f32 1.442695, %v3669_v61  ;;  %v3862_v40 = vmul.f32 -0.005, %v7650_v60 }
 0x3f2   :  { %v6404_v35 = vpop.eup %6403  ;;  %v2278_v42 = vadd.f32 %v6402_v38, %v2086_v18  ;;  %6429 = vpow2.f32 %v3565_v39  ;;  %v3757_v32 = vmul.f32 1.442695, %v3670_v29  ;;  %v3947_v21 = vmul.f32 1.442695, %v3861_v53 }
 0x3f3   :  { %v6406_v44 = vpop.eup %6405  ;;  %v2469_v12 = vadd.f32 %v6404_v35, %v2277_v1  ;;  %6431 = vpow2.f32 %v3755_v54  ;;  %v3949_v37 = vmul.f32 1.442695, %v3862_v40  ;;  %v4053_v24 = vmul.f32 -0.0005, %v9144_v5 }
 0x3f4   :  { %v6408_v23 = vpop.eup %6407  ;;  %v2470_v46 = vadd.f32 %v6406_v44, %v2278_v42  ;;  %6433 = vpow2.f32 %v3757_v32  ;;  %v4054_v0 = vmul.f32 -0.0005, %v7650_v60  ;;  %v4245_v28 = vmul.f32 -5e-05, %v9144_v5 }
 0x3f5   :  { %v6410_v19 = vpop.eup %6409  ;;  %v2661_v6 = vadd.f32 %v6408_v23, %v2469_v12  ;;  %6435 = vpow2.f32 %v3947_v21  ;;  %v4139_v55 = vmul.f32 1.442695, %v4053_v24  ;;  %v4246_v25 = vmul.f32 -5e-05, %v7650_v60 }
 0x3f6   :  { %v6412_v4 = vpop.eup %6411  ;;  %v2662_v52 = vadd.f32 %v6410_v19, %v2470_v46  ;;  %6437 = vpow2.f32 %v3949_v37  ;;  %v4141_v41 = vmul.f32 1.442695, %v4054_v0  ;;  %v4331_v9 = vmul.f32 1.442695, %v4245_v28 }
 0x3f7   :  { %v6414_v63 = vpop.eup %6413  ;;  %v2853_v47 = vadd.f32 %v6412_v4, %v2661_v6  ;;  %6439 = vpow2.f32 %v4139_v55  ;;  %v4333_v48 = vmul.f32 1.442695, %v4246_v25  ;;  %v4437_v43 = vmul.f32 -5e-06, %v9144_v5 }
 0x3f8   :  { %v6416_v2 = vpop.eup %6415  ;;  %v2854_v13 = vadd.f32 %v6414_v63, %v2662_v52  ;;  %6441 = vpow2.f32 %v4141_v41  ;;  %v4438_v51 = vmul.f32 -5e-06, %v7650_v60  ;;  %v4629_v36 = vmul.f32 -5e-07, %v9144_v5 }
 0x3f9   :  { %v6418_v15 = vpop.eup %6417  ;;  %v3045_v17 = vadd.f32 %v6416_v2, %v2853_v47  ;;  %6443 = vpow2.f32 %v4331_v9  ;;  %v4523_v27 = vmul.f32 1.442695, %v4437_v43  ;;  %v4630_v7 = vmul.f32 -5e-07, %v7650_v60 }
 0x3fa   :  { %v6420_v11 = vpop.eup %6419  ;;  %v3046_v31 = vadd.f32 %v6418_v15, %v2854_v13  ;;  %6445 = vpow2.f32 %v4333_v48  ;;  %v4525_v10 = vmul.f32 1.442695, %v4438_v51  ;;  %v4715_v26 = vmul.f32 1.442695, %v4629_v36 }
 0x3fb   :  { %v6422_v14 = vpop.eup %6421  ;;  %v3237_v34 = vadd.f32 %v6420_v11, %v3045_v17  ;;  %6447 = vpow2.f32 %v4523_v27  ;;  %v4717_v45 = vmul.f32 1.442695, %v4630_v7  ;;  %v1175_v22 = vmul.f32 -500000.0, %v9145_v3 }
 0x3fc   :  { %v6424_v50 = vpop.eup %6423  ;;  %v3238_v58 = vadd.f32 %v6422_v14, %v3046_v31  ;;  %6449 = vpow2.f32 %v4525_v10  ;;  %v1176_v5 = vmul.f32 -500000.0, %v7675_v8  ;;  %v1367_v49 = vmul.f32 -50000.0, %v9145_v3 }
 0x3fd   :  { %v6426_v33 = vpop.eup %6425  ;;  %v3429_v60 = vadd.f32 %v6424_v50, %v3237_v34  ;;  %6451 = vpow2.f32 %v4715_v26  ;;  %v1263_v57 = vmul.f32 1.442695, %v1175_v22  ;;  %v1368_v39 = vmul.f32 -50000.0, %v7675_v8 }
 0x3fe   :  { %v6428_v61 = vpop.eup %6427  ;;  %v3430_v59 = vadd.f32 %v6426_v33, %v3238_v58  ;;  %6453 = vpow2.f32 %v4717_v45  ;;  %v1265_v18 = vmul.f32 1.442695, %v1176_v5  ;;  %v1455_v29 = vmul.f32 1.442695, %v1367_v49 }
 0x3ff   :  { %v6430_v53 = vpop.eup %6429  ;;  %v3621_v38 = vadd.f32 %v6428_v61, %v3429_v60  ;;  %6455 = vpow2.f32 %v1263_v57  ;;  %v1457_v1 = vmul.f32 1.442695, %v1368_v39  ;;  %v1559_v54 = vmul.f32 -5000.0, %v9145_v3 }
 0x400   :  { %v6432_v40 = vpop.eup %6431  ;;  %v3622_v35 = vadd.f32 %v6430_v53, %v3430_v59  ;;  %6457 = vpow2.f32 %v1265_v18  ;;  %v1560_v42 = vmul.f32 -5000.0, %v7675_v8  ;;  %v1751_v32 = vmul.f32 -500.0, %v9145_v3 }
 0x401   :  { %v6434_v21 = vpop.eup %6433  ;;  %v3813_v44 = vadd.f32 %v6432_v40, %v3621_v38  ;;  %6459 = vpow2.f32 %v1455_v29  ;;  %v1647_v12 = vmul.f32 1.442695, %v1559_v54  ;;  %v1752_v37 = vmul.f32 -500.0, %v7675_v8 }
 0x402   :  { %v6436_v24 = vpop.eup %6435  ;;  %v3814_v23 = vadd.f32 %v6434_v21, %v3622_v35  ;;  %6461 = vpow2.f32 %v1457_v1  ;;  %v1649_v46 = vmul.f32 1.442695, %v1560_v42  ;;  %v1839_v0 = vmul.f32 1.442695, %v1751_v32 }
 0x403   :  { %v6438_v28 = vpop.eup %6437  ;;  %v4005_v19 = vadd.f32 %v6436_v24, %v3813_v44  ;;  %6463 = vpow2.f32 %v1647_v12  ;;  %v1841_v6 = vmul.f32 1.442695, %v1752_v37  ;;  %v1943_v55 = vmul.f32 -50.0, %v9145_v3 }
 0x404   :  { %v6440_v25 = vpop.eup %6439  ;;  %v4006_v4 = vadd.f32 %v6438_v28, %v3814_v23  ;;  %6465 = vpow2.f32 %v1649_v46  ;;  %v1944_v52 = vmul.f32 -50.0, %v7675_v8  ;;  %v2135_v41 = vmul.f32 -5.0, %v9145_v3 }
 0x405   :  { %v6442_v9 = vpop.eup %6441  ;;  %v4197_v63 = vadd.f32 %v6440_v25, %v4005_v19  ;;  %6467 = vpow2.f32 %v1839_v0  ;;  %v2031_v47 = vmul.f32 1.442695, %v1943_v55  ;;  %v2136_v48 = vmul.f32 -5.0, %v7675_v8 }
 0x406   :  { %v6444_v43 = vpop.eup %6443  ;;  %v4198_v2 = vadd.f32 %v6442_v9, %v4006_v4  ;;  %6469 = vpow2.f32 %v1841_v6  ;;  %v2033_v13 = vmul.f32 1.442695, %v1944_v52  ;;  %v2223_v51 = vmul.f32 1.442695, %v2135_v41 }
 0x407   :  { %v6446_v36 = vpop.eup %6445  ;;  %v4389_v15 = vadd.f32 %v6444_v43, %v4197_v63  ;;  %6471 = vpow2.f32 %v2031_v47  ;;  %v2225_v17 = vmul.f32 1.442695, %v2136_v48  ;;  %v2327_v27 = vmul.f32 -0.5, %v9145_v3 }
 0x408   :  { %v6448_v7 = vpop.eup %6447  ;;  %v4390_v11 = vadd.f32 %v6446_v36, %v4198_v2  ;;  %6473 = vpow2.f32 %v2033_v13  ;;  %v2328_v31 = vmul.f32 -0.5, %v7675_v8  ;;  %v2519_v10 = vmul.f32 -0.1, %v9145_v3 }
 0x409   :  { %v6450_v26 = vpop.eup %6449  ;;  %v4581_v14 = vadd.f32 %v6448_v7, %v4389_v15  ;;  %6475 = vpow2.f32 %v2223_v51  ;;  %v2415_v34 = vmul.f32 1.442695, %v2327_v27  ;;  %v2520_v45 = vmul.f32 -0.1, %v7675_v8 }
 0x40a   :  { %v6452_v22 = vpop.eup %6451  ;;  %v4582_v50 = vadd.f32 %v6450_v26, %v4390_v11  ;;  %6477 = vpow2.f32 %v2225_v17  ;;  %v2417_v58 = vmul.f32 1.442695, %v2328_v31  ;;  %v2607_v5 = vmul.f32 1.442695, %v2519_v10 }
 0x40b   :  { %v6454_v49 = vpop.eup %6453  ;;  %v4773_v33 = vadd.f32 %v6452_v22, %v4581_v14  ;;  %6479 = vpow2.f32 %v2415_v34  ;;  %v2609_v60 = vmul.f32 1.442695, %v2520_v45  ;;  %v2711_v57 = vmul.f32 -0.05, %v9145_v3 }
 0x40c   :  { %v6456_v39 = vpop.eup %6455  ;;  %v4774_v61 = vadd.f32 %v6454_v49, %v4582_v50  ;;  %6481 = vpow2.f32 %v2417_v58  ;;  %v2712_v59 = vmul.f32 -0.05, %v7675_v8  ;;  %v2903_v18 = vmul.f32 -0.033333335, %v9145_v3 }
 0x40d   :  { %v6458_v29 = vpop.eup %6457  ;;  %6483 = vpow2.f32 %v2607_v5  ;;  %v2799_v53 = vmul.f32 1.442695, %v2711_v57  ;;  %v2904_v38 = vmul.f32 -0.033333335, %v7675_v8  ;;  %v3095_v1 = vmul.f32 -0.025, %v9145_v3 }
 0x40e   :  { %v6460_v54 = vpop.eup %6459  ;;  %v4896_v40 = vsel %vm4808_vm10, %v4774_v61, 0.0  ;;  %6485 = vpow2.f32 %v2609_v60  ;;  %v2801_v35 = vmul.f32 1.442695, %v2712_v59  ;;  %v2991_v42 = vmul.f32 1.442695, %v2903_v18 }
 0x40f   :  { %v6462_v32 = vpop.eup %6461  ;;  %v4981_v21 = vsel %vm84_vm0, %v4896_v40, 0.0  ;;  %v1511_v44 = vadd.f32 %v6460_v54, %v6456_v39  ;;  %6487 = vpow2.f32 %v2799_v53  ;;  %v2993_v12 = vmul.f32 1.442695, %v2904_v38 }
 0x410   :  { %v6464_v37 = vpop.eup %6463  ;;  %v4982_v24 = vadd.f32 %v4981_v21, %v4773_v33  ;;  %v1512_v23 = vadd.f32 %v6462_v32, %v6458_v29  ;;  %6489 = vpow2.f32 %v2801_v35  ;;  %v3096_v46 = vmul.f32 -0.025, %v7675_v8 }
 0x411   :  { %v6466_v0 = vpop.eup %6465  ;;  %v1703_v28 = vadd.f32 %v6464_v37, %v1511_v44  ;;  %6491 = vpow2.f32 %v2991_v42  ;;  %v3183_v19 = vmul.f32 1.442695, %v3095_v1  ;;  %v3287_v6 = vmul.f32 -0.02, %v9145_v3 }
 0x412   :  { %v6468_v55 = vpop.eup %6467  ;;  %4983 = vadd.xlane.f32.xlu0 %v4982_v24  ;;  %v1704_v25 = vadd.f32 %v6466_v0, %v1512_v23  ;;  %6493 = vpow2.f32 %v2993_v12  ;;  %v3185_v4 = vmul.f32 1.442695, %v3096_v46  ;;  %v3288_v52 = vmul.f32 -0.02, %v7675_v8 }
 0x413   :  { %v6470_v41 = vpop.eup %6469  ;;  %v1895_v9 = vadd.f32 %v6468_v55, %v1703_v28  ;;  %6495 = vpow2.f32 %v3183_v19  ;;  %v3375_v63 = vmul.f32 1.442695, %v3287_v6  ;;  %v3479_v47 = vmul.f32 -0.016666668, %v9145_v3 }
 0x414   :  { %v6472_v48 = vpop.eup %6471  ;;  %v1896_v43 = vadd.f32 %v6470_v41, %v1704_v25  ;;  %6497 = vpow2.f32 %v3185_v4  ;;  %v3377_v2 = vmul.f32 1.442695, %v3288_v52  ;;  %v3480_v13 = vmul.f32 -0.016666668, %v7675_v8 }
 0x415   :  { %v6474_v51 = vpop.eup %6473  ;;  %v2087_v36 = vadd.f32 %v6472_v48, %v1895_v9  ;;  %6499 = vpow2.f32 %v3375_v63  ;;  %v3567_v15 = vmul.f32 1.442695, %v3479_v47  ;;  %v3671_v17 = vmul.f32 -0.014285714, %v9145_v3 }
 0x416   :  { %v6476_v27 = vpop.eup %6475  ;;  %v2088_v7 = vadd.f32 %v6474_v51, %v1896_v43  ;;  %6501 = vpow2.f32 %v3377_v2  ;;  %v3569_v11 = vmul.f32 1.442695, %v3480_v13  ;;  %v3672_v31 = vmul.f32 -0.014285714, %v7675_v8 }
 0x417   :  { %v6478_v10 = vpop.eup %6477  ;;  %v2279_v26 = vadd.f32 %v6476_v27, %v2087_v36  ;;  %6503 = vpow2.f32 %v3567_v15  ;;  %v3759_v14 = vmul.f32 1.442695, %v3671_v17  ;;  %v3863_v34 = vmul.f32 -0.005, %v9145_v3 }
 0x418   :  { %v6480_v45 = vpop.eup %6479  ;;  %v2280_v22 = vadd.f32 %v6478_v10, %v2088_v7  ;;  %6505 = vpow2.f32 %v3569_v11  ;;  %v3761_v50 = vmul.f32 1.442695, %v3672_v31  ;;  %v3864_v58 = vmul.f32 -0.005, %v7675_v8 }
 0x419   :  { %v6482_v5 = vpop.eup %6481  ;;  %v2471_v49 = vadd.f32 %v6480_v45, %v2279_v26  ;;  %6507 = vpow2.f32 %v3759_v14  ;;  %v3951_v33 = vmul.f32 1.442695, %v3863_v34  ;;  %v4055_v60 = vmul.f32 -0.0005, %v9145_v3 }
 0x41a   :  { %v6484_v57 = vpop.eup %6483  ;;  %v2472_v39 = vadd.f32 %v6482_v5, %v2280_v22  ;;  %6509 = vpow2.f32 %v3761_v50  ;;  %v3953_v61 = vmul.f32 1.442695, %v3864_v58  ;;  %v4056_v59 = vmul.f32 -0.0005, %v7675_v8 }
 0x41b   :  { %v6486_v18 = vpop.eup %6485  ;;  %v2663_v29 = vadd.f32 %v6484_v57, %v2471_v49  ;;  %6511 = vpow2.f32 %v3951_v33  ;;  %v4143_v53 = vmul.f32 1.442695, %v4055_v60  ;;  %v4247_v38 = vmul.f32 -5e-05, %v9145_v3 }
 0x41c   :  { %v6488_v1 = vpop.eup %6487  ;;  %v2664_v54 = vadd.f32 %v6486_v18, %v2472_v39  ;;  %6513 = vpow2.f32 %v3953_v61  ;;  %v4145_v40 = vmul.f32 1.442695, %v4056_v59  ;;  %v4248_v35 = vmul.f32 -5e-05, %v7675_v8 }
 0x41d   :  { %v6490_v42 = vpop.eup %6489  ;;  %v2855_v32 = vadd.f32 %v6488_v1, %v2663_v29  ;;  %6515 = vpow2.f32 %v4143_v53  ;;  %v4335_v21 = vmul.f32 1.442695, %v4247_v38  ;;  %v4439_v44 = vmul.f32 -5e-06, %v9145_v3 }
 0x41e   :  { %v6492_v12 = vpop.eup %6491  ;;  %v2856_v37 = vadd.f32 %v6490_v42, %v2664_v54  ;;  %6517 = vpow2.f32 %v4145_v40  ;;  %v4337_v24 = vmul.f32 1.442695, %v4248_v35  ;;  %v4440_v23 = vmul.f32 -5e-06, %v7675_v8 }
 0x41f   :  { %v6494_v46 = vpop.eup %6493  ;;  %v3047_v0 = vadd.f32 %v6492_v12, %v2855_v32  ;;  %6519 = vpow2.f32 %v4335_v21  ;;  %v4527_v28 = vmul.f32 1.442695, %v4439_v44  ;;  %v4631_v19 = vmul.f32 -5e-07, %v9145_v3 }
 0x420   :  { %v6496_v6 = vpop.eup %6495  ;;  %v3048_v55 = vadd.f32 %v6494_v46, %v2856_v37  ;;  %6521 = vpow2.f32 %v4337_v24  ;;  %v4529_v25 = vmul.f32 1.442695, %v4440_v23  ;;  %v4632_v4 = vmul.f32 -5e-07, %v7675_v8 }
 0x421   :  { %v6498_v52 = vpop.eup %6497  ;;  %v3239_v41 = vadd.f32 %v6496_v6, %v3047_v0  ;;  %6523 = vpow2.f32 %v4527_v28  ;;  %v4719_v9 = vmul.f32 1.442695, %v4631_v19  ;;  %v1153_v63 = vmul.f32 -500000.0, %v7642_v16 }
 0x422   :  { %v6500_v47 = vpop.eup %6499  ;;  %v3240_v48 = vadd.f32 %v6498_v52, %v3048_v55  ;;  %6525 = vpow2.f32 %v4529_v25  ;;  %v4721_v43 = vmul.f32 1.442695, %v4632_v4  ;;  %v1154_v2 = vmul.f32 -500000.0, %v7691_v56 }
 0x423   :  { %v6502_v13 = vpop.eup %6501  ;;  %v3431_v3 = vadd.f32 %v6500_v47, %v3239_v41  ;;  %6527 = vpow2.f32 %v4719_v9  ;;  %v1219_v51 = vmul.f32 1.442695, %v1153_v63  ;;  %v1345_v36 = vmul.f32 -50000.0, %v7642_v16 }
 0x424   :  { %v6504_v15 = vpop.eup %6503  ;;  %v3432_v8 = vadd.f32 %v6502_v13, %v3240_v48  ;;  %6529 = vpow2.f32 %v4721_v43  ;;  %v1221_v17 = vmul.f32 1.442695, %v1154_v2  ;;  %v1346_v27 = vmul.f32 -50000.0, %v7691_v56 }
 0x425   :  { %v6506_v7 = vpop.eup %6505  ;;  %v3623_v11 = vadd.f32 %v6504_v15, %v3431_v3  ;;  %6531 = vpow2.f32 %v1219_v51  ;;  %v1411_v31 = vmul.f32 1.442695, %v1345_v36  ;;  %v1537_v10 = vmul.f32 -5000.0, %v7642_v16 }
 0x426   :  { %v6508_v26 = vpop.eup %6507  ;;  %v3624_v14 = vadd.f32 %v6506_v7, %v3432_v8  ;;  %6533 = vpow2.f32 %v1221_v17  ;;  %v1413_v34 = vmul.f32 1.442695, %v1346_v27  ;;  %v1538_v45 = vmul.f32 -5000.0, %v7691_v56 }
 0x427   :  { %v6510_v22 = vpop.eup %6509  ;;  %v3815_v50 = vadd.f32 %v6508_v26, %v3623_v11  ;;  %6535 = vpow2.f32 %v1411_v31  ;;  %v1603_v58 = vmul.f32 1.442695, %v1537_v10  ;;  %v1729_v5 = vmul.f32 -500.0, %v7642_v16 }
 0x428   :  { %v6512_v49 = vpop.eup %6511  ;;  %v3816_v33 = vadd.f32 %v6510_v22, %v3624_v14  ;;  %6537 = vpow2.f32 %v1413_v34  ;;  %v1605_v60 = vmul.f32 1.442695, %v1538_v45  ;;  %v1730_v57 = vmul.f32 -500.0, %v7691_v56 }
 0x429   :  { %v6514_v39 = vpop.eup %6513  ;;  %v4007_v61 = vadd.f32 %v6512_v49, %v3815_v50  ;;  %6539 = vpow2.f32 %v1603_v58  ;;  %v1795_v59 = vmul.f32 1.442695, %v1729_v5  ;;  %v1921_v18 = vmul.f32 -50.0, %v7642_v16 }
 0x42a   :  { %v6516_v29 = vpop.eup %6515  ;;  %v4008_v53 = vadd.f32 %v6514_v39, %v3816_v33  ;;  %6541 = vpow2.f32 %v1605_v60  ;;  %v1797_v38 = vmul.f32 1.442695, %v1730_v57  ;;  %v1922_v1 = vmul.f32 -50.0, %v7691_v56 }
 0x42b   :  { %v6518_v54 = vpop.eup %6517  ;;  %v4199_v40 = vadd.f32 %v6516_v29, %v4007_v61  ;;  %6543 = vpow2.f32 %v1795_v59  ;;  %v1987_v35 = vmul.f32 1.442695, %v1921_v18  ;;  %v2113_v42 = vmul.f32 -5.0, %v7642_v16 }
 0x42c   :  { %v6520_v32 = vpop.eup %6519  ;;  %v4200_v21 = vadd.f32 %v6518_v54, %v4008_v53  ;;  %6545 = vpow2.f32 %v1797_v38  ;;  %v1989_v44 = vmul.f32 1.442695, %v1922_v1  ;;  %v2114_v12 = vmul.f32 -5.0, %v7691_v56 }
 0x42d   :  { %v6522_v37 = vpop.eup %6521  ;;  %v4391_v24 = vadd.f32 %v6520_v32, %v4199_v40  ;;  %6547 = vpow2.f32 %v1987_v35  ;;  %v2179_v23 = vmul.f32 1.442695, %v2113_v42  ;;  %v2305_v46 = vmul.f32 -0.5, %v7642_v16 }
 0x42e   :  { %v6524_v0 = vpop.eup %6523  ;;  %v4392_v28 = vadd.f32 %v6522_v37, %v4200_v21  ;;  %6549 = vpow2.f32 %v1989_v44  ;;  %v2181_v19 = vmul.f32 1.442695, %v2114_v12  ;;  %v2306_v6 = vmul.f32 -0.5, %v7691_v56 }
 0x42f   :  { %v6526_v55 = vpop.eup %6525  ;;  %v4583_v25 = vadd.f32 %v6524_v0, %v4391_v24  ;;  %6551 = vpow2.f32 %v2179_v23  ;;  %v2371_v4 = vmul.f32 1.442695, %v2305_v46  ;;  %v2497_v52 = vmul.f32 -0.1, %v7642_v16 }
 0x430   :  { %v6528_v41 = vpop.eup %6527  ;;  %v4584_v9 = vadd.f32 %v6526_v55, %v4392_v28  ;;  %6553 = vpow2.f32 %v2181_v19  ;;  %v2373_v63 = vmul.f32 1.442695, %v2306_v6  ;;  %v2498_v47 = vmul.f32 -0.1, %v7691_v56 }
 0x431   :  { %v6530_v48 = vpop.eup %6529  ;;  %v4775_v43 = vadd.f32 %v6528_v41, %v4583_v25  ;;  %6555 = vpow2.f32 %v2371_v4  ;;  %v2563_v2 = vmul.f32 1.442695, %v2497_v52  ;;  %v2689_v13 = vmul.f32 -0.05, %v7642_v16 }
 0x432   :  { %v6532_v3 = vpop.eup %6531  ;;  %v4776_v51 = vadd.f32 %v6530_v48, %v4584_v9  ;;  %6557 = vpow2.f32 %v2373_v63  ;;  %v2565_v36 = vmul.f32 1.442695, %v2498_v47  ;;  %v2690_v15 = vmul.f32 -0.05, %v7691_v56 }
 0x433   :  { %v6534_v8 = vpop.eup %6533  ;;  %6559 = vpow2.f32 %v2563_v2  ;;  %v2755_v17 = vmul.f32 1.442695, %v2689_v13  ;;  %v2881_v27 = vmul.f32 -0.033333335, %v7642_v16  ;;  %v2882_v7 = vmul.f32 -0.033333335, %v7691_v56 }
 0x434   :  { %v6536_v11 = vpop.eup %6535  ;;  %v4898_v31 = vsel %vm4808_vm10, %v4776_v51, 0.0  ;;  %6561 = vpow2.f32 %v2565_v36  ;;  %v2757_v10 = vmul.f32 1.442695, %v2690_v15  ;;  %v3073_v26 = vmul.f32 -0.025, %v7642_v16 }
 0x435   :  { %v6538_v14 = vpop.eup %6537  ;;  %v4985_v34 = vsel %vm84_vm0, %v4898_v31, 0.0  ;;  %v1489_v45 = vadd.f32 %v6536_v11, %v6532_v3  ;;  %6563 = vpow2.f32 %v2755_v17  ;;  %v2947_v22 = vmul.f32 1.442695, %v2881_v27 }
 0x436   :  { %v6540_v50 = vpop.eup %6539  ;;  %v4986_v58 = vadd.f32 %v4985_v34, %v4775_v43  ;;  %v1490_v5 = vadd.f32 %v6538_v14, %v6534_v8  ;;  %6565 = vpow2.f32 %v2757_v10  ;;  %v2949_v49 = vmul.f32 1.442695, %v2882_v7 }
 0x437   :  { %v6542_v33 = vpop.eup %6541  ;;  %v1681_v60 = vadd.f32 %v6540_v50, %v1489_v45  ;;  %6567 = vpow2.f32 %v2947_v22  ;;  %v3074_v57 = vmul.f32 -0.025, %v7691_v56  ;;  %v3139_v39 = vmul.f32 1.442695, %v3073_v26 }
 0x438   :  { %v6544_v61 = vpop.eup %6543  ;;  %4987 = vadd.xlane.f32.xlu1 %v4986_v58  ;;  %v1682_v59 = vadd.f32 %v6542_v33, %v1490_v5  ;;  %6569 = vpow2.f32 %v2949_v49  ;;  %v3265_v18 = vmul.f32 -0.02, %v7642_v16  ;;  %v3266_v29 = vmul.f32 -0.02, %v7691_v56 }
 0x439   :  { %v6546_v53 = vpop.eup %6545  ;;  %v1873_v38 = vadd.f32 %v6544_v61, %v1681_v60  ;;  %6571 = vpow2.f32 %v3139_v39  ;;  %v3141_v1 = vmul.f32 1.442695, %v3074_v57  ;;  %v3457_v54 = vmul.f32 -0.016666668, %v7642_v16 }
 0x43a   :  { %v6548_v40 = vpop.eup %6547  ;;  %v1874_v35 = vadd.f32 %v6546_v53, %v1682_v59  ;;  %v3331_v42 = vmul.f32 1.442695, %v3265_v18  ;;  %v3333_v32 = vmul.f32 1.442695, %v3266_v29  ;;  %v3458_v21 = vmul.f32 -0.016666668, %v7691_v56 }
 0x43b   :  { %v6550_v44 = vpop.eup %6549  ;;  %v2065_v12 = vadd.f32 %v6548_v40, %v1873_v38  ;;  %6573 = vpow2.f32 %v3141_v1  ;;  %v3523_v37 = vmul.f32 1.442695, %v3457_v54  ;;  %v3649_v24 = vmul.f32 -0.014285714, %v7642_v16 }
 0x43c   :  { %v6552_v23 = vpop.eup %6551  ;;  %v2066_v46 = vadd.f32 %v6550_v44, %v1874_v35  ;;  %6575 = vpow2.f32 %v3331_v42  ;;  %v3525_v0 = vmul.f32 1.442695, %v3458_v21  ;;  %v3650_v28 = vmul.f32 -0.014285714, %v7691_v56 }
 0x43d   :  { %v6554_v19 = vpop.eup %6553  ;;  %v2257_v6 = vadd.f32 %v6552_v23, %v2065_v12  ;;  %6577 = vpow2.f32 %v3333_v32  ;;  %v3715_v55 = vmul.f32 1.442695, %v3649_v24  ;;  %v3841_v25 = vmul.f32 -0.005, %v7642_v16 }
 0x43e   :  { %v6556_v4 = vpop.eup %6555  ;;  %v2258_v52 = vadd.f32 %v6554_v19, %v2066_v46  ;;  %6579 = vpow2.f32 %v3523_v37  ;;  %v3717_v41 = vmul.f32 1.442695, %v3650_v28  ;;  %v3842_v9 = vmul.f32 -0.005, %v7691_v56 }
 0x43f   :  { %v6558_v63 = vpop.eup %6557  ;;  %v2449_v47 = vadd.f32 %v6556_v4, %v2257_v6  ;;  %6581 = vpow2.f32 %v3525_v0  ;;  %v3907_v48 = vmul.f32 1.442695, %v3841_v25  ;;  %v4033_v43 = vmul.f32 -0.0005, %v7642_v16 }
 0x440   :  { %v6560_v2 = vpop.eup %6559  ;;  %v2450_v13 = vadd.f32 %v6558_v63, %v2258_v52  ;;  %6583 = vpow2.f32 %v3715_v55  ;;  %v3909_v3 = vmul.f32 1.442695, %v3842_v9  ;;  %v4034_v51 = vmul.f32 -0.0005, %v7691_v56 }
 0x441   :  { %v6562_v36 = vpop.eup %6561  ;;  %v2641_v15 = vadd.f32 %v6560_v2, %v2449_v47  ;;  %6585 = vpow2.f32 %v3717_v41  ;;  %v4099_v8 = vmul.f32 1.442695, %v4033_v43  ;;  %v4225_v17 = vmul.f32 -5e-05, %v7642_v16 }
 0x442   :  { %v6564_v27 = vpop.eup %6563  ;;  %v2642_v7 = vadd.f32 %v6562_v36, %v2450_v13  ;;  %6587 = vpow2.f32 %v3907_v48  ;;  %v4101_v11 = vmul.f32 1.442695, %v4034_v51  ;;  %v4226_v31 = vmul.f32 -5e-05, %v7691_v56 }
 0x443   :  { %v6566_v10 = vpop.eup %6565  ;;  %v2833_v26 = vadd.f32 %v6564_v27, %v2641_v15  ;;  %6589 = vpow2.f32 %v3909_v3  ;;  %v4291_v14 = vmul.f32 1.442695, %v4225_v17  ;;  %v4417_v34 = vmul.f32 -5e-06, %v7642_v16 }
 0x444   :  { %v6568_v45 = vpop.eup %6567  ;;  %v2834_v22 = vadd.f32 %v6566_v10, %v2642_v7  ;;  %6591 = vpow2.f32 %v4099_v8  ;;  %v4293_v50 = vmul.f32 1.442695, %v4226_v31  ;;  %v4418_v58 = vmul.f32 -5e-06, %v7691_v56 }
 0x445   :  { %v6570_v5 = vpop.eup %6569  ;;  %v3025_v49 = vadd.f32 %v6568_v45, %v2833_v26  ;;  %6593 = vpow2.f32 %v4101_v11  ;;  %v4483_v33 = vmul.f32 1.442695, %v4417_v34  ;;  %v4609_v60 = vmul.f32 -5e-07, %v7642_v16 }
 0x446   :  { %v6572_v57 = vpop.eup %6571  ;;  %v3026_v39 = vadd.f32 %v6570_v5, %v2834_v22  ;;  %6595 = vpow2.f32 %v4291_v14  ;;  %v4485_v61 = vmul.f32 1.442695, %v4418_v58  ;;  %v4610_v59 = vmul.f32 -5e-07, %v7691_v56 }
 0x447   :  { %v3217_v18 = vadd.f32 %v6572_v57, %v3025_v49  ;;  %6597 = vpow2.f32 %v4293_v50  ;;  %v4675_v29 = vmul.f32 1.442695, %v4609_v60  ;;  %v1155_v53 = vmul.f32 -500000.0, %v7663_v30 }
 0x448   :  { %v6574_v38 = vpop.eup %6573  ;;  %6599 = vpow2.f32 %v4483_v33  ;;  %v4677_v1 = vmul.f32 1.442695, %v4610_v59  ;;  %v1156_v54 = vmul.f32 -500000.0, %v7701_v20  ;;  %v1347_v40 = vmul.f32 -50000.0, %v7663_v30 }
 0x449   :  { %v6576_v35 = vpop.eup %6575  ;;  %v3218_v16 = vadd.f32 %v6574_v38, %v3026_v39  ;;  %6601 = vpow2.f32 %v4485_v61  ;;  %v1223_v42 = vmul.f32 1.442695, %v1155_v53  ;;  %v1348_v32 = vmul.f32 -50000.0, %v7701_v20 }
 0x44a   :  { %v6578_v21 = vpop.eup %6577  ;;  %v3409_v56 = vadd.f32 %v6576_v35, %v3217_v18  ;;  %6603 = vpow2.f32 %v4675_v29  ;;  %v1225_v44 = vmul.f32 1.442695, %v1156_v54  ;;  %v1415_v12 = vmul.f32 1.442695, %v1347_v40 }
 0x44b   :  { %v6580_v37 = vpop.eup %6579  ;;  %v3410_v24 = vadd.f32 %v6578_v21, %v3218_v16  ;;  %6605 = vpow2.f32 %v4677_v1  ;;  %v1417_v23 = vmul.f32 1.442695, %v1348_v32  ;;  %v1539_v46 = vmul.f32 -5000.0, %v7663_v30 }
 0x44c   :  { %v6582_v0 = vpop.eup %6581  ;;  %v3601_v28 = vadd.f32 %v6580_v37, %v3409_v56  ;;  %6607 = vpow2.f32 %v1223_v42  ;;  %v1540_v19 = vmul.f32 -5000.0, %v7701_v20  ;;  %v1731_v6 = vmul.f32 -500.0, %v7663_v30 }
 0x44d   :  { %v6584_v55 = vpop.eup %6583  ;;  %v3602_v25 = vadd.f32 %v6582_v0, %v3410_v24  ;;  %6609 = vpow2.f32 %v1225_v44  ;;  %v1607_v4 = vmul.f32 1.442695, %v1539_v46  ;;  %v1732_v52 = vmul.f32 -500.0, %v7701_v20 }
 0x44e   :  { %v6586_v41 = vpop.eup %6585  ;;  %v3793_v9 = vadd.f32 %v6584_v55, %v3601_v28  ;;  %6611 = vpow2.f32 %v1415_v12  ;;  %v1609_v63 = vmul.f32 1.442695, %v1540_v19  ;;  %v1799_v47 = vmul.f32 1.442695, %v1731_v6 }
 0x44f   :  { %v6588_v48 = vpop.eup %6587  ;;  %v3794_v43 = vadd.f32 %v6586_v41, %v3602_v25  ;;  %6613 = vpow2.f32 %v1417_v23  ;;  %v1801_v2 = vmul.f32 1.442695, %v1732_v52  ;;  %v1923_v13 = vmul.f32 -50.0, %v7663_v30 }
 0x450   :  { %v6590_v3 = vpop.eup %6589  ;;  %v3985_v51 = vadd.f32 %v6588_v48, %v3793_v9  ;;  %6615 = vpow2.f32 %v1607_v4  ;;  %v1924_v36 = vmul.f32 -50.0, %v7701_v20  ;;  %v2115_v15 = vmul.f32 -5.0, %v7663_v30 }
 0x451   :  { %v6592_v8 = vpop.eup %6591  ;;  %v3986_v17 = vadd.f32 %v6590_v3, %v3794_v43  ;;  %6617 = vpow2.f32 %v1609_v63  ;;  %v1991_v27 = vmul.f32 1.442695, %v1923_v13  ;;  %v2116_v7 = vmul.f32 -5.0, %v7701_v20 }
 0x452   :  { %v6594_v11 = vpop.eup %6593  ;;  %v4177_v31 = vadd.f32 %v6592_v8, %v3985_v51  ;;  %6619 = vpow2.f32 %v1799_v47  ;;  %v1993_v10 = vmul.f32 1.442695, %v1924_v36  ;;  %v2183_v26 = vmul.f32 1.442695, %v2115_v15 }
 0x453   :  { %v6596_v14 = vpop.eup %6595  ;;  %v4178_v34 = vadd.f32 %v6594_v11, %v3986_v17  ;;  %6621 = vpow2.f32 %v1801_v2  ;;  %v2185_v45 = vmul.f32 1.442695, %v2116_v7  ;;  %v2307_v22 = vmul.f32 -0.5, %v7663_v30 }
 0x454   :  { %v6598_v50 = vpop.eup %6597  ;;  %v4369_v58 = vadd.f32 %v6596_v14, %v4177_v31  ;;  %6623 = vpow2.f32 %v1991_v27  ;;  %v2308_v5 = vmul.f32 -0.5, %v7701_v20  ;;  %v2499_v49 = vmul.f32 -0.1, %v7663_v30 }
 0x455   :  { %v6600_v33 = vpop.eup %6599  ;;  %v4370_v60 = vadd.f32 %v6598_v50, %v4178_v34  ;;  %6625 = vpow2.f32 %v1993_v10  ;;  %v2375_v57 = vmul.f32 1.442695, %v2307_v22  ;;  %v2500_v39 = vmul.f32 -0.1, %v7701_v20 }
 0x456   :  { %v6602_v61 = vpop.eup %6601  ;;  %v4561_v59 = vadd.f32 %v6600_v33, %v4369_v58  ;;  %6627 = vpow2.f32 %v2183_v26  ;;  %v2377_v18 = vmul.f32 1.442695, %v2308_v5  ;;  %v2567_v29 = vmul.f32 1.442695, %v2499_v49 }
 0x457   :  { %v6604_v53 = vpop.eup %6603  ;;  %v4562_v38 = vadd.f32 %v6602_v61, %v4370_v60  ;;  %6629 = vpow2.f32 %v2185_v45  ;;  %v2569_v1 = vmul.f32 1.442695, %v2500_v39  ;;  %v2691_v54 = vmul.f32 -0.05, %v7663_v30 }
 0x458   :  { %v6606_v40 = vpop.eup %6605  ;;  %v4753_v35 = vadd.f32 %v6604_v53, %v4561_v59  ;;  %6631 = vpow2.f32 %v2375_v57  ;;  %v2692_v16 = vmul.f32 -0.05, %v7701_v20  ;;  %v2883_v42 = vmul.f32 -0.033333335, %v7663_v30 }
 0x459   :  { %v6608_v32 = vpop.eup %6607  ;;  %v4754_v21 = vadd.f32 %v6606_v40, %v4562_v38  ;;  %6633 = vpow2.f32 %v2377_v18  ;;  %v2759_v56 = vmul.f32 1.442695, %v2691_v54  ;;  %v2884_v44 = vmul.f32 -0.033333335, %v7701_v20 }
 0x45a   :  { %v6610_v12 = vpop.eup %6609  ;;  %6635 = vpow2.f32 %v2567_v29  ;;  %v2761_v37 = vmul.f32 1.442695, %v2692_v16  ;;  %v2951_v24 = vmul.f32 1.442695, %v2883_v42  ;;  %v3075_v23 = vmul.f32 -0.025, %v7663_v30 }
 0x45b   :  { %v6612_v46 = vpop.eup %6611  ;;  %v4876_v0 = vsel %vm4808_vm10, %v4754_v21, 0.0  ;;  %6637 = vpow2.f32 %v2569_v1  ;;  %v2953_v28 = vmul.f32 1.442695, %v2884_v44  ;;  %v3076_v19 = vmul.f32 -0.025, %v7701_v20 }
 0x45c   :  { %v6614_v6 = vpop.eup %6613  ;;  %v4941_v55 = vsel %vm84_vm0, %v4876_v0, 0.0  ;;  %v1491_v25 = vadd.f32 %v6612_v46, %v6608_v32  ;;  %6639 = vpow2.f32 %v2759_v56  ;;  %v3143_v4 = vmul.f32 1.442695, %v3075_v23 }
 0x45d   :  { %v6616_v52 = vpop.eup %6615  ;;  %v4942_v41 = vadd.f32 %v4941_v55, %v4753_v35  ;;  %v1492_v9 = vadd.f32 %v6614_v6, %v6610_v12  ;;  %6641 = vpow2.f32 %v2761_v37  ;;  %v3145_v63 = vmul.f32 1.442695, %v3076_v19 }
 0x45e   :  { %v6618_v47 = vpop.eup %6617  ;;  %v1683_v48 = vadd.f32 %v6616_v52, %v1491_v25  ;;  %6643 = vpow2.f32 %v2951_v24  ;;  %v3267_v43 = vmul.f32 -0.02, %v7663_v30  ;;  %v3268_v2 = vmul.f32 -0.02, %v7701_v20 }
 0x45f   :  { %v6620_v13 = vpop.eup %6619  ;;  %4943 = vadd.xlane.f32.xlu0 %v4942_v41  ;;  %v1684_v3 = vadd.f32 %v6618_v47, %v1492_v9  ;;  %6645 = vpow2.f32 %v2953_v28  ;;  %v3459_v51 = vmul.f32 -0.016666668, %v7663_v30  ;;  %v3460_v36 = vmul.f32 -0.016666668, %v7701_v20 }
 0x460   :  { %v6622_v15 = vpop.eup %6621  ;;  %v1875_v8 = vadd.f32 %v6620_v13, %v1683_v48  ;;  %6647 = vpow2.f32 %v3143_v4  ;;  %v3335_v17 = vmul.f32 1.442695, %v3267_v43  ;;  %v3337_v27 = vmul.f32 1.442695, %v3268_v2 }
 0x461   :  { %v6624_v7 = vpop.eup %6623  ;;  %v1876_v11 = vadd.f32 %v6622_v15, %v1684_v3  ;;  %6649 = vpow2.f32 %v3145_v63  ;;  %v3527_v31 = vmul.f32 1.442695, %v3459_v51  ;;  %v3529_v10 = vmul.f32 1.442695, %v3460_v36  ;;  %v9146_v3 = vld [vmem:[#allocation31_spill] sm:$0xff]  ;;  %v9147_v36 = vld [vmem:[#allocation14_spill] sm:$0xff] }
 0x462   :  { %v6626_v26 = vpop.eup %6625  ;;  %v2067_v14 = vadd.f32 %v6624_v7, %v1875_v8  ;;  %6651 = vpow2.f32 %v3335_v17  ;;  %v3651_v34 = vmul.f32 -0.014285714, %v7663_v30  ;;  %v3652_v45 = vmul.f32 -0.014285714, %v7701_v20 }
 0x463   :  { %v6628_v22 = vpop.eup %6627  ;;  %v2068_v50 = vadd.f32 %v6626_v26, %v1876_v11  ;;  %6653 = vpow2.f32 %v3337_v27  ;;  %v3843_v58 = vmul.f32 -0.005, %v7663_v30  ;;  %v3844_v5 = vmul.f32 -0.005, %v7701_v20 }
 0x464   :  { %v6630_v49 = vpop.eup %6629  ;;  %v2259_v33 = vadd.f32 %v6628_v22, %v2067_v14  ;;  %6655 = vpow2.f32 %v3527_v31  ;;  %v3719_v60 = vmul.f32 1.442695, %v3651_v34  ;;  %v3721_v57 = vmul.f32 1.442695, %v3652_v45 }
 0x465   :  { %v6632_v39 = vpop.eup %6631  ;;  %v2260_v61 = vadd.f32 %v6630_v49, %v2068_v50  ;;  %6657 = vpow2.f32 %v3529_v10  ;;  %v3911_v59 = vmul.f32 1.442695, %v3843_v58  ;;  %v3913_v18 = vmul.f32 1.442695, %v3844_v5 }
 0x466   :  { %v6634_v29 = vpop.eup %6633  ;;  %v2451_v53 = vadd.f32 %v6632_v39, %v2259_v33  ;;  %6659 = vpow2.f32 %v3719_v60  ;;  %v4035_v38 = vmul.f32 -0.0005, %v7663_v30  ;;  %v4036_v1 = vmul.f32 -0.0005, %v7701_v20 }
 0x467   :  { %v6636_v54 = vpop.eup %6635  ;;  %v2452_v40 = vadd.f32 %v6634_v29, %v2260_v61  ;;  %6661 = vpow2.f32 %v3721_v57  ;;  %v4227_v35 = vmul.f32 -5e-05, %v7663_v30  ;;  %v4228_v16 = vmul.f32 -5e-05, %v7701_v20 }
 0x468   :  { %v6638_v42 = vpop.eup %6637  ;;  %v2643_v32 = vadd.f32 %v6636_v54, %v2451_v53  ;;  %6663 = vpow2.f32 %v3911_v59  ;;  %v4103_v21 = vmul.f32 1.442695, %v4035_v38  ;;  %v4105_v56 = vmul.f32 1.442695, %v4036_v1 }
 0x469   :  { %v6640_v44 = vpop.eup %6639  ;;  %v2644_v12 = vadd.f32 %v6638_v42, %v2452_v40  ;;  %6665 = vpow2.f32 %v3913_v18  ;;  %v4295_v37 = vmul.f32 1.442695, %v4227_v35  ;;  %v4297_v24 = vmul.f32 1.442695, %v4228_v16 }
 0x46a   :  { %v6642_v23 = vpop.eup %6641  ;;  %v2835_v46 = vadd.f32 %v6640_v44, %v2643_v32  ;;  %6667 = vpow2.f32 %v4103_v21  ;;  %v4419_v0 = vmul.f32 -5e-06, %v7663_v30  ;;  %v4420_v28 = vmul.f32 -5e-06, %v7701_v20 }
 0x46b   :  { %v6644_v19 = vpop.eup %6643  ;;  %v2836_v6 = vadd.f32 %v6642_v23, %v2644_v12  ;;  %6669 = vpow2.f32 %v4105_v56  ;;  %v4611_v55 = vmul.f32 -5e-07, %v7663_v30  ;;  %v4612_v25 = vmul.f32 -5e-07, %v7701_v20 }
 0x46c   :  { %v6646_v4 = vpop.eup %6645  ;;  %v3027_v52 = vadd.f32 %v6644_v19, %v2835_v46  ;;  %6671 = vpow2.f32 %v4295_v37  ;;  %v4487_v41 = vmul.f32 1.442695, %v4419_v0  ;;  %v4489_v9 = vmul.f32 1.442695, %v4420_v28 }
 0x46d   :  { %v6648_v63 = vpop.eup %6647  ;;  %v3028_v47 = vadd.f32 %v6646_v4, %v2836_v6  ;;  %6673 = vpow2.f32 %v4297_v24  ;;  %v4679_v48 = vmul.f32 1.442695, %v4611_v55  ;;  %v4681_v43 = vmul.f32 1.442695, %v4612_v25 }
 0x46e   :  { %v6650_v2 = vpop.eup %6649  ;;  %v3219_v13 = vadd.f32 %v6648_v63, %v3027_v52  ;;  %6675 = vpow2.f32 %v4487_v41  ;;  %v1177_v51 = vmul.f32 -500000.0, %v9146_v3  ;;  %v1178_v15 = vmul.f32 -500000.0, %v9147_v36 }
 0x46f   :  { %v6652_v30 = vpop.eup %6651  ;;  %v3220_v8 = vadd.f32 %v6650_v2, %v3028_v47  ;;  %6677 = vpow2.f32 %v4489_v9  ;;  %v1369_v20 = vmul.f32 -50000.0, %v9146_v3  ;;  %v1370_v17 = vmul.f32 -50000.0, %v9147_v36 }
 0x470   :  { %v6654_v27 = vpop.eup %6653  ;;  %v3411_v7 = vadd.f32 %v6652_v30, %v3219_v13  ;;  %6679 = vpow2.f32 %v4679_v48  ;;  %v1267_v11 = vmul.f32 1.442695, %v1177_v51  ;;  %v1269_v31 = vmul.f32 1.442695, %v1178_v15 }
 0x471   :  { %v6656_v10 = vpop.eup %6655  ;;  %v3412_v26 = vadd.f32 %v6654_v27, %v3220_v8  ;;  %6681 = vpow2.f32 %v4681_v43  ;;  %v1459_v14 = vmul.f32 1.442695, %v1369_v20  ;;  %v1461_v34 = vmul.f32 1.442695, %v1370_v17 }
 0x472   :  { %v6658_v45 = vpop.eup %6657  ;;  %v3603_v22 = vadd.f32 %v6656_v10, %v3411_v7  ;;  %6683 = vpow2.f32 %v1267_v11  ;;  %v1561_v50 = vmul.f32 -5000.0, %v9146_v3  ;;  %v1562_v58 = vmul.f32 -5000.0, %v9147_v36 }
 0x473   :  { %v6660_v5 = vpop.eup %6659  ;;  %v3604_v49 = vadd.f32 %v6658_v45, %v3412_v26  ;;  %6685 = vpow2.f32 %v1269_v31  ;;  %v1753_v33 = vmul.f32 -500.0, %v9146_v3  ;;  %v1754_v60 = vmul.f32 -500.0, %v9147_v36 }
 0x474   :  { %v6662_v57 = vpop.eup %6661  ;;  %v3795_v39 = vadd.f32 %v6660_v5, %v3603_v22  ;;  %6687 = vpow2.f32 %v1459_v14  ;;  %v1651_v61 = vmul.f32 1.442695, %v1561_v50  ;;  %v1653_v59 = vmul.f32 1.442695, %v1562_v58 }
 0x475   :  { %v6664_v18 = vpop.eup %6663  ;;  %v3796_v29 = vadd.f32 %v6662_v57, %v3604_v49  ;;  %6689 = vpow2.f32 %v1461_v34  ;;  %v1843_v53 = vmul.f32 1.442695, %v1753_v33  ;;  %v1845_v38 = vmul.f32 1.442695, %v1754_v60 }
 0x476   :  { %v6666_v1 = vpop.eup %6665  ;;  %v3987_v54 = vadd.f32 %v6664_v18, %v3795_v39  ;;  %6691 = vpow2.f32 %v1651_v61  ;;  %v1945_v40 = vmul.f32 -50.0, %v9146_v3  ;;  %v1946_v35 = vmul.f32 -50.0, %v9147_v36 }
 0x477   :  { %v6668_v16 = vpop.eup %6667  ;;  %v3988_v42 = vadd.f32 %v6666_v1, %v3796_v29  ;;  %6693 = vpow2.f32 %v1653_v59  ;;  %v2137_v32 = vmul.f32 -5.0, %v9146_v3  ;;  %v2138_v21 = vmul.f32 -5.0, %v9147_v36 }
 0x478   :  { %v6670_v56 = vpop.eup %6669  ;;  %v4179_v44 = vadd.f32 %v6668_v16, %v3987_v54  ;;  %6695 = vpow2.f32 %v1843_v53  ;;  %v2035_v12 = vmul.f32 1.442695, %v1945_v40  ;;  %v2037_v37 = vmul.f32 1.442695, %v1946_v35 }
 0x479   :  { %v6672_v24 = vpop.eup %6671  ;;  %v4180_v23 = vadd.f32 %v6670_v56, %v3988_v42  ;;  %6697 = vpow2.f32 %v1845_v38  ;;  %v2227_v46 = vmul.f32 1.442695, %v2137_v32  ;;  %v2229_v0 = vmul.f32 1.442695, %v2138_v21 }
 0x47a   :  { %v6674_v28 = vpop.eup %6673  ;;  %v4371_v19 = vadd.f32 %v6672_v24, %v4179_v44  ;;  %6699 = vpow2.f32 %v2035_v12  ;;  %v2329_v6 = vmul.f32 -0.5, %v9146_v3  ;;  %v2330_v55 = vmul.f32 -0.5, %v9147_v36 }
 0x47b   :  { %v6676_v25 = vpop.eup %6675  ;;  %v4372_v4 = vadd.f32 %v6674_v28, %v4180_v23  ;;  %6701 = vpow2.f32 %v2037_v37  ;;  %v2521_v52 = vmul.f32 -0.1, %v9146_v3  ;;  %v2522_v41 = vmul.f32 -0.1, %v9147_v36 }
 0x47c   :  { %v6678_v9 = vpop.eup %6677  ;;  %v4563_v63 = vadd.f32 %v6676_v25, %v4371_v19  ;;  %6703 = vpow2.f32 %v2227_v46  ;;  %v2419_v47 = vmul.f32 1.442695, %v2329_v6  ;;  %v2421_v48 = vmul.f32 1.442695, %v2330_v55 }
 0x47d   :  { %v6680_v43 = vpop.eup %6679  ;;  %v4564_v2 = vadd.f32 %v6678_v9, %v4372_v4  ;;  %6705 = vpow2.f32 %v2229_v0  ;;  %v2611_v13 = vmul.f32 1.442695, %v2521_v52  ;;  %v2613_v51 = vmul.f32 1.442695, %v2522_v41 }
 0x47e   :  { %v6682_v15 = vpop.eup %6681  ;;  %v4755_v30 = vadd.f32 %v6680_v43, %v4563_v63  ;;  %6707 = vpow2.f32 %v2419_v47  ;;  %v2713_v8 = vmul.f32 -0.05, %v9146_v3  ;;  %v2714_v20 = vmul.f32 -0.05, %v9147_v36 }
 0x47f   :  { %v6684_v17 = vpop.eup %6683  ;;  %v4756_v27 = vadd.f32 %v6682_v15, %v4564_v2  ;;  %6709 = vpow2.f32 %v2421_v48  ;;  %v2905_v7 = vmul.f32 -0.033333335, %v9146_v3  ;;  %v2906_v11 = vmul.f32 -0.033333335, %v9147_v36 }
 0x480   :  { %v6686_v31 = vpop.eup %6685  ;;  %6711 = vpow2.f32 %v2611_v13  ;;  %v2803_v10 = vmul.f32 1.442695, %v2713_v8  ;;  %v2805_v26 = vmul.f32 1.442695, %v2714_v20  ;;  %v3097_v14 = vmul.f32 -0.025, %v9146_v3 }
 0x481   :  { %v6688_v34 = vpop.eup %6687  ;;  %v4878_v45 = vsel %vm4808_vm10, %v4756_v27, 0.0  ;;  %6713 = vpow2.f32 %v2613_v51  ;;  %v2995_v22 = vmul.f32 1.442695, %v2905_v7  ;;  %v2997_v50 = vmul.f32 1.442695, %v2906_v11 }
 0x482   :  { %v6690_v58 = vpop.eup %6689  ;;  %v4945_v5 = vsel %vm84_vm0, %v4878_v45, 0.0  ;;  %v1513_v49 = vadd.f32 %v6688_v34, %v6684_v17  ;;  %6715 = vpow2.f32 %v2803_v10  ;;  %v3098_v33 = vmul.f32 -0.025, %v9147_v36 }
 0x483   :  { %v6692_v60 = vpop.eup %6691  ;;  %v4946_v57 = vadd.f32 %v4945_v5, %v4755_v30  ;;  %v1514_v39 = vadd.f32 %v6690_v58, %v6686_v31  ;;  %6717 = vpow2.f32 %v2805_v26  ;;  %v3187_v61 = vmul.f32 1.442695, %v3097_v14 }
 0x484   :  { %v6694_v59 = vpop.eup %6693  ;;  %v1705_v18 = vadd.f32 %v6692_v60, %v1513_v49  ;;  %6719 = vpow2.f32 %v2995_v22  ;;  %v3189_v29 = vmul.f32 1.442695, %v3098_v33  ;;  %v3289_v53 = vmul.f32 -0.02, %v9146_v3 }
 0x485   :  { %v6696_v38 = vpop.eup %6695  ;;  %4947 = vadd.xlane.f32.xlu1 %v4946_v57  ;;  %v1706_v1 = vadd.f32 %v6694_v59, %v1514_v39  ;;  %6721 = vpow2.f32 %v2997_v50  ;;  %v3290_v54 = vmul.f32 -0.02, %v9147_v36  ;;  %v3481_v40 = vmul.f32 -0.016666668, %v9146_v3 }
 0x486   :  { %v6698_v35 = vpop.eup %6697  ;;  %v1897_v16 = vadd.f32 %v6696_v38, %v1705_v18  ;;  %6723 = vpow2.f32 %v3187_v61  ;;  %v3379_v42 = vmul.f32 1.442695, %v3289_v53  ;;  %v3482_v32 = vmul.f32 -0.016666668, %v9147_v36 }
 0x487   :  { %v6700_v21 = vpop.eup %6699  ;;  %v1898_v56 = vadd.f32 %v6698_v35, %v1706_v1  ;;  %6725 = vpow2.f32 %v3189_v29  ;;  %v3381_v44 = vmul.f32 1.442695, %v3290_v54  ;;  %v3571_v12 = vmul.f32 1.442695, %v3481_v40  ;;  %v9148_v54 = vld [vmem:[#allocation11_spill] sm:$0xff] }
 0x488   :  { %v6702_v37 = vpop.eup %6701  ;;  %v2089_v24 = vadd.f32 %v6700_v21, %v1897_v16  ;;  %6727 = vpow2.f32 %v3379_v42  ;;  %v3573_v23 = vmul.f32 1.442695, %v3482_v32  ;;  %v3673_v46 = vmul.f32 -0.014285714, %v9146_v3 }
 0x489   :  { %v6704_v0 = vpop.eup %6703  ;;  %v2090_v28 = vadd.f32 %v6702_v37, %v1898_v56  ;;  %6729 = vpow2.f32 %v3381_v44  ;;  %v3674_v19 = vmul.f32 -0.014285714, %v9147_v36  ;;  %v3865_v6 = vmul.f32 -0.005, %v9146_v3 }
 0x48a   :  { %v6706_v55 = vpop.eup %6705  ;;  %v2281_v25 = vadd.f32 %v6704_v0, %v2089_v24  ;;  %6731 = vpow2.f32 %v3571_v12  ;;  %v3763_v4 = vmul.f32 1.442695, %v3673_v46  ;;  %v3866_v52 = vmul.f32 -0.005, %v9147_v36 }
 0x48b   :  { %v6708_v41 = vpop.eup %6707  ;;  %v2282_v9 = vadd.f32 %v6706_v55, %v2090_v28  ;;  %6733 = vpow2.f32 %v3573_v23  ;;  %v3765_v63 = vmul.f32 1.442695, %v3674_v19  ;;  %v3955_v47 = vmul.f32 1.442695, %v3865_v6 }
 0x48c   :  { %v6710_v48 = vpop.eup %6709  ;;  %v2473_v43 = vadd.f32 %v6708_v41, %v2281_v25  ;;  %6735 = vpow2.f32 %v3763_v4  ;;  %v3957_v2 = vmul.f32 1.442695, %v3866_v52  ;;  %v4057_v13 = vmul.f32 -0.0005, %v9146_v3 }
 0x48d   :  { %v6712_v51 = vpop.eup %6711  ;;  %v2474_v15 = vadd.f32 %v6710_v48, %v2282_v9  ;;  %6737 = vpow2.f32 %v3765_v63  ;;  %v4058_v30 = vmul.f32 -0.0005, %v9147_v36  ;;  %v4249_v8 = vmul.f32 -5e-05, %v9146_v3 }
 0x48e   :  { %v6714_v20 = vpop.eup %6713  ;;  %v2665_v17 = vadd.f32 %v6712_v51, %v2473_v43  ;;  %6739 = vpow2.f32 %v3955_v47  ;;  %v4147_v27 = vmul.f32 1.442695, %v4057_v13  ;;  %v4250_v7 = vmul.f32 -5e-05, %v9147_v36 }
 0x48f   :  { %v6716_v11 = vpop.eup %6715  ;;  %v2666_v31 = vadd.f32 %v6714_v20, %v2474_v15  ;;  %6741 = vpow2.f32 %v3957_v2  ;;  %v4149_v10 = vmul.f32 1.442695, %v4058_v30  ;;  %v4339_v26 = vmul.f32 1.442695, %v4249_v8 }
 0x490   :  { %v6718_v14 = vpop.eup %6717  ;;  %v2857_v34 = vadd.f32 %v6716_v11, %v2665_v17  ;;  %6743 = vpow2.f32 %v4147_v27  ;;  %v4341_v45 = vmul.f32 1.442695, %v4250_v7  ;;  %v4441_v22 = vmul.f32 -5e-06, %v9146_v3 }
 0x491   :  { %v6720_v50 = vpop.eup %6719  ;;  %v2858_v58 = vadd.f32 %v6718_v14, %v2666_v31  ;;  %6745 = vpow2.f32 %v4149_v10  ;;  %v4442_v5 = vmul.f32 -5e-06, %v9147_v36  ;;  %v4633_v49 = vmul.f32 -5e-07, %v9146_v3  ;;  %v9149_v3 = vld [vmem:[#allocation9_spill] sm:$0xff] }
 0x492   :  { %v6722_v33 = vpop.eup %6721  ;;  %v3049_v60 = vadd.f32 %v6720_v50, %v2857_v34  ;;  %6747 = vpow2.f32 %v4339_v26  ;;  %v4531_v57 = vmul.f32 1.442695, %v4441_v22  ;;  %v4634_v39 = vmul.f32 -5e-07, %v9147_v36 }
 0x493   :  { %v6724_v61 = vpop.eup %6723  ;;  %v3050_v59 = vadd.f32 %v6722_v33, %v2858_v58  ;;  %6749 = vpow2.f32 %v4341_v45  ;;  %v4533_v18 = vmul.f32 1.442695, %v4442_v5  ;;  %v4723_v29 = vmul.f32 1.442695, %v4633_v49 }
 0x494   :  { %v6726_v53 = vpop.eup %6725  ;;  %v3241_v38 = vadd.f32 %v6724_v61, %v3049_v60  ;;  %6751 = vpow2.f32 %v4531_v57  ;;  %v4725_v1 = vmul.f32 1.442695, %v4634_v39  ;;  %v1179_v40 = vmul.f32 -500000.0, %v9148_v54 }
 0x495   :  { %v6728_v35 = vpop.eup %6727  ;;  %v3242_v16 = vadd.f32 %v6726_v53, %v3050_v59  ;;  %6753 = vpow2.f32 %v4533_v18  ;;  %v1180_v42 = vmul.f32 -500000.0, %v9149_v3  ;;  %v1371_v32 = vmul.f32 -50000.0, %v9148_v54 }
 0x496   :  { %v6730_v21 = vpop.eup %6729  ;;  %v3433_v36 = vadd.f32 %v6728_v35, %v3241_v38  ;;  %6755 = vpow2.f32 %v4723_v29  ;;  %v1271_v56 = vmul.f32 1.442695, %v1179_v40  ;;  %v1372_v44 = vmul.f32 -50000.0, %v9149_v3 }
 0x497   :  { %v6732_v12 = vpop.eup %6731  ;;  %v3434_v37 = vadd.f32 %v6730_v21, %v3242_v16  ;;  %6757 = vpow2.f32 %v4725_v1  ;;  %v1273_v24 = vmul.f32 1.442695, %v1180_v42  ;;  %v1463_v23 = vmul.f32 1.442695, %v1371_v32 }
 0x498   :  { %v6734_v46 = vpop.eup %6733  ;;  %v3625_v0 = vadd.f32 %v6732_v12, %v3433_v36  ;;  %6759 = vpow2.f32 %v1271_v56  ;;  %v1465_v28 = vmul.f32 1.442695, %v1372_v44  ;;  %v1563_v19 = vmul.f32 -5000.0, %v9148_v54 }
 0x499   :  { %v6736_v6 = vpop.eup %6735  ;;  %v3626_v55 = vadd.f32 %v6734_v46, %v3434_v37  ;;  %6761 = vpow2.f32 %v1273_v24  ;;  %v1564_v25 = vmul.f32 -5000.0, %v9149_v3  ;;  %v1755_v4 = vmul.f32 -500.0, %v9148_v54 }
 0x49a   :  { %v6738_v52 = vpop.eup %6737  ;;  %v3817_v41 = vadd.f32 %v6736_v6, %v3625_v0  ;;  %6763 = vpow2.f32 %v1463_v23  ;;  %v1655_v9 = vmul.f32 1.442695, %v1563_v19  ;;  %v1756_v63 = vmul.f32 -500.0, %v9149_v3 }
 0x49b   :  { %v6740_v47 = vpop.eup %6739  ;;  %v3818_v48 = vadd.f32 %v6738_v52, %v3626_v55  ;;  %6765 = vpow2.f32 %v1465_v28  ;;  %v1657_v43 = vmul.f32 1.442695, %v1564_v25  ;;  %v1847_v2 = vmul.f32 1.442695, %v1755_v4 }
 0x49c   :  { %v6742_v13 = vpop.eup %6741  ;;  %v4009_v51 = vadd.f32 %v6740_v47, %v3817_v41  ;;  %6767 = vpow2.f32 %v1655_v9  ;;  %v1849_v15 = vmul.f32 1.442695, %v1756_v63  ;;  %v1947_v30 = vmul.f32 -50.0, %v9148_v54 }
 0x49d   :  { %v6744_v8 = vpop.eup %6743  ;;  %v4010_v20 = vadd.f32 %v6742_v13, %v3818_v48  ;;  %6769 = vpow2.f32 %v1657_v43  ;;  %v1948_v17 = vmul.f32 -50.0, %v9149_v3  ;;  %v2139_v27 = vmul.f32 -5.0, %v9148_v54 }
 0x49e   :  { %v6746_v7 = vpop.eup %6745  ;;  %v4201_v11 = vadd.f32 %v6744_v8, %v4009_v51  ;;  %6771 = vpow2.f32 %v1847_v2  ;;  %v2039_v31 = vmul.f32 1.442695, %v1947_v30  ;;  %v2140_v10 = vmul.f32 -5.0, %v9149_v3 }
 0x49f   :  { %v6748_v26 = vpop.eup %6747  ;;  %v4202_v14 = vadd.f32 %v6746_v7, %v4010_v20  ;;  %6773 = vpow2.f32 %v1849_v15  ;;  %v2041_v34 = vmul.f32 1.442695, %v1948_v17  ;;  %v2231_v45 = vmul.f32 1.442695, %v2139_v27 }
 0x4a0   :  { %v6750_v22 = vpop.eup %6749  ;;  %v4393_v50 = vadd.f32 %v6748_v26, %v4201_v11  ;;  %6775 = vpow2.f32 %v2039_v31  ;;  %v2233_v58 = vmul.f32 1.442695, %v2140_v10  ;;  %v2331_v5 = vmul.f32 -0.5, %v9148_v54 }
 0x4a1   :  { %v6752_v49 = vpop.eup %6751  ;;  %v4394_v33 = vadd.f32 %v6750_v22, %v4202_v14  ;;  %6777 = vpow2.f32 %v2041_v34  ;;  %v2332_v60 = vmul.f32 -0.5, %v9149_v3  ;;  %v2523_v57 = vmul.f32 -0.1, %v9148_v54 }
 0x4a2   :  { %v6754_v39 = vpop.eup %6753  ;;  %v4585_v61 = vadd.f32 %v6752_v49, %v4393_v50  ;;  %6779 = vpow2.f32 %v2231_v45  ;;  %v2423_v59 = vmul.f32 1.442695, %v2331_v5  ;;  %v2524_v18 = vmul.f32 -0.1, %v9149_v3 }
 0x4a3   :  { %v6756_v29 = vpop.eup %6755  ;;  %v4586_v53 = vadd.f32 %v6754_v39, %v4394_v33  ;;  %6781 = vpow2.f32 %v2233_v58  ;;  %v2425_v38 = vmul.f32 1.442695, %v2332_v60  ;;  %v2615_v1 = vmul.f32 1.442695, %v2523_v57 }
 0x4a4   :  { %v6758_v40 = vpop.eup %6757  ;;  %v4777_v35 = vadd.f32 %v6756_v29, %v4585_v61  ;;  %6783 = vpow2.f32 %v2423_v59  ;;  %v2617_v16 = vmul.f32 1.442695, %v2524_v18  ;;  %v2715_v42 = vmul.f32 -0.05, %v9148_v54 }
 0x4a5   :  { %v6760_v32 = vpop.eup %6759  ;;  %v4778_v21 = vadd.f32 %v6758_v40, %v4586_v53  ;;  %6785 = vpow2.f32 %v2425_v38  ;;  %v2716_v36 = vmul.f32 -0.05, %v9149_v3  ;;  %v2907_v56 = vmul.f32 -0.033333335, %v9148_v54 }
 0x4a6   :  { %v6762_v44 = vpop.eup %6761  ;;  %6787 = vpow2.f32 %v2615_v1  ;;  %v2807_v12 = vmul.f32 1.442695, %v2715_v42  ;;  %v2908_v37 = vmul.f32 -0.033333335, %v9149_v3  ;;  %v3099_v24 = vmul.f32 -0.025, %v9148_v54 }
 0x4a7   :  { %v6764_v23 = vpop.eup %6763  ;;  %v4900_v46 = vsel %vm4808_vm10, %v4778_v21, 0.0  ;;  %6789 = vpow2.f32 %v2617_v16  ;;  %v2809_v0 = vmul.f32 1.442695, %v2716_v36  ;;  %v2999_v28 = vmul.f32 1.442695, %v2907_v56 }
 0x4a8   :  { %v6766_v19 = vpop.eup %6765  ;;  %v4989_v6 = vsel %vm84_vm0, %v4900_v46, 0.0  ;;  %v1515_v55 = vadd.f32 %v6764_v23, %v6760_v32  ;;  %6791 = vpow2.f32 %v2807_v12  ;;  %v3001_v25 = vmul.f32 1.442695, %v2908_v37 }
 0x4a9   :  { %v6768_v4 = vpop.eup %6767  ;;  %v4990_v52 = vadd.f32 %v4989_v6, %v4777_v35  ;;  %v1516_v41 = vadd.f32 %v6766_v19, %v6762_v44  ;;  %6793 = vpow2.f32 %v2809_v0  ;;  %v3100_v9 = vmul.f32 -0.025, %v9149_v3 }
 0x4aa   :  { %v6770_v63 = vpop.eup %6769  ;;  %v1707_v47 = vadd.f32 %v6768_v4, %v1515_v55  ;;  %6795 = vpow2.f32 %v2999_v28  ;;  %v3191_v48 = vmul.f32 1.442695, %v3099_v24  ;;  %v3291_v43 = vmul.f32 -0.02, %v9148_v54 }
 0x4ab   :  { %v6772_v2 = vpop.eup %6771  ;;  %4991 = vadd.xlane.f32.xlu0 %v4990_v52  ;;  %v1708_v13 = vadd.f32 %v6770_v63, %v1516_v41  ;;  %6797 = vpow2.f32 %v3001_v25  ;;  %v3193_v51 = vmul.f32 1.442695, %v3100_v9  ;;  %v3292_v15 = vmul.f32 -0.02, %v9149_v3 }
 0x4ac   :  { %v6774_v30 = vpop.eup %6773  ;;  %v1899_v8 = vadd.f32 %v6772_v2, %v1707_v47  ;;  %6799 = vpow2.f32 %v3191_v48  ;;  %v3383_v20 = vmul.f32 1.442695, %v3291_v43  ;;  %v3483_v17 = vmul.f32 -0.016666668, %v9148_v54 }
 0x4ad   :  { %v6776_v27 = vpop.eup %6775  ;;  %v1900_v7 = vadd.f32 %v6774_v30, %v1708_v13  ;;  %6801 = vpow2.f32 %v3193_v51  ;;  %v3385_v11 = vmul.f32 1.442695, %v3292_v15  ;;  %v3484_v31 = vmul.f32 -0.016666668, %v9149_v3  ;;  %v9150_v51 = vld [vmem:[#allocation30_spill] sm:$0xff] }
 0x4ae   :  { %v6778_v10 = vpop.eup %6777  ;;  %v2091_v26 = vadd.f32 %v6776_v27, %v1899_v8  ;;  %6803 = vpow2.f32 %v3383_v20  ;;  %v3575_v14 = vmul.f32 1.442695, %v3483_v17  ;;  %v3675_v34 = vmul.f32 -0.014285714, %v9148_v54  ;;  %v9151_v17 = vld [vmem:[#allocation34_spill] sm:$0xff] }
 0x4af   :  { %v6780_v45 = vpop.eup %6779  ;;  %v2092_v22 = vadd.f32 %v6778_v10, %v1900_v7  ;;  %6805 = vpow2.f32 %v3385_v11  ;;  %v3577_v50 = vmul.f32 1.442695, %v3484_v31  ;;  %v3676_v58 = vmul.f32 -0.014285714, %v9149_v3 }
 0x4b0   :  { %v6782_v5 = vpop.eup %6781  ;;  %v2283_v49 = vadd.f32 %v6780_v45, %v2091_v26  ;;  %6807 = vpow2.f32 %v3575_v14  ;;  %v3767_v33 = vmul.f32 1.442695, %v3675_v34  ;;  %v3867_v60 = vmul.f32 -0.005, %v9148_v54 }
 0x4b1   :  { %v6784_v57 = vpop.eup %6783  ;;  %v2284_v39 = vadd.f32 %v6782_v5, %v2092_v22  ;;  %6809 = vpow2.f32 %v3577_v50  ;;  %v3769_v61 = vmul.f32 1.442695, %v3676_v58  ;;  %v3868_v59 = vmul.f32 -0.005, %v9149_v3 }
 0x4b2   :  { %v6786_v18 = vpop.eup %6785  ;;  %v2475_v29 = vadd.f32 %v6784_v57, %v2283_v49  ;;  %6811 = vpow2.f32 %v3767_v33  ;;  %v3959_v53 = vmul.f32 1.442695, %v3867_v60  ;;  %v4059_v38 = vmul.f32 -0.0005, %v9148_v54 }
 0x4b3   :  { %v6788_v1 = vpop.eup %6787  ;;  %v2476_v40 = vadd.f32 %v6786_v18, %v2284_v39  ;;  %6813 = vpow2.f32 %v3769_v61  ;;  %v3961_v35 = vmul.f32 1.442695, %v3868_v59  ;;  %v4060_v16 = vmul.f32 -0.0005, %v9149_v3 }
 0x4b4   :  { %v6790_v42 = vpop.eup %6789  ;;  %v2667_v32 = vadd.f32 %v6788_v1, %v2475_v29  ;;  %6815 = vpow2.f32 %v3959_v53  ;;  %v4151_v21 = vmul.f32 1.442695, %v4059_v38  ;;  %v4251_v36 = vmul.f32 -5e-05, %v9148_v54 }
 0x4b5   :  { %v6792_v56 = vpop.eup %6791  ;;  %v2668_v44 = vadd.f32 %v6790_v42, %v2476_v40  ;;  %6817 = vpow2.f32 %v3961_v35  ;;  %v4153_v12 = vmul.f32 1.442695, %v4060_v16  ;;  %v4252_v37 = vmul.f32 -5e-05, %v9149_v3 }
 0x4b6   :  { %v6794_v24 = vpop.eup %6793  ;;  %v2859_v23 = vadd.f32 %v6792_v56, %v2667_v32  ;;  %6819 = vpow2.f32 %v4151_v21  ;;  %v4343_v46 = vmul.f32 1.442695, %v4251_v36  ;;  %v4443_v0 = vmul.f32 -5e-06, %v9148_v54 }
 0x4b7   :  { %v6796_v28 = vpop.eup %6795  ;;  %v2860_v19 = vadd.f32 %v6794_v24, %v2668_v44  ;;  %6821 = vpow2.f32 %v4153_v12  ;;  %v4345_v6 = vmul.f32 1.442695, %v4252_v37  ;;  %v4444_v55 = vmul.f32 -5e-06, %v9149_v3 }
 0x4b8   :  { %v6798_v25 = vpop.eup %6797  ;;  %v3051_v4 = vadd.f32 %v6796_v28, %v2859_v23  ;;  %6823 = vpow2.f32 %v4343_v46  ;;  %v4535_v52 = vmul.f32 1.442695, %v4443_v0  ;;  %v4635_v41 = vmul.f32 -5e-07, %v9148_v54 }
 0x4b9   :  { %v6800_v9 = vpop.eup %6799  ;;  %v3052_v63 = vadd.f32 %v6798_v25, %v2860_v19  ;;  %6825 = vpow2.f32 %v4345_v6  ;;  %v4537_v47 = vmul.f32 1.442695, %v4444_v55  ;;  %v4636_v48 = vmul.f32 -5e-07, %v9149_v3 }
 0x4ba   :  { %v6802_v43 = vpop.eup %6801  ;;  %v3243_v2 = vadd.f32 %v6800_v9, %v3051_v4  ;;  %6827 = vpow2.f32 %v4535_v52  ;;  %v4727_v13 = vmul.f32 1.442695, %v4635_v41  ;;  %v1157_v15 = vmul.f32 -500000.0, %v9150_v51 }
 0x4bb   :  { %v6804_v30 = vpop.eup %6803  ;;  %v3244_v8 = vadd.f32 %v6802_v43, %v3052_v63  ;;  %6829 = vpow2.f32 %v4537_v47  ;;  %v4729_v20 = vmul.f32 1.442695, %v4636_v48  ;;  %v1158_v27 = vmul.f32 -500000.0, %v9151_v17 }
 0x4bc   :  { %v6806_v7 = vpop.eup %6805  ;;  %v3435_v54 = vadd.f32 %v6804_v30, %v3243_v2  ;;  %6831 = vpow2.f32 %v4727_v13  ;;  %v1227_v11 = vmul.f32 1.442695, %v1157_v15  ;;  %v1349_v31 = vmul.f32 -50000.0, %v9150_v51 }
 0x4bd   :  { %v6808_v10 = vpop.eup %6807  ;;  %v3436_v3 = vadd.f32 %v6806_v7, %v3244_v8  ;;  %6833 = vpow2.f32 %v4729_v20  ;;  %v1229_v26 = vmul.f32 1.442695, %v1158_v27  ;;  %v1350_v14 = vmul.f32 -50000.0, %v9151_v17 }
 0x4be   :  { %v6810_v34 = vpop.eup %6809  ;;  %v3627_v45 = vadd.f32 %v6808_v10, %v3435_v54  ;;  %6835 = vpow2.f32 %v1227_v11  ;;  %v1419_v22 = vmul.f32 1.442695, %v1349_v31  ;;  %v1541_v50 = vmul.f32 -5000.0, %v9150_v51 }
 0x4bf   :  { %v6812_v58 = vpop.eup %6811  ;;  %v3628_v5 = vadd.f32 %v6810_v34, %v3436_v3  ;;  %6837 = vpow2.f32 %v1229_v26  ;;  %v1421_v49 = vmul.f32 1.442695, %v1350_v14  ;;  %v1542_v33 = vmul.f32 -5000.0, %v9151_v17 }
 0x4c0   :  { %v6814_v60 = vpop.eup %6813  ;;  %v3819_v57 = vadd.f32 %v6812_v58, %v3627_v45  ;;  %6839 = vpow2.f32 %v1419_v22  ;;  %v1611_v39 = vmul.f32 1.442695, %v1541_v50  ;;  %v1733_v61 = vmul.f32 -500.0, %v9150_v51 }
 0x4c1   :  { %v6816_v59 = vpop.eup %6815  ;;  %v3820_v18 = vadd.f32 %v6814_v60, %v3628_v5  ;;  %6841 = vpow2.f32 %v1421_v49  ;;  %v1613_v29 = vmul.f32 1.442695, %v1542_v33  ;;  %v1734_v53 = vmul.f32 -500.0, %v9151_v17 }
 0x4c2   :  { %v6818_v38 = vpop.eup %6817  ;;  %v4011_v1 = vadd.f32 %v6816_v59, %v3819_v57  ;;  %6843 = vpow2.f32 %v1611_v39  ;;  %v1803_v40 = vmul.f32 1.442695, %v1733_v61  ;;  %v1925_v35 = vmul.f32 -50.0, %v9150_v51 }
 0x4c3   :  { %v6820_v16 = vpop.eup %6819  ;;  %v4012_v42 = vadd.f32 %v6818_v38, %v3820_v18  ;;  %6845 = vpow2.f32 %v1613_v29  ;;  %v1805_v32 = vmul.f32 1.442695, %v1734_v53  ;;  %v1926_v21 = vmul.f32 -50.0, %v9151_v17 }
 0x4c4   :  { %v6822_v36 = vpop.eup %6821  ;;  %v4203_v56 = vadd.f32 %v6820_v16, %v4011_v1  ;;  %6847 = vpow2.f32 %v1803_v40  ;;  %v1995_v44 = vmul.f32 1.442695, %v1925_v35  ;;  %v2117_v12 = vmul.f32 -5.0, %v9150_v51 }
 0x4c5   :  { %v6824_v37 = vpop.eup %6823  ;;  %v4204_v24 = vadd.f32 %v6822_v36, %v4012_v42  ;;  %6849 = vpow2.f32 %v1805_v32  ;;  %v1997_v23 = vmul.f32 1.442695, %v1926_v21  ;;  %v2118_v46 = vmul.f32 -5.0, %v9151_v17 }
 0x4c6   :  { %v6826_v0 = vpop.eup %6825  ;;  %v4395_v28 = vadd.f32 %v6824_v37, %v4203_v56  ;;  %6851 = vpow2.f32 %v1995_v44  ;;  %v2187_v19 = vmul.f32 1.442695, %v2117_v12  ;;  %v2309_v6 = vmul.f32 -0.5, %v9150_v51 }
 0x4c7   :  { %v6828_v55 = vpop.eup %6827  ;;  %v4396_v25 = vadd.f32 %v6826_v0, %v4204_v24  ;;  %6853 = vpow2.f32 %v1997_v23  ;;  %v2189_v4 = vmul.f32 1.442695, %v2118_v46  ;;  %v2310_v52 = vmul.f32 -0.5, %v9151_v17 }
 0x4c8   :  { %v6830_v41 = vpop.eup %6829  ;;  %v4587_v9 = vadd.f32 %v6828_v55, %v4395_v28  ;;  %6855 = vpow2.f32 %v2187_v19  ;;  %v2379_v63 = vmul.f32 1.442695, %v2309_v6  ;;  %v2501_v47 = vmul.f32 -0.1, %v9150_v51 }
 0x4c9   :  { %v6832_v48 = vpop.eup %6831  ;;  %v4588_v43 = vadd.f32 %v6830_v41, %v4396_v25  ;;  %6857 = vpow2.f32 %v2189_v4  ;;  %v2381_v2 = vmul.f32 1.442695, %v2310_v52  ;;  %v2502_v13 = vmul.f32 -0.1, %v9151_v17 }
 0x4ca   :  { %v6834_v15 = vpop.eup %6833  ;;  %v4779_v30 = vadd.f32 %v6832_v48, %v4587_v9  ;;  %6859 = vpow2.f32 %v2379_v63  ;;  %v2571_v8 = vmul.f32 1.442695, %v2501_v47  ;;  %v2693_v20 = vmul.f32 -0.05, %v9150_v51 }
 0x4cb   :  { %v6836_v27 = vpop.eup %6835  ;;  %v4780_v7 = vadd.f32 %v6834_v15, %v4588_v43  ;;  %6861 = vpow2.f32 %v2381_v2  ;;  %v2573_v54 = vmul.f32 1.442695, %v2502_v13  ;;  %v2694_v11 = vmul.f32 -0.05, %v9151_v17 }
 0x4cc   :  { %v6838_v31 = vpop.eup %6837  ;;  %6863 = vpow2.f32 %v2571_v8  ;;  %v2763_v10 = vmul.f32 1.442695, %v2693_v20  ;;  %v2885_v3 = vmul.f32 -0.033333335, %v9150_v51  ;;  %v2886_v26 = vmul.f32 -0.033333335, %v9151_v17 }
 0x4cd   :  { %v6840_v14 = vpop.eup %6839  ;;  %v4902_v34 = vsel %vm4808_vm10, %v4780_v7, 0.0  ;;  %6865 = vpow2.f32 %v2573_v54  ;;  %v2765_v45 = vmul.f32 1.442695, %v2694_v11  ;;  %v3077_v22 = vmul.f32 -0.025, %v9150_v51 }
 0x4ce   :  { %v6842_v50 = vpop.eup %6841  ;;  %v4993_v58 = vsel %vm84_vm0, %v4902_v34, 0.0  ;;  %v1493_v5 = vadd.f32 %v6840_v14, %v6836_v27  ;;  %6867 = vpow2.f32 %v2763_v10  ;;  %v2955_v49 = vmul.f32 1.442695, %v2885_v3 }
 0x4cf   :  { %v6844_v33 = vpop.eup %6843  ;;  %v4994_v60 = vadd.f32 %v4993_v58, %v4779_v30  ;;  %v1494_v57 = vadd.f32 %v6842_v50, %v6838_v31  ;;  %6869 = vpow2.f32 %v2765_v45  ;;  %v2957_v39 = vmul.f32 1.442695, %v2886_v26 }
 0x4d0   :  { %v6846_v61 = vpop.eup %6845  ;;  %v1685_v59 = vadd.f32 %v6844_v33, %v1493_v5  ;;  %6871 = vpow2.f32 %v2955_v49  ;;  %v3078_v18 = vmul.f32 -0.025, %v9151_v17  ;;  %v3147_v29 = vmul.f32 1.442695, %v3077_v22  ;;  %v8653_v33 = vpop.xlane.xlu0 %4907 }
 0x4d1   :  { %v6848_v53 = vpop.eup %6847  ;;  %4995 = vadd.xlane.f32.xlu1 %v4994_v60  ;;  %v1686_v38 = vadd.f32 %v6846_v61, %v1494_v57  ;;  %6873 = vpow2.f32 %v2957_v39  ;;  %v3269_v1 = vmul.f32 -0.02, %v9150_v51  ;;  %v3270_v40 = vmul.f32 -0.02, %v9151_v17 }
 0x4d2   :  { %v6850_v35 = vpop.eup %6849  ;;  %v1877_v16 = vadd.f32 %v6848_v53, %v1685_v59  ;;  %6875 = vpow2.f32 %v3147_v29  ;;  %v3149_v42 = vmul.f32 1.442695, %v3078_v18  ;;  %v3461_v32 = vmul.f32 -0.016666668, %v9150_v51 }
 0x4d3   :  { %v6852_v21 = vpop.eup %6851  ;;  %v1878_v36 = vadd.f32 %v6850_v35, %v1686_v38  ;;  %v3339_v56 = vmul.f32 1.442695, %v3269_v1  ;;  %v3341_v44 = vmul.f32 1.442695, %v3270_v40  ;;  %v3462_v12 = vmul.f32 -0.016666668, %v9151_v17  ;;  %v8657_v38 = vpop.xlane.xlu1 %4955 }
 0x4d4   :  { %v6854_v37 = vpop.eup %6853  ;;  %v2069_v24 = vadd.f32 %v6852_v21, %v1877_v16  ;;  %6877 = vpow2.f32 %v3149_v42  ;;  %v3531_v23 = vmul.f32 1.442695, %v3461_v32  ;;  %v3653_v46 = vmul.f32 -0.014285714, %v9150_v51  ;;  %v9152_v35 = vld [vmem:[#allocation21_spill] sm:$0xff]  ;;  %v9153_v21 = vld [vmem:[#allocation20_spill] sm:$0xff] }
 0x4d5   :  { %v6856_v0 = vpop.eup %6855  ;;  %v2070_v28 = vadd.f32 %v6854_v37, %v1878_v36  ;;  %6879 = vpow2.f32 %v3339_v56  ;;  %v3533_v19 = vmul.f32 1.442695, %v3462_v12  ;;  %v3654_v6 = vmul.f32 -0.014285714, %v9151_v17 }
 0x4d6   :  { %v6858_v55 = vpop.eup %6857  ;;  %v2261_v25 = vadd.f32 %v6856_v0, %v2069_v24  ;;  %6881 = vpow2.f32 %v3341_v44  ;;  %v3723_v4 = vmul.f32 1.442695, %v3653_v46  ;;  %v3845_v52 = vmul.f32 -0.005, %v9150_v51  ;;  %v8663_v0 = vpop.xlane.xlu0 %4959 }
 0x4d7   :  { %v6860_v41 = vpop.eup %6859  ;;  %v2262_v9 = vadd.f32 %v6858_v55, %v2070_v28  ;;  %6883 = vpow2.f32 %v3531_v23  ;;  %v3725_v63 = vmul.f32 1.442695, %v3654_v6  ;;  %v3846_v47 = vmul.f32 -0.005, %v9151_v17 }
 0x4d8   :  { %v6862_v48 = vpop.eup %6861  ;;  %v2453_v43 = vadd.f32 %v6860_v41, %v2261_v25  ;;  %6885 = vpow2.f32 %v3533_v19  ;;  %v3915_v2 = vmul.f32 1.442695, %v3845_v52  ;;  %v4037_v13 = vmul.f32 -0.0005, %v9150_v51 }
 0x4d9   :  { %v6864_v15 = vpop.eup %6863  ;;  %v2454_v30 = vadd.f32 %v6862_v48, %v2262_v9  ;;  %6887 = vpow2.f32 %v3723_v4  ;;  %v3917_v8 = vmul.f32 1.442695, %v3846_v47  ;;  %v4038_v20 = vmul.f32 -0.0005, %v9151_v17  ;;  %v8668_v9 = vpop.xlane.xlu1 %4911 }
 0x4da   :  { %v6866_v27 = vpop.eup %6865  ;;  %v2645_v7 = vadd.f32 %v6864_v15, %v2453_v43  ;;  %6889 = vpow2.f32 %v3725_v63  ;;  %v4107_v54 = vmul.f32 1.442695, %v4037_v13  ;;  %v4229_v11 = vmul.f32 -5e-05, %v9150_v51 }
 0x4db   :  { %v6868_v31 = vpop.eup %6867  ;;  %v2646_v10 = vadd.f32 %v6866_v27, %v2454_v30  ;;  %6891 = vpow2.f32 %v3915_v2  ;;  %v4109_v3 = vmul.f32 1.442695, %v4038_v20  ;;  %v4230_v26 = vmul.f32 -5e-05, %v9151_v17 }
 0x4dc   :  { %v6870_v14 = vpop.eup %6869  ;;  %v2837_v34 = vadd.f32 %v6868_v31, %v2645_v7  ;;  %6893 = vpow2.f32 %v3917_v8  ;;  %v4299_v45 = vmul.f32 1.442695, %v4229_v11  ;;  %v4421_v22 = vmul.f32 -5e-06, %v9150_v51 }
 0x4dd   :  { %v6872_v50 = vpop.eup %6871  ;;  %v2838_v58 = vadd.f32 %v6870_v14, %v2646_v10  ;;  %6895 = vpow2.f32 %v4107_v54  ;;  %v4301_v5 = vmul.f32 1.442695, %v4230_v26  ;;  %v4422_v49 = vmul.f32 -5e-06, %v9151_v17 }
 0x4de   :  { %v6874_v60 = vpop.eup %6873  ;;  %v3029_v57 = vadd.f32 %v6872_v50, %v2837_v34  ;;  %6897 = vpow2.f32 %v4109_v3  ;;  %v4491_v39 = vmul.f32 1.442695, %v4421_v22  ;;  %v4613_v61 = vmul.f32 -5e-07, %v9150_v51  ;;  %v8674_v3 = vpop.xlane.xlu0 %4915 }
 0x4df   :  { %v6876_v59 = vpop.eup %6875  ;;  %v3030_v18 = vadd.f32 %v6874_v60, %v2838_v58  ;;  %6899 = vpow2.f32 %v4299_v45  ;;  %v4493_v29 = vmul.f32 1.442695, %v4422_v49  ;;  %v4614_v53 = vmul.f32 -5e-07, %v9151_v17  ;;  %v8677_v49 = vpop.xlane.xlu1 %4963 }
 0x4e0   :  { %v3221_v1 = vadd.f32 %v6876_v59, %v3029_v57  ;;  %6901 = vpow2.f32 %v4301_v5  ;;  %v4683_v40 = vmul.f32 1.442695, %v4613_v61  ;;  %v1181_v16 = vmul.f32 -500000.0, %v9152_v35 }
 0x4e1   :  { %v6878_v42 = vpop.eup %6877  ;;  %6903 = vpow2.f32 %v4491_v39  ;;  %v4685_v32 = vmul.f32 1.442695, %v4614_v53  ;;  %v1182_v36 = vmul.f32 -500000.0, %v9153_v21  ;;  %v1373_v51 = vmul.f32 -50000.0, %v9152_v35 }
 0x4e2   :  { %v6880_v56 = vpop.eup %6879  ;;  %v3222_v44 = vadd.f32 %v6878_v42, %v3030_v18  ;;  %6905 = vpow2.f32 %v4493_v29  ;;  %v1275_v12 = vmul.f32 1.442695, %v1181_v16  ;;  %v1374_v17 = vmul.f32 -50000.0, %v9153_v21 }
 0x4e3   :  { %v6882_v37 = vpop.eup %6881  ;;  %v3413_v24 = vadd.f32 %v6880_v56, %v3221_v1  ;;  %6907 = vpow2.f32 %v4683_v40  ;;  %v1277_v23 = vmul.f32 1.442695, %v1182_v36  ;;  %v1467_v46 = vmul.f32 1.442695, %v1373_v51 }
 0x4e4   :  { %v6884_v28 = vpop.eup %6883  ;;  %v3414_v19 = vadd.f32 %v6882_v37, %v3222_v44  ;;  %6909 = vpow2.f32 %v4685_v32  ;;  %v1469_v6 = vmul.f32 1.442695, %v1374_v17  ;;  %v1565_v55 = vmul.f32 -5000.0, %v9152_v35  ;;  %v8683_v44 = vpop.xlane.xlu0 %4919 }
 0x4e5   :  { %v6886_v25 = vpop.eup %6885  ;;  %v3605_v4 = vadd.f32 %v6884_v28, %v3413_v24  ;;  %6911 = vpow2.f32 %v1275_v12  ;;  %v1566_v52 = vmul.f32 -5000.0, %v9153_v21  ;;  %v1757_v41 = vmul.f32 -500.0, %v9152_v35  ;;  %v8685_v12 = vpop.xlane.xlu1 %4923 }
 0x4e6   :  { %v6888_v63 = vpop.eup %6887  ;;  %v3606_v47 = vadd.f32 %v6886_v25, %v3414_v19  ;;  %6913 = vpow2.f32 %v1277_v23  ;;  %v1659_v48 = vmul.f32 1.442695, %v1565_v55  ;;  %v1758_v43 = vmul.f32 -500.0, %v9153_v21 }
 0x4e7   :  { %v6890_v2 = vpop.eup %6889  ;;  %v3797_v13 = vadd.f32 %v6888_v63, %v3605_v4  ;;  %6915 = vpow2.f32 %v1467_v46  ;;  %v1661_v15 = vmul.f32 1.442695, %v1566_v52  ;;  %v1851_v30 = vmul.f32 1.442695, %v1757_v41 }
 0x4e8   :  { %v6892_v8 = vpop.eup %6891  ;;  %v3798_v20 = vadd.f32 %v6890_v2, %v3606_v47  ;;  %6917 = vpow2.f32 %v1469_v6  ;;  %v1853_v27 = vmul.f32 1.442695, %v1758_v43  ;;  %v1949_v7 = vmul.f32 -50.0, %v9152_v35 }
 0x4e9   :  { %v6894_v54 = vpop.eup %6893  ;;  %v3989_v11 = vadd.f32 %v6892_v8, %v3797_v13  ;;  %6919 = vpow2.f32 %v1659_v48  ;;  %v1950_v31 = vmul.f32 -50.0, %v9153_v21  ;;  %v2141_v10 = vmul.f32 -5.0, %v9152_v35 }
 0x4ea   :  { %v6896_v26 = vpop.eup %6895  ;;  %v3990_v14 = vadd.f32 %v6894_v54, %v3798_v20  ;;  %6921 = vpow2.f32 %v1661_v15  ;;  %v2043_v34 = vmul.f32 1.442695, %v1949_v7  ;;  %v2142_v45 = vmul.f32 -5.0, %v9153_v21  ;;  %v8696_v7 = vpop.xlane.xlu0 %4967 }
 0x4eb   :  { %v6898_v22 = vpop.eup %6897  ;;  %v4181_v50 = vadd.f32 %v6896_v26, %v3989_v11  ;;  %6923 = vpow2.f32 %v1851_v30  ;;  %v2045_v58 = vmul.f32 1.442695, %v1950_v31  ;;  %v2235_v5 = vmul.f32 1.442695, %v2141_v10  ;;  %v8698_v54 = vpop.xlane.xlu1 %4971 }
 0x4ec   :  { %v6900_v60 = vpop.eup %6899  ;;  %v4182_v57 = vadd.f32 %v6898_v22, %v3990_v14  ;;  %6925 = vpow2.f32 %v1853_v27  ;;  %v2237_v39 = vmul.f32 1.442695, %v2142_v45  ;;  %v2333_v61 = vmul.f32 -0.5, %v9152_v35 }
 0x4ed   :  { %v6902_v59 = vpop.eup %6901  ;;  %v4373_v18 = vadd.f32 %v6900_v60, %v4181_v50  ;;  %6927 = vpow2.f32 %v2043_v34  ;;  %v2334_v29 = vmul.f32 -0.5, %v9153_v21  ;;  %v2525_v53 = vmul.f32 -0.1, %v9152_v35 }
 0x4ee   :  { %v6904_v1 = vpop.eup %6903  ;;  %v4374_v40 = vadd.f32 %v6902_v59, %v4182_v57  ;;  %6929 = vpow2.f32 %v2045_v58  ;;  %v2427_v16 = vmul.f32 1.442695, %v2333_v61  ;;  %v2526_v42 = vmul.f32 -0.1, %v9153_v21 }
 0x4ef   :  { %v6906_v32 = vpop.eup %6905  ;;  %v4565_v36 = vadd.f32 %v6904_v1, %v4373_v18  ;;  %6931 = vpow2.f32 %v2235_v5  ;;  %v2429_v51 = vmul.f32 1.442695, %v2334_v29  ;;  %v2619_v56 = vmul.f32 1.442695, %v2525_v53 }
 0x4f0   :  { %v6908_v17 = vpop.eup %6907  ;;  %v4566_v37 = vadd.f32 %v6906_v32, %v4374_v40  ;;  %6933 = vpow2.f32 %v2237_v39  ;;  %v2621_v24 = vmul.f32 1.442695, %v2526_v42  ;;  %v2717_v23 = vmul.f32 -0.05, %v9152_v35 }
 0x4f1   :  { %v6910_v46 = vpop.eup %6909  ;;  %v4757_v28 = vadd.f32 %v6908_v17, %v4565_v36  ;;  %6935 = vpow2.f32 %v2427_v16  ;;  %v2718_v19 = vmul.f32 -0.05, %v9153_v21  ;;  %v2909_v6 = vmul.f32 -0.033333335, %v9152_v35  ;;  %v8706_v36 = vpop.xlane.xlu0 %4927 }
 0x4f2   :  { %v6912_v55 = vpop.eup %6911  ;;  %v4758_v25 = vadd.f32 %v6910_v46, %v4566_v37  ;;  %6937 = vpow2.f32 %v2429_v51  ;;  %v2811_v4 = vmul.f32 1.442695, %v2717_v23  ;;  %v2910_v52 = vmul.f32 -0.033333335, %v9153_v21  ;;  %v8708_v51 = vpop.xlane.xlu1 %4931 }
 0x4f3   :  { %v6914_v41 = vpop.eup %6913  ;;  %6939 = vpow2.f32 %v2619_v56  ;;  %v2813_v63 = vmul.f32 1.442695, %v2718_v19  ;;  %v3003_v47 = vmul.f32 1.442695, %v2909_v6  ;;  %v3101_v48 = vmul.f32 -0.025, %v9152_v35 }
 0x4f4   :  { %v6916_v43 = vpop.eup %6915  ;;  %v4880_v2 = vsel %vm4808_vm10, %v4758_v25, 0.0  ;;  %6941 = vpow2.f32 %v2621_v24  ;;  %v3005_v13 = vmul.f32 1.442695, %v2910_v52  ;;  %v3102_v15 = vmul.f32 -0.025, %v9153_v21 }
 0x4f5   :  { %v6918_v30 = vpop.eup %6917  ;;  %v4949_v8 = vsel %vm84_vm0, %v4880_v2, 0.0  ;;  %v1517_v20 = vadd.f32 %v6916_v43, %v6912_v55  ;;  %6943 = vpow2.f32 %v2811_v4  ;;  %v3195_v27 = vmul.f32 1.442695, %v3101_v48 }
 0x4f6   :  { %v6920_v11 = vpop.eup %6919  ;;  %v4950_v31 = vadd.f32 %v4949_v8, %v4757_v28  ;;  %v1518_v10 = vadd.f32 %v6918_v30, %v6914_v41  ;;  %6945 = vpow2.f32 %v2813_v63  ;;  %v3197_v26 = vmul.f32 1.442695, %v3102_v15 }
 0x4f7   :  { %v6922_v14 = vpop.eup %6921  ;;  %v1709_v34 = vadd.f32 %v6920_v11, %v1517_v20  ;;  %6947 = vpow2.f32 %v3003_v47  ;;  %v3293_v45 = vmul.f32 -0.02, %v9152_v35  ;;  %v3294_v22 = vmul.f32 -0.02, %v9153_v21  ;;  %v8718_v11 = vpop.xlane.xlu1 %4979 }
 0x4f8   :  { %v6924_v50 = vpop.eup %6923  ;;  %4951 = vadd.xlane.f32.xlu0 %v4950_v31  ;;  %v1710_v58 = vadd.f32 %v6922_v14, %v1518_v10  ;;  %6949 = vpow2.f32 %v3005_v13  ;;  %v3485_v5 = vmul.f32 -0.016666668, %v9152_v35  ;;  %v3486_v60 = vmul.f32 -0.016666668, %v9153_v21 }
 0x4f9   :  { %v6926_v57 = vpop.eup %6925  ;;  %v1901_v39 = vadd.f32 %v6924_v50, %v1709_v34  ;;  %6951 = vpow2.f32 %v3195_v27  ;;  %v3387_v61 = vmul.f32 1.442695, %v3293_v45  ;;  %v3389_v59 = vmul.f32 1.442695, %v3294_v22  ;;  %v8716_v27 = vpop.xlane.xlu0 %4975 }
 0x4fa   :  { %v6928_v18 = vpop.eup %6927  ;;  %v1902_v29 = vadd.f32 %v6926_v57, %v1710_v58  ;;  %6953 = vpow2.f32 %v3197_v26  ;;  %v3579_v53 = vmul.f32 1.442695, %v3485_v5  ;;  %v3581_v1 = vmul.f32 1.442695, %v3486_v60 }
 0x4fb   :  { %v6930_v40 = vpop.eup %6929  ;;  %v2093_v16 = vadd.f32 %v6928_v18, %v1901_v39  ;;  %6955 = vpow2.f32 %v3387_v61  ;;  %v3677_v42 = vmul.f32 -0.014285714, %v9152_v35  ;;  %v3678_v32 = vmul.f32 -0.014285714, %v9153_v21 }
 0x4fc   :  { %v6932_v56 = vpop.eup %6931  ;;  %v2094_v17 = vadd.f32 %v6930_v40, %v1902_v29  ;;  %6957 = vpow2.f32 %v3389_v59  ;;  %v3869_v37 = vmul.f32 -0.005, %v9152_v35  ;;  %v3870_v24 = vmul.f32 -0.005, %v9153_v21 }
 0x4fd   :  { %v6934_v23 = vpop.eup %6933  ;;  %v2285_v46 = vadd.f32 %v6932_v56, %v2093_v16  ;;  %6959 = vpow2.f32 %v3579_v53  ;;  %v3771_v28 = vmul.f32 1.442695, %v3677_v42  ;;  %v3773_v19 = vmul.f32 1.442695, %v3678_v32  ;;  %v8724_v42 = vpop.xlane.xlu0 %4935 }
 0x4fe   :  { %v6936_v6 = vpop.eup %6935  ;;  %v2286_v55 = vadd.f32 %v6934_v23, %v2094_v17  ;;  %6961 = vpow2.f32 %v3581_v1  ;;  %v3963_v25 = vmul.f32 1.442695, %v3869_v37  ;;  %v3965_v4 = vmul.f32 1.442695, %v3870_v24  ;;  %v8726_v32 = vpop.xlane.xlu1 %4939 }
 0x4ff   :  { %v6938_v52 = vpop.eup %6937  ;;  %v2477_v41 = vadd.f32 %v6936_v6, %v2285_v46  ;;  %6963 = vpow2.f32 %v3771_v28  ;;  %v4061_v63 = vmul.f32 -0.0005, %v9152_v35  ;;  %v4062_v47 = vmul.f32 -0.0005, %v9153_v21 }
 0x500   :  { %v6940_v48 = vpop.eup %6939  ;;  %v2478_v43 = vadd.f32 %v6938_v52, %v2286_v55  ;;  %6965 = vpow2.f32 %v3773_v19  ;;  %v4253_v2 = vmul.f32 -5e-05, %v9152_v35  ;;  %v4254_v13 = vmul.f32 -5e-05, %v9153_v21 }
 0x501   :  { %v6942_v15 = vpop.eup %6941  ;;  %v2669_v30 = vadd.f32 %v6940_v48, %v2477_v41  ;;  %6967 = vpow2.f32 %v3963_v25  ;;  %v4155_v8 = vmul.f32 1.442695, %v4061_v63  ;;  %v4157_v20 = vmul.f32 1.442695, %v4062_v47  ;;  %v8848_v52 = vpop.xlane.xlu0 %4983 }
 0x502   :  { %v6944_v31 = vpop.eup %6943  ;;  %v2670_v10 = vadd.f32 %v6942_v15, %v2478_v43  ;;  %6969 = vpow2.f32 %v3965_v4  ;;  %v4347_v26 = vmul.f32 1.442695, %v4253_v2  ;;  %v4349_v14 = vmul.f32 1.442695, %v4254_v13  ;;  %v8850_v41 = vpop.xlane.xlu1 %4987 }
 0x503   :  { %v6946_v34 = vpop.eup %6945  ;;  %v2861_v45 = vadd.f32 %v6944_v31, %v2669_v30  ;;  %6971 = vpow2.f32 %v4155_v8  ;;  %v4445_v22 = vmul.f32 -5e-06, %v9152_v35  ;;  %v4446_v50 = vmul.f32 -5e-06, %v9153_v21 }
 0x504   :  { %v6948_v58 = vpop.eup %6947  ;;  %v2862_v5 = vadd.f32 %v6946_v34, %v2670_v10  ;;  %6973 = vpow2.f32 %v4157_v20  ;;  %v4637_v60 = vmul.f32 -5e-07, %v9152_v35  ;;  %v4638_v57 = vmul.f32 -5e-07, %v9153_v21 }
 0x505   :  { %v6950_v39 = vpop.eup %6949  ;;  %v3053_v61 = vadd.f32 %v6948_v58, %v2861_v45  ;;  %6975 = vpow2.f32 %v4347_v26  ;;  %v4539_v59 = vmul.f32 1.442695, %v4445_v22  ;;  %v4541_v18 = vmul.f32 1.442695, %v4446_v50 }
 0x506   :  { %v6952_v29 = vpop.eup %6951  ;;  %v3054_v53 = vadd.f32 %v6950_v39, %v2862_v5  ;;  %6977 = vpow2.f32 %v4349_v14  ;;  %v4733_v1 = vmul.f32 1.442695, %v4638_v57  ;;  %vm51_vm11 = vcmask 7168  }
 0x507   :  { %v6954_v40 = vpop.eup %6953  ;;  %v3245_v16 = vadd.f32 %v6952_v29, %v3053_v61  ;;  %6979 = vpow2.f32 %v4539_v59  ;;  %v4731_v21 = vmul.f32 1.442695, %v4637_v60  ;;  %v9154_v17 = vmov 0.0  }
 0x508   :  { %v6956_v35 = vpop.eup %6955  ;;  %v3246_v56 = vadd.f32 %v6954_v40, %v3054_v53  ;;  %6981 = vpow2.f32 %v4541_v18  ;;  %64 = vst.msk [vmem:[%s9045_s4 + $0x60] sm:$0xff] %vm51_vm11, %v9154_v17  ;;  %52 = vst.msk [vmem:[%s9045_s4] sm:$0xff] %vm51_vm11, %v9154_v17 }
 0x509   :  { %53 = vst.msk [vmem:[%s9045_s4 + $0x8] sm:$0xff] %vm51_vm11, %v9154_v17  ;;  %54 = vst.msk [vmem:[%s9045_s4 + $0x10] sm:$0xff] %vm51_vm11, %v9154_v17  ;;  %v6958_v37 = vpop.eup %6957  ;;  %v3437_v24 = vadd.f32 %v6956_v35, %v3245_v16  ;;  %6983 = vpow2.f32 %v4733_v1  ;;  %v4944_v16 = vpop.xlane.xlu0 %4943 }
 0x50a   :  { %55 = vst.msk [vmem:[%s9045_s4 + $0x18] sm:$0xff] %vm51_vm11, %v9154_v17  ;;  %56 = vst.msk [vmem:[%s9045_s4 + $0x20] sm:$0xff] %vm51_vm11, %v9154_v17  ;;  %v6960_v23 = vpop.eup %6959  ;;  %v3438_v46 = vadd.f32 %v6958_v37, %v3246_v56  ;;  %6985 = vpow2.f32 %v4731_v21 }
 0x50b   :  { %57 = vst.msk [vmem:[%s9045_s4 + $0x28] sm:$0xff] %vm51_vm11, %v9154_v17  ;;  %58 = vst.msk [vmem:[%s9045_s4 + $0x30] sm:$0xff] %vm51_vm11, %v9154_v17  ;;  %v6962_v28 = vpop.eup %6961  ;;  %v3629_v19 = vadd.f32 %v6960_v23, %v3437_v24 }
 0x50c   :  { %59 = vst.msk [vmem:[%s9045_s4 + $0x38] sm:$0xff] %vm51_vm11, %v9154_v17  ;;  %60 = vst.msk [vmem:[%s9045_s4 + $0x40] sm:$0xff] %vm51_vm11, %v9154_v17  ;;  %v6964_v6 = vpop.eup %6963  ;;  %v3630_v55 = vadd.f32 %v6962_v28, %v3438_v46 }
 0x50d   :  { %61 = vst.msk [vmem:[%s9045_s4 + $0x48] sm:$0xff] %vm51_vm11, %v9154_v17  ;;  %62 = vst.msk [vmem:[%s9045_s4 + $0x50] sm:$0xff] %vm51_vm11, %v9154_v17  ;;  %v6966_v25 = vpop.eup %6965  ;;  %v3821_v4 = vadd.f32 %v6964_v6, %v3629_v19 }
 0x50e   :  { %63 = vst.msk [vmem:[%s9045_s4 + $0x58] sm:$0xff] %vm51_vm11, %v9154_v17  ;;  %65 = vst.msk [vmem:[%s9045_s4 + $0x68] sm:$0xff] %vm51_vm11, %v9154_v17  ;;  %v6968_v63 = vpop.eup %6967  ;;  %v3822_v47 = vadd.f32 %v6966_v25, %v3630_v55  ;;  %v4948_v35 = vpop.xlane.xlu1 %4947 }
 0x50f   :  { %66 = vst.msk [vmem:[%s9045_s4 + $0x70] sm:$0xff] %vm51_vm11, %v9154_v17  ;;  %67 = vst.msk [vmem:[%s9045_s4 + $0x78] sm:$0xff] %vm51_vm11, %v9154_v17  ;;  %v6970_v48 = vpop.eup %6969  ;;  %v4013_v43 = vadd.f32 %v6968_v63, %v3821_v4  ;;  %v5040_v2 = vld [vmem:[%s9045_s4 + $0x60] sm:$0xff] }
 0x510   :  { %68 = vst.msk [vmem:[%s9045_s4 + $0x80] sm:$0xff] %vm51_vm11, %v9154_v17  ;;  %69 = vst.msk [vmem:[%s9045_s4 + $0x88] sm:$0xff] %vm51_vm11, %v9154_v17  ;;  %v5028_v13 = vld [vmem:[%s9045_s4] sm:$0xff]  ;;  %v5029_v15 = vld [vmem:[%s9045_s4 + $0x8] sm:$0xff]  ;;  %v6972_v30 = vpop.eup %6971  ;;  %v4014_v8 = vadd.f32 %v6970_v48, %v3822_v47  ;;  %v5064_v20 = vadd.f32 %v5040_v2, %v8657_v38 }
 0x511   :  { %70 = vst.msk [vmem:[%s9045_s4 + $0x90] sm:$0xff] %vm51_vm11, %v9154_v17  ;;  %71 = vst.msk [vmem:[%s9045_s4 + $0x98] sm:$0xff] %vm51_vm11, %v9154_v17  ;;  %v5052_v31 = vadd.f32 %v5028_v13, %v8653_v33  ;;  %v5053_v10 = vadd.f32 %v5029_v15, %v8668_v9  ;;  %v5030_v34 = vld [vmem:[%s9045_s4 + $0x10] sm:$0xff]  ;;  %v6974_v45 = vpop.eup %6973  ;;  %v4205_v22 = vadd.f32 %v6972_v30, %v4013_v43  ;;  %v5031_v50 = vld [vmem:[%s9045_s4 + $0x18] sm:$0xff] }
 0x512   :  { %72 = vst.msk [vmem:[%s9045_s4 + $0xa0] sm:$0xff] %vm51_vm11, %v9154_v17  ;;  %73 = vst.msk [vmem:[%s9045_s4 + $0xa8] sm:$0xff] %vm51_vm11, %v9154_v17  ;;  %v5054_v9 = vadd.f32 %v5030_v34, %v8674_v3  ;;  %v5032_v58 = vld [vmem:[%s9045_s4 + $0x20] sm:$0xff]  ;;  %v6976_v60 = vpop.eup %6975  ;;  %v4206_v57 = vadd.f32 %v6974_v45, %v4014_v8  ;;  %v5033_v61 = vld [vmem:[%s9045_s4 + $0x28] sm:$0xff] }
 0x513   :  { %74 = vst.msk [vmem:[%s9045_s4 + $0xb0] sm:$0xff] %vm51_vm11, %v9154_v17  ;;  %75 = vst.msk [vmem:[%s9045_s4 + $0xb8] sm:$0xff] %vm51_vm11, %v9154_v17  ;;  %v5056_v3 = vadd.f32 %v5032_v58, %v8685_v12  ;;  %v5034_v59 = vld [vmem:[%s9045_s4 + $0x30] sm:$0xff]  ;;  %v6978_v18 = vpop.eup %6977  ;;  %v4397_v29 = vadd.f32 %v6976_v60, %v4205_v22  ;;  %v5057_v12 = vadd.f32 %v5033_v61, %v8706_v36  ;;  %v5035_v40 = vld [vmem:[%s9045_s4 + $0x38] sm:$0xff] }
 0x514   :  { %5089 = vst.msk [vmem:[%s9045_s4 + $0x60] sm:$0xff] %vm51_vm11, %v5064_v20  ;;  %5077 = vst.msk [vmem:[%s9045_s4] sm:$0xff] %vm51_vm11, %v5052_v31  ;;  %v6980_v56 = vpop.eup %6979  ;;  %v5059_v21 = vadd.f32 %v5035_v40, %v8724_v42  ;;  %v5036_v17 = vld [vmem:[%s9045_s4 + $0x40] sm:$0xff]  ;;  %v5037_v46 = vld [vmem:[%s9045_s4 + $0x48] sm:$0xff] }
 0x515   :  { %v5041_v26 = vld [vmem:[%s9045_s4 + $0x68] sm:$0xff]  ;;  %5078 = vst.msk [vmem:[%s9045_s4 + $0x8] sm:$0xff] %vm51_vm11, %v5053_v10  ;;  %5079 = vst.msk [vmem:[%s9045_s4 + $0x10] sm:$0xff] %vm51_vm11, %v5054_v9  ;;  %v6982_v23 = vpop.eup %6981  ;;  %v5038_v28 = vld [vmem:[%s9045_s4 + $0x50] sm:$0xff]  ;;  %v4589_v19 = vadd.f32 %v6980_v56, %v4397_v29 }
 0x516   :  { %v5042_v14 = vld [vmem:[%s9045_s4 + $0x70] sm:$0xff]  ;;  %v5065_v38 = vadd.f32 %v5041_v26, %v8663_v0  ;;  %v5043_v5 = vld [vmem:[%s9045_s4 + $0x78] sm:$0xff]  ;;  %v5055_v0 = vadd.f32 %v5031_v50, %v8683_v44  ;;  %5081 = vst.msk [vmem:[%s9045_s4 + $0x20] sm:$0xff] %vm51_vm11, %v5056_v3  ;;  %5082 = vst.msk [vmem:[%s9045_s4 + $0x28] sm:$0xff] %vm51_vm11, %v5057_v12  ;;  %v5062_v55 = vadd.f32 %v5038_v28, %v4948_v35  ;;  %v6984_v25 = vpop.eup %6983 }
 0x517   :  { %v5066_v33 = vadd.f32 %v5042_v14, %v8677_v49  ;;  %v5067_v49 = vadd.f32 %v5043_v5, %v8696_v7  ;;  %v5044_v39 = vld [vmem:[%s9045_s4 + $0x80] sm:$0xff]  ;;  %v5058_v7 = vadd.f32 %v5034_v59, %v8708_v51  ;;  %v5045_v53 = vld [vmem:[%s9045_s4 + $0x88] sm:$0xff]  ;;  %5084 = vst.msk [vmem:[%s9045_s4 + $0x38] sm:$0xff] %vm51_vm11, %v5059_v21  ;;  %v5039_v8 = vld [vmem:[%s9045_s4 + $0x58] sm:$0xff] }
 0x518   :  { %5090 = vst.msk [vmem:[%s9045_s4 + $0x68] sm:$0xff] %vm51_vm11, %v5065_v38  ;;  %v5068_v44 = vadd.f32 %v5044_v39, %v8698_v54  ;;  %v5046_v1 = vld [vmem:[%s9045_s4 + $0x90] sm:$0xff]  ;;  %v4398_v54 = vadd.f32 %v6978_v18, %v4206_v57  ;;  %5080 = vst.msk [vmem:[%s9045_s4 + $0x18] sm:$0xff] %vm51_vm11, %v5055_v0  ;;  %v5069_v36 = vadd.f32 %v5045_v53, %v8716_v27  ;;  %v5047_v37 = vld [vmem:[%s9045_s4 + $0x98] sm:$0xff] }
 0x519   :  { %5091 = vst.msk [vmem:[%s9045_s4 + $0x70] sm:$0xff] %vm51_vm11, %v5066_v33  ;;  %5092 = vst.msk [vmem:[%s9045_s4 + $0x78] sm:$0xff] %vm51_vm11, %v5067_v49  ;;  %v5070_v51 = vadd.f32 %v5046_v1, %v8718_v11  ;;  %v5048_v24 = vld [vmem:[%s9045_s4 + $0xa0] sm:$0xff]  ;;  %v5060_v27 = vadd.f32 %v5036_v17, %v8726_v32  ;;  %v5071_v11 = vadd.f32 %v5047_v37, %v8848_v52  ;;  %v6986_v52 = vpop.eup %6985  ;;  %v5049_v43 = vld [vmem:[%s9045_s4 + $0xa8] sm:$0xff] }
 0x51a   :  { %5093 = vst.msk [vmem:[%s9045_s4 + $0x80] sm:$0xff] %vm51_vm11, %v5068_v44  ;;  %5083 = vst.msk [vmem:[%s9045_s4 + $0x30] sm:$0xff] %vm51_vm11, %v5058_v7  ;;  %v5072_v42 = vadd.f32 %v5048_v24, %v8850_v41  ;;  %v4590_v6 = vadd.f32 %v6982_v23, %v4398_v54  ;;  %v5061_v32 = vadd.f32 %v5037_v46, %v4944_v16  ;;  %v5050_v62 = vld [vmem:[%s9045_s4 + $0xb0] sm:$0xff]  ;;  %v5051_v10 = vld [vmem:[%s9045_s4 + $0xb8] sm:$0xff] }
 0x51b   :  { %5094 = vst.msk [vmem:[%s9045_s4 + $0x88] sm:$0xff] %vm51_vm11, %v5069_v36  ;;  %5095 = vst.msk [vmem:[%s9045_s4 + $0x90] sm:$0xff] %vm51_vm11, %v5070_v51  ;;  %v4781_v41 = vadd.f32 %v6986_v52, %v4589_v19 }
 0x51c   :  { %5085 = vst.msk [vmem:[%s9045_s4 + $0x40] sm:$0xff] %vm51_vm11, %v5060_v27  ;;  %5096 = vst.msk [vmem:[%s9045_s4 + $0x98] sm:$0xff] %vm51_vm11, %v5071_v11  ;;  %v4782_v4 = vadd.f32 %v6984_v25, %v4590_v6 }
 0x51d   :  { %5097 = vst.msk [vmem:[%s9045_s4 + $0xa0] sm:$0xff] %vm51_vm11, %v5072_v42  ;;  %5086 = vst.msk [vmem:[%s9045_s4 + $0x48] sm:$0xff] %vm51_vm11, %v5061_v32 }
 0x51e   :  { %5087 = vst.msk [vmem:[%s9045_s4 + $0x50] sm:$0xff] %vm51_vm11, %v5062_v55  ;;  %v4904_v63 = vsel %vm4808_vm10, %v4782_v4, 0.0 }
 0x51f   :  { %v4997_v47 = vsel %vm84_vm0, %v4904_v63, 0.0 }
 0x520   :  { %v4998_v48 = vadd.f32 %v4997_v47, %v4781_v41 }
 0x522   :  { %4999 = vadd.xlane.f32.xlu0 %v4998_v48 }
 0x534   :  { %v4992_v2 = vpop.xlane.xlu0 %4991 }
 0x535   :  { %v5073_v13 = vadd.f32 %v5049_v43, %v4992_v2 }
 0x537   :  { %5098 = vst.msk [vmem:[%s9045_s4 + $0xa8] sm:$0xff] %vm51_vm11, %v5073_v13 }
 0x55a   :  { %v4996_v15 = vpop.xlane.xlu1 %4995 }
 0x55b   :  { %v5074_v30 = vadd.f32 %v5050_v62, %v4996_v15 }
 0x55d   :  { %5099 = vst.msk [vmem:[%s9045_s4 + $0xb0] sm:$0xff] %vm51_vm11, %v5074_v30 }
 0x581   :  { %v4952_v20 = vpop.xlane.xlu0 %4951 }
 0x582   :  { %v5063_v31 = vadd.f32 %v5039_v8, %v4952_v20 }
 0x584   :  { %5088 = vst.msk [vmem:[%s9045_s4 + $0x58] sm:$0xff] %vm51_vm11, %v5063_v31 }
 0x5ab   :  { %v5000_v26 = vpop.xlane.xlu0 %4999 }
 0x5ac   :  { %v5075_v14 = vadd.f32 %v5051_v10, %v5000_v26 }
 0x5ae   :  { %5100 = vst.msk [vmem:[%s9045_s4 + $0xb8] sm:$0xff] %vm51_vm11, %v5075_v14 }
 0x5af   :  { %5105 = vsyncpa [#allocation4], 1 }
 0x5b0   :  { %5106 = vsyncpa [#allocation6], 1 }

</bundles_post_ra>
